<compile_context>
chip_gen: v7x
topology: tpu7x:2x2x1
jax: 0.10.0
libtpu: 0.0.40
codegen_flags: <defaults>
</compile_context>

<pallas_src>
import functools

import numpy as np

import jax
import jax.numpy as jnp
from jax.experimental import pallas as pl
from jax.experimental.pallas import tpu as pltpu

LANE = 128


def _round_up(x, m):
    return (x + m - 1) // m * m


def _cdiv(a, b):
    return -(-a // b)


def _vmem_limit_bytes():
    """Per-generation scoped-VMEM limit (headroom on v7x, more on v5e/v6e)."""
    phys = None
    try:
        info = pltpu.get_tpu_info()
        for name in ("vmem_capacity_bytes", "vmem_bytes", "vmem_size_bytes"):
            val = getattr(info, name, None)
            if isinstance(val, (int, np.integer)) and val > 0:
                phys = int(val)
                break
    except Exception:
        phys = None
    if phys is None:
        return 32 * 1024 * 1024                      # safe default
    return int(min(max(phys - 16 * 1024 * 1024, 32 * 1024 * 1024),
                   96 * 1024 * 1024))


# ---------------------------------------------------------------------------
# Kernel: fused 3x3 conv (stride 1) + BN bias + optional shortcut + ReLU
# ---------------------------------------------------------------------------
def _conv3x3_kernel(x_ref, xh_ref, w_ref, b_ref, *rest,
                    rs, ts, nsub, relu, res_mode, masked):
    """One (image, row-block) per grid step.

    x_ref  : (tr, Cp)      bf16  body rows of the flattened padded input
    xh_ref : (halo, Cp)    bf16  halo rows immediately after the body block
    w_ref  : (9, Cp, Cop)  bf16  conv weights (BN scale folded), VMEM-resident
    b_ref  : (1, Cop)      f32   folded BN bias
    rest   : [m_ref  (tr, 1)   f32 ]  pad-ring mask           (masked)
             [r_ref  (tr, Crp)      ]  residual rows           (res_mode > 0)
             [rw_ref (Crp, Cop) bf16]  1x1 shortcut weight     (res_mode == 2)
             o_ref   (tr, Cop)         output rows
             xtail   (ts+halo, Cp)     VMEM scratch (last-chunk window)
    """
    pos = 0
    m_ref = r_ref = rw_ref = None
    if masked:
        m_ref = rest[pos]; pos += 1
    if res_mode:
        r_ref = rest[pos]; pos += 1
    if res_mode == 2:
        rw_ref = rest[pos]; pos += 1
    o_ref = rest[pos]
    xtail_ref = rest[pos + 1]

    tr = ts * nsub
    halo = xh_ref.shape[0]
    cop = o_ref.shape[-1]

    # Contiguous (ts + halo)-row window for the last sub-chunk (the only one
    # whose taps run past the body block).  Earlier sub-chunks slice the body
    # block directly (no copy).
    xtail_ref[0:ts, :] = x_ref[tr - ts:tr, :]
    xtail_ref[ts:ts + halo, :] = xh_ref[...]

    for s in range(nsub):                                # static unroll
        last = s == nsub - 1
        src = xtail_ref if last else x_ref
        base = 0 if last else s * ts
        r0 = s * ts

        acc = jnp.zeros((ts, cop), jnp.float32)
        # 3x3 conv == 9 shifted matmuls on the flattened padded image.
        for kh in range(3):
            for kw in range(3):
                d = base + kh * rs + kw                  # static, kh*rs aligned
                acc = acc + jnp.dot(src[d:d + ts, :], w_ref[3 * kh + kw],
                                    preferred_element_type=jnp.float32)
        acc = acc + b_ref[...]                           # folded BN bias
        if res_mode == 1:                                # identity shortcut
            acc = acc + r_ref[r0:r0 + ts, :].astype(jnp.float32)
        elif res_mode == 2:                              # 1x1 conv shortcut
            acc = acc + jnp.dot(r_ref[r0:r0 + ts, :], rw_ref[...],
                                preferred_element_type=jnp.float32)
        if relu:
            acc = jnp.maximum(acc, 0.0)
        if masked:                                       # zero conv pad ring
            acc = acc * m_ref[r0:r0 + ts, :]
        o_ref[r0:r0 + ts, :] = acc.astype(o_ref.dtype)


# ---------------------------------------------------------------------------
# Row-tiling plan + layout helpers
# ---------------------------------------------------------------------------
def _plan(rs, n_out_rows, min_out_rows=0, *, sub_rows=256, block_rows=2048):
    """Row-tiling plan: halo = max tap shift, ts = in-kernel sub-chunk rows
    (multiple of halo), tr = output rows per grid step (multiple of ts)."""
    assert rs % 8 == 0
    halo = _round_up(2 * rs + 2, 8)
    ts = halo * max(1, sub_rows // halo)
    nsub = max(1, min(block_rows // ts, _cdiv(n_out_rows, ts)))
    tr = ts * nsub
    rows_out = tr * _cdiv(max(n_out_rows, min_out_rows, 1), tr)
    return dict(rs=rs, halo=halo, ts=ts, tr=tr, rb=rows_out // tr,
                rows_out=rows_out, rows_in=rows_out + halo)


def _flatten_nhwc(x, rs, cpad, *, front, total_rows, dtype=jnp.bfloat16):
    """Pad NHWC with a 1-pixel ring + lane-dense channels, flatten spatial
    dims row-major with row stride rs, pad rows to total_rows (front leading
    zero rows)."""
    n, h, w, c = x.shape
    xp = jnp.pad(x.astype(dtype),
                 ((0, 0), (1, 1), (1, rs - w - 1), (0, cpad - c)))
    xf = xp.reshape(n, (h + 2) * rs, cpad)
    back = total_rows - front - (h + 2) * rs
    assert back >= 0, (total_rows, front, (h + 2) * rs)
    return jnp.pad(xf, ((0, 0), (front, back), (0, 0)))


def _flatten_rows(x, rs, cpad, total_rows, dtype):
    """Flatten NHWC to (N, H*rs, cpad) rows (no ring pad) for the residual
    operand; junk columns only ever feed junk output rows."""
    n, h, w, c = x.shape
    xp = jnp.pad(x.astype(dtype), ((0, 0), (0, 0), (0, rs - w), (0, cpad - c)))
    xf = xp.reshape(n, h * rs, cpad)
    return jnp.pad(xf, ((0, 0), (0, total_rows - h * rs), (0, 0)))


def _pad_ring_mask(rs, h, w, total_rows):
    """(total_rows, 1) f32 mask: 1 on interior positions (1<=r<=h, 1<=c<=w) of
    the padded flattened layout, 0 on the pad ring / junk rows."""
    q = np.arange(total_rows)
    r, c = q // rs, q % rs
    m = ((r >= 1) & (r <= h) & (c >= 1) & (c <= w)).astype(np.float32)
    return jnp.asarray(m).reshape(total_rows, 1)


# ---------------------------------------------------------------------------
# Wrapper: pallas_call with row-block grid
# ---------------------------------------------------------------------------
def conv3x3_flat(x_flat, w9, bias, plan, *, mask=None, residual_flat=None,
                 res_w=None, relu=True, out_dtype=jnp.float32):
    """act(conv3x3_stride1(x) + bias [+ shortcut]) on the flattened padded
    layout.  Grid = (batch, row_blocks); weights stay VMEM-resident."""
    N, rows_avail, Cp = x_flat.shape
    assert w9.shape[0] == 9 and w9.shape[1] == Cp, w9.shape
    Cop = w9.shape[2]
    rs, halo, ts, tr, rb = (plan[k] for k in ("rs", "halo", "ts", "tr", "rb"))
    rows_out, rows_in = plan["rows_out"], plan["rows_in"]
    assert rows_avail >= rows_in, (rows_avail, rows_in)
    nsub = tr // ts
    halo_blocks = tr // halo                    # tr is a multiple of halo
    bias = bias.reshape(1, Cop)

    inputs = [x_flat, x_flat, w9, bias]
    in_specs = [
        pl.BlockSpec((None, tr, Cp), lambda n, r: (n, r, 0)),
        pl.BlockSpec((None, halo, Cp),
                     lambda n, r: (n, (r + 1) * halo_blocks, 0)),
        pl.BlockSpec((9, Cp, Cop), lambda n, r: (0, 0, 0)),   # resident
        pl.BlockSpec((1, Cop), lambda n, r: (0, 0)),
    ]
    masked = mask is not None
    if masked:
        assert mask.shape == (rows_out, 1)
        inputs.append(mask)
        in_specs.append(pl.BlockSpec((tr, 1), lambda n, r: (r, 0)))
    res_mode = 0
    if residual_flat is not None:
        res_mode = 2 if res_w is not None else 1
        assert residual_flat.shape[0] == N
        assert residual_flat.shape[1] >= rows_out
        Crp = residual_flat.shape[-1]
        inputs.append(residual_flat)
        in_specs.append(pl.BlockSpec((None, tr, Crp), lambda n, r: (n, r, 0)))
        if res_mode == 2:
            assert res_w.shape == (Crp, Cop)
            inputs.append(res_w)
            in_specs.append(pl.BlockSpec((Crp, Cop), lambda n, r: (0, 0)))

    kernel = functools.partial(_conv3x3_kernel, rs=rs, ts=ts, nsub=nsub,
                               relu=relu, res_mode=res_mode, masked=masked)
    return pl.pallas_call(
        kernel,
        out_shape=jax.ShapeDtypeStruct((N, rows_out, Cop), out_dtype),
        grid=(N, rb),
        in_specs=in_specs,
        out_specs=pl.BlockSpec((None, tr, Cop), lambda n, r: (n, r, 0)),
        scratch_shapes=[pltpu.VMEM((ts + halo, Cp), x_flat.dtype)],
        compiler_params=pltpu.CompilerParams(
            dimension_semantics=("parallel", "parallel"),
            vmem_limit_bytes=_vmem_limit_bytes()),
    )(*inputs)


# ---------------------------------------------------------------------------
# ResidualBlock forward
# ---------------------------------------------------------------------------
def fold_bn(gamma, beta, mean, var, eps=1e-5):
    scale = gamma / jnp.sqrt(var + eps)
    return scale, beta - mean * scale


def residual_block(x_nhwc, params, stride=1, out_dtype=jnp.float32):
    """ResidualBlock forward (NHWC).  x: (N, H, W, Cin) -> (N, Ho, Wo, Cout).
    Use out_dtype=bfloat16 when the consumer is the next residual block."""
    N, H, W, Cin = x_nhwc.shape
    Cout = params["w1"].shape[-1]
    Cip = _round_up(Cin, LANE)
    Cop = _round_up(Cout, LANE)
    Ho = (H - 1) // stride + 1
    Wo = (W - 1) // stride + 1
    proj = (stride != 1) or (Cin != Cout)

    s1, b1 = fold_bn(*params["bn1"])
    s2, b2 = fold_bn(*params["bn2"])

    def pack_w3x3(w, cin, cinp):
        wp = jnp.pad(w.astype(jnp.bfloat16),
                     ((0, 0), (0, 0), (0, cinp - cin), (0, Cop - Cout)))
        return wp.reshape(9, cinp, Cop)

    w1p = pack_w3x3(params["w1"] * s1, Cin, Cip)       # fold BN scale
    w2p = pack_w3x3(params["w2"] * s2, Cout, Cop)
    b1p = jnp.pad(b1.astype(jnp.float32), (0, Cop - Cout)).reshape(1, Cop)
    if proj:
        ss, bs = fold_bn(*params["bns"])
        wsp = jnp.pad(
            (params["ws"].reshape(Cin, Cout) * ss).astype(jnp.bfloat16),
            ((0, Cip - Cin), (0, Cop - Cout)))
        b2p = jnp.pad((b2 + bs).astype(jnp.float32),
                      (0, Cop - Cout)).reshape(1, Cop)
    else:
        wsp = None
        b2p = jnp.pad(b2.astype(jnp.float32), (0, Cop - Cout)).reshape(1, Cop)

    if stride == 1:
        rs = _round_up(W + 2, 8)
        plan2 = _plan(rs, H * rs)
        plan1 = _plan(rs, (H + 2) * rs, min_out_rows=plan2["rows_in"])

        # conv1 + bn1 + ReLU, writing directly in the padded flattened layout
        # conv2 consumes (pad ring zeroed in-kernel): no slice / re-pad passes.
        x1 = _flatten_nhwc(x_nhwc, rs, Cip, front=rs + 1,
                           total_rows=plan1["rows_in"])
        mask1 = _pad_ring_mask(rs, H, W, plan1["rows_out"])
        y2 = conv3x3_flat(x1, w1p, b1p, plan1, mask=mask1, relu=True,
                          out_dtype=jnp.bfloat16)

        # conv2 + bn2 + shortcut(+BN) + add + ReLU, fused in one kernel.
        if proj:
            res = _flatten_rows(x_nhwc, rs, Cip, plan2["rows_out"],
                                jnp.bfloat16)
            out = conv3x3_flat(y2, w2p, b2p, plan2, residual_flat=res,
                               res_w=wsp, relu=True, out_dtype=out_dtype)
        else:
            res = _flatten_rows(x_nhwc, rs, Cop, plan2["rows_out"],
                                jnp.float32)          # identity add in fp32
            out = conv3x3_flat(y2, w2p, b2p, plan2, residual_flat=res,
                               relu=True, out_dtype=out_dtype)
        return out[:, :H * rs].reshape(N, H, rs, Cop)[:, :, :W, :Cout]

    # stride > 1: conv1 at stride 1, subsampled in a single wrapper slice.
    # TODO(synk): in-kernel strided taps would remove the stride^2 extra work.
    rs1 = _round_up(W + 2, 8)
    plan1 = _plan(rs1, H * rs1)
    x1 = _flatten_nhwc(x_nhwc, rs1, Cip, front=0, total_rows=plan1["rows_in"])
    o1 = conv3x3_flat(x1, w1p, b1p, plan1, relu=True, out_dtype=jnp.bfloat16)
    y = o1[:, :H * rs1].reshape(N, H, rs1, Cop)[:, ::stride, :W:stride, :]
    xs = x_nhwc[:, ::stride, ::stride, :]

    rs2 = _round_up(Wo + 2, 8)
    plan2 = _plan(rs2, Ho * rs2)
    x2 = _flatten_nhwc(y, rs2, Cop, front=0, total_rows=plan2["rows_in"])
    res = _flatten_rows(xs, rs2, Cip, plan2["rows_out"], jnp.bfloat16)
    out = conv3x3_flat(x2, w2p, b2p, plan2, residual_flat=res, res_w=wsp,
                       relu=True, out_dtype=out_dtype)
    return out[:, :Ho * rs2].reshape(N, Ho, rs2, Cop)[:, :, :Wo, :Cout]


# ---------------------------------------------------------------------------
# Pure-JAX fp32 reference (correctness check)
# ---------------------------------------------------------------------------
def _conv_nhwc(x, w_hwio, stride, padding):
    return jax.lax.conv_general_dilated(
        x, w_hwio, (stride, stride), padding=padding,
        dimension_numbers=("NHWC", "HWIO", "NHWC"))


def residual_block_ref(x, params, stride=1):
    s1, b1 = fold_bn(*params["bn1"])
    s2, b2 = fold_bn(*params["bn2"])
    out = jnp.maximum(
        _conv_nhwc(x, params["w1"], stride, ((1, 1), (1, 1))) * s1 + b1, 0.0)
    out = _conv_nhwc(out, params["w2"], 1, ((1, 1), (1, 1))) * s2 + b2
    Cin, Cout = x.shape[-1], params["w1"].shape[-1]
    if stride != 1 or Cin != Cout:
        ss, bs = fold_bn(*params["bns"])
        sc = _conv_nhwc(x, params["ws"], stride, "VALID") * ss + bs
    else:
        sc = x
    return jnp.maximum(out + sc, 0.0)


# ---------------------------------------------------------------------------
if __name__ == "__main__":
    f32 = jnp.float32
    root = jax.random.PRNGKey(0)

    def bn_params(k, c):
        k0, k1, k2, k3 = jax.random.split(k, 4)
        return (1.0 + 0.1 * jax.random.normal(k0, (c,), f32),
                0.1 * jax.random.normal(k1, (c,), f32),
                0.1 * jax.random.normal(k2, (c,), f32),
                0.5 + jnp.abs(jax.random.normal(k3, (c,), f32)))

    def make_params(k, cin, cout):
        ks = jax.random.split(k, 6)
        return {
            "w1": 0.1 * jax.random.normal(ks[0], (3, 3, cin, cout), f32),
            "w2": 0.1 * jax.random.normal(ks[1], (3, 3, cout, cout), f32),
            "ws": 0.1 * jax.random.normal(ks[2], (1, 1, cin, cout), f32),
            "bn1": bn_params(ks[3], cout),
            "bn2": bn_params(ks[4], cout),
            "bns": bn_params(ks[5], cout),
        }

    block = jax.jit(residual_block, static_argnames=("stride",))

    N, H, W = 2, 16, 16
    configs = [
        (4, 8, 1),   # projection shortcut (1x1 conv + BN), stride 1
        (8, 8, 1),   # identity shortcut
        (4, 8, 2),   # projection shortcut with spatial downsampling
    ]
    for idx, (cin, cout, stride) in enumerate(configs):
        kx, kp = jax.random.split(jax.random.fold_in(root, idx))
        x = jax.random.normal(kx, (N, H, W, cin), f32)       # NHWC layout
        params = make_params(kp, cin, cout)

        out = jax.block_until_ready(block(x, params, stride=stride))
        ref = jax.block_until_ready(residual_block_ref(x, params, stride))

        assert out.shape == ref.shape, (out.shape, ref.shape)
        max_err = float(jnp.max(jnp.abs(out - ref)))
        assert jnp.allclose(out, ref, rtol=5e-2, atol=5e-2), (idx, max_err)

    print("KERNEL_OK")
</pallas_src>

<mosaic_0001>
module attributes {stable_mosaic.version = 11 : i64} {
  func.func @_conv3x3_kernel(%arg0: i32, %arg1: i32, %arg2: memref<1x448x128xbf16, #tpu.memory_space<vmem>>, %arg3: memref<1x56x128xbf16, #tpu.memory_space<vmem>>, %arg4: memref<9x128x128xbf16, #tpu.memory_space<vmem>>, %arg5: memref<1x128xf32, #tpu.memory_space<vmem>>, %arg6: memref<448x1xf32, #tpu.memory_space<vmem>>, %arg7: memref<1x448x128xbf16, #tpu.memory_space<vmem>>, %arg8: memref<280x128xbf16, #tpu.memory_space<vmem>>) attributes {dimension_semantics = [#tpu.dimension_semantics<parallel>, #tpu.dimension_semantics<parallel>], iteration_bounds = array<i64: 2, 2>, scalar_prefetch = 0 : i64, scratch_operands = 1 : i64, tpu.core_type = #tpu.core_type<tc>, window_params = [{transform_indices = @transform_0, window_bounds = array<i64: 1, 448, 128>}, {transform_indices = @transform_1, window_bounds = array<i64: 1, 56, 128>}, {pipeline_mode = #tpu.pipeline_mode<synchronous>, transform_indices = @transform_2, window_bounds = array<i64: 9, 128, 128>}, {pipeline_mode = #tpu.pipeline_mode<synchronous>, transform_indices = @transform_3, window_bounds = array<i64: 1, 128>}, {transform_indices = @transform_4, window_bounds = array<i64: 448, 1>}, {transform_indices = @transform_5, window_bounds = array<i64: 1, 448, 128>}]} {
    %c0 = arith.constant 0 : index
    %c224 = arith.constant 224 : index
    %c0_0 = arith.constant 0 : index
    %0 = vector.load %arg2[%c0, %c224, %c0_0] : memref<1x448x128xbf16, #tpu.memory_space<vmem>>, vector<1x224x128xbf16>
    %1 = vector.shape_cast %0 : vector<1x224x128xbf16> to vector<224x128xbf16>
    %c0_1 = arith.constant 0 : index
    %c0_2 = arith.constant 0 : index
    %2 = vector.load %arg8[%c0_1, %c0_2] : memref<280x128xbf16, #tpu.memory_space<vmem>>, vector<224x128xbf16>
    tpu.vector_store %arg8[%c0_1, %c0_2], %1 {strides = array<i32>} : memref<280x128xbf16, #tpu.memory_space<vmem>>, vector<224x128xbf16>,
    %c0_3 = arith.constant 0 : index
    %c0_4 = arith.constant 0 : index
    %c0_5 = arith.constant 0 : index
    %3 = vector.load %arg3[%c0_3, %c0_4, %c0_5] : memref<1x56x128xbf16, #tpu.memory_space<vmem>>, vector<1x56x128xbf16>
    %4 = vector.shape_cast %3 : vector<1x56x128xbf16> to vector<56x128xbf16>
    %c224_6 = arith.constant 224 : index
    %c0_7 = arith.constant 0 : index
    %5 = vector.load %arg8[%c224_6, %c0_7] : memref<280x128xbf16, #tpu.memory_space<vmem>>, vector<56x128xbf16>
    tpu.vector_store %arg8[%c224_6, %c0_7], %4 {strides = array<i32>} : memref<280x128xbf16, #tpu.memory_space<vmem>>, vector<56x128xbf16>,
    %cst = arith.constant 0.000000e+00 : f32
    %6 = vector.broadcast %cst : f32 to vector<224x128xf32>
    %c0_8 = arith.constant 0 : index
    %c0_9 = arith.constant 0 : index
    %c0_10 = arith.constant 0 : index
    %7 = vector.load %arg2[%c0_8, %c0_9, %c0_10] : memref<1x448x128xbf16, #tpu.memory_space<vmem>>, vector<1x224x128xbf16>
    %8 = vector.shape_cast %7 : vector<1x224x128xbf16> to vector<224x128xbf16>
    %c0_11 = arith.constant 0 : index
    %c0_12 = arith.constant 0 : index
    %c0_13 = arith.constant 0 : index
    %9 = vector.load %arg4[%c0_11, %c0_12, %c0_13] : memref<9x128x128xbf16, #tpu.memory_space<vmem>>, vector<1x128x128xbf16>
    %10 = vector.shape_cast %9 : vector<1x128x128xbf16> to vector<128x128xbf16>
    %cst_14 = arith.constant dense<0.000000e+00> : vector<224x128xf32>
    %11 = tpu.matmul %8, %10, %cst_14 {dimension_numbers = #tpu.dot_dimension_numbers<[1], [0], [0], [1], [0, 0, 1, 1], [], []>} : vector<224x128xbf16>, vector<128x128xbf16>, vector<224x128xf32> -> vector<224x128xf32>
    %12 = arith.addf %6, %11 : vector<224x128xf32>
    %c0_15 = arith.constant 0 : index
    %c1 = arith.constant 1 : index
    %c0_16 = arith.constant 0 : index
    %13 = vector.load %arg2[%c0_15, %c1, %c0_16] : memref<1x448x128xbf16, #tpu.memory_space<vmem>>, vector<1x224x128xbf16>
    %14 = vector.shape_cast %13 : vector<1x224x128xbf16> to vector<224x128xbf16>
    %c1_17 = arith.constant 1 : index
    %c0_18 = arith.constant 0 : index
    %c0_19 = arith.constant 0 : index
    %15 = vector.load %arg4[%c1_17, %c0_18, %c0_19] : memref<9x128x128xbf16, #tpu.memory_space<vmem>>, vector<1x128x128xbf16>
    %16 = vector.shape_cast %15 : vector<1x128x128xbf16> to vector<128x128xbf16>
    %cst_20 = arith.constant dense<0.000000e+00> : vector<224x128xf32>
    %17 = tpu.matmul %14, %16, %cst_20 {dimension_numbers = #tpu.dot_dimension_numbers<[1], [0], [0], [1], [0, 0, 1, 1], [], []>} : vector<224x128xbf16>, vector<128x128xbf16>, vector<224x128xf32> -> vector<224x128xf32>
    %18 = arith.addf %12, %17 : vector<224x128xf32>
    %c0_21 = arith.constant 0 : index
    %c2 = arith.constant 2 : index
    %c0_22 = arith.constant 0 : index
    %19 = vector.load %arg2[%c0_21, %c2, %c0_22] : memref<1x448x128xbf16, #tpu.memory_space<vmem>>, vector<1x224x128xbf16>
    %20 = vector.shape_cast %19 : vector<1x224x128xbf16> to vector<224x128xbf16>
    %c2_23 = arith.constant 2 : index
    %c0_24 = arith.constant 0 : index
    %c0_25 = arith.constant 0 : index
    %21 = vector.load %arg4[%c2_23, %c0_24, %c0_25] : memref<9x128x128xbf16, #tpu.memory_space<vmem>>, vector<1x128x128xbf16>
    %22 = vector.shape_cast %21 : vector<1x128x128xbf16> to vector<128x128xbf16>
    %cst_26 = arith.constant dense<0.000000e+00> : vector<224x128xf32>
    %23 = tpu.matmul %20, %22, %cst_26 {dimension_numbers = #tpu.dot_dimension_numbers<[1], [0], [0], [1], [0, 0, 1, 1], [], []>} : vector<224x128xbf16>, vector<128x128xbf16>, vector<224x128xf32> -> vector<224x128xf32>
    %24 = arith.addf %18, %23 : vector<224x128xf32>
    %c0_27 = arith.constant 0 : index
    %c24 = arith.constant 24 : index
    %c0_28 = arith.constant 0 : index
    %25 = vector.load %arg2[%c0_27, %c24, %c0_28] : memref<1x448x128xbf16, #tpu.memory_space<vmem>>, vector<1x224x128xbf16>
    %26 = vector.shape_cast %25 : vector<1x224x128xbf16> to vector<224x128xbf16>
    %c3 = arith.constant 3 : index
    %c0_29 = arith.constant 0 : index
    %c0_30 = arith.constant 0 : index
    %27 = vector.load %arg4[%c3, %c0_29, %c0_30] : memref<9x128x128xbf16, #tpu.memory_space<vmem>>, vector<1x128x128xbf16>
    %28 = vector.shape_cast %27 : vector<1x128x128xbf16> to vector<128x128xbf16>
    %cst_31 = arith.constant dense<0.000000e+00> : vector<224x128xf32>
    %29 = tpu.matmul %26, %28, %cst_31 {dimension_numbers = #tpu.dot_dimension_numbers<[1], [0], [0], [1], [0, 0, 1, 1], [], []>} : vector<224x128xbf16>, vector<128x128xbf16>, vector<224x128xf32> -> vector<224x128xf32>
    %30 = arith.addf %24, %29 : vector<224x128xf32>
    %c0_32 = arith.constant 0 : index
    %c25 = arith.constant 25 : index
    %c0_33 = arith.constant 0 : index
    %31 = vector.load %arg2[%c0_32, %c25, %c0_33] : memref<1x448x128xbf16, #tpu.memory_space<vmem>>, vector<1x224x128xbf16>
    %32 = vector.shape_cast %31 : vector<1x224x128xbf16> to vector<224x128xbf16>
    %c4 = arith.constant 4 : index
    %c0_34 = arith.constant 0 : index
    %c0_35 = arith.constant 0 : index
    %33 = vector.load %arg4[%c4, %c0_34, %c0_35] : memref<9x128x128xbf16, #tpu.memory_space<vmem>>, vector<1x128x128xbf16>
    %34 = vector.shape_cast %33 : vector<1x128x128xbf16> to vector<128x128xbf16>
    %cst_36 = arith.constant dense<0.000000e+00> : vector<224x128xf32>
    %35 = tpu.matmul %32, %34, %cst_36 {dimension_numbers = #tpu.dot_dimension_numbers<[1], [0], [0], [1], [0, 0, 1, 1], [], []>} : vector<224x128xbf16>, vector<128x128xbf16>, vector<224x128xf32> -> vector<224x128xf32>
    %36 = arith.addf %30, %35 : vector<224x128xf32>
    %c0_37 = arith.constant 0 : index
    %c26 = arith.constant 26 : index
    %c0_38 = arith.constant 0 : index
    %37 = vector.load %arg2[%c0_37, %c26, %c0_38] : memref<1x448x128xbf16, #tpu.memory_space<vmem>>, vector<1x224x128xbf16>
    %38 = vector.shape_cast %37 : vector<1x224x128xbf16> to vector<224x128xbf16>
    %c5 = arith.constant 5 : index
    %c0_39 = arith.constant 0 : index
    %c0_40 = arith.constant 0 : index
    %39 = vector.load %arg4[%c5, %c0_39, %c0_40] : memref<9x128x128xbf16, #tpu.memory_space<vmem>>, vector<1x128x128xbf16>
    %40 = vector.shape_cast %39 : vector<1x128x128xbf16> to vector<128x128xbf16>
    %cst_41 = arith.constant dense<0.000000e+00> : vector<224x128xf32>
    %41 = tpu.matmul %38, %40, %cst_41 {dimension_numbers = #tpu.dot_dimension_numbers<[1], [0], [0], [1], [0, 0, 1, 1], [], []>} : vector<224x128xbf16>, vector<128x128xbf16>, vector<224x128xf32> -> vector<224x128xf32>
    %42 = arith.addf %36, %41 : vector<224x128xf32>
    %c0_42 = arith.constant 0 : index
    %c48 = arith.constant 48 : index
    %c0_43 = arith.constant 0 : index
    %43 = vector.load %arg2[%c0_42, %c48, %c0_43] : memref<1x448x128xbf16, #tpu.memory_space<vmem>>, vector<1x224x128xbf16>
    %44 = vector.shape_cast %43 : vector<1x224x128xbf16> to vector<224x128xbf16>
    %c6 = arith.constant 6 : index
    %c0_44 = arith.constant 0 : index
    %c0_45 = arith.constant 0 : index
    %45 = vector.load %arg4[%c6, %c0_44, %c0_45] : memref<9x128x128xbf16, #tpu.memory_space<vmem>>, vector<1x128x128xbf16>
    %46 = vector.shape_cast %45 : vector<1x128x128xbf16> to vector<128x128xbf16>
    %cst_46 = arith.constant dense<0.000000e+00> : vector<224x128xf32>
    %47 = tpu.matmul %44, %46, %cst_46 {dimension_numbers = #tpu.dot_dimension_numbers<[1], [0], [0], [1], [0, 0, 1, 1], [], []>} : vector<224x128xbf16>, vector<128x128xbf16>, vector<224x128xf32> -> vector<224x128xf32>
    %48 = arith.addf %42, %47 : vector<224x128xf32>
    %c0_47 = arith.constant 0 : index
    %c49 = arith.constant 49 : index
    %c0_48 = arith.constant 0 : index
    %49 = vector.load %arg2[%c0_47, %c49, %c0_48] : memref<1x448x128xbf16, #tpu.memory_space<vmem>>, vector<1x224x128xbf16>
    %50 = vector.shape_cast %49 : vector<1x224x128xbf16> to vector<224x128xbf16>
    %c7 = arith.constant 7 : index
    %c0_49 = arith.constant 0 : index
    %c0_50 = arith.constant 0 : index
    %51 = vector.load %arg4[%c7, %c0_49, %c0_50] : memref<9x128x128xbf16, #tpu.memory_space<vmem>>, vector<1x128x128xbf16>
    %52 = vector.shape_cast %51 : vector<1x128x128xbf16> to vector<128x128xbf16>
    %cst_51 = arith.constant dense<0.000000e+00> : vector<224x128xf32>
    %53 = tpu.matmul %50, %52, %cst_51 {dimension_numbers = #tpu.dot_dimension_numbers<[1], [0], [0], [1], [0, 0, 1, 1], [], []>} : vector<224x128xbf16>, vector<128x128xbf16>, vector<224x128xf32> -> vector<224x128xf32>
    %54 = arith.addf %48, %53 : vector<224x128xf32>
    %c0_52 = arith.constant 0 : index
    %c50 = arith.constant 50 : index
    %c0_53 = arith.constant 0 : index
    %55 = vector.load %arg2[%c0_52, %c50, %c0_53] : memref<1x448x128xbf16, #tpu.memory_space<vmem>>, vector<1x224x128xbf16>
    %56 = vector.shape_cast %55 : vector<1x224x128xbf16> to vector<224x128xbf16>
    %c8 = arith.constant 8 : index
    %c0_54 = arith.constant 0 : index
    %c0_55 = arith.constant 0 : index
    %57 = vector.load %arg4[%c8, %c0_54, %c0_55] : memref<9x128x128xbf16, #tpu.memory_space<vmem>>, vector<1x128x128xbf16>
    %58 = vector.shape_cast %57 : vector<1x128x128xbf16> to vector<128x128xbf16>
    %cst_56 = arith.constant dense<0.000000e+00> : vector<224x128xf32>
    %59 = tpu.matmul %56, %58, %cst_56 {dimension_numbers = #tpu.dot_dimension_numbers<[1], [0], [0], [1], [0, 0, 1, 1], [], []>} : vector<224x128xbf16>, vector<128x128xbf16>, vector<224x128xf32> -> vector<224x128xf32>
    %60 = arith.addf %54, %59 : vector<224x128xf32>
    %c0_57 = arith.constant 0 : index
    %c0_58 = arith.constant 0 : index
    %61 = vector.load %arg5[%c0_57, %c0_58] : memref<1x128xf32, #tpu.memory_space<vmem>>, vector<1x128xf32>
    %62 = vector.broadcast %61 : vector<1x128xf32> to vector<224x128xf32>
    %63 = arith.addf %60, %62 : vector<224x128xf32>
    %cst_59 = arith.constant 0.000000e+00 : f32
    %64 = vector.broadcast %cst_59 : f32 to vector<224x128xf32>
    %65 = arith.maximumf %63, %64 : vector<224x128xf32>
    %c0_60 = arith.constant 0 : index
    %c0_61 = arith.constant 0 : index
    %66 = vector.load %arg6[%c0_60, %c0_61] : memref<448x1xf32, #tpu.memory_space<vmem>>, vector<224x1xf32>
    %67 = vector.broadcast %66 : vector<224x1xf32> to vector<224x128xf32>
    %68 = arith.mulf %65, %67 : vector<224x128xf32>
    %69 = arith.truncf %68 : vector<224x128xf32> to vector<224x128xbf16>
    %c0_62 = arith.constant 0 : index
    %c0_63 = arith.constant 0 : index
    %c0_64 = arith.constant 0 : index
    %70 = vector.load %arg7[%c0_62, %c0_63, %c0_64] : memref<1x448x128xbf16, #tpu.memory_space<vmem>>, vector<1x224x128xbf16>
    %71 = vector.shape_cast %70 : vector<1x224x128xbf16> to vector<224x128xbf16>
    %72 = vector.shape_cast %69 : vector<224x128xbf16> to vector<1x224x128xbf16>
    tpu.vector_store %arg7[%c0_62, %c0_63, %c0_64], %72 {strides = array<i32>} : memref<1x448x128xbf16, #tpu.memory_space<vmem>>, vector<1x224x128xbf16>,
    %cst_65 = arith.constant 0.000000e+00 : f32
    %73 = vector.broadcast %cst_65 : f32 to vector<224x128xf32>
    %c0_66 = arith.constant 0 : index
    %c0_67 = arith.constant 0 : index
    %74 = vector.load %arg8[%c0_66, %c0_67] : memref<280x128xbf16, #tpu.memory_space<vmem>>, vector<224x128xbf16>
    %c0_68 = arith.constant 0 : index
    %c0_69 = arith.constant 0 : index
    %c0_70 = arith.constant 0 : index
    %75 = vector.load %arg4[%c0_68, %c0_69, %c0_70] : memref<9x128x128xbf16, #tpu.memory_space<vmem>>, vector<1x128x128xbf16>
    %76 = vector.shape_cast %75 : vector<1x128x128xbf16> to vector<128x128xbf16>
    %cst_71 = arith.constant dense<0.000000e+00> : vector<224x128xf32>
    %77 = tpu.matmul %74, %76, %cst_71 {dimension_numbers = #tpu.dot_dimension_numbers<[1], [0], [0], [1], [0, 0, 1, 1], [], []>} : vector<224x128xbf16>, vector<128x128xbf16>, vector<224x128xf32> -> vector<224x128xf32>
    %78 = arith.addf %73, %77 : vector<224x128xf32>
    %c1_72 = arith.constant 1 : index
    %c0_73 = arith.constant 0 : index
    %79 = vector.load %arg8[%c1_72, %c0_73] : memref<280x128xbf16, #tpu.memory_space<vmem>>, vector<224x128xbf16>
    %c1_74 = arith.constant 1 : index
    %c0_75 = arith.constant 0 : index
    %c0_76 = arith.constant 0 : index
    %80 = vector.load %arg4[%c1_74, %c0_75, %c0_76] : memref<9x128x128xbf16, #tpu.memory_space<vmem>>, vector<1x128x128xbf16>
    %81 = vector.shape_cast %80 : vector<1x128x128xbf16> to vector<128x128xbf16>
    %cst_77 = arith.constant dense<0.000000e+00> : vector<224x128xf32>
    %82 = tpu.matmul %79, %81, %cst_77 {dimension_numbers = #tpu.dot_dimension_numbers<[1], [0], [0], [1], [0, 0, 1, 1], [], []>} : vector<224x128xbf16>, vector<128x128xbf16>, vector<224x128xf32> -> vector<224x128xf32>
    %83 = arith.addf %78, %82 : vector<224x128xf32>
    %c2_78 = arith.constant 2 : index
    %c0_79 = arith.constant 0 : index
    %84 = vector.load %arg8[%c2_78, %c0_79] : memref<280x128xbf16, #tpu.memory_space<vmem>>, vector<224x128xbf16>
    %c2_80 = arith.constant 2 : index
    %c0_81 = arith.constant 0 : index
    %c0_82 = arith.constant 0 : index
    %85 = vector.load %arg4[%c2_80, %c0_81, %c0_82] : memref<9x128x128xbf16, #tpu.memory_space<vmem>>, vector<1x128x128xbf16>
    %86 = vector.shape_cast %85 : vector<1x128x128xbf16> to vector<128x128xbf16>
    %cst_83 = arith.constant dense<0.000000e+00> : vector<224x128xf32>
    %87 = tpu.matmul %84, %86, %cst_83 {dimension_numbers = #tpu.dot_dimension_numbers<[1], [0], [0], [1], [0, 0, 1, 1], [], []>} : vector<224x128xbf16>, vector<128x128xbf16>, vector<224x128xf32> -> vector<224x128xf32>
    %88 = arith.addf %83, %87 : vector<224x128xf32>
    %c24_84 = arith.constant 24 : index
    %c0_85 = arith.constant 0 : index
    %89 = vector.load %arg8[%c24_84, %c0_85] : memref<280x128xbf16, #tpu.memory_space<vmem>>, vector<224x128xbf16>
    %c3_86 = arith.constant 3 : index
    %c0_87 = arith.constant 0 : index
    %c0_88 = arith.constant 0 : index
    %90 = vector.load %arg4[%c3_86, %c0_87, %c0_88] : memref<9x128x128xbf16, #tpu.memory_space<vmem>>, vector<1x128x128xbf16>
    %91 = vector.shape_cast %90 : vector<1x128x128xbf16> to vector<128x128xbf16>
    %cst_89 = arith.constant dense<0.000000e+00> : vector<224x128xf32>
    %92 = tpu.matmul %89, %91, %cst_89 {dimension_numbers = #tpu.dot_dimension_numbers<[1], [0], [0], [1], [0, 0, 1, 1], [], []>} : vector<224x128xbf16>, vector<128x128xbf16>, vector<224x128xf32> -> vector<224x128xf32>
    %93 = arith.addf %88, %92 : vector<224x128xf32>
    %c25_90 = arith.constant 25 : index
    %c0_91 = arith.constant 0 : index
    %94 = vector.load %arg8[%c25_90, %c0_91] : memref<280x128xbf16, #tpu.memory_space<vmem>>, vector<224x128xbf16>
    %c4_92 = arith.constant 4 : index
    %c0_93 = arith.constant 0 : index
    %c0_94 = arith.constant 0 : index
    %95 = vector.load %arg4[%c4_92, %c0_93, %c0_94] : memref<9x128x128xbf16, #tpu.memory_space<vmem>>, vector<1x128x128xbf16>
    %96 = vector.shape_cast %95 : vector<1x128x128xbf16> to vector<128x128xbf16>
    %cst_95 = arith.constant dense<0.000000e+00> : vector<224x128xf32>
    %97 = tpu.matmul %94, %96, %cst_95 {dimension_numbers = #tpu.dot_dimension_numbers<[1], [0], [0], [1], [0, 0, 1, 1], [], []>} : vector<224x128xbf16>, vector<128x128xbf16>, vector<224x128xf32> -> vector<224x128xf32>
    %98 = arith.addf %93, %97 : vector<224x128xf32>
    %c26_96 = arith.constant 26 : index
    %c0_97 = arith.constant 0 : index
    %99 = vector.load %arg8[%c26_96, %c0_97] : memref<280x128xbf16, #tpu.memory_space<vmem>>, vector<224x128xbf16>
    %c5_98 = arith.constant 5 : index
    %c0_99 = arith.constant 0 : index
    %c0_100 = arith.constant 0 : index
    %100 = vector.load %arg4[%c5_98, %c0_99, %c0_100] : memref<9x128x128xbf16, #tpu.memory_space<vmem>>, vector<1x128x128xbf16>
    %101 = vector.shape_cast %100 : vector<1x128x128xbf16> to vector<128x128xbf16>
    %cst_101 = arith.constant dense<0.000000e+00> : vector<224x128xf32>
    %102 = tpu.matmul %99, %101, %cst_101 {dimension_numbers = #tpu.dot_dimension_numbers<[1], [0], [0], [1], [0, 0, 1, 1], [], []>} : vector<224x128xbf16>, vector<128x128xbf16>, vector<224x128xf32> -> vector<224x128xf32>
    %103 = arith.addf %98, %102 : vector<224x128xf32>
    %c48_102 = arith.constant 48 : index
    %c0_103 = arith.constant 0 : index
    %104 = vector.load %arg8[%c48_102, %c0_103] : memref<280x128xbf16, #tpu.memory_space<vmem>>, vector<224x128xbf16>
    %c6_104 = arith.constant 6 : index
    %c0_105 = arith.constant 0 : index
    %c0_106 = arith.constant 0 : index
    %105 = vector.load %arg4[%c6_104, %c0_105, %c0_106] : memref<9x128x128xbf16, #tpu.memory_space<vmem>>, vector<1x128x128xbf16>
    %106 = vector.shape_cast %105 : vector<1x128x128xbf16> to vector<128x128xbf16>
    %cst_107 = arith.constant dense<0.000000e+00> : vector<224x128xf32>
    %107 = tpu.matmul %104, %106, %cst_107 {dimension_numbers = #tpu.dot_dimension_numbers<[1], [0], [0], [1], [0, 0, 1, 1], [], []>} : vector<224x128xbf16>, vector<128x128xbf16>, vector<224x128xf32> -> vector<224x128xf32>
    %108 = arith.addf %103, %107 : vector<224x128xf32>
    %c49_108 = arith.constant 49 : index
    %c0_109 = arith.constant 0 : index
    %109 = vector.load %arg8[%c49_108, %c0_109] : memref<280x128xbf16, #tpu.memory_space<vmem>>, vector<224x128xbf16>
    %c7_110 = arith.constant 7 : index
    %c0_111 = arith.constant 0 : index
    %c0_112 = arith.constant 0 : index
    %110 = vector.load %arg4[%c7_110, %c0_111, %c0_112] : memref<9x128x128xbf16, #tpu.memory_space<vmem>>, vector<1x128x128xbf16>
    %111 = vector.shape_cast %110 : vector<1x128x128xbf16> to vector<128x128xbf16>
    %cst_113 = arith.constant dense<0.000000e+00> : vector<224x128xf32>
    %112 = tpu.matmul %109, %111, %cst_113 {dimension_numbers = #tpu.dot_dimension_numbers<[1], [0], [0], [1], [0, 0, 1, 1], [], []>} : vector<224x128xbf16>, vector<128x128xbf16>, vector<224x128xf32> -> vector<224x128xf32>
    %113 = arith.addf %108, %112 : vector<224x128xf32>
    %c50_114 = arith.constant 50 : index
    %c0_115 = arith.constant 0 : index
    %114 = vector.load %arg8[%c50_114, %c0_115] : memref<280x128xbf16, #tpu.memory_space<vmem>>, vector<224x128xbf16>
    %c8_116 = arith.constant 8 : index
    %c0_117 = arith.constant 0 : index
    %c0_118 = arith.constant 0 : index
    %115 = vector.load %arg4[%c8_116, %c0_117, %c0_118] : memref<9x128x128xbf16, #tpu.memory_space<vmem>>, vector<1x128x128xbf16>
    %116 = vector.shape_cast %115 : vector<1x128x128xbf16> to vector<128x128xbf16>
    %cst_119 = arith.constant dense<0.000000e+00> : vector<224x128xf32>
    %117 = tpu.matmul %114, %116, %cst_119 {dimension_numbers = #tpu.dot_dimension_numbers<[1], [0], [0], [1], [0, 0, 1, 1], [], []>} : vector<224x128xbf16>, vector<128x128xbf16>, vector<224x128xf32> -> vector<224x128xf32>
    %118 = arith.addf %113, %117 : vector<224x128xf32>
    %c0_120 = arith.constant 0 : index
    %c0_121 = arith.constant 0 : index
    %119 = vector.load %arg5[%c0_120, %c0_121] : memref<1x128xf32, #tpu.memory_space<vmem>>, vector<1x128xf32>
    %120 = vector.broadcast %119 : vector<1x128xf32> to vector<224x128xf32>
    %121 = arith.addf %118, %120 : vector<224x128xf32>
    %cst_122 = arith.constant 0.000000e+00 : f32
    %122 = vector.broadcast %cst_122 : f32 to vector<224x128xf32>
    %123 = arith.maximumf %121, %122 : vector<224x128xf32>
    %c224_123 = arith.constant 224 : index
    %c0_124 = arith.constant 0 : index
    %124 = vector.load %arg6[%c224_123, %c0_124] : memref<448x1xf32, #tpu.memory_space<vmem>>, vector<224x1xf32>
    %125 = vector.broadcast %124 : vector<224x1xf32> to vector<224x128xf32>
    %126 = arith.mulf %123, %125 : vector<224x128xf32>
    %127 = arith.truncf %126 : vector<224x128xf32> to vector<224x128xbf16>
    %c0_125 = arith.constant 0 : index
    %c224_126 = arith.constant 224 : index
    %c0_127 = arith.constant 0 : index
    %128 = vector.load %arg7[%c0_125, %c224_126, %c0_127] : memref<1x448x128xbf16, #tpu.memory_space<vmem>>, vector<1x224x128xbf16>
    %129 = vector.shape_cast %128 : vector<1x224x128xbf16> to vector<224x128xbf16>
    %130 = vector.shape_cast %127 : vector<224x128xbf16> to vector<1x224x128xbf16>
    tpu.vector_store %arg7[%c0_125, %c224_126, %c0_127], %130 {strides = array<i32>} : memref<1x448x128xbf16, #tpu.memory_space<vmem>>, vector<1x224x128xbf16>,
    return
  }
  func.func @transform_0(%arg0: i32, %arg1: i32) -> (i32, i32, i32) {
    %c0_i32 = arith.constant 0 : i32
    %c0_i32_0 = arith.constant 0 : i32
    return %arg0, %arg1, %c0_i32 : i32, i32, i32
  }
  func.func @transform_1(%arg0: i32, %arg1: i32) -> (i32, i32, i32) {
    %c1_i32 = arith.constant 1 : i32
    %0 = arith.addi %arg1, %c1_i32 : i32
    %c8_i32 = arith.constant 8 : i32
    %1 = arith.muli %0, %c8_i32 : i32
    %c0_i32 = arith.constant 0 : i32
    %c0_i32_0 = arith.constant 0 : i32
    return %arg0, %1, %c0_i32 : i32, i32, i32
  }
  func.func @transform_2(%arg0: i32, %arg1: i32) -> (i32, i32, i32) {
    %c0_i32 = arith.constant 0 : i32
    %c0_i32_0 = arith.constant 0 : i32
    %c0_i32_1 = arith.constant 0 : i32
    %c0_i32_2 = arith.constant 0 : i32
    return %c0_i32, %c0_i32_0, %c0_i32_1 : i32, i32, i32
  }
  func.func @transform_3(%arg0: i32, %arg1: i32) -> (i32, i32) {
    %c0_i32 = arith.constant 0 : i32
    %c0_i32_0 = arith.constant 0 : i32
    %c0_i32_1 = arith.constant 0 : i32
    return %c0_i32, %c0_i32_0 : i32, i32
  }
  func.func @transform_4(%arg0: i32, %arg1: i32) -> (i32, i32) {
    %c0_i32 = arith.constant 0 : i32
    %c0_i32_0 = arith.constant 0 : i32
    return %arg1, %c0_i32 : i32, i32
  }
  func.func @transform_5(%arg0: i32, %arg1: i32) -> (i32, i32, i32) {
    %c0_i32 = arith.constant 0 : i32
    %c0_i32_0 = arith.constant 0 : i32
    return %arg0, %arg1, %c0_i32 : i32, i32, i32
  }
}

module attributes {stable_mosaic.version = 11 : i64} {
  func.func @_conv3x3_kernel(%arg0: i32, %arg1: i32, %arg2: memref<1x448x128xbf16, #tpu.memory_space<vmem>>, %arg3: memref<1x56x128xbf16, #tpu.memory_space<vmem>>, %arg4: memref<9x128x128xbf16, #tpu.memory_space<vmem>>, %arg5: memref<1x128xf32, #tpu.memory_space<vmem>>, %arg6: memref<1x448x128xbf16, #tpu.memory_space<vmem>>, %arg7: memref<128x128xbf16, #tpu.memory_space<vmem>>, %arg8: memref<1x448x128xf32, #tpu.memory_space<vmem>>, %arg9: memref<280x128xbf16, #tpu.memory_space<vmem>>) attributes {dimension_semantics = [#tpu.dimension_semantics<parallel>, #tpu.dimension_semantics<parallel>], iteration_bounds = array<i64: 2, 1>, scalar_prefetch = 0 : i64, scratch_operands = 1 : i64, tpu.core_type = #tpu.core_type<tc>, window_params = [{transform_indices = @transform_0, window_bounds = array<i64: 1, 448, 128>}, {transform_indices = @transform_1, window_bounds = array<i64: 1, 56, 128>}, {pipeline_mode = #tpu.pipeline_mode<synchronous>, transform_indices = @transform_2, window_bounds = array<i64: 9, 128, 128>}, {pipeline_mode = #tpu.pipeline_mode<synchronous>, transform_indices = @transform_3, window_bounds = array<i64: 1, 128>}, {transform_indices = @transform_4, window_bounds = array<i64: 1, 448, 128>}, {pipeline_mode = #tpu.pipeline_mode<synchronous>, transform_indices = @transform_5, window_bounds = array<i64: 128, 128>}, {transform_indices = @transform_6, window_bounds = array<i64: 1, 448, 128>}]} {
    %c0 = arith.constant 0 : index
    %c224 = arith.constant 224 : index
    %c0_0 = arith.constant 0 : index
    %0 = vector.load %arg2[%c0, %c224, %c0_0] : memref<1x448x128xbf16, #tpu.memory_space<vmem>>, vector<1x224x128xbf16>
    %1 = vector.shape_cast %0 : vector<1x224x128xbf16> to vector<224x128xbf16>
    %c0_1 = arith.constant 0 : index
    %c0_2 = arith.constant 0 : index
    %2 = vector.load %arg9[%c0_1, %c0_2] : memref<280x128xbf16, #tpu.memory_space<vmem>>, vector<224x128xbf16>
    tpu.vector_store %arg9[%c0_1, %c0_2], %1 {strides = array<i32>} : memref<280x128xbf16, #tpu.memory_space<vmem>>, vector<224x128xbf16>,
    %c0_3 = arith.constant 0 : index
    %c0_4 = arith.constant 0 : index
    %c0_5 = arith.constant 0 : index
    %3 = vector.load %arg3[%c0_3, %c0_4, %c0_5] : memref<1x56x128xbf16, #tpu.memory_space<vmem>>, vector<1x56x128xbf16>
    %4 = vector.shape_cast %3 : vector<1x56x128xbf16> to vector<56x128xbf16>
    %c224_6 = arith.constant 224 : index
    %c0_7 = arith.constant 0 : index
    %5 = vector.load %arg9[%c224_6, %c0_7] : memref<280x128xbf16, #tpu.memory_space<vmem>>, vector<56x128xbf16>
    tpu.vector_store %arg9[%c224_6, %c0_7], %4 {strides = array<i32>} : memref<280x128xbf16, #tpu.memory_space<vmem>>, vector<56x128xbf16>,
    %cst = arith.constant 0.000000e+00 : f32
    %6 = vector.broadcast %cst : f32 to vector<224x128xf32>
    %c0_8 = arith.constant 0 : index
    %c0_9 = arith.constant 0 : index
    %c0_10 = arith.constant 0 : index
    %7 = vector.load %arg2[%c0_8, %c0_9, %c0_10] : memref<1x448x128xbf16, #tpu.memory_space<vmem>>, vector<1x224x128xbf16>
    %8 = vector.shape_cast %7 : vector<1x224x128xbf16> to vector<224x128xbf16>
    %c0_11 = arith.constant 0 : index
    %c0_12 = arith.constant 0 : index
    %c0_13 = arith.constant 0 : index
    %9 = vector.load %arg4[%c0_11, %c0_12, %c0_13] : memref<9x128x128xbf16, #tpu.memory_space<vmem>>, vector<1x128x128xbf16>
    %10 = vector.shape_cast %9 : vector<1x128x128xbf16> to vector<128x128xbf16>
    %cst_14 = arith.constant dense<0.000000e+00> : vector<224x128xf32>
    %11 = tpu.matmul %8, %10, %cst_14 {dimension_numbers = #tpu.dot_dimension_numbers<[1], [0], [0], [1], [0, 0, 1, 1], [], []>} : vector<224x128xbf16>, vector<128x128xbf16>, vector<224x128xf32> -> vector<224x128xf32>
    %12 = arith.addf %6, %11 : vector<224x128xf32>
    %c0_15 = arith.constant 0 : index
    %c1 = arith.constant 1 : index
    %c0_16 = arith.constant 0 : index
    %13 = vector.load %arg2[%c0_15, %c1, %c0_16] : memref<1x448x128xbf16, #tpu.memory_space<vmem>>, vector<1x224x128xbf16>
    %14 = vector.shape_cast %13 : vector<1x224x128xbf16> to vector<224x128xbf16>
    %c1_17 = arith.constant 1 : index
    %c0_18 = arith.constant 0 : index
    %c0_19 = arith.constant 0 : index
    %15 = vector.load %arg4[%c1_17, %c0_18, %c0_19] : memref<9x128x128xbf16, #tpu.memory_space<vmem>>, vector<1x128x128xbf16>
    %16 = vector.shape_cast %15 : vector<1x128x128xbf16> to vector<128x128xbf16>
    %cst_20 = arith.constant dense<0.000000e+00> : vector<224x128xf32>
    %17 = tpu.matmul %14, %16, %cst_20 {dimension_numbers = #tpu.dot_dimension_numbers<[1], [0], [0], [1], [0, 0, 1, 1], [], []>} : vector<224x128xbf16>, vector<128x128xbf16>, vector<224x128xf32> -> vector<224x128xf32>
    %18 = arith.addf %12, %17 : vector<224x128xf32>
    %c0_21 = arith.constant 0 : index
    %c2 = arith.constant 2 : index
    %c0_22 = arith.constant 0 : index
    %19 = vector.load %arg2[%c0_21, %c2, %c0_22] : memref<1x448x128xbf16, #tpu.memory_space<vmem>>, vector<1x224x128xbf16>
    %20 = vector.shape_cast %19 : vector<1x224x128xbf16> to vector<224x128xbf16>
    %c2_23 = arith.constant 2 : index
    %c0_24 = arith.constant 0 : index
    %c0_25 = arith.constant 0 : index
    %21 = vector.load %arg4[%c2_23, %c0_24, %c0_25] : memref<9x128x128xbf16, #tpu.memory_space<vmem>>, vector<1x128x128xbf16>
    %22 = vector.shape_cast %21 : vector<1x128x128xbf16> to vector<128x128xbf16>
    %cst_26 = arith.constant dense<0.000000e+00> : vector<224x128xf32>
    %23 = tpu.matmul %20, %22, %cst_26 {dimension_numbers = #tpu.dot_dimension_numbers<[1], [0], [0], [1], [0, 0, 1, 1], [], []>} : vector<224x128xbf16>, vector<128x128xbf16>, vector<224x128xf32> -> vector<224x128xf32>
    %24 = arith.addf %18, %23 : vector<224x128xf32>
    %c0_27 = arith.constant 0 : index
    %c24 = arith.constant 24 : index
    %c0_28 = arith.constant 0 : index
    %25 = vector.load %arg2[%c0_27, %c24, %c0_28] : memref<1x448x128xbf16, #tpu.memory_space<vmem>>, vector<1x224x128xbf16>
    %26 = vector.shape_cast %25 : vector<1x224x128xbf16> to vector<224x128xbf16>
    %c3 = arith.constant 3 : index
    %c0_29 = arith.constant 0 : index
    %c0_30 = arith.constant 0 : index
    %27 = vector.load %arg4[%c3, %c0_29, %c0_30] : memref<9x128x128xbf16, #tpu.memory_space<vmem>>, vector<1x128x128xbf16>
    %28 = vector.shape_cast %27 : vector<1x128x128xbf16> to vector<128x128xbf16>
    %cst_31 = arith.constant dense<0.000000e+00> : vector<224x128xf32>
    %29 = tpu.matmul %26, %28, %cst_31 {dimension_numbers = #tpu.dot_dimension_numbers<[1], [0], [0], [1], [0, 0, 1, 1], [], []>} : vector<224x128xbf16>, vector<128x128xbf16>, vector<224x128xf32> -> vector<224x128xf32>
    %30 = arith.addf %24, %29 : vector<224x128xf32>
    %c0_32 = arith.constant 0 : index
    %c25 = arith.constant 25 : index
    %c0_33 = arith.constant 0 : index
    %31 = vector.load %arg2[%c0_32, %c25, %c0_33] : memref<1x448x128xbf16, #tpu.memory_space<vmem>>, vector<1x224x128xbf16>
    %32 = vector.shape_cast %31 : vector<1x224x128xbf16> to vector<224x128xbf16>
    %c4 = arith.constant 4 : index
    %c0_34 = arith.constant 0 : index
    %c0_35 = arith.constant 0 : index
    %33 = vector.load %arg4[%c4, %c0_34, %c0_35] : memref<9x128x128xbf16, #tpu.memory_space<vmem>>, vector<1x128x128xbf16>
    %34 = vector.shape_cast %33 : vector<1x128x128xbf16> to vector<128x128xbf16>
    %cst_36 = arith.constant dense<0.000000e+00> : vector<224x128xf32>
    %35 = tpu.matmul %32, %34, %cst_36 {dimension_numbers = #tpu.dot_dimension_numbers<[1], [0], [0], [1], [0, 0, 1, 1], [], []>} : vector<224x128xbf16>, vector<128x128xbf16>, vector<224x128xf32> -> vector<224x128xf32>
    %36 = arith.addf %30, %35 : vector<224x128xf32>
    %c0_37 = arith.constant 0 : index
    %c26 = arith.constant 26 : index
    %c0_38 = arith.constant 0 : index
    %37 = vector.load %arg2[%c0_37, %c26, %c0_38] : memref<1x448x128xbf16, #tpu.memory_space<vmem>>, vector<1x224x128xbf16>
    %38 = vector.shape_cast %37 : vector<1x224x128xbf16> to vector<224x128xbf16>
    %c5 = arith.constant 5 : index
    %c0_39 = arith.constant 0 : index
    %c0_40 = arith.constant 0 : index
    %39 = vector.load %arg4[%c5, %c0_39, %c0_40] : memref<9x128x128xbf16, #tpu.memory_space<vmem>>, vector<1x128x128xbf16>
    %40 = vector.shape_cast %39 : vector<1x128x128xbf16> to vector<128x128xbf16>
    %cst_41 = arith.constant dense<0.000000e+00> : vector<224x128xf32>
    %41 = tpu.matmul %38, %40, %cst_41 {dimension_numbers = #tpu.dot_dimension_numbers<[1], [0], [0], [1], [0, 0, 1, 1], [], []>} : vector<224x128xbf16>, vector<128x128xbf16>, vector<224x128xf32> -> vector<224x128xf32>
    %42 = arith.addf %36, %41 : vector<224x128xf32>
    %c0_42 = arith.constant 0 : index
    %c48 = arith.constant 48 : index
    %c0_43 = arith.constant 0 : index
    %43 = vector.load %arg2[%c0_42, %c48, %c0_43] : memref<1x448x128xbf16, #tpu.memory_space<vmem>>, vector<1x224x128xbf16>
    %44 = vector.shape_cast %43 : vector<1x224x128xbf16> to vector<224x128xbf16>
    %c6 = arith.constant 6 : index
    %c0_44 = arith.constant 0 : index
    %c0_45 = arith.constant 0 : index
    %45 = vector.load %arg4[%c6, %c0_44, %c0_45] : memref<9x128x128xbf16, #tpu.memory_space<vmem>>, vector<1x128x128xbf16>
    %46 = vector.shape_cast %45 : vector<1x128x128xbf16> to vector<128x128xbf16>
    %cst_46 = arith.constant dense<0.000000e+00> : vector<224x128xf32>
    %47 = tpu.matmul %44, %46, %cst_46 {dimension_numbers = #tpu.dot_dimension_numbers<[1], [0], [0], [1], [0, 0, 1, 1], [], []>} : vector<224x128xbf16>, vector<128x128xbf16>, vector<224x128xf32> -> vector<224x128xf32>
    %48 = arith.addf %42, %47 : vector<224x128xf32>
    %c0_47 = arith.constant 0 : index
    %c49 = arith.constant 49 : index
    %c0_48 = arith.constant 0 : index
    %49 = vector.load %arg2[%c0_47, %c49, %c0_48] : memref<1x448x128xbf16, #tpu.memory_space<vmem>>, vector<1x224x128xbf16>
    %50 = vector.shape_cast %49 : vector<1x224x128xbf16> to vector<224x128xbf16>
    %c7 = arith.constant 7 : index
    %c0_49 = arith.constant 0 : index
    %c0_50 = arith.constant 0 : index
    %51 = vector.load %arg4[%c7, %c0_49, %c0_50] : memref<9x128x128xbf16, #tpu.memory_space<vmem>>, vector<1x128x128xbf16>
    %52 = vector.shape_cast %51 : vector<1x128x128xbf16> to vector<128x128xbf16>
    %cst_51 = arith.constant dense<0.000000e+00> : vector<224x128xf32>
    %53 = tpu.matmul %50, %52, %cst_51 {dimension_numbers = #tpu.dot_dimension_numbers<[1], [0], [0], [1], [0, 0, 1, 1], [], []>} : vector<224x128xbf16>, vector<128x128xbf16>, vector<224x128xf32> -> vector<224x128xf32>
    %54 = arith.addf %48, %53 : vector<224x128xf32>
    %c0_52 = arith.constant 0 : index
    %c50 = arith.constant 50 : index
    %c0_53 = arith.constant 0 : index
    %55 = vector.load %arg2[%c0_52, %c50, %c0_53] : memref<1x448x128xbf16, #tpu.memory_space<vmem>>, vector<1x224x128xbf16>
    %56 = vector.shape_cast %55 : vector<1x224x128xbf16> to vector<224x128xbf16>
    %c8 = arith.constant 8 : index
    %c0_54 = arith.constant 0 : index
    %c0_55 = arith.constant 0 : index
    %57 = vector.load %arg4[%c8, %c0_54, %c0_55] : memref<9x128x128xbf16, #tpu.memory_space<vmem>>, vector<1x128x128xbf16>
    %58 = vector.shape_cast %57 : vector<1x128x128xbf16> to vector<128x128xbf16>
    %cst_56 = arith.constant dense<0.000000e+00> : vector<224x128xf32>
    %59 = tpu.matmul %56, %58, %cst_56 {dimension_numbers = #tpu.dot_dimension_numbers<[1], [0], [0], [1], [0, 0, 1, 1], [], []>} : vector<224x128xbf16>, vector<128x128xbf16>, vector<224x128xf32> -> vector<224x128xf32>
    %60 = arith.addf %54, %59 : vector<224x128xf32>
    %c0_57 = arith.constant 0 : index
    %c0_58 = arith.constant 0 : index
    %61 = vector.load %arg5[%c0_57, %c0_58] : memref<1x128xf32, #tpu.memory_space<vmem>>, vector<1x128xf32>
    %62 = vector.broadcast %61 : vector<1x128xf32> to vector<224x128xf32>
    %63 = arith.addf %60, %62 : vector<224x128xf32>
    %c0_59 = arith.constant 0 : index
    %c0_60 = arith.constant 0 : index
    %c0_61 = arith.constant 0 : index
    %64 = vector.load %arg6[%c0_59, %c0_60, %c0_61] : memref<1x448x128xbf16, #tpu.memory_space<vmem>>, vector<1x224x128xbf16>
    %65 = vector.shape_cast %64 : vector<1x224x128xbf16> to vector<224x128xbf16>
    %c0_62 = arith.constant 0 : index
    %c0_63 = arith.constant 0 : index
    %66 = vector.load %arg7[%c0_62, %c0_63] : memref<128x128xbf16, #tpu.memory_space<vmem>>, vector<128x128xbf16>
    %cst_64 = arith.constant dense<0.000000e+00> : vector<224x128xf32>
    %67 = tpu.matmul %65, %66, %cst_64 {dimension_numbers = #tpu.dot_dimension_numbers<[1], [0], [0], [1], [0, 0, 1, 1], [], []>} : vector<224x128xbf16>, vector<128x128xbf16>, vector<224x128xf32> -> vector<224x128xf32>
    %68 = arith.addf %63, %67 : vector<224x128xf32>
    %cst_65 = arith.constant 0.000000e+00 : f32
    %69 = vector.broadcast %cst_65 : f32 to vector<224x128xf32>
    %70 = arith.maximumf %68, %69 : vector<224x128xf32>
    %c0_66 = arith.constant 0 : index
    %c0_67 = arith.constant 0 : index
    %c0_68 = arith.constant 0 : index
    %71 = vector.load %arg8[%c0_66, %c0_67, %c0_68] : memref<1x448x128xf32, #tpu.memory_space<vmem>>, vector<1x224x128xf32>
    %72 = vector.shape_cast %71 : vector<1x224x128xf32> to vector<224x128xf32>
    %73 = vector.shape_cast %70 : vector<224x128xf32> to vector<1x224x128xf32>
    tpu.vector_store %arg8[%c0_66, %c0_67, %c0_68], %73 {strides = array<i32>} : memref<1x448x128xf32, #tpu.memory_space<vmem>>, vector<1x224x128xf32>,
    %cst_69 = arith.constant 0.000000e+00 : f32
    %74 = vector.broadcast %cst_69 : f32 to vector<224x128xf32>
    %c0_70 = arith.constant 0 : index
    %c0_71 = arith.constant 0 : index
    %75 = vector.load %arg9[%c0_70, %c0_71] : memref<280x128xbf16, #tpu.memory_space<vmem>>, vector<224x128xbf16>
    %c0_72 = arith.constant 0 : index
    %c0_73 = arith.constant 0 : index
    %c0_74 = arith.constant 0 : index
    %76 = vector.load %arg4[%c0_72, %c0_73, %c0_74] : memref<9x128x128xbf16, #tpu.memory_space<vmem>>, vector<1x128x128xbf16>
    %77 = vector.shape_cast %76 : vector<1x128x128xbf16> to vector<128x128xbf16>
    %cst_75 = arith.constant dense<0.000000e+00> : vector<224x128xf32>
    %78 = tpu.matmul %75, %77, %cst_75 {dimension_numbers = #tpu.dot_dimension_numbers<[1], [0], [0], [1], [0, 0, 1, 1], [], []>} : vector<224x128xbf16>, vector<128x128xbf16>, vector<224x128xf32> -> vector<224x128xf32>
    %79 = arith.addf %74, %78 : vector<224x128xf32>
    %c1_76 = arith.constant 1 : index
    %c0_77 = arith.constant 0 : index
    %80 = vector.load %arg9[%c1_76, %c0_77] : memref<280x128xbf16, #tpu.memory_space<vmem>>, vector<224x128xbf16>
    %c1_78 = arith.constant 1 : index
    %c0_79 = arith.constant 0 : index
    %c0_80 = arith.constant 0 : index
    %81 = vector.load %arg4[%c1_78, %c0_79, %c0_80] : memref<9x128x128xbf16, #tpu.memory_space<vmem>>, vector<1x128x128xbf16>
    %82 = vector.shape_cast %81 : vector<1x128x128xbf16> to vector<128x128xbf16>
    %cst_81 = arith.constant dense<0.000000e+00> : vector<224x128xf32>
    %83 = tpu.matmul %80, %82, %cst_81 {dimension_numbers = #tpu.dot_dimension_numbers<[1], [0], [0], [1], [0, 0, 1, 1], [], []>} : vector<224x128xbf16>, vector<128x128xbf16>, vector<224x128xf32> -> vector<224x128xf32>
    %84 = arith.addf %79, %83 : vector<224x128xf32>
    %c2_82 = arith.constant 2 : index
    %c0_83 = arith.constant 0 : index
    %85 = vector.load %arg9[%c2_82, %c0_83] : memref<280x128xbf16, #tpu.memory_space<vmem>>, vector<224x128xbf16>
    %c2_84 = arith.constant 2 : index
    %c0_85 = arith.constant 0 : index
    %c0_86 = arith.constant 0 : index
    %86 = vector.load %arg4[%c2_84, %c0_85, %c0_86] : memref<9x128x128xbf16, #tpu.memory_space<vmem>>, vector<1x128x128xbf16>
    %87 = vector.shape_cast %86 : vector<1x128x128xbf16> to vector<128x128xbf16>
    %cst_87 = arith.constant dense<0.000000e+00> : vector<224x128xf32>
    %88 = tpu.matmul %85, %87, %cst_87 {dimension_numbers = #tpu.dot_dimension_numbers<[1], [0], [0], [1], [0, 0, 1, 1], [], []>} : vector<224x128xbf16>, vector<128x128xbf16>, vector<224x128xf32> -> vector<224x128xf32>
    %89 = arith.addf %84, %88 : vector<224x128xf32>
    %c24_88 = arith.constant 24 : index
    %c0_89 = arith.constant 0 : index
    %90 = vector.load %arg9[%c24_88, %c0_89] : memref<280x128xbf16, #tpu.memory_space<vmem>>, vector<224x128xbf16>
    %c3_90 = arith.constant 3 : index
    %c0_91 = arith.constant 0 : index
    %c0_92 = arith.constant 0 : index
    %91 = vector.load %arg4[%c3_90, %c0_91, %c0_92] : memref<9x128x128xbf16, #tpu.memory_space<vmem>>, vector<1x128x128xbf16>
    %92 = vector.shape_cast %91 : vector<1x128x128xbf16> to vector<128x128xbf16>
    %cst_93 = arith.constant dense<0.000000e+00> : vector<224x128xf32>
    %93 = tpu.matmul %90, %92, %cst_93 {dimension_numbers = #tpu.dot_dimension_numbers<[1], [0], [0], [1], [0, 0, 1, 1], [], []>} : vector<224x128xbf16>, vector<128x128xbf16>, vector<224x128xf32> -> vector<224x128xf32>
    %94 = arith.addf %89, %93 : vector<224x128xf32>
    %c25_94 = arith.constant 25 : index
    %c0_95 = arith.constant 0 : index
    %95 = vector.load %arg9[%c25_94, %c0_95] : memref<280x128xbf16, #tpu.memory_space<vmem>>, vector<224x128xbf16>
    %c4_96 = arith.constant 4 : index
    %c0_97 = arith.constant 0 : index
    %c0_98 = arith.constant 0 : index
    %96 = vector.load %arg4[%c4_96, %c0_97, %c0_98] : memref<9x128x128xbf16, #tpu.memory_space<vmem>>, vector<1x128x128xbf16>
    %97 = vector.shape_cast %96 : vector<1x128x128xbf16> to vector<128x128xbf16>
    %cst_99 = arith.constant dense<0.000000e+00> : vector<224x128xf32>
    %98 = tpu.matmul %95, %97, %cst_99 {dimension_numbers = #tpu.dot_dimension_numbers<[1], [0], [0], [1], [0, 0, 1, 1], [], []>} : vector<224x128xbf16>, vector<128x128xbf16>, vector<224x128xf32> -> vector<224x128xf32>
    %99 = arith.addf %94, %98 : vector<224x128xf32>
    %c26_100 = arith.constant 26 : index
    %c0_101 = arith.constant 0 : index
    %100 = vector.load %arg9[%c26_100, %c0_101] : memref<280x128xbf16, #tpu.memory_space<vmem>>, vector<224x128xbf16>
    %c5_102 = arith.constant 5 : index
    %c0_103 = arith.constant 0 : index
    %c0_104 = arith.constant 0 : index
    %101 = vector.load %arg4[%c5_102, %c0_103, %c0_104] : memref<9x128x128xbf16, #tpu.memory_space<vmem>>, vector<1x128x128xbf16>
    %102 = vector.shape_cast %101 : vector<1x128x128xbf16> to vector<128x128xbf16>
    %cst_105 = arith.constant dense<0.000000e+00> : vector<224x128xf32>
    %103 = tpu.matmul %100, %102, %cst_105 {dimension_numbers = #tpu.dot_dimension_numbers<[1], [0], [0], [1], [0, 0, 1, 1], [], []>} : vector<224x128xbf16>, vector<128x128xbf16>, vector<224x128xf32> -> vector<224x128xf32>
    %104 = arith.addf %99, %103 : vector<224x128xf32>
    %c48_106 = arith.constant 48 : index
    %c0_107 = arith.constant 0 : index
    %105 = vector.load %arg9[%c48_106, %c0_107] : memref<280x128xbf16, #tpu.memory_space<vmem>>, vector<224x128xbf16>
    %c6_108 = arith.constant 6 : index
    %c0_109 = arith.constant 0 : index
    %c0_110 = arith.constant 0 : index
    %106 = vector.load %arg4[%c6_108, %c0_109, %c0_110] : memref<9x128x128xbf16, #tpu.memory_space<vmem>>, vector<1x128x128xbf16>
    %107 = vector.shape_cast %106 : vector<1x128x128xbf16> to vector<128x128xbf16>
    %cst_111 = arith.constant dense<0.000000e+00> : vector<224x128xf32>
    %108 = tpu.matmul %105, %107, %cst_111 {dimension_numbers = #tpu.dot_dimension_numbers<[1], [0], [0], [1], [0, 0, 1, 1], [], []>} : vector<224x128xbf16>, vector<128x128xbf16>, vector<224x128xf32> -> vector<224x128xf32>
    %109 = arith.addf %104, %108 : vector<224x128xf32>
    %c49_112 = arith.constant 49 : index
    %c0_113 = arith.constant 0 : index
    %110 = vector.load %arg9[%c49_112, %c0_113] : memref<280x128xbf16, #tpu.memory_space<vmem>>, vector<224x128xbf16>
    %c7_114 = arith.constant 7 : index
    %c0_115 = arith.constant 0 : index
    %c0_116 = arith.constant 0 : index
    %111 = vector.load %arg4[%c7_114, %c0_115, %c0_116] : memref<9x128x128xbf16, #tpu.memory_space<vmem>>, vector<1x128x128xbf16>
    %112 = vector.shape_cast %111 : vector<1x128x128xbf16> to vector<128x128xbf16>
    %cst_117 = arith.constant dense<0.000000e+00> : vector<224x128xf32>
    %113 = tpu.matmul %110, %112, %cst_117 {dimension_numbers = #tpu.dot_dimension_numbers<[1], [0], [0], [1], [0, 0, 1, 1], [], []>} : vector<224x128xbf16>, vector<128x128xbf16>, vector<224x128xf32> -> vector<224x128xf32>
    %114 = arith.addf %109, %113 : vector<224x128xf32>
    %c50_118 = arith.constant 50 : index
    %c0_119 = arith.constant 0 : index
    %115 = vector.load %arg9[%c50_118, %c0_119] : memref<280x128xbf16, #tpu.memory_space<vmem>>, vector<224x128xbf16>
    %c8_120 = arith.constant 8 : index
    %c0_121 = arith.constant 0 : index
    %c0_122 = arith.constant 0 : index
    %116 = vector.load %arg4[%c8_120, %c0_121, %c0_122] : memref<9x128x128xbf16, #tpu.memory_space<vmem>>, vector<1x128x128xbf16>
    %117 = vector.shape_cast %116 : vector<1x128x128xbf16> to vector<128x128xbf16>
    %cst_123 = arith.constant dense<0.000000e+00> : vector<224x128xf32>
    %118 = tpu.matmul %115, %117, %cst_123 {dimension_numbers = #tpu.dot_dimension_numbers<[1], [0], [0], [1], [0, 0, 1, 1], [], []>} : vector<224x128xbf16>, vector<128x128xbf16>, vector<224x128xf32> -> vector<224x128xf32>
    %119 = arith.addf %114, %118 : vector<224x128xf32>
    %c0_124 = arith.constant 0 : index
    %c0_125 = arith.constant 0 : index
    %120 = vector.load %arg5[%c0_124, %c0_125] : memref<1x128xf32, #tpu.memory_space<vmem>>, vector<1x128xf32>
    %121 = vector.broadcast %120 : vector<1x128xf32> to vector<224x128xf32>
    %122 = arith.addf %119, %121 : vector<224x128xf32>
    %c0_126 = arith.constant 0 : index
    %c224_127 = arith.constant 224 : index
    %c0_128 = arith.constant 0 : index
    %123 = vector.load %arg6[%c0_126, %c224_127, %c0_128] : memref<1x448x128xbf16, #tpu.memory_space<vmem>>, vector<1x224x128xbf16>
    %124 = vector.shape_cast %123 : vector<1x224x128xbf16> to vector<224x128xbf16>
    %c0_129 = arith.constant 0 : index
    %c0_130 = arith.constant 0 : index
    %125 = vector.load %arg7[%c0_129, %c0_130] : memref<128x128xbf16, #tpu.memory_space<vmem>>, vector<128x128xbf16>
    %cst_131 = arith.constant dense<0.000000e+00> : vector<224x128xf32>
    %126 = tpu.matmul %124, %125, %cst_131 {dimension_numbers = #tpu.dot_dimension_numbers<[1], [0], [0], [1], [0, 0, 1, 1], [], []>} : vector<224x128xbf16>, vector<128x128xbf16>, vector<224x128xf32> -> vector<224x128xf32>
    %127 = arith.addf %122, %126 : vector<224x128xf32>
    %cst_132 = arith.constant 0.000000e+00 : f32
    %128 = vector.broadcast %cst_132 : f32 to vector<224x128xf32>
    %129 = arith.maximumf %127, %128 : vector<224x128xf32>
    %c0_133 = arith.constant 0 : index
    %c224_134 = arith.constant 224 : index
    %c0_135 = arith.constant 0 : index
    %130 = vector.load %arg8[%c0_133, %c224_134, %c0_135] : memref<1x448x128xf32, #tpu.memory_space<vmem>>, vector<1x224x128xf32>
    %131 = vector.shape_cast %130 : vector<1x224x128xf32> to vector<224x128xf32>
    %132 = vector.shape_cast %129 : vector<224x128xf32> to vector<1x224x128xf32>
    tpu.vector_store %arg8[%c0_133, %c224_134, %c0_135], %132 {strides = array<i32>} : memref<1x448x128xf32, #tpu.memory_space<vmem>>, vector<1x224x128xf32>,
    return
  }
  func.func @transform_0(%arg0: i32, %arg1: i32) -> (i32, i32, i32) {
    %c0_i32 = arith.constant 0 : i32
    %c0_i32_0 = arith.constant 0 : i32
    return %arg0, %arg1, %c0_i32 : i32, i32, i32
  }
  func.func @transform_1(%arg0: i32, %arg1: i32) -> (i32, i32, i32) {
    %c1_i32 = arith.constant 1 : i32
    %0 = arith.addi %arg1, %c1_i32 : i32
    %c8_i32 = arith.constant 8 : i32
    %1 = arith.muli %0, %c8_i32 : i32
    %c0_i32 = arith.constant 0 : i32
    %c0_i32_0 = arith.constant 0 : i32
    return %arg0, %1, %c0_i32 : i32, i32, i32
  }
  func.func @transform_2(%arg0: i32, %arg1: i32) -> (i32, i32, i32) {
    %c0_i32 = arith.constant 0 : i32
    %c0_i32_0 = arith.constant 0 : i32
    %c0_i32_1 = arith.constant 0 : i32
    %c0_i32_2 = arith.constant 0 : i32
    return %c0_i32, %c0_i32_0, %c0_i32_1 : i32, i32, i32
  }
  func.func @transform_3(%arg0: i32, %arg1: i32) -> (i32, i32) {
    %c0_i32 = arith.constant 0 : i32
    %c0_i32_0 = arith.constant 0 : i32
    %c0_i32_1 = arith.constant 0 : i32
    return %c0_i32, %c0_i32_0 : i32, i32
  }
  func.func @transform_4(%arg0: i32, %arg1: i32) -> (i32, i32, i32) {
    %c0_i32 = arith.constant 0 : i32
    %c0_i32_0 = arith.constant 0 : i32
    return %arg0, %arg1, %c0_i32 : i32, i32, i32
  }
  func.func @transform_5(%arg0: i32, %arg1: i32) -> (i32, i32) {
    %c0_i32 = arith.constant 0 : i32
    %c0_i32_0 = arith.constant 0 : i32
    %c0_i32_1 = arith.constant 0 : i32
    return %c0_i32, %c0_i32_0 : i32, i32
  }
  func.func @transform_6(%arg0: i32, %arg1: i32) -> (i32, i32, i32) {
    %c0_i32 = arith.constant 0 : i32
    %c0_i32_0 = arith.constant 0 : i32
    return %arg0, %arg1, %c0_i32 : i32, i32, i32
  }
}

</mosaic_0001>

<bundles_post_ra>
// kernel: residual_block.2
= control target key start
LH: loop header
LB: loop body
LE: loop exit
PB: predicated region body
PF: predicated region fallthrough
CT: control target
= control target key end

     0   :  { %s10578_s18 = smov 0   ;;  %s10580_s19 = smov 0   ;;  %s12194_s0 = inlined_call_operand.vmem [shape: bf16[2,952,128], index: 0, kind: input, shape index: {}, may-alias: {0,1}]   ;;  %s12195_s1 = inlined_call_operand.vmem [shape: bf16[2,952,128], index: 1, kind: input, shape index: {}, may-alias: {0,1}]   ;;  %s12196_s2 = inlined_call_operand.vmem [shape: bf16[9,128,128], index: 2, kind: input, shape index: {}]   ;;  %s12197_s3 = inlined_call_operand.vmem [shape: f32[1,128], index: 3, kind: input, shape index: {}]   ;;  %s12198_s4 = inlined_call_operand.vmem [shape: f32[896,1], index: 4, kind: input, shape index: {}]   ;;  %s12199_s5 = inlined_call_operand.vmem [shape: bf16[2,896,128], index: 5, kind: output, shape index: {}]  }
   0x1   :  { %s10582_s20 = smov 0   ;;  %s10584_s21 = smov 0  }
   0x2   :  { %s10586_s22 = smov 0  }
   0x3 LB: > { %s24_s23 = sadd.s32 1, %s10537_s20  ;;  %s27_s24 = sadd.s32 1, %s10541_s21  ;;  %s10545_s22 = sphi %s10586_s22, %s15_s22   ;;  %s10541_s21 = sphi %s10584_s21, %s12203_s21   ;;  %s10537_s20 = sphi %s10582_s20, %s12202_s20   ;;  %s10533_s19 = sphi %s10580_s19, %s12201_s19   ;;  %s10529_s18 = sphi %s10578_s18, %s12200_s18  }
   0x4   : > { %p25_p0 = scmp.ge.s32.totalorder %s24_s23, 2  ;;  %p7665_p1 = scmp.ge.s32.totalorder %s10545_s22, 1 }
   0x5   : > { %p252_p2 = scmp.lt.s32.totalorder %s10545_s22, 5 }
   0x6   : > { %s12205_s23 = smov (%p25_p0, %s24_s23), 0  ;;  %s12207_s24 = smov (!%p25_p0, %s27_s24), %s10541_s21 }
   0x7   : > { %p253_p3 = pnand %p7665_p1, %p252_p2  ;;  %p29_p4 = scmp.ge.s32.totalorder %s12207_s24, 2 }
   0x8   : > { %v10194_v0 = vld [vmem:[%s12196_s2 + $0x40] sm:$0xff] (!%p253_p3)   ;;  %s10614_s27 = smul.u32 (!%p253_p3), 56, %s10529_s18  ;;  %p313_p5 = scmp.lt.s32.totalorder (!%p253_p3), %s10533_s19, 1  ;;  %v10196_v2 = vld [vmem:[%s12196_s2 + $0x48] sm:$0xff] (!%p253_p3)   ;;  %v10198_v4 = vld [vmem:[%s12196_s2 + $0x50] sm:$0xff] (!%p253_p3)   ;;  %vm1114_vm1 = vcmask (!%p253_p3), 1046528  }
   0x9   : > { %s12209_s24 = smov (%p29_p4, %s12207_s24), 0  ;;  %256 = sbr.rel (%p253_p3) target bundleno = 765 (0x2fd), region = 40 }
   0xa   : > { %v10195_v1 = vld [vmem:[%s12196_s2 + $0x40] sm:$0xff] (!%p253_p3)   ;;  %8909 = vmatprep.subr.bf16.mxu0 (!%p253_p3), %v10194_v0  ;;  %p315_p6 = scmp.lt.s32.totalorder (!%p253_p3), %s10614_s27, 118  ;;  %v10197_v3 = vld [vmem:[%s12196_s2 + $0x48] sm:$0xff] (!%p253_p3)   ;;  %v10199_v5 = vld [vmem:[%s12196_s2 + $0x50] sm:$0xff] (!%p253_p3)   ;;  %vm562_vm0 = vsmask.f32 (!%p253_p3), 7424 }
   0xb   : > { %9305 = vmatprep.subr.bf16.mxu1 (!%p253_p3), %v10195_v1  ;;  %8910 = vmatpush3.bf16.msra.mxu0 (!%p253_p3), %v10194_v0  ;;  %v10200_v6 = vld [vmem:[%s12196_s2 + $0x58] sm:$0xff] (!%p253_p3)   ;;  %v10202_v8 = vld [vmem:[%s12196_s2 + $0x60] sm:$0xff] (!%p253_p3)   ;;  %v10204_v10 = vld [vmem:[%s12196_s2 + $0x68] sm:$0xff] (!%p253_p3)   ;;  %p341_p8 = scmp.lt.s32.totalorder (!%p253_p3), %s10614_s27, 111 }
   0xc   : > { %9306 = vmatpush3.bf16.msra.mxu1 (!%p253_p3), %v10195_v1  ;;  %8911 = vmatprep.subr.bf16.mxu0 (!%p253_p3), %v10196_v2  ;;  %v10201_v7 = vld [vmem:[%s12196_s2 + $0x58] sm:$0xff] (!%p253_p3)   ;;  %v10203_v9 = vld [vmem:[%s12196_s2 + $0x60] sm:$0xff] (!%p253_p3)   ;;  %v10205_v11 = vld [vmem:[%s12196_s2 + $0x68] sm:$0xff] (!%p253_p3)  }
   0xd   : > { %9307 = vmatprep.subr.bf16.mxu1 (!%p253_p3), %v10197_v3  ;;  %v10206_v18 = vld [vmem:[%s12196_s2 + $0x70] sm:$0xff] (!%p253_p3)   ;;  %v10208_v27 = vld [vmem:[%s12196_s2 + $0x78] sm:$0xff] (!%p253_p3)   ;;  %v10215_v41 = vld [vmem:[%s12196_s2] sm:$0xff] (!%p253_p3)  }
   0xe   : > { %v10207_v19 = vld [vmem:[%s12196_s2 + $0x70] sm:$0xff] (!%p253_p3)   ;;  %v10209_v28 = vld [vmem:[%s12196_s2 + $0x78] sm:$0xff] (!%p253_p3)   ;;  %v10217_v44 = vld [vmem:[%s12196_s2] sm:$0xff] (!%p253_p3)  }
   0xf   : > { %8912 = vmatpush3.bf16.msra.mxu0 (!%p253_p3), %v10196_v2  ;;  %v10219_v59 = vld [vmem:[%s12196_s2 + $0x8] sm:$0xff] (!%p253_p3)  }
  0x10   : > { %s12211_s19 = smov (!%p313_p5, %s10533_s19), 1  ;;  %9308 = vmatpush3.bf16.msra.mxu1 %v10197_v3  ;;  %8913 = vmatprep.subr.bf16.mxu0 %v10198_v4  ;;  %v10221_v2 = vld [vmem:[%s12196_s2 + $0x8] sm:$0xff]  }
  0x11   : > { %s316_s11 = scalar_select %p315_p6, %s10614_s27, 118  ;;  %9309 = vmatprep.subr.bf16.mxu1 %v10199_v5 }
  0x12   : > { %s10149_s14 = smul.u32 119, %s12211_s19  ;;  %s12215_s27 = smov (!%p341_p8, %s10614_s27), 111 }
  0x13   : > { %8914 = vmatpush3.bf16.msra.mxu0 %v10198_v4  ;;  %s7670_s6 = sshll.u32 %s12215_s27, 3 }
  0x14   : > { %s318_s17 = sadd.s32 %s10149_s14, %s316_s11  ;;  %9310 = vmatpush3.bf16.msra.mxu1 %v10199_v5  ;;  %8915 = vmatprep.subr.bf16.mxu0 %v10200_v6  ;;  %s11373_s10 = scalar_lea.vmem %s12198_s4, %s7670_s6 }
  0x15   : > { %s7666_s28 = sshll.u32 %s318_s17, 2  ;;  %9311 = vmatprep.subr.bf16.mxu1 %v10201_v7 }
  0x16   : > { %s10656_s12 = scalar_lea.vmem %s12194_s0, %s7666_s28  ;;  %s326_s28 = sadd.s32 1, %s10529_s18 }
  0x17   : > { %8916 = vmatpush3.bf16.msra.mxu0 %v10200_v6  ;;  %v427_v12 = vld [vmem:[%s10656_s12] sm:$0xf]  ;;  %v428_v13 = vld [vmem:[%s10656_s12 + $0x4] sm:$0xf]  ;;  %v10666_v15 = vld [vmem:[%s10656_s12 + $0x8] sm:$0xff]   ;;  %s10706_s9 = smul.u32 56, %s326_s28 }
  0x18   : > { %9312 = vmatpush3.bf16.msra.mxu1 %v10201_v7  ;;  %8917 = vmatprep.subr.bf16.mxu0 %v10202_v8  ;;  %v10663_v14 = vcombine.low %v427_v12, %v428_v13  ;;  %v357_v16 = vld [vmem:[%s10656_s12 + $0x70] sm:$0xff]   ;;  %v359_v17 = vld [vmem:[%s10656_s12 + $0x78] sm:$0xff]   ;;  %v571_v22 = vshll.u32 %v10666_v15, 16  ;;  %v361_v24 = vld [vmem:[%s10656_s12 + $0x80] sm:$0xff]   ;;  %v575_v30 = vshrl.u32 %v10666_v15, 16 }
  0x19   : > { %9313 = vmatprep.subr.bf16.mxu1 %v10203_v9  ;;  %385 = vst [vmem:[#allocation2] sm:$0xff] %v357_v16   ;;  %387 = vst [vmem:[#allocation2 + $0x8] sm:$0xff] %v359_v17   ;;  %v10680_v23 = vld [vmem:[%s10656_s12 + $0x10] sm:$0xff]   ;;  %v10693_v32 = vld [vmem:[%s10656_s12 + $0x18] sm:$0xff]   ;;  %p331_p7 = scmp.lt.s32.totalorder %s10706_s9, 118 }
  0x1a   : > { %v564_v20 = vshrl.u32 %v10663_v14, 16  ;;  %v566_v21 = vshll.u32 %v10663_v14, 16  ;;  %v573_v26 = vrot.slane %v571_v22, 1  ;;  %389 = vst [vmem:[#allocation2 + $0x10] sm:$0xff] %v361_v24   ;;  %v579_v31 = vshll.u32 %v10680_v23, 16  ;;  %v363_v33 = vld [vmem:[%s10656_s12 + $0x88] sm:$0xff]  }
  0x1b   : > { %8918 = vmatpush3.bf16.msra.mxu0 %v10202_v8  ;;  %v583_v37 = vshrl.u32 %v10680_v23, 16  ;;  %v587_v38 = vshll.u32 %v10693_v32, 16  ;;  %391 = vst [vmem:[#allocation2 + $0x18] sm:$0xff] %v363_v33   ;;  %v10712_v45 = vld [vmem:[%s10656_s12 + $0x20] sm:$0xff]   ;;  %v365_v57 = vld [vmem:[%s10656_s12 + $0x90] sm:$0xff]   ;;  %v591_v60 = vshrl.u32 %v10693_v32, 16 }
  0x1c   : > { %9314 = vmatpush3.bf16.msra.mxu1 %v10203_v9  ;;  %8919 = vmatprep.subr.bf16.mxu0 %v10204_v10  ;;  %v568_v25 = vrot.slane %v566_v21, 1  ;;  %v577_v42 = vor.u32 %v575_v30, %v573_v26  ;;  %v581_v43 = vrot.slane %v579_v31, 1  ;;  %v595_v61 = vshll.u32 %v10712_v45, 16  ;;  %393 = vst [vmem:[#allocation2 + $0x20] sm:$0xff] %v365_v57   ;;  %v10224_v8 = vld [vmem:[%s12196_s2 + $0x10] sm:$0xff]   ;;  %v10743_v9 = vld [vmem:[%s10656_s12 + $0x28] sm:$0xff]  }
  0x1d   : > { %9315 = vmatprep.subr.bf16.mxu1 %v10205_v11  ;;  %v589_v52 = vrot.slane %v587_v38, 1  ;;  %s12213_s9 = smov (!%p331_p7, %s10706_s9), 118  ;;  %v599_v13 = vshrl.u32 %v10712_v45, 16  ;;  %v607_v21 = vshrl.u32 %v10743_v9, 16  ;;  %v369_v22 = vld [vmem:[%s10656_s12 + $0xa0] sm:$0xff]   ;;  %v10230_v30 = vld [vmem:[%s12196_s2 + $0x18] sm:$0xff]  }
  0x1e   : > { %v569_v29 = vor.u32 %v568_v25, %v564_v20  ;;  %v585_v51 = vor.u32 %v583_v37, %v581_v43  ;;  %v582_v58 = vsel %vm562_vm0, %v577_v42, %v581_v43  ;;  %v597_v12 = vrot.slane %v595_v61, 1  ;;  %v10758_v20 = vld [vmem:[%s10656_s12 + $0x30] sm:$0xff]   ;;  %397 = vst [vmem:[#allocation2 + $0x30] sm:$0xff] %v369_v22   ;;  %v371_v37 = vld [vmem:[%s10656_s12 + $0xa8] sm:$0xff]   ;;  %s10840_s26 = sadd.s32 %s10149_s14, %s12213_s9 }
  0x1f   : > { %8920 = vmatpush3.bf16.msra.mxu0 %v10204_v10  ;;  %v367_v10 = vld [vmem:[%s10656_s12 + $0x98] sm:$0xff]   ;;  %v615_v42 = vshrl.u32 %v10758_v20, 16  ;;  %399 = vst [vmem:[#allocation2 + $0x38] sm:$0xff] %v371_v37   ;;  %s7669_s14 = sshll.u32 %s10840_s26, 2  ;;  %s10150_s26 = smul.u32 112, %s12211_s19 }
  0x20   : > { %9316 = vmatpush3.bf16.msra.mxu1 %v10205_v11  ;;  %8921 = vmatprep.subr.bf16.mxu0 %v10206_v18  ;;  %v574_v34 = vsel %vm562_vm0, %v569_v29, %v573_v26  ;;  %v3988_v35 = vld [vmem:[#allocation2] sm:$0xf]  ;;  %v3989_v36 = vld [vmem:[#allocation2 + $0x4] sm:$0xf]  ;;  %v10701_v40 = vld [vmem:[#allocation2 + $0x8] sm:$0xff]   ;;  %v590_v3 = vsel %vm562_vm0, %v585_v51, %v589_v52  ;;  %v593_v11 = vor.u32 %v591_v60, %v589_v52  ;;  %v611_v29 = vshll.u32 %v10758_v20, 16  ;;  %s10885_s18 = scalar_lea.vmem %s12195_s1, %s7669_s14 }
  0x21   : > { %9317 = vmatprep.subr.bf16.mxu1 %v10207_v19  ;;  %8925 = vmatprep.mubr.bf16.mxu0 %v574_v34  ;;  %v10699_v39 = vcombine.low %v3988_v35, %v3989_v36  ;;  %v4130_v48 = vshll.u32 %v10701_v40, 16  ;;  %v10717_v49 = vld [vmem:[#allocation2 + $0x10] sm:$0xff]   ;;  %v4134_v50 = vshrl.u32 %v10701_v40, 16  ;;  %395 = vst [vmem:[#allocation2 + $0x28] sm:$0xff] %v367_v10   ;;  %v601_v24 = vor.u32 %v599_v13, %v597_v12  ;;  %v10774_v36 = vld [vmem:[%s10656_s12 + $0x38] sm:$0xff]   ;;  %v10236_v60 = vld [vmem:[%s12196_s2 + $0x20] sm:$0xff]   ;;  %s352_s14 = sadd.s32 %s10150_s26, %s12215_s27 }
  0x22   : > { %v4138_v55 = vshll.u32 %v10717_v49, 16  ;;  %v4142_v56 = vshrl.u32 %v10717_v49, 16  ;;  %v10730_v1 = vld [vmem:[#allocation2 + $0x18] sm:$0xff]   ;;  %v613_v38 = vrot.slane %v611_v29, 1  ;;  %v373_v51 = vld [vmem:[%s10656_s12 + $0xb0] sm:$0xff]   ;;  %s7671_s19 = sshll.u32 %s352_s14, 2 }
  0x23   : > { %8922 = vmatpush3.bf16.msra.mxu0 %v10206_v18  ;;  %v4123_v46 = vshrl.u32 %v10699_v39, 16  ;;  %v4125_v47 = vshll.u32 %v10699_v39, 16  ;;  %v4132_v54 = vrot.slane %v4130_v48, 1  ;;  %v4146_v7 = vshll.u32 %v10730_v1, 16  ;;  %v10225_v18 = vld [vmem:[%s12196_s2 + $0x10] sm:$0xff]   ;;  %v10763_v26 = vld [vmem:[#allocation2 + $0x20] sm:$0xff]   ;;  %s12041_s28 = scalar_lea.vmem %s12199_s5, %s7671_s19 }
  0x24   : > { %9318 = vmatpush3.bf16.msra.mxu1 %v10207_v19  ;;  %8923 = vmatprep.subr.bf16.mxu0 %v10208_v27  ;;  %v4140_v0 = vrot.slane %v4138_v55, 1  ;;  %v4150_v17 = vshrl.u32 %v10730_v1, 16  ;;  %v603_v19 = vshll.u32 %v10743_v9, 16  ;;  %v4154_v33 = vshll.u32 %v10763_v26, 16  ;;  %v10785_v48 = vld [vmem:[%s10656_s12 + $0x40] sm:$0xff]   ;;  %401 = vst [vmem:[#allocation2 + $0x40] sm:$0xff] %v373_v51  }
  0x25   : > { %9319 = vmatprep.subr.bf16.mxu1 %v10209_v28  ;;  %v4127_v53 = vrot.slane %v4125_v47, 1  ;;  %v4136_v63 = vor.u32 %v4134_v50, %v4132_v54  ;;  %v4148_v16 = vrot.slane %v4146_v7, 1  ;;  %v4158_v35 = vshrl.u32 %v10763_v26, 16  ;;  %v10791_v55 = vld [vmem:[#allocation2 + $0x30] sm:$0xff]   ;;  %v375_v13 = vld [vmem:[%s10656_s12 + $0xb8] sm:$0xff]  }
  0x26   : > { %v4144_v6 = vor.u32 %v4142_v56, %v4140_v0  ;;  %v4156_v43 = vrot.slane %v4154_v33, 1  ;;  %v619_v47 = vshll.u32 %v10774_v36, 16  ;;  %v623_v50 = vshrl.u32 %v10774_v36, 16  ;;  %v10809_v10 = vld [vmem:[#allocation2 + $0x38] sm:$0xff]   ;;  %403 = vst [vmem:[#allocation2 + $0x48] sm:$0xff] %v375_v13  }
  0x27   : > { %8924 = vmatpush3.bf16.msra.mxu0 %v10208_v27  ;;  %v4128_v62 = vor.u32 %v4127_v53, %v4123_v46  ;;  %v4141_v5 = vsel %vm562_vm0, %v4136_v63, %v4140_v0  ;;  %v605_v27 = vrot.slane %v603_v19, 1  ;;  %v4152_v31 = vor.u32 %v4150_v17, %v4148_v16  ;;  %v10237_v0 = vld [vmem:[%s12196_s2 + $0x20] sm:$0xff]  }
  0x28   : > { %9320 = vmatpush3.bf16.msra.mxu1 %v10209_v28  ;;  %8953 = vmatprep.subr.bf16.mxu0 %v10215_v41  ;;  %v4149_v25 = vsel %vm562_vm0, %v4144_v6, %v4148_v16  ;;  %v598_v28 = vsel %vm562_vm0, %v593_v11, %v597_v12  ;;  %v4160_v53 = vor.u32 %v4158_v35, %v4156_v43  ;;  %v4174_v63 = vshrl.u32 %v10791_v55, 16  ;;  %v10815_v16 = vld [vmem:[%s10656_s12 + $0x50] sm:$0xff]   ;;  %v10243_v35 = vld [vmem:[%s12196_s2 + $0x28] sm:$0xff]  }
  0x29   : > { %9349 = vmatprep.subr.bf16.mxu1 %v10217_v44  ;;  %v4133_v4 = vsel %vm562_vm0, %v4128_v62, %v4132_v54  ;;  %v606_v34 = vsel %vm562_vm0, %v601_v24, %v605_v27  ;;  %v609_v46 = vor.u32 %v607_v21, %v605_v27  ;;  %v4157_v52 = vsel %vm562_vm0, %v4152_v31, %v4156_v43 }
  0x2a   : > { %8926 = vmatmul.mubr.bf16.vlgmr.msra.gmra.mrb[0].mxu0 %v582_v58  ;;  %9321 = vmatprep.mubr.bf16.mxu1 %v4133_v4  ;;  %v617_v56 = vor.u32 %v615_v42, %v613_v38  ;;  %v621_v58 = vrot.slane %v619_v47, 1  ;;  %v4170_v62 = vshll.u32 %v10791_v55, 16  ;;  %v10805_v4 = vld [vmem:[%s10656_s12 + $0x48] sm:$0xff]   ;;  %v631_v11 = vshrl.u32 %v10785_v48, 16  ;;  %v10835_v42 = vld [vmem:[%s10656_s12 + $0x58] sm:$0xff]  }
  0x2b   : > { %8954 = vmatpush3.bf16.msra.mxu0 %v10215_v41  ;;  %9322 = vmatmul.mubr.bf16.vlgmr.msra.gmra.mrb[0].mxu1 %v4141_v5  ;;  %v10231_v41 = vld [vmem:[%s12196_s2 + $0x18] sm:$0xff]   ;;  %v635_v12 = vshll.u32 %v10805_v4, 16  ;;  %v4178_v19 = vshll.u32 %v10809_v10, 16  ;;  %v4182_v21 = vshrl.u32 %v10809_v10, 16  ;;  %v10820_v24 = vld [vmem:[#allocation2 + $0x40] sm:$0xff]   ;;  %v639_v29 = vshrl.u32 %v10805_v4, 16 }
  0x2c   : > { %8929 = vmatprep.mubr.bf16.mxu0 %v590_v3  ;;  %9350 = vmatpush3.bf16.msra.mxu1 %v10217_v44  ;;  %v10781_v44 = vld [vmem:[#allocation2 + $0x28] sm:$0xff]   ;;  %v4172_v7 = vrot.slane %v4170_v62, 1  ;;  %v625_v22 = vor.u32 %v623_v50, %v621_v58  ;;  %v4186_v31 = vshll.u32 %v10820_v24, 16  ;;  %v643_v33 = vshll.u32 %v10815_v16, 16 }
  0x2d   : > { %8955 = vmatprep.subr.bf16.mxu0 %v10219_v59  ;;  %9351 = vmatprep.subr.bf16.mxu1 %v10221_v2  ;;  %v4162_v54 = vshll.u32 %v10781_v44, 16  ;;  %v4166_v57 = vshrl.u32 %v10781_v44, 16  ;;  %v647_v47 = vshrl.u32 %v10815_v16, 16  ;;  %v651_v51 = vshll.u32 %v10835_v42, 16 }
  0x2e   : > { %9325 = vmatprep.mubr.bf16.mxu1 %v4149_v25  ;;  %v4180_v25 = vrot.slane %v4178_v19, 1  ;;  %v655_v13 = vshrl.u32 %v10835_v42, 16 }
  0x2f   : > { %8956 = vmatpush3.bf16.msra.mxu0 %v10219_v59  ;;  %v627_v59 = vshll.u32 %v10785_v48, 16  ;;  %v4164_v61 = vrot.slane %v4162_v54, 1 }
  0x30   : > { %8957 = vmatprep.subr.bf16.mxu0 %v10224_v8  ;;  %9352 = vmatpush3.bf16.msra.mxu1 %v10221_v2  ;;  %v614_v2 = vsel %vm562_vm0, %v609_v46, %v613_v38  ;;  %v4184_v38 = vor.u32 %v4182_v21, %v4180_v25  ;;  %v4188_v46 = vrot.slane %v4186_v31, 1  ;;  %v10888_v31 = vld [vmem:[%s10656_s12 + $0x70] ss:$0 sps:$4 sm:$0x11]  }
  0x31   : > { %9353 = vmatprep.subr.bf16.mxu1 %v10225_v18  ;;  %v629_v3 = vrot.slane %v627_v59, 1  ;;  %v4165_v5 = vsel %vm562_vm0, %v4160_v53, %v4164_v61  ;;  %v4168_v6 = vor.u32 %v4166_v57, %v4164_v61  ;;  %v10847_v53 = vld [vmem:[#allocation2 + $0x48] sm:$0xff]   ;;  %v653_v57 = vrot.slane %v651_v51, 1  ;;  %v381_v59 = vld [vmem:[%s10656_s12 + $0xd0] sm:$0xff]  }
  0x32   : > { %8930 = vmatmul.mubr.bf16.gmra.mrb[4].mxu0 %v598_v28  ;;  %v637_v28 = vrot.slane %v635_v12, 1  ;;  %v4189_v54 = vsel %vm562_vm0, %v4184_v38, %v4188_v46  ;;  %v4194_v61 = vshll.u32 %v10847_v53, 16  ;;  %409 = vst [vmem:[#allocation2 + $0x60] sm:$0xff] %v381_v59   ;;  %v10256_v59 = vld [vmem:[%s12196_s2 + $0x80] sm:$0xff]  }
  0x33   : > { %8933 = vmatprep.mubr.bf16.mxu0 %v606_v34  ;;  %8958 = vmatpush3.bf16.msra.mxu0 %v10224_v8  ;;  %v622_v8 = vsel %vm562_vm0, %v617_v56, %v621_v58  ;;  %v4173_v17 = vsel %vm562_vm0, %v4168_v6, %v4172_v7  ;;  %v633_v27 = vor.u32 %v631_v11, %v629_v3  ;;  %v10242_v34 = vld [vmem:[%s12196_s2 + $0x28] sm:$0xff]   ;;  %v645_v56 = vrot.slane %v643_v33, 1  ;;  %v10852_v58 = vld [vmem:[%s10656_s12 + $0x60] sm:$0xff]   ;;  %v10254_v33 = vld [vmem:[%s12196_s2 + $0x38] sm:$0xff]  }
  0x34   : > { %8959 = vmatprep.subr.bf16.mxu0 %v10230_v30  ;;  %9326 = vmatmul.mubr.bf16.gmra.mrb[4].mxu1 %v4157_v52  ;;  %v630_v43 = vsel %vm562_vm0, %v625_v22, %v629_v3  ;;  %v379_v52 = vld [vmem:[%s10656_s12 + $0xc8] sm:$0xff]   ;;  %v641_v62 = vor.u32 %v639_v29, %v637_v28  ;;  %v659_v6 = vshll.u32 %v10852_v58, 16 }
  0x35   : > { %9354 = vmatpush3.bf16.msra.mxu1 %v10225_v18  ;;  %9329 = vmatprep.mubr.bf16.mxu1 %v4165_v5  ;;  %v4176_v18 = vor.u32 %v4174_v63, %v4172_v7  ;;  %v638_v50 = vsel %vm562_vm0, %v633_v27, %v637_v28  ;;  %407 = vst [vmem:[#allocation2 + $0x58] sm:$0xff] %v379_v52   ;;  %v4198_v63 = vshrl.u32 %v10847_v53, 16  ;;  %v4196_v7 = vrot.slane %v4194_v61, 1 }
  0x36   : > { %9355 = vmatprep.subr.bf16.mxu1 %v10231_v41  ;;  %v649_v5 = vor.u32 %v647_v47, %v645_v56  ;;  %v646_v19 = vsel %vm562_vm0, %v641_v62, %v645_v56  ;;  %v413_v47 = vld [vmem:[%s10885_s18] sm:$0xf]  ;;  %v10255_v56 = vld [vmem:[%s12196_s2 + $0x38] sm:$0xff]  }
  0x37   : > { %8960 = vmatpush3.bf16.msra.mxu0 %v10230_v30  ;;  %v377_v30 = vld [vmem:[%s10656_s12 + $0xc0] sm:$0xff]   ;;  %v4181_v37 = vsel %vm562_vm0, %v4176_v18, %v4180_v25  ;;  %v4200_v21 = vor.u32 %v4198_v63, %v4196_v7  ;;  %v383_v25 = vld [vmem:[%s10656_s12 + $0xd8] sm:$0xff]   ;;  %420 = vst [vmem:[#allocation2 + $0x70] sm:$0xf] %v413_v47 }
  0x38   : > { %8961 = vmatprep.subr.bf16.mxu0 %v10236_v60  ;;  %405 = vst [vmem:[#allocation2 + $0x50] sm:$0xff] %v377_v30   ;;  %v654_v28 = vsel %vm562_vm0, %v649_v5, %v653_v57  ;;  %411 = vst [vmem:[#allocation2 + $0x68] sm:$0xff] %v383_v25   ;;  %v661_v30 = vrot.slane %v659_v6, 1  ;;  %v10257_v63 = vld [vmem:[%s12196_s2 + $0x80] sm:$0xff]  }
  0x39   : > { %9356 = vmatpush3.bf16.msra.mxu1 %v10231_v41  ;;  %v4190_v41 = vshrl.u32 %v10820_v24, 16  ;;  %v10895_v38 = vld [vmem:[#allocation2 + $0x60] sm:$0xff]  }
  0x3a   : > { %8934 = vmatmul.mubr.bf16.gmra.mrb[8].mxu0 %v614_v2  ;;  %9357 = vmatprep.subr.bf16.mxu1 %v10237_v0  ;;  %v10249_v2 = vld [vmem:[%s12196_s2 + $0x30] sm:$0xff]   ;;  %v4218_v51 = vshll.u32 %v10895_v38, 16  ;;  %v10491_v47 = vld [vmem:[#allocation2 + $0x4] sm:$0xf] }
  0x3b   : > { %8937 = vmatprep.mubr.bf16.mxu0 %v622_v8  ;;  %8962 = vmatpush3.bf16.msra.mxu0 %v10236_v60  ;;  %v4192_v60 = vor.u32 %v4190_v41, %v4188_v46  ;;  %v10867_v8 = vld [vmem:[%s10656_s12 + $0x68] sm:$0xff]   ;;  %v657_v41 = vor.u32 %v655_v13, %v653_v57  ;;  %v4222_v57 = vshrl.u32 %v10895_v38, 16 }
  0x3c   : > { %9330 = vmatmul.mubr.bf16.gmra.mrb[8].mxu1 %v4173_v17  ;;  %8963 = vmatprep.subr.bf16.mxu0 %v10242_v34  ;;  %v663_v17 = vshrl.u32 %v10852_v58, 16  ;;  %v667_v22 = vshll.u32 %v10867_v8, 16  ;;  %v10878_v29 = vld [vmem:[#allocation2 + $0x58] sm:$0xff]   ;;  %v4220_v62 = vrot.slane %v4218_v51, 1  ;;  %v671_v5 = vshrl.u32 %v10867_v8, 16  ;;  %v10492_v51 = vld [vmem:[%s10656_s12 + $0x8] sm:$0xff]  }
  0x3d   : > { %9358 = vmatpush3.bf16.msra.mxu1 %v10237_v0  ;;  %9333 = vmatprep.mubr.bf16.mxu1 %v4181_v37  ;;  %v10248_v0 = vld [vmem:[%s12196_s2 + $0x30] sm:$0xff]   ;;  %v4197_v18 = vsel %vm562_vm0, %v4192_v60, %v4196_v7  ;;  %v4210_v37 = vshll.u32 %v10878_v29, 16 }
  0x3e   : > { %9359 = vmatprep.subr.bf16.mxu1 %v10243_v35  ;;  %v669_v46 = vrot.slane %v667_v22, 1  ;;  %v665_v52 = vor.u32 %v663_v17, %v661_v30  ;;  %v4224_v7 = vor.u32 %v4222_v57, %v4220_v62 }
  0x3f   : > { %8964 = vmatpush3.bf16.msra.mxu0 %v10242_v34  ;;  %v10863_v3 = vld [vmem:[#allocation2 + $0x50] sm:$0xff]  }
  0x40   : > { %8965 = vmatprep.subr.bf16.mxu0 %v10248_v0  ;;  %v4202_v11 = vshll.u32 %v10863_v3, 16  ;;  %v4206_v12 = vshrl.u32 %v10863_v3, 16  ;;  %v670_v6 = vsel %vm562_vm0, %v665_v52, %v669_v46 }
  0x41   : > { %9360 = vmatpush3.bf16.msra.mxu1 %v10243_v35 }
  0x42   : > { %8938 = vmatmul.mubr.bf16.gmra.mrb[12].mxu0 %v630_v43  ;;  %9361 = vmatprep.subr.bf16.mxu1 %v10249_v2  ;;  %v4204_v27 = vrot.slane %v4202_v11, 1  ;;  %v4214_v43 = vshrl.u32 %v10878_v29, 16 }
  0x43   : > { %8941 = vmatprep.mubr.bf16.mxu0 %v638_v50  ;;  %8966 = vmatpush3.bf16.msra.mxu0 %v10248_v0  ;;  %v4212_v50 = vrot.slane %v4210_v37, 1  ;;  %v662_v0 = vsel %vm562_vm0, %v657_v41, %v661_v30  ;;  %v10274_v37 = vld [vmem:[%s12196_s2 + $0xc0] sm:$0xff]  }
  0x44   : > { %9334 = vmatmul.mubr.bf16.gmra.mrb[12].mxu1 %v4189_v54  ;;  %v4205_v34 = vsel %vm562_vm0, %v4200_v21, %v4204_v27  ;;  %v4208_v35 = vor.u32 %v4206_v12, %v4204_v27  ;;  %8967 = vmatprep.subr.bf16.mxu0 %v10254_v33  ;;  %v675_v54 = vshll.u32 %v10888_v31, 16  ;;  %v10920_v21 = vld [vmem:[#allocation2 + $0x70] ss:$0 sps:$4 sm:$0x11]   ;;  %v10490_v41 = vld [vmem:[%s10656_s12 + $0x4] sm:$0xf] }
  0x45   : > { %9362 = vmatpush3.bf16.msra.mxu1 %v10249_v2  ;;  %9337 = vmatprep.mubr.bf16.mxu1 %v4197_v18  ;;  %v4216_v61 = vor.u32 %v4214_v43, %v4212_v50  ;;  %v10913_v2 = vld [vmem:[#allocation2 + $0x68] sm:$0xff]   ;;  %v4234_v25 = vshll.u32 %v10920_v21, 16 }
  0x46   : > { %v4213_v60 = vsel %vm562_vm0, %v4208_v35, %v4212_v50  ;;  %9363 = vmatprep.subr.bf16.mxu1 %v10255_v56  ;;  %v4226_v11 = vshll.u32 %v10913_v2, 16  ;;  %v677_v12 = vrot.slane %v675_v54, 1  ;;  %v4230_v13 = vshrl.u32 %v10913_v2, 16  ;;  %v10259_v35 = vld [vmem:[%s12196_s2 + $0x88] sm:$0xff]  }
  0x47   : > { %8968 = vmatpush3.bf16.msra.mxu0 %v10254_v33  ;;  %v4221_v17 = vsel %vm562_vm0, %v4216_v61, %v4220_v62  ;;  %v4236_v30 = vrot.slane %v4234_v25, 1  ;;  %v10493_v54 = vld [vmem:[#allocation2 + $0x8] sm:$0xff]   ;;  %v10495_v62 = vld [vmem:[%s10656_s12 + $0x18] sm:$0xff]   ;;  %v10498_v25 = vld [vmem:[%s10656_s12 + $0x20] sm:$0xff]  }
  0x48   : > { %8997 = vmatprep.subr.bf16.mxu0 %v10256_v59  ;;  %v4228_v18 = vrot.slane %v4226_v11, 1 }
  0x49   : > { %9364 = vmatpush3.bf16.msra.mxu1 %v10255_v56  ;;  %v4673_v56 = vrot.slane %v10493_v54, 1  ;;  %v4687_v54 = vrot.slane %v10820_v24, 1 }
  0x4a   : > { %8942 = vmatmul.mubr.bf16.gmra.mrb[16].mxu0 %v646_v19  ;;  %9393 = vmatprep.subr.bf16.mxu1 %v10257_v63  ;;  %v673_v19 = vor.u32 %v671_v5, %v669_v46  ;;  %v4229_v22 = vsel %vm562_vm0, %v4224_v7, %v4228_v18  ;;  %v4232_v27 = vor.u32 %v4230_v13, %v4228_v18  ;;  %v4652_v46 = vld [vmem:[#allocation2] sm:$0xe]  ;;  %v10497_v7 = vld [vmem:[#allocation2 + $0x18] sm:$0xff]   ;;  %v10276_v13 = vld [vmem:[%s12196_s2 + $0xc8] sm:$0xff]  }
  0x4b   : > { %8945 = vmatprep.mubr.bf16.mxu0 %v654_v28  ;;  %v8040_v50 = vcombine.low %v4652_v46, %v10491_v47  ;;  %v4677_v11 = vrot.slane %v10497_v7, 1  ;;  %v10284_v46 = vld [vmem:[%s12196_s2 + $0xe8] sm:$0xff]   ;;  %v10503_v47 = vld [vmem:[%s10656_s12 + $0x40] sm:$0xff]   ;;  %v4691_v7 = vrot.slane %v10863_v3, 1 }
  0x4c   : > { %9338 = vmatmul.mubr.bf16.gmra.mrb[16].mxu1 %v4205_v34  ;;  %v678_v28 = vsel %vm562_vm0, %v673_v19, %v677_v12  ;;  %v4237_v33 = vsel %vm562_vm0, %v4232_v27, %v4236_v30  ;;  %v10258_v34 = vld [vmem:[%s12196_s2 + $0x88] sm:$0xff]   ;;  %v1122_v27 = vrot.slane %v10498_v25, 1  ;;  %v4697_v25 = vrot.slane %v10913_v2, 1 }
  0x4d   : > { %9341 = vmatprep.mubr.bf16.mxu1 %v4213_v60  ;;  %v4672_v52 = vrot.slane %v8040_v50, 1  ;;  %v10494_v60 = vld [vmem:[%s10656_s12 + $0x10] sm:$0xff]   ;;  %v10499_v30 = vld [vmem:[%s10656_s12 + $0x28] sm:$0xff]   ;;  %v1130_v50 = vrot.slane %v10503_v47, 1 }
  0x4e   : > { %v1118_v61 = vrot.slane %v10494_v60, 1  ;;  %v10307_v47 = vld [vmem:[#allocation2 + $0x34] sm:$0xff]  }
  0x52   : > { %8946 = vmatmul.mubr.bf16.gmra.mrb[20].mxu0 %v662_v0  ;;  %v10496_v0 = vld [vmem:[#allocation2 + $0x10] sm:$0xff]  }
  0x53   : > { %8949 = vmatprep.mubr.bf16.mxu0 %v670_v6  ;;  %v4675_v5 = vrot.slane %v10496_v0, 1  ;;  %v10289_v0 = vld [vmem:[%s12196_s2 + $0xf8] sm:$0xff]  }
  0x54   : > { %9342 = vmatmul.mubr.bf16.gmra.mrb[20].mxu1 %v4221_v17  ;;  %v414_v17 = vld [vmem:[%s10885_s18 + $0x4] sm:$0xff]  }
  0x55   : > { %9345 = vmatprep.mubr.bf16.mxu1 %v4229_v22  ;;  %v4676_v18 = vsel %vm1114_vm1, %v4673_v56, %v4675_v5  ;;  %421 = vst [vmem:[#allocation2 + $0x74] sm:$0xff] %v414_v17   ;;  %v4678_v19 = vsel %vm1114_vm1, %v4675_v5, %v4677_v11  ;;  %v10277_v22 = vld [vmem:[%s12196_s2 + $0xc8] sm:$0xff]   ;;  %v1136_v5 = vrot.slane %v10835_v42, 1 }
  0x5a   : > { %8950 = vmatmul.mubr.bf16.gmra.mrb[24].mxu0 %v678_v28  ;;  %v10278_v28 = vld [vmem:[%s12196_s2 + $0xd0] sm:$0xff]  }
  0x5b   : > { %8969 = vmatprep.mubr.bf16.mxu0 %v10663_v14  ;;  %v10260_v14 = vld [vmem:[%s12196_s2 + $0x90] sm:$0xff]  }
  0x5c   : > { %9346 = vmatmul.mubr.bf16.gmra.mrb[24].mxu1 %v4237_v33  ;;  %v1124_v33 = vrot.slane %v10499_v30, 1 }
  0x5d   : > { %9365 = vmatprep.mubr.bf16.mxu1 %v10699_v39  ;;  %v10263_v39 = vld [vmem:[%s12196_s2 + $0x98] sm:$0xff]  }
  0x62   : > { %8970 = vmatmul.mubr.bf16.vlgmr.msra.gmra.mrb[0].mxu0 %v10666_v15  ;;  %v10261_v15 = vld [vmem:[%s12196_s2 + $0x90] sm:$0xff]  }
  0x63   : > { %8998 = vmatpush3.bf16.msra.mxu0 %v10256_v59  ;;  %8973 = vmatprep.mubr.bf16.mxu0 %v10680_v23  ;;  %v10262_v23 = vld [vmem:[%s12196_s2 + $0x98] sm:$0xff]   ;;  %v4674_v59 = vsel %vm1114_vm1, %v4672_v52, %v4673_v56  ;;  %v10286_v52 = vld [vmem:[%s12196_s2 + $0xf0] sm:$0xff]  }
  0x64   : > { %8999 = vmatprep.subr.bf16.mxu0 %v10258_v34  ;;  %9366 = vmatmul.mubr.bf16.vlgmr.msra.gmra.mrb[0].mxu1 %v10701_v40  ;;  %v10264_v40 = vld [vmem:[%s12196_s2 + $0xa0] sm:$0xff]  }
  0x65   : > { %9394 = vmatpush3.bf16.msra.mxu1 %v10257_v63  ;;  %9369 = vmatprep.mubr.bf16.mxu1 %v10717_v49  ;;  %v10267_v49 = vld [vmem:[%s12196_s2 + $0xa8] sm:$0xff]   ;;  %v1120_v63 = vrot.slane %v10495_v62, 1  ;;  %v10505_v62 = vld [vmem:[%s10656_s12 + $0x50] sm:$0xff]  }
  0x66   : > { %9395 = vmatprep.subr.bf16.mxu1 %v10259_v35 }
  0x67   : > { %9000 = vmatpush3.bf16.msra.mxu0 %v10258_v34  ;;  %v1121_v12 = vsel %vm1114_vm1, %v1118_v61, %v1120_v63  ;;  %v10500_v34 = vld [vmem:[#allocation2 + $0x20] sm:$0xff]  }
  0x68   : > { %9001 = vmatprep.subr.bf16.mxu0 %v10260_v14 }
  0x69   : > { %9396 = vmatpush3.bf16.msra.mxu1 %v10259_v35  ;;  %v4679_v35 = vrot.slane %v10500_v34, 1  ;;  %v10291_v34 = vld [vmem:[#allocation2 + $0xc] sm:$0xff]  }
  0x6a   : > { %8974 = vmatmul.mubr.bf16.gmra.mrb[4].mxu0 %v10693_v32  ;;  %9397 = vmatprep.subr.bf16.mxu1 %v10261_v15  ;;  %v10265_v32 = vld [vmem:[%s12196_s2 + $0xa0] sm:$0xff]  }
  0x6b   : > { %8977 = vmatprep.mubr.bf16.mxu0 %v10712_v45  ;;  %9002 = vmatpush3.bf16.msra.mxu0 %v10260_v14  ;;  %v10266_v45 = vld [vmem:[%s12196_s2 + $0xa8] sm:$0xff]   ;;  %v1123_v14 = vsel %vm1114_vm1, %v1120_v63, %v1122_v27  ;;  %v1134_v63 = vrot.slane %v10505_v62, 1 }
  0x6c   : > { %9370 = vmatmul.mubr.bf16.gmra.mrb[4].mxu1 %v10730_v1  ;;  %9003 = vmatprep.subr.bf16.mxu0 %v10262_v23  ;;  %v10268_v1 = vld [vmem:[%s12196_s2 + $0xb0] sm:$0xff]  }
  0x6d   : > { %9373 = vmatprep.mubr.bf16.mxu1 %v10763_v26  ;;  %9398 = vmatpush3.bf16.msra.mxu1 %v10261_v15  ;;  %v10271_v26 = vld [vmem:[%s12196_s2 + $0xb8] sm:$0xff]   ;;  %v10279_v15 = vld [vmem:[%s12196_s2 + $0xd0] sm:$0xff]  }
  0x6e   : > { %9399 = vmatprep.subr.bf16.mxu1 %v10263_v39 }
  0x6f   : > { %9004 = vmatpush3.bf16.msra.mxu0 %v10262_v23  ;;  %v4681_v23 = vrot.slane %v10781_v44, 1 }
  0x70   : > { %9005 = vmatprep.subr.bf16.mxu0 %v10264_v40 }
  0x71   : > { %9400 = vmatpush3.bf16.msra.mxu1 %v10263_v39  ;;  %v1125_v39 = vsel %vm1114_vm1, %v1122_v27, %v1124_v33 }
  0x72   : > { %8978 = vmatmul.mubr.bf16.gmra.mrb[8].mxu0 %v10743_v9  ;;  %9401 = vmatprep.subr.bf16.mxu1 %v10265_v32  ;;  %v10269_v9 = vld [vmem:[%s12196_s2 + $0xb0] sm:$0xff]  }
  0x73   : > { %8981 = vmatprep.mubr.bf16.mxu0 %v10758_v20  ;;  %9006 = vmatpush3.bf16.msra.mxu0 %v10264_v40  ;;  %v10270_v20 = vld [vmem:[%s12196_s2 + $0xb8] sm:$0xff]  }
  0x74   : > { %9374 = vmatmul.mubr.bf16.gmra.mrb[8].mxu1 %v10781_v44  ;;  %9007 = vmatprep.subr.bf16.mxu0 %v10266_v45  ;;  %v10280_v40 = vld [vmem:[%s12196_s2 + $0xd8] sm:$0xff]  }
  0x75   : > { %9377 = vmatprep.mubr.bf16.mxu1 %v10791_v55  ;;  %9402 = vmatpush3.bf16.msra.mxu1 %v10265_v32  ;;  %v4680_v32 = vsel %vm1114_vm1, %v4677_v11, %v4679_v35  ;;  %v10281_v44 = vld [vmem:[%s12196_s2 + $0xd8] sm:$0xff]  }
  0x76   : > { %9403 = vmatprep.subr.bf16.mxu1 %v10267_v49 }
  0x77   : > { %9008 = vmatpush3.bf16.msra.mxu0 %v10266_v45  ;;  %v4682_v45 = vsel %vm1114_vm1, %v4679_v35, %v4681_v23  ;;  %v10292_v35 = vld [vmem:[%s10656_s12 + $0x14] sm:$0xff]  }
  0x78   : > { %9009 = vmatprep.subr.bf16.mxu0 %v10268_v1 }
  0x79   : > { %9404 = vmatpush3.bf16.msra.mxu1 %v10267_v49  ;;  %v10501_v49 = vld [vmem:[%s10656_s12 + $0x30] sm:$0xff]  }
  0x7a   : > { %8982 = vmatmul.mubr.bf16.gmra.mrb[12].mxu0 %v10774_v36  ;;  %9405 = vmatprep.subr.bf16.mxu1 %v10269_v9  ;;  %v10275_v36 = vld [vmem:[%s12196_s2 + $0xc0] sm:$0xff]  }
  0x7b   : > { %8985 = vmatprep.mubr.bf16.mxu0 %v10785_v48  ;;  %9010 = vmatpush3.bf16.msra.mxu0 %v10268_v1  ;;  %v1093_v48 = vld [vmem:[%s10656_s12] sm:$0xe]  ;;  %v1126_v1 = vrot.slane %v10501_v49, 1  ;;  %v10304_v49 = vld [vmem:[%s10656_s12 + $0x2c] sm:$0xff]  }
  0x7c   : > { %9378 = vmatmul.mubr.bf16.gmra.mrb[12].mxu1 %v10809_v10  ;;  %9011 = vmatprep.subr.bf16.mxu0 %v10270_v20  ;;  %v7735_v43 = vcombine.low %v1093_v48, %v10490_v41  ;;  %v4685_v48 = vrot.slane %v10809_v10, 1  ;;  %v10283_v41 = vld [vmem:[%s12196_s2 + $0xe0] sm:$0xff]  }
  0x7d   : > { %9381 = vmatprep.mubr.bf16.mxu1 %v10820_v24  ;;  %9406 = vmatpush3.bf16.msra.mxu1 %v10269_v9  ;;  %v10502_v9 = vld [vmem:[%s10656_s12 + $0x38] sm:$0xff]  }
  0x7e   : > { %9407 = vmatprep.subr.bf16.mxu1 %v10271_v26  ;;  %v4688_v24 = vsel %vm1114_vm1, %v4685_v48, %v4687_v54 }
  0x7f   : > { %9012 = vmatpush3.bf16.msra.mxu0 %v10270_v20  ;;  %v1128_v20 = vrot.slane %v10502_v9, 1  ;;  %v10301_v9 = vld [vmem:[#allocation2 + $0x24] sm:$0xff]  }
  0x80   : > { %9041 = vmatprep.subr.bf16.mxu0 %v10274_v37 }
  0x81   : > { %9408 = vmatpush3.bf16.msra.mxu1 %v10271_v26  ;;  %v10282_v26 = vld [vmem:[%s12196_s2 + $0xe0] sm:$0xff]   ;;  %v1131_v56 = vsel %vm1114_vm1, %v1128_v20, %v1130_v50 }
  0x82   : > { %8986 = vmatmul.mubr.bf16.gmra.mrb[16].mxu0 %v10805_v4  ;;  %9437 = vmatprep.subr.bf16.mxu1 %v10275_v36  ;;  %v1115_v4 = vrot.slane %v7735_v43, 1  ;;  %v1129_v43 = vsel %vm1114_vm1, %v1126_v1, %v1128_v20  ;;  %v10308_v20 = vld [vmem:[%s12196_s2 + $0x118] sm:$0xff]  }
  0x83   : > { %8989 = vmatprep.mubr.bf16.mxu0 %v10815_v16  ;;  %v1116_v16 = vrot.slane %v10492_v51, 1  ;;  %v10504_v51 = vld [vmem:[%s10656_s12 + $0x48] sm:$0xff]  }
  0x84   : > { %9382 = vmatmul.mubr.bf16.gmra.mrb[16].mxu1 %v10847_v53 }
  0x85   : > { %9385 = vmatprep.mubr.bf16.mxu1 %v10863_v3  ;;  %v1117_v57 = vsel %vm1114_vm1, %v1115_v4, %v1116_v16  ;;  %v1119_v6 = vsel %vm1114_vm1, %v1116_v16, %v1118_v61  ;;  %v10285_v4 = vld [vmem:[%s12196_s2 + $0xe8] sm:$0xff]   ;;  %v1132_v16 = vrot.slane %v10504_v51, 1  ;;  %v10288_v61 = vld [vmem:[%s12196_s2 + $0xf8] sm:$0xff]   ;;  %v11148_v51 = vld [vmem:[#allocation2 + $0x10] sm:$0xf] }
  0x87   : > { %v1133_v60 = vsel %vm1114_vm1, %v1130_v50, %v1132_v16  ;;  %v1135_v11 = vsel %vm1114_vm1, %v1132_v16, %v1134_v63  ;;  %v10320_v50 = vld [vmem:[%s12196_s2 + $0x128] sm:$0xff]   ;;  %v10311_v16 = vld [vmem:[#allocation2 + $0x3c] sm:$0xff]  }
  0x8a   : > { %8990 = vmatmul.mubr.bf16.gmra.mrb[20].mxu0 %v10835_v42  ;;  %v10295_v42 = vld [vmem:[%s12196_s2 + $0x100] sm:$0xff]  }
  0x8b   : > { %8993 = vmatprep.mubr.bf16.mxu0 %v10852_v58 }
  0x8c   : > { %9386 = vmatmul.mubr.bf16.gmra.mrb[20].mxu1 %v10878_v29 }
  0x8d   : > { %9389 = vmatprep.mubr.bf16.mxu1 %v10895_v38 }
  0x92   : > { %8994 = vmatmul.mubr.bf16.gmra.mrb[24].mxu0 %v10867_v8 }
  0x93   : > { %9013 = vmatprep.mubr.bf16.mxu0 %v1117_v57  ;;  %v4689_v57 = vrot.slane %v10847_v53, 1 }
  0x94   : > { %9390 = vmatmul.mubr.bf16.gmra.mrb[24].mxu1 %v10913_v2  ;;  %v10290_v2 = vld [vmem:[%s10656_s12 + $0xc] sm:$0xff]  }
  0x95   : > { %9409 = vmatprep.mubr.bf16.mxu1 %v4674_v59  ;;  %v10287_v59 = vld [vmem:[%s12196_s2 + $0xf0] sm:$0xff]   ;;  %v4690_v53 = vsel %vm1114_vm1, %v4687_v54, %v4689_v57  ;;  %v4692_v17 = vsel %vm1114_vm1, %v4689_v57, %v4691_v7  ;;  %v10312_v57 = vld [vmem:[%s10656_s12 + $0x44] sm:$0xff]  }
  0x9a   : > { %9014 = vmatmul.mubr.bf16.vlgmr.msra.gmra.mrb[0].mxu0 %v1119_v6  ;;  %v10293_v6 = vld [vmem:[%s12196_s2 + $0x100] sm:$0xff]  }
  0x9b   : > { %9042 = vmatpush3.bf16.msra.mxu0 %v10274_v37  ;;  %9017 = vmatprep.mubr.bf16.mxu0 %v1121_v12  ;;  %v4683_v37 = vrot.slane %v10791_v55, 1  ;;  %v4693_v12 = vrot.slane %v10878_v29, 1  ;;  %v1140_v29 = vrot.slane %v10867_v8, 1  ;;  %v1142_v8 = vrot.slane %v10888_v31, 1  ;;  %v10297_v31 = vld [vmem:[%s12196_s2 + $0x108] sm:$0xff]  }
  0x9c   : > { %9043 = vmatprep.subr.bf16.mxu0 %v10276_v13  ;;  %9410 = vmatmul.mubr.bf16.vlgmr.msra.gmra.mrb[0].mxu1 %v4676_v18  ;;  %v1138_v18 = vrot.slane %v10852_v58, 1 }
  0x9d   : > { %9438 = vmatpush3.bf16.msra.mxu1 %v10275_v36  ;;  %9413 = vmatprep.mubr.bf16.mxu1 %v4678_v19  ;;  %v1127_v36 = vsel %vm1114_vm1, %v1124_v33, %v1126_v1  ;;  %v4684_v55 = vsel %vm1114_vm1, %v4681_v23, %v4683_v37  ;;  %v4686_v10 = vsel %vm1114_vm1, %v4683_v37, %v4685_v48  ;;  %v4695_v19 = vrot.slane %v10895_v38, 1  ;;  %v10298_v23 = vld [vmem:[#allocation2 + $0x1c] sm:$0xff]   ;;  %v1729_v1 = vld [vmem:[%s10656_s12 + $0xc] sm:$0xf]  ;;  %v10306_v48 = vld [vmem:[%s10656_s12 + $0x34] sm:$0xff]  }
  0x9e   : > { %9439 = vmatprep.subr.bf16.mxu1 %v10277_v22  ;;  %v4694_v3 = vsel %vm1114_vm1, %v4691_v7, %v4693_v12  ;;  %v1141_v27 = vsel %vm1114_vm1, %v1138_v18, %v1140_v29  ;;  %v4699_v38 = vrot.slane %v10920_v21, 1  ;;  %v1143_v30 = vsel %vm1114_vm1, %v1140_v29, %v1142_v8  ;;  %v10294_v21 = vld [vmem:[#allocation2 + $0x14] sm:$0xff]   ;;  %v10323_v8 = vld [vmem:[#allocation2 + $0x5c] sm:$0xff]  }
  0x9f   : > { %9044 = vmatpush3.bf16.msra.mxu0 %v10276_v13  ;;  %v1137_v13 = vsel %vm1114_vm1, %v1134_v63, %v1136_v5  ;;  %v4698_v58 = vsel %vm1114_vm1, %v4695_v19, %v4697_v25  ;;  %v11175_v7 = vld [vmem:[#allocation2 + $0x14] sm:$0xff]  }
  0xa0   : > { %9045 = vmatprep.subr.bf16.mxu0 %v10278_v28  ;;  %v4700_v33 = vsel %vm1114_vm1, %v4697_v25, %v4699_v38  ;;  %v5411_v29 = vshll.u32 %v11175_v7, 16  ;;  %v11194_v25 = vld [vmem:[%s12196_s2 + $0x140] sm:$0xff]  }
  0xa1   : > { %9440 = vmatpush3.bf16.msra.mxu1 %v10277_v22  ;;  %v1139_v22 = vsel %vm1114_vm1, %v1136_v5, %v1138_v18  ;;  %v10313_v5 = vld [vmem:[#allocation2 + $0x44] sm:$0xff]   ;;  %v10322_v18 = vld [vmem:[%s10656_s12 + $0x5c] sm:$0xff]  }
  0xa2   : > { %9018 = vmatmul.mubr.bf16.gmra.mrb[4].mxu0 %v1123_v14  ;;  %9441 = vmatprep.subr.bf16.mxu1 %v10279_v15  ;;  %v416_v14 = vld [vmem:[%s10885_s18 + $0xc] sm:$0xf]  ;;  %v11203_v38 = vld [vmem:[%s10656_s12 + $0x24] sm:$0xff]  }
  0xa3   : > { %9021 = vmatprep.mubr.bf16.mxu0 %v1125_v39  ;;  %9046 = vmatpush3.bf16.msra.mxu0 %v10278_v28  ;;  %v4696_v28 = vsel %vm1114_vm1, %v4693_v12, %v4695_v19  ;;  %423 = vst [vmem:[#allocation2 + $0x7c] sm:$0xf] %v416_v14  ;;  %v10299_v39 = vld [vmem:[%s12196_s2 + $0x108] sm:$0xff]   ;;  %v5415_v19 = vshrl.u32 %v11175_v7, 16 }
  0xa4   : > { %9414 = vmatmul.mubr.bf16.gmra.mrb[4].mxu1 %v4680_v32  ;;  %9047 = vmatprep.subr.bf16.mxu0 %v10280_v40  ;;  %v10302_v32 = vld [vmem:[%s12196_s2 + $0x110] sm:$0xff]  }
  0xa5   : > { %9417 = vmatprep.mubr.bf16.mxu1 %v4682_v45  ;;  %9442 = vmatpush3.bf16.msra.mxu1 %v10279_v15  ;;  %v10296_v15 = vld [vmem:[%s10656_s12 + $0x1c] sm:$0xff]   ;;  %v10303_v45 = vld [vmem:[%s12196_s2 + $0x110] sm:$0xff]  }
  0xa6   : > { %9443 = vmatprep.subr.bf16.mxu1 %v10281_v44  ;;  %v10317_v12 = vld [vmem:[#allocation2 + $0x4c] sm:$0xff]  }
  0xa7   : > { %9048 = vmatpush3.bf16.msra.mxu0 %v10280_v40  ;;  %v10300_v40 = vld [vmem:[%s10656_s12 + $0x24] sm:$0xff]  }
  0xa8   : > { %9049 = vmatprep.subr.bf16.mxu0 %v10282_v26 }
  0xa9   : > { %9444 = vmatpush3.bf16.msra.mxu1 %v10281_v44  ;;  %v1730_v44 = vld [vmem:[%s10656_s12 + $0x10] sm:$0xf] }
  0xaa   : > { %9022 = vmatmul.mubr.bf16.gmra.mrb[8].mxu0 %v1127_v36  ;;  %9445 = vmatprep.subr.bf16.mxu1 %v10283_v41  ;;  %v11128_v37 = vcombine.low %v1729_v1, %v1730_v44  ;;  %v10309_v36 = vld [vmem:[%s12196_s2 + $0x118] sm:$0xff]  }
  0xab   : > { %9025 = vmatprep.mubr.bf16.mxu0 %v1129_v43  ;;  %9050 = vmatpush3.bf16.msra.mxu0 %v10282_v26  ;;  %v10305_v26 = vld [vmem:[#allocation2 + $0x2c] sm:$0xff]   ;;  %v10314_v43 = vld [vmem:[%s12196_s2 + $0x120] sm:$0xff]   ;;  %v11222_v44 = vld [vmem:[%s10656_s12 + $0x34] sm:$0xff]  }
  0xac   : > { %9418 = vmatmul.mubr.bf16.gmra.mrb[8].mxu1 %v4684_v55  ;;  %9051 = vmatprep.subr.bf16.mxu0 %v10284_v46  ;;  %v11142_v55 = vld [vmem:[%s10656_s12 + $0x14] sm:$0xff]  }
  0xad   : > { %9421 = vmatprep.mubr.bf16.mxu1 %v4686_v10  ;;  %9446 = vmatpush3.bf16.msra.mxu1 %v10283_v41  ;;  %v10310_v41 = vld [vmem:[%s10656_s12 + $0x3c] sm:$0xff]   ;;  %v1851_v10 = vshll.u32 %v11128_v37, 16  ;;  %v1856_v54 = vshll.u32 %v11142_v55, 16  ;;  %v1860_v62 = vshrl.u32 %v11142_v55, 16 }
  0xae   : > { %9447 = vmatprep.subr.bf16.mxu1 %v10285_v4 }
  0xaf   : > { %9052 = vmatpush3.bf16.msra.mxu0 %v10284_v46  ;;  %v10315_v46 = vld [vmem:[%s12196_s2 + $0x120] sm:$0xff]   ;;  %v11169_v63 = vrot.slane %v1856_v54, 1  ;;  %v1888_v54 = vshll.u32 %v11222_v44, 16 }
  0xb0   : > { %9053 = vmatprep.subr.bf16.mxu0 %v10286_v52 }
  0xb1   : > { %9448 = vmatpush3.bf16.msra.mxu1 %v10285_v4  ;;  %v5285_v4 = vld [vmem:[#allocation2 + $0xc] sm:$0xf] }
  0xb2   : > { %9026 = vmatmul.mubr.bf16.gmra.mrb[12].mxu0 %v1131_v56  ;;  %9449 = vmatprep.subr.bf16.mxu1 %v10287_v59  ;;  %v10326_v56 = vld [vmem:[%s12196_s2 + $0x130] sm:$0xff]  }
  0xb3   : > { %9029 = vmatprep.mubr.bf16.mxu0 %v1133_v60  ;;  %9054 = vmatpush3.bf16.msra.mxu0 %v10286_v52  ;;  %v10321_v52 = vld [vmem:[%s12196_s2 + $0x128] sm:$0xff]  }
  0xb4   : > { %9422 = vmatmul.mubr.bf16.gmra.mrb[12].mxu1 %v4688_v24  ;;  %9055 = vmatprep.subr.bf16.mxu0 %v10288_v61  ;;  %v10316_v60 = vld [vmem:[%s10656_s12 + $0x4c] sm:$0xff]   ;;  %v1849_v24 = vshrl.u32 %v11128_v37, 16  ;;  %v10331_v37 = vld [vmem:[#allocation2 + $0x74] sm:$0xff]  }
  0xb5   : > { %9425 = vmatprep.mubr.bf16.mxu1 %v4690_v53  ;;  %9450 = vmatpush3.bf16.msra.mxu1 %v10287_v59  ;;  %v11159_v59 = vcombine.low %v5285_v4, %v11148_v51  ;;  %v11166_v53 = vrot.slane %v1851_v10, 1  ;;  %v11238_v4 = vld [vmem:[#allocation2 + $0x3c] sm:$0xff]  }
  0xb6   : > { %9451 = vmatprep.subr.bf16.mxu1 %v10289_v0 }
  0xb7   : > { %9056 = vmatpush3.bf16.msra.mxu0 %v10288_v61  ;;  %v10327_v61 = vld [vmem:[%s12196_s2 + $0x130] sm:$0xff]  }
  0xb8   : > { %9085 = vmatprep.subr.bf16.mxu0 %v10293_v6 }
  0xb9   : > { %9452 = vmatpush3.bf16.msra.mxu1 %v10289_v0  ;;  %v5404_v0 = vshrl.u32 %v11159_v59, 16 }
  0xba   : > { %9030 = vmatmul.mubr.bf16.gmra.mrb[16].mxu0 %v1135_v11  ;;  %9481 = vmatprep.subr.bf16.mxu1 %v10295_v42  ;;  %v11178_v11 = vld [vmem:[%s10656_s12 + $0x1c] sm:$0xff]  }
  0xbb   : > { %9033 = vmatprep.mubr.bf16.mxu0 %v1137_v13  ;;  %v5406_v13 = vshll.u32 %v11159_v59, 16 }
  0xbc   : > { %9426 = vmatmul.mubr.bf16.gmra.mrb[16].mxu1 %v4692_v17  ;;  %v11184_v17 = vld [vmem:[#allocation2 + $0x1c] sm:$0xff]  }
  0xbd   : > { %9429 = vmatprep.mubr.bf16.mxu1 %v4694_v3  ;;  %v10318_v3 = vld [vmem:[%s10656_s12 + $0x54] sm:$0xff]  }
  0xc2   : > { %9034 = vmatmul.mubr.bf16.gmra.mrb[20].mxu0 %v1139_v22  ;;  %v1864_v22 = vshll.u32 %v11178_v11, 16 }
  0xc3   : > { %9037 = vmatprep.mubr.bf16.mxu0 %v1141_v27  ;;  %v5419_v27 = vshll.u32 %v11184_v17, 16 }
  0xc4   : > { %9430 = vmatmul.mubr.bf16.gmra.mrb[20].mxu1 %v4696_v28  ;;  %v11200_v28 = vld [vmem:[%s12196_s2 + $0x140] sm:$0xff]   ;;  %v1866_v14 = vrot.slane %v1864_v22, 1 }
  0xc5   : > { %9433 = vmatprep.mubr.bf16.mxu1 %v4698_v58  ;;  %v10319_v58 = vld [vmem:[#allocation2 + $0x54] sm:$0xff]  }
  0xca   : > { %9038 = vmatmul.mubr.bf16.gmra.mrb[24].mxu0 %v1143_v30  ;;  %v5408_v30 = vrot.slane %v5406_v13, 1 }
  0xcb   : > { %9057 = vmatprep.mubr.bf16.mxu0 %v10290_v2  ;;  %v11206_v2 = vld [vmem:[#allocation2 + $0x24] sm:$0xff]  }
  0xcc   : > { %9434 = vmatmul.mubr.bf16.gmra.mrb[24].mxu1 %v4700_v33  ;;  %v10324_v33 = vld [vmem:[%s10656_s12 + $0x64] sm:$0xff]  }
  0xcd   : > { %9453 = vmatprep.mubr.bf16.mxu1 %v10291_v34  ;;  %v10328_v34 = vld [vmem:[%s10656_s12 + $0x6c] sm:$0xff]  }
  0xd2   : > { %9058 = vmatmul.mubr.bf16.vlgmr.msra.gmra.mrb[0].mxu0 %v10292_v35  ;;  %v5413_v35 = vrot.slane %v5411_v29, 1 }
  0xd3   : > { %9086 = vmatpush3.bf16.msra.mxu0 %v10293_v6  ;;  %9061 = vmatprep.mubr.bf16.mxu0 %v10296_v15  ;;  %v10332_v6 = vld [vmem:[%s12196_s2 + $0x138] sm:$0xff]   ;;  %v5421_v15 = vrot.slane %v5419_v27, 1  ;;  %v11271_v27 = vld [vmem:[#allocation2 + $0x44] sm:$0xff]  }
  0xd4   : > { %9087 = vmatprep.subr.bf16.mxu0 %v10297_v31  ;;  %9454 = vmatmul.mubr.bf16.vlgmr.msra.gmra.mrb[0].mxu1 %v10294_v21  ;;  %v1872_v21 = vshll.u32 %v11203_v38, 16 }
  0xd5   : > { %9482 = vmatpush3.bf16.msra.mxu1 %v10295_v42  ;;  %9457 = vmatprep.mubr.bf16.mxu1 %v10298_v23  ;;  %v10333_v42 = vld [vmem:[%s12196_s2 + $0x138] sm:$0xff]   ;;  %v5427_v23 = vshll.u32 %v11206_v2, 16 }
  0xd6   : > { %9483 = vmatprep.subr.bf16.mxu1 %v10299_v39 }
  0xd7   : > { %9088 = vmatpush3.bf16.msra.mxu0 %v10297_v31  ;;  %v1868_v31 = vshrl.u32 %v11178_v11, 16 }
  0xd8   : > { %9089 = vmatprep.subr.bf16.mxu0 %v10302_v32 }
  0xd9   : > { %9484 = vmatpush3.bf16.msra.mxu1 %v10299_v39  ;;  %v11215_v39 = vld [vmem:[%s10656_s12 + $0x2c] sm:$0xff]  }
  0xda   : > { %9062 = vmatmul.mubr.bf16.gmra.mrb[4].mxu0 %v10300_v40  ;;  %9485 = vmatprep.subr.bf16.mxu1 %v10303_v45  ;;  %v11217_v40 = vld [vmem:[#allocation2 + $0x2c] sm:$0xff]  }
  0xdb   : > { %9065 = vmatprep.mubr.bf16.mxu0 %v10304_v49  ;;  %9090 = vmatpush3.bf16.msra.mxu0 %v10302_v32  ;;  %v10325_v32 = vld [vmem:[#allocation2 + $0x64] sm:$0xff]   ;;  %v1880_v49 = vshll.u32 %v11215_v39, 16  ;;  %v5435_v1 = vshll.u32 %v11217_v40, 16 }
  0xdc   : > { %9458 = vmatmul.mubr.bf16.gmra.mrb[4].mxu1 %v10301_v9  ;;  %9091 = vmatprep.subr.bf16.mxu0 %v10308_v20  ;;  %v11224_v9 = vld [vmem:[#allocation2 + $0x34] sm:$0xff]  }
  0xdd   : > { %9461 = vmatprep.mubr.bf16.mxu1 %v10305_v26  ;;  %9486 = vmatpush3.bf16.msra.mxu1 %v10303_v45  ;;  %v10329_v45 = vld [vmem:[#allocation2 + $0x6c] sm:$0xff]   ;;  %v1854_v26 = vor.u32 %v11166_v53, %v1849_v24  ;;  %v1882_v10 = vrot.slane %v1880_v49, 1  ;;  %v1870_v53 = vor.u32 %v1868_v31, %v1866_v14 }
  0xde   : > { %9487 = vmatprep.subr.bf16.mxu1 %v10309_v36 }
  0xdf   : > { %9092 = vmatpush3.bf16.msra.mxu0 %v10308_v20  ;;  %v10330_v20 = vld [vmem:[%s10656_s12 + $0x74] sm:$0xff]  }
  0xe0   : > { %9093 = vmatprep.subr.bf16.mxu0 %v10314_v43 }
  0xe1   : > { %9488 = vmatpush3.bf16.msra.mxu1 %v10309_v36  ;;  %v5409_v36 = vor.u32 %v5408_v30, %v5404_v0  ;;  %v1890_v0 = vrot.slane %v1888_v54, 1  ;;  %v10348_v30 = vld [vmem:[%s12196_s2 + $0x150] sm:$0xff]  }
  0xe2   : > { %9066 = vmatmul.mubr.bf16.gmra.mrb[8].mxu0 %v10306_v48  ;;  %9489 = vmatprep.subr.bf16.mxu1 %v10315_v46  ;;  %v1874_v48 = vrot.slane %v1872_v21, 1 }
  0xe3   : > { %9069 = vmatprep.mubr.bf16.mxu0 %v10310_v41  ;;  %9094 = vmatpush3.bf16.msra.mxu0 %v10314_v43  ;;  %v5423_v41 = vshrl.u32 %v11184_v17, 16  ;;  %v5429_v43 = vrot.slane %v5427_v23, 1  ;;  %v5414_v24 = vsel %vm562_vm0, %v5409_v36, %v5413_v35  ;;  %v5455_v23 = vshrl.u32 %v11238_v4, 16 }
  0xe4   : > { %9462 = vmatmul.mubr.bf16.gmra.mrb[8].mxu1 %v10307_v47  ;;  %9095 = vmatprep.subr.bf16.mxu0 %v10320_v50  ;;  %v5431_v47 = vshrl.u32 %v11206_v2, 16 }
  0xe5   : > { %9465 = vmatprep.mubr.bf16.mxu1 %v10311_v16  ;;  %9490 = vmatpush3.bf16.msra.mxu1 %v10315_v46  ;;  %v1876_v46 = vshrl.u32 %v11203_v38, 16  ;;  %v11240_v16 = vrot.slane %v5435_v1, 1  ;;  %v5425_v22 = vor.u32 %v5423_v41, %v5421_v15  ;;  %v10354_v41 = vld [vmem:[%s12196_s2 + $0x158] sm:$0xff]  }
  0xe6   : > { %9491 = vmatprep.subr.bf16.mxu1 %v10321_v52 }
  0xe7   : > { %9096 = vmatpush3.bf16.msra.mxu0 %v10320_v50  ;;  %v11236_v50 = vld [vmem:[%s10656_s12 + $0x3c] sm:$0xff]  }
  0xe8   : > { %9097 = vmatprep.subr.bf16.mxu0 %v10326_v56  ;;  %v1896_v59 = vshll.u32 %v11236_v50, 16  ;;  %v1900_v21 = vshrl.u32 %v11236_v50, 16 }
  0xe9   : > { %9492 = vmatpush3.bf16.msra.mxu1 %v10321_v52  ;;  %v1884_v52 = vshrl.u32 %v11215_v39, 16 }
  0xea   : > { %9070 = vmatmul.mubr.bf16.gmra.mrb[12].mxu0 %v10312_v57  ;;  %9493 = vmatprep.subr.bf16.mxu1 %v10327_v61  ;;  %v1859_v57 = vsel %vm562_vm0, %v1854_v26, %v11169_v63  ;;  %v11263_v13 = vrot.slane %v1896_v59, 1  ;;  %v11298_v26 = vld [vmem:[%s10656_s12 + $0x54] sm:$0xff]  }
  0xeb   : > { %9073 = vmatprep.mubr.bf16.mxu0 %v10316_v60  ;;  %9098 = vmatpush3.bf16.msra.mxu0 %v10326_v56  ;;  %v5443_v56 = vshll.u32 %v11224_v9, 16  ;;  %v5451_v60 = vshll.u32 %v11238_v4, 16  ;;  %v1886_v31 = vor.u32 %v1884_v52, %v1882_v10 }
  0xec   : > { %9466 = vmatmul.mubr.bf16.gmra.mrb[12].mxu1 %v10313_v5  ;;  %9099 = vmatprep.subr.bf16.mxu0 %v10332_v6  ;;  %v5439_v5 = vshrl.u32 %v11217_v40, 16 }
  0xed   : > { %9469 = vmatprep.mubr.bf16.mxu1 %v10317_v12  ;;  %9494 = vmatpush3.bf16.msra.mxu1 %v10327_v61  ;;  %v1862_v61 = vor.u32 %v1860_v62, %v11169_v63  ;;  %v5447_v12 = vshrl.u32 %v11224_v9, 16  ;;  %v10343_v62 = vld [vmem:[%s12196_s2 + $0x148] sm:$0xff]   ;;  %v11261_v63 = vrot.slane %v5443_v56, 1  ;;  %v1902_v56 = vor.u32 %v1900_v21, %v11263_v13 }
  0xee   : > { %9495 = vmatprep.subr.bf16.mxu1 %v10333_v42 }
  0xef   : > { %9100 = vmatpush3.bf16.msra.mxu0 %v10332_v6  ;;  %v1892_v6 = vshrl.u32 %v11222_v44, 16  ;;  %v1867_v29 = vsel %vm562_vm0, %v1862_v61, %v1866_v14  ;;  %v1878_v14 = vor.u32 %v1876_v46, %v1874_v48  ;;  %v10355_v46 = vld [vmem:[%s12196_s2 + $0x158] sm:$0xff]   ;;  %v10361_v61 = vld [vmem:[%s12196_s2 + $0x160] sm:$0xff]  }
  0xf0   : > { %9129 = vmatprep.subr.bf16.mxu0 %v11194_v25 }
  0xf1   : > { %9496 = vmatpush3.bf16.msra.mxu1 %v10333_v42  ;;  %v5417_v42 = vor.u32 %v5415_v19, %v5413_v35  ;;  %v1875_v19 = vsel %vm562_vm0, %v1870_v53, %v1874_v48  ;;  %v5430_v35 = vsel %vm562_vm0, %v5425_v22, %v5429_v43  ;;  %v1883_v36 = vsel %vm562_vm0, %v1878_v14, %v1882_v10 }
  0xf2   : > { %9074 = vmatmul.mubr.bf16.gmra.mrb[16].mxu0 %v10318_v3  ;;  %9525 = vmatprep.subr.bf16.mxu1 %v11200_v28  ;;  %v11265_v3 = vrot.slane %v5451_v60, 1  ;;  %v5441_v48 = vor.u32 %v5439_v5, %v11240_v16  ;;  %v1894_v54 = vor.u32 %v1892_v6, %v1890_v0  ;;  %v10360_v60 = vld [vmem:[%s12196_s2 + $0x160] sm:$0xff]   ;;  %v5449_v53 = vor.u32 %v5447_v12, %v11261_v63 }
  0xf3   : > { %9077 = vmatprep.mubr.bf16.mxu0 %v10322_v18  ;;  %v11268_v18 = vld [vmem:[%s10656_s12 + $0x44] sm:$0xff]   ;;  %v11341_v12 = vld [vmem:[#allocation2 + $0x5c] sm:$0xff]  }
  0xf4   : > { %9470 = vmatmul.mubr.bf16.gmra.mrb[16].mxu1 %v10319_v58  ;;  %v10345_v58 = vld [vmem:[%s12196_s2 + $0x148] sm:$0xff]   ;;  %v5446_v52 = vsel %vm562_vm0, %v5441_v48, %v11261_v63  ;;  %v10373_v48 = vld [vmem:[%s12196_s2 + $0x170] sm:$0xff]  }
  0xf5   : > { %9473 = vmatprep.mubr.bf16.mxu1 %v10323_v8  ;;  %v5422_v8 = vsel %vm562_vm0, %v5417_v42, %v5421_v15  ;;  %v10349_v15 = vld [vmem:[%s12196_s2 + $0x150] sm:$0xff]   ;;  %v11335_v42 = vld [vmem:[%s10656_s12 + $0x5c] sm:$0xff]   ;;  %v10366_v63 = vld [vmem:[%s12196_s2 + $0x168] sm:$0xff]  }
  0xfa   : > { %9078 = vmatmul.mubr.bf16.gmra.mrb[20].mxu0 %v10324_v33  ;;  %v1904_v33 = vshll.u32 %v11268_v18, 16 }
  0xfb   : > { %9081 = vmatprep.mubr.bf16.mxu0 %v10328_v34  ;;  %v11283_v34 = vld [vmem:[%s10656_s12 + $0x4c] sm:$0xff]  }
  0xfc   : > { %9474 = vmatmul.mubr.bf16.gmra.mrb[20].mxu1 %v10325_v32  ;;  %v5459_v32 = vshll.u32 %v11271_v27, 16  ;;  %v1906_v49 = vrot.slane %v1904_v33, 1  ;;  %v1912_v1 = vshll.u32 %v11283_v34, 16  ;;  %v11355_v33 = vld [vmem:[%s10656_s12 + $0x64] sm:$0xff]  }
  0xfd   : > { %9477 = vmatprep.mubr.bf16.mxu1 %v10329_v45  ;;  %v5433_v45 = vor.u32 %v5431_v47, %v5429_v43  ;;  %v1891_v43 = vsel %vm562_vm0, %v1886_v31, %v1890_v0  ;;  %v1920_v47 = vshll.u32 %v11298_v26, 16  ;;  %v1924_v31 = vshrl.u32 %v11298_v26, 16 }
  0xfe   : > { %v1914_v59 = vrot.slane %v1912_v1, 1  ;;  %v1907_v22 = vsel %vm562_vm0, %v1902_v56, %v1906_v49  ;;  %v3652_v56 = vld [vmem:[%s11373_s10] sm:$0xff] }
  0xff   : > { %v5438_v10 = vsel %vm562_vm0, %v5433_v45, %v11240_v16  ;;  %v11330_v0 = vrot.slane %v1920_v47, 1  ;;  %v11368_v45 = vld [vmem:[#allocation2 + $0x64] sm:$0xff]   ;;  %v5487_v47 = vshrl.u32 %v11341_v12, 16 }
 0x102   : > { %9082 = vmatmul.mubr.bf16.gmra.mrb[24].mxu0 %v10330_v20  ;;  %v5463_v20 = vshrl.u32 %v11271_v27, 16 }
 0x103   : > { %9101 = vmatprep.mubr.bf16.mxu0 %v1859_v57  ;;  %v5461_v57 = vrot.slane %v5459_v32, 1 }
 0x104   : > { %9478 = vmatmul.mubr.bf16.gmra.mrb[24].mxu1 %v10331_v37  ;;  %v11314_v37 = vld [vmem:[#allocation2 + $0x54] sm:$0xff]  }
 0x105   : > { %9497 = vmatprep.mubr.bf16.mxu1 %v5414_v24  ;;  %v1916_v24 = vshrl.u32 %v11283_v34, 16  ;;  %v5475_v6 = vshll.u32 %v11314_v37, 16  ;;  %v5479_v32 = vshrl.u32 %v11314_v37, 16 }
 0x10a   : > { %9102 = vmatmul.mubr.bf16.vlgmr.msra.gmra.mrb[0].mxu0 %v1867_v29  ;;  %v5457_v29 = vor.u32 %v5455_v23, %v11265_v3  ;;  %v5477_v23 = vrot.slane %v5475_v6, 1  ;;  %v417_v6 = vld [vmem:[%s10885_s18 + $0x10] sm:$0xff]  }
 0x10b   : > { %9130 = vmatpush3.bf16.msra.mxu0 %v11194_v25  ;;  %9105 = vmatprep.mubr.bf16.mxu0 %v1875_v19  ;;  %v1908_v25 = vshrl.u32 %v11268_v18, 16  ;;  %424 = vst [vmem:[#allocation2 + $0x80] sm:$0xff] %v417_v6  }
 0x10c   : > { %9131 = vmatprep.subr.bf16.mxu0 %v10343_v62  ;;  %9498 = vmatmul.mubr.bf16.vlgmr.msra.gmra.mrb[0].mxu1 %v5422_v8  ;;  %v10367_v8 = vld [vmem:[%s12196_s2 + $0x168] sm:$0xff]  }
 0x10d   : > { %9526 = vmatpush3.bf16.msra.mxu1 %v11200_v28  ;;  %9501 = vmatprep.mubr.bf16.mxu1 %v5430_v35  ;;  %v11305_v28 = vld [vmem:[#allocation2 + $0x4c] sm:$0xff]   ;;  %v1910_v19 = vor.u32 %v1908_v25, %v1906_v49  ;;  %v1918_v35 = vor.u32 %v1916_v24, %v1914_v59  ;;  %v5483_v25 = vshll.u32 %v11341_v12, 16  ;;  %v3655_v24 = vld [vmem:[%s11373_s10 + $0x18] sm:$0xff] }
 0x10e   : > { %9527 = vmatprep.subr.bf16.mxu1 %v10345_v58  ;;  %v5467_v16 = vshll.u32 %v11305_v28, 16  ;;  %v5471_v5 = vshrl.u32 %v11305_v28, 16 }
 0x10f   : > { %9132 = vmatpush3.bf16.msra.mxu0 %v10343_v62  ;;  %v1899_v62 = vsel %vm562_vm0, %v1894_v54, %v11263_v13  ;;  %v5454_v13 = vsel %vm562_vm0, %v5449_v53, %v11265_v3  ;;  %v5465_v3 = vor.u32 %v5463_v20, %v5461_v57  ;;  %v1915_v21 = vsel %vm562_vm0, %v1910_v19, %v1914_v59  ;;  %v11390_v54 = vld [vmem:[#allocation2 + $0x6c] sm:$0xff]   ;;  %v10379_v59 = vld [vmem:[%s12196_s2 + $0x178] sm:$0xff]  }
 0x110   : > { %9133 = vmatprep.subr.bf16.mxu0 %v10348_v30  ;;  %v5469_v14 = vrot.slane %v5467_v16, 1  ;;  %v1932_v20 = vshrl.u32 %v11335_v42, 16  ;;  %v1940_v19 = vshrl.u32 %v11355_v33, 16 }
 0x111   : > { %9528 = vmatpush3.bf16.msra.mxu1 %v10345_v58  ;;  %v1928_v58 = vshll.u32 %v11335_v42, 16 }
 0x112   : > { %9106 = vmatmul.mubr.bf16.gmra.mrb[4].mxu0 %v1883_v36  ;;  %9529 = vmatprep.subr.bf16.mxu1 %v10349_v15  ;;  %v5473_v49 = vor.u32 %v5471_v5, %v5469_v14  ;;  %v1936_v36 = vshll.u32 %v11355_v33, 16  ;;  %v5470_v16 = vsel %vm562_vm0, %v5465_v3, %v5469_v14 }
 0x113   : > { %9109 = vmatprep.mubr.bf16.mxu0 %v1891_v43  ;;  %9134 = vmatpush3.bf16.msra.mxu0 %v10348_v30  ;;  %v5462_v30 = vsel %vm562_vm0, %v5457_v29, %v5461_v57  ;;  %v1930_v1 = vrot.slane %v1928_v58, 1  ;;  %v10547_v43 = vmov 0   ;;  %v11394_v57 = vld [vmem:[%s10656_s12 + $0x74] sm:$0xff]   ;;  %v5481_v29 = vor.u32 %v5479_v32, %v5477_v23 }
 0x114   : > { %9502 = vmatmul.mubr.bf16.gmra.mrb[4].mxu1 %v5438_v10  ;;  %9135 = vmatprep.subr.bf16.mxu0 %v10354_v41  ;;  %v1923_v10 = vsel %vm562_vm0, %v1918_v35, %v11330_v0  ;;  %v5478_v53 = vsel %vm562_vm0, %v5473_v49, %v5477_v23  ;;  %v1938_v5 = vrot.slane %v1936_v36, 1  ;;  %v3656_v23 = vld [vmem:[%s11373_s10 + $0x20] sm:$0xff]  ;;  %v11431_v36 = vld [vmem:[%s10656_s12 + $0x7c] ss:$0 sps:$4 sm:$0x11]   ;;  %v1956_v6 = vshrl.u32 %v11394_v57, 16 }
 0x115   : > { %9505 = vmatprep.mubr.bf16.mxu1 %v5446_v52  ;;  %9530 = vmatpush3.bf16.msra.mxu1 %v10349_v15  ;;  %v10372_v15 = vld [vmem:[%s12196_s2 + $0x170] sm:$0xff]  }
 0x116   : > { %9531 = vmatprep.subr.bf16.mxu1 %v10355_v46  ;;  %10193 = vset.pattern.permute.xlu1 %v10547_v43  ;;  %v11388_v52 = vld [vmem:[%s10656_s12 + $0x6c] sm:$0xff]   ;;  %v1942_v49 = vor.u32 %v1940_v19, %v1938_v5 }
 0x117   : > { %9136 = vmatpush3.bf16.msra.mxu0 %v10354_v41  ;;  %v10378_v41 = vld [vmem:[%s12196_s2 + $0x178] sm:$0xff]   ;;  %10192 = vset.pattern.permute.xlu0 %v10547_v43  ;;  %v1944_v58 = vshll.u32 %v11388_v52, 16  ;;  %v1948_v14 = vshrl.u32 %v11388_v52, 16  ;;  %v3661_v19 = vld [vmem:[%s11373_s10 + $0x48] sm:$0xff] }
 0x118   : > { %9137 = vmatprep.subr.bf16.mxu0 %v10360_v60  ;;  %3682 = vperm.xlu0 %10192, %v3652_v56   ;;  %v2199_v56 = vld [vmem:[%s10656_s12 + $0xc] sm:$0xe] }
 0x119   : > { %9532 = vmatpush3.bf16.msra.mxu1 %v10355_v46  ;;  %v3654_v46 = vld [vmem:[%s11373_s10 + $0x10] sm:$0xff] }
 0x11a   : > { %9110 = vmatmul.mubr.bf16.gmra.mrb[8].mxu0 %v1899_v62  ;;  %9533 = vmatprep.subr.bf16.mxu1 %v10361_v61  ;;  %v1934_v62 = vor.u32 %v1932_v20, %v1930_v1  ;;  %v5495_v20 = vshrl.u32 %v11368_v45, 16 }
 0x11b   : > { %9113 = vmatprep.mubr.bf16.mxu0 %v1907_v22  ;;  %9138 = vmatpush3.bf16.msra.mxu0 %v10360_v60  ;;  %v1926_v60 = vor.u32 %v1924_v31, %v11330_v0  ;;  %v5485_v22 = vrot.slane %v5483_v25, 1  ;;  %v11408_v0 = vld [vmem:[%s12196_s2 + $0x180] sm:$0xff]   ;;  %v1952_v31 = vshll.u32 %v11394_v57, 16 }
 0x11c   : > { %9506 = vmatmul.mubr.bf16.gmra.mrb[8].mxu1 %v5454_v13  ;;  %9139 = vmatprep.subr.bf16.mxu0 %v10366_v63  ;;  %v1939_v32 = vsel %vm562_vm0, %v1934_v62, %v1938_v5  ;;  %v1960_v62 = vshll.u32 %v11431_v36, 16 }
 0x11d   : > { %9509 = vmatprep.mubr.bf16.mxu1 %v5462_v30  ;;  %9534 = vmatpush3.bf16.msra.mxu1 %v10361_v61  ;;  %v5491_v61 = vshll.u32 %v11368_v45, 16  ;;  %v1931_v13 = vsel %vm562_vm0, %v1926_v60, %v1930_v1  ;;  %v11415_v30 = vld [vmem:[#allocation2 + $0x74] sm:$0xff]   ;;  %v5489_v35 = vor.u32 %v5487_v47, %v5485_v22  ;;  %v5486_v25 = vsel %vm562_vm0, %v5481_v29, %v5485_v22  ;;  %v10506_v22 = vld [vmem:[%s10656_s12 + $0x10] sm:$0xf] }
 0x11e   : > { %9535 = vmatprep.subr.bf16.mxu1 %v10367_v8  ;;  %3692 = vperm.xlu1 %10193, %v3654_v46   ;;  %v1946_v1 = vrot.slane %v1944_v58, 1  ;;  %v5507_v43 = vshll.u32 %v11415_v30, 16  ;;  %v3660_v58 = vld [vmem:[%s11373_s10 + $0x40] sm:$0xff] }
 0x11f   : > { %9140 = vmatpush3.bf16.msra.mxu0 %v10366_v63  ;;  %v3653_v63 = vld [vmem:[%s11373_s10 + $0x8] sm:$0xff]  ;;  %v5493_v3 = vrot.slane %v5491_v61, 1 }
 0x120   : > { %9141 = vmatprep.subr.bf16.mxu0 %v10372_v15  ;;  %3687 = vperm.xlu0 %10192, %v3653_v63   ;;  %v1950_v46 = vor.u32 %v1948_v14, %v1946_v1  ;;  %v1947_v60 = vsel %vm562_vm0, %v1942_v49, %v1946_v1  ;;  %v5509_v5 = vrot.slane %v5507_v43, 1  ;;  %v7837_v63 = vcombine.low %v2199_v56, %v10506_v22  ;;  %v3663_v49 = vld [vmem:[%s11373_s10 + $0x58] sm:$0xff]  ;;  %v3662_v1 = vld [vmem:[%s11373_s10 + $0x50] sm:$0xff] }
 0x121   : > { %9536 = vmatpush3.bf16.msra.mxu1 %v10367_v8  ;;  %v5499_v8 = vshll.u32 %v11390_v54, 16  ;;  %v5497_v61 = vor.u32 %v5495_v20, %v5493_v3  ;;  %v2223_v56 = vrot.slane %v11178_v11, 1  ;;  %v2227_v22 = vrot.slane %v11215_v39, 1 }
 0x122   : > { %9114 = vmatmul.mubr.bf16.gmra.mrb[12].mxu0 %v1915_v21  ;;  %9537 = vmatprep.subr.bf16.mxu1 %v10373_v48  ;;  %v3657_v21 = vld [vmem:[%s11373_s10 + $0x28] sm:$0xff] }
 0x123   : > { %9117 = vmatprep.mubr.bf16.mxu0 %v1923_v10  ;;  %9142 = vmatpush3.bf16.msra.mxu0 %v10372_v15  ;;  %v11422_v15 = vld [vmem:[%s12196_s2 + $0x180] sm:$0xff]   ;;  %v1954_v10 = vrot.slane %v1952_v31, 1  ;;  %v5501_v47 = vrot.slane %v5499_v8, 1 }
 0x124   : > { %9510 = vmatmul.mubr.bf16.gmra.mrb[12].mxu1 %v5470_v16  ;;  %9143 = vmatprep.subr.bf16.mxu0 %v10378_v41  ;;  %v3659_v16 = vld [vmem:[%s11373_s10 + $0x38] sm:$0xff] }
 0x125   : > { %9513 = vmatprep.mubr.bf16.mxu1 %v5478_v53  ;;  %9538 = vmatpush3.bf16.msra.mxu1 %v10373_v48  ;;  %v5494_v48 = vsel %vm562_vm0, %v5489_v35, %v5493_v3  ;;  %v1955_v29 = vsel %vm562_vm0, %v1950_v46, %v1954_v10  ;;  %v5502_v8 = vsel %vm562_vm0, %v5497_v61, %v5501_v47  ;;  %v5511_v35 = vshrl.u32 %v11415_v30, 16 }
 0x126   : > { %9539 = vmatprep.subr.bf16.mxu1 %v10379_v59  ;;  %3697 = vperm.xlu1 %10193, %v3655_v24   ;;  %v11441_v24 = vld [vmem:[#allocation2 + $0x7c] ss:$0 sps:$4 sm:$0x11]   ;;  %v1958_v31 = vor.u32 %v1956_v6, %v1954_v10  ;;  %v5775_v46 = vrot.slane %v11175_v7, 1  ;;  %v3664_v10 = vld [vmem:[%s11373_s10 + $0x60] sm:$0xff]  ;;  %v5777_v61 = vrot.slane %v11184_v17, 1 }
 0x127   : > { %9144 = vmatpush3.bf16.msra.mxu0 %v10378_v41  ;;  %v5503_v41 = vshrl.u32 %v11390_v54, 16  ;;  %3702 = vperm.xlu0 %10192, %v3656_v23   ;;  %v5515_v3 = vshll.u32 %v11441_v24, 16  ;;  %v5513_v20 = vor.u32 %v5511_v35, %v5509_v5  ;;  %v3667_v7 = vld [vmem:[%s11373_s10 + $0x78] sm:$0xff]  ;;  %v10384_v6 = vld [vmem:[%s12196_s2 + $0x188] sm:$0xff]  }
 0x128   : > { %9173 = vmatprep.subr.bf16.mxu0 %v11408_v0 }
 0x129   : > { %9540 = vmatpush3.bf16.msra.mxu1 %v10379_v59  ;;  %v3658_v59 = vld [vmem:[%s11373_s10 + $0x30] sm:$0xff]  ;;  %v5505_v53 = vor.u32 %v5503_v41, %v5501_v47 }
 0x12a   : > { %9118 = vmatmul.mubr.bf16.gmra.mrb[16].mxu0 %v1931_v13  ;;  %9569 = vmatprep.subr.bf16.mxu1 %v11422_v15  ;;  %v5754_v13 = vld [vmem:[#allocation2 + $0xc] sm:$0xe] }
 0x12b   : > { %9121 = vmatprep.mubr.bf16.mxu0 %v1939_v32  ;;  %3707 = vperm.xlu1 %10193, %v3657_v21   ;;  %v5510_v14 = vsel %vm562_vm0, %v5505_v53, %v5509_v5  ;;  %v1962_v21 = vrot.slane %v1960_v62, 1  ;;  %v8142_v23 = vcombine.low %v5754_v13, %v11148_v51  ;;  %v2220_v32 = vrot.slane %v7837_v63, 1  ;;  %v10386_v63 = vld [vmem:[%s12196_s2 + $0x190] sm:$0xff]  }
 0x12c   : > { %9514 = vmatmul.mubr.bf16.gmra.mrb[16].mxu1 %v5486_v25  ;;  %3712 = vperm.xlu0 %10192, %v3658_v59   ;;  %v2221_v25 = vrot.slane %v11142_v55, 1  ;;  %v3665_v55 = vld [vmem:[%s11373_s10 + $0x68] sm:$0xff]  ;;  %v2225_v59 = vrot.slane %v11203_v38, 1  ;;  %v5779_v5 = vrot.slane %v11206_v2, 1  ;;  %v5778_v62 = vsel %vm1114_vm1, %v5775_v46, %v5777_v61 }
 0x12d   : > { %9517 = vmatprep.mubr.bf16.mxu1 %v5494_v48  ;;  %v5517_v48 = vrot.slane %v5515_v3, 1  ;;  %v1963_v41 = vsel %vm562_vm0, %v1958_v31, %v1962_v21  ;;  %v5774_v43 = vrot.slane %v8142_v23, 1  ;;  %v3669_v38 = vld [vmem:[%s11373_s10 + $0x88] sm:$0xff]  ;;  %v2229_v13 = vrot.slane %v11222_v44, 1  ;;  %v10389_v31 = vld [vmem:[%s12196_s2 + $0x198] sm:$0xff]   ;;  %v3672_v23 = vld [vmem:[%s11373_s10 + $0xa0] sm:$0xff] }
 0x12e   : > { %v2222_v51 = vsel %vm1114_vm1, %v2220_v32, %v2221_v25  ;;  %v2224_v53 = vsel %vm1114_vm1, %v2221_v25, %v2223_v56  ;;  %v2226_v11 = vsel %vm1114_vm1, %v2223_v56, %v2225_v59  ;;  %v5780_v17 = vsel %vm1114_vm1, %v5777_v61, %v5779_v5  ;;  %v10385_v2 = vld [vmem:[%s12196_s2 + $0x188] sm:$0xff]   ;;  %v10390_v32 = vld [vmem:[%s12196_s2 + $0x1a0] sm:$0xff]   ;;  %v3675_v25 = vld [vmem:[%s11373_s10 + $0xb8] sm:$0xff] }
 0x12f   : > { %3717 = vperm.xlu1 %10193, %v3659_v16   ;;  %v5518_v47 = vsel %vm562_vm0, %v5513_v20, %v5517_v48  ;;  %v5776_v16 = vsel %vm1114_vm1, %v5774_v43, %v5775_v46  ;;  %v2228_v39 = vsel %vm1114_vm1, %v2225_v59, %v2227_v22  ;;  %v5783_v44 = vrot.slane %v11224_v9, 1  ;;  %v3674_v48 = vld [vmem:[%s11373_s10 + $0xb0] sm:$0xff]  ;;  %v10393_v46 = vld [vmem:[%s12196_s2 + $0x1a8] sm:$0xff]   ;;  %v419_v59 = vld [vmem:[%s10885_s18 + $0x18] sm:$0xf] }
 0x130   : > { %3722 = vperm.xlu0 %10192, %v3660_v58   ;;  %v3670_v58 = vld [vmem:[%s11373_s10 + $0x90] sm:$0xff]  ;;  %v2230_v35 = vsel %vm1114_vm1, %v2227_v22, %v2229_v13  ;;  %v2233_v21 = vrot.slane %v11268_v18, 1  ;;  %v10391_v18 = vld [vmem:[%s12196_s2 + $0x1a0] sm:$0xff]   ;;  %v2235_v43 = vrot.slane %v11283_v34, 1  ;;  %v5789_v34 = vrot.slane %v11305_v28, 1  ;;  %v10396_v28 = vld [vmem:[%s12196_s2 + $0x1b8] sm:$0xff]  }
 0x131   : > { %426 = vst [vmem:[#allocation2 + $0x88] sm:$0xf] %v419_v59  ;;  %v7206_v22 = vld [vmem:[%s11373_s10 + $0xf8] sm:$0xff] }
 0x132   : > { %9122 = vmatmul.mubr.bf16.gmra.mrb[20].mxu0 %v1947_v60  ;;  %v3666_v60 = vld [vmem:[%s11373_s10 + $0x70] sm:$0xff]  ;;  %v2236_v56 = vsel %vm1114_vm1, %v2233_v21, %v2235_v43  ;;  %v7222_v59 = vld [vmem:[%s11373_s10 + $0x178] sm:$0xff] }
 0x133   : > { %9125 = vmatprep.mubr.bf16.mxu0 %v1955_v29  ;;  %3727 = vperm.xlu1 %10193, %v3661_v19   ;;  %v3668_v29 = vld [vmem:[%s11373_s10 + $0x80] sm:$0xff]  ;;  %v5781_v19 = vrot.slane %v11217_v40, 1  ;;  %v10388_v40 = vld [vmem:[%s12196_s2 + $0x198] sm:$0xff]  }
 0x134   : > { %9518 = vmatmul.mubr.bf16.gmra.mrb[20].mxu1 %v5502_v8  ;;  %3732 = vperm.xlu0 %10192, %v3662_v1   ;;  %v10387_v8 = vld [vmem:[%s12196_s2 + $0x190] sm:$0xff]   ;;  %v5787_v1 = vrot.slane %v11271_v27, 1 }
 0x135   : > { %9521 = vmatprep.mubr.bf16.mxu1 %v5510_v14  ;;  %v5782_v3 = vsel %vm1114_vm1, %v5779_v5, %v5781_v19  ;;  %v5784_v9 = vsel %vm1114_vm1, %v5781_v19, %v5783_v44  ;;  %v2231_v14 = vrot.slane %v11236_v50, 1  ;;  %v5785_v50 = vrot.slane %v11238_v4, 1  ;;  %v10392_v4 = vld [vmem:[%s12196_s2 + $0x1a8] sm:$0xff]   ;;  %v10397_v5 = vld [vmem:[%s12196_s2 + $0x1b8] sm:$0xff]   ;;  %v7205_v19 = vld [vmem:[%s11373_s10 + $0xf0] sm:$0xff] }
 0x137   : > { %3737 = vperm.xlu1 %10193, %v3663_v49   ;;  %v2232_v49 = vsel %vm1114_vm1, %v2229_v13, %v2231_v14  ;;  %v2234_v20 = vsel %vm1114_vm1, %v2231_v14, %v2233_v21  ;;  %v5786_v27 = vsel %vm1114_vm1, %v5783_v44, %v5785_v50  ;;  %v2243_v13 = vrot.slane %v11388_v52, 1  ;;  %v7211_v21 = vld [vmem:[%s11373_s10 + $0x120] sm:$0xff] }
 0x138   : > { %3742 = vperm.xlu0 %10192, %v3664_v10   ;;  %v10394_v10 = vld [vmem:[%s12196_s2 + $0x1b0] sm:$0xff]   ;;  %v5799_v44 = vrot.slane %v11415_v30, 1 }
 0x139   : > { %v7209_v30 = vld [vmem:[%s11373_s10 + $0x110] sm:$0xff] }
 0x13a   : > { %9126 = vmatmul.mubr.bf16.gmra.mrb[24].mxu0 %v1963_v41  ;;  %v5788_v41 = vsel %vm1114_vm1, %v5785_v50, %v5787_v1  ;;  %v10400_v50 = vld [vmem:[%s10656_s12 + $0x20] sm:$0xff]  }
 0x13b   : > { %9145 = vmatprep.mubr.bf16.mxu0 %v2222_v51  ;;  %3747 = vperm.xlu1 %10193, %v3665_v55   ;;  %v2237_v51 = vrot.slane %v11298_v26, 1  ;;  %v3677_v55 = vld [vmem:[%s11373_s10 + $0xc8] sm:$0xff]  ;;  %v10395_v26 = vld [vmem:[%s12196_s2 + $0x1b0] sm:$0xff]  }
 0x13c   : > { %9522 = vmatmul.mubr.bf16.gmra.mrb[24].mxu1 %v5518_v47  ;;  %3752 = vperm.xlu0 %10192, %v3666_v60   ;;  %v3676_v47 = vld [vmem:[%s11373_s10 + $0xc0] sm:$0xff]  ;;  %v3679_v60 = vld [vmem:[%s11373_s10 + $0xd8] sm:$0xff] }
 0x13d   : > { %9541 = vmatprep.mubr.bf16.mxu1 %v5776_v16  ;;  %v5791_v16 = vrot.slane %v11314_v37, 1  ;;  %v5790_v37 = vsel %vm1114_vm1, %v5787_v1, %v5789_v34  ;;  %v10405_v1 = vld [vmem:[%s12196_s2 + $0x1c8] sm:$0xff]  }
 0x13f   : > { %3757 = vperm.xlu1 %10193, %v3667_v7   ;;  %v2238_v7 = vsel %vm1114_vm1, %v2235_v43, %v2237_v51  ;;  %v5792_v61 = vsel %vm1114_vm1, %v5789_v34, %v5791_v16  ;;  %v7217_v43 = vld [vmem:[%s11373_s10 + $0x150] sm:$0xff]  ;;  %v10416_v34 = vld [vmem:[%s12196_s2 + $0x1d8] sm:$0xff]  }
 0x140   : > { %3762 = vperm.xlu0 %10192, %v3668_v29  }
 0x142   : > { %9146 = vmatmul.mubr.bf16.vlgmr.msra.gmra.mrb[0].mxu0 %v2224_v53  ;;  %v2239_v53 = vrot.slane %v11335_v42, 1  ;;  %v7204_v42 = vld [vmem:[%s11373_s10 + $0xe8] sm:$0xff] }
 0x143   : > { %9174 = vmatpush3.bf16.msra.mxu0 %v11408_v0  ;;  %9149 = vmatprep.mubr.bf16.mxu0 %v2226_v11  ;;  %v3671_v0 = vld [vmem:[%s11373_s10 + $0x98] sm:$0xff]  ;;  %v2241_v11 = vrot.slane %v11355_v33, 1  ;;  %v5795_v33 = vrot.slane %v11368_v45, 1 }
 0x144   : > { %9175 = vmatprep.subr.bf16.mxu0 %v10384_v6  ;;  %3767 = vperm.xlu1 %10193, %v3669_v38   ;;  %v11560_v38 = vld [vmem:[%s12196_s2 + $0x1c0] sm:$0xff]   ;;  %v2240_v29 = vsel %vm1114_vm1, %v2237_v51, %v2239_v53  ;;  %v7220_v51 = vld [vmem:[%s11373_s10 + $0x168] sm:$0xff] }
 0x145   : > { %9542 = vmatmul.mubr.bf16.vlgmr.msra.gmra.mrb[0].mxu1 %v5778_v62  ;;  %3772 = vperm.xlu0 %10192, %v3670_v58   ;;  %v5793_v62 = vrot.slane %v11341_v12, 1  ;;  %v7203_v12 = vld [vmem:[%s11373_s10 + $0xe0] sm:$0xff]  ;;  %v7208_v58 = vld [vmem:[%s11373_s10 + $0x108] sm:$0xff] }
 0x146   : > { %9570 = vmatpush3.bf16.msra.mxu1 %v11422_v15  ;;  %9545 = vmatprep.mubr.bf16.mxu1 %v5780_v17  ;;  %v3673_v15 = vld [vmem:[%s11373_s10 + $0xa8] sm:$0xff]  ;;  %v11569_v17 = vld [vmem:[%s12196_s2 + $0x1c0] sm:$0xff]  }
 0x147   : > { %9571 = vmatprep.subr.bf16.mxu1 %v10385_v2  ;;  %9176 = vmatpush3.bf16.msra.mxu0 %v10384_v6  ;;  %v3678_v6 = vld [vmem:[%s11373_s10 + $0xd0] sm:$0xff]  ;;  %v5794_v45 = vsel %vm1114_vm1, %v5791_v16, %v5793_v62  ;;  %v10413_v16 = vld [vmem:[#allocation2 + $0x38] sm:$0xff]  }
 0x148   : > { %9177 = vmatprep.subr.bf16.mxu0 %v10386_v63  ;;  %3777 = vperm.xlu1 %10193, %v3671_v0   ;;  %v2245_v0 = vrot.slane %v11394_v57, 1  ;;  %v7207_v57 = vld [vmem:[%s11373_s10 + $0x100] sm:$0xff] }
 0x149   : > { %3782 = vperm.xlu0 %10192, %v3672_v23   ;;  %v7214_v23 = vld [vmem:[%s11373_s10 + $0x138] sm:$0xff] }
 0x14a   : > { %9150 = vmatmul.mubr.bf16.gmra.mrb[4].mxu0 %v2228_v39  ;;  %9572 = vmatpush3.bf16.msra.mxu1 %v10385_v2  ;;  %v2242_v2 = vsel %vm1114_vm1, %v2239_v53, %v2241_v11  ;;  %v5797_v39 = vrot.slane %v11390_v54, 1  ;;  %v2246_v52 = vsel %vm1114_vm1, %v2243_v13, %v2245_v0  ;;  %v10415_v53 = vld [vmem:[#allocation2 + $0x40] sm:$0xff]  }
 0x14b   : > { %9573 = vmatprep.subr.bf16.mxu1 %v10387_v8  ;;  %9153 = vmatprep.mubr.bf16.mxu0 %v2230_v35  ;;  %v7210_v35 = vld [vmem:[%s11373_s10 + $0x118] sm:$0xff] }
 0x14c   : > { %9178 = vmatpush3.bf16.msra.mxu0 %v10386_v63  ;;  %3787 = vperm.xlu1 %10193, %v3673_v15   ;;  %v5796_v63 = vsel %vm1114_vm1, %v5793_v62, %v5795_v33  ;;  %v5800_v54 = vsel %vm1114_vm1, %v5797_v39, %v5799_v44  ;;  %v2247_v15 = vrot.slane %v11431_v36, 1  ;;  %v10434_v62 = vld [vmem:[%s12196_s2 + $0x1f0] sm:$0xff]  }
 0x14d   : > { %9546 = vmatmul.mubr.bf16.gmra.mrb[4].mxu1 %v5782_v3  ;;  %9179 = vmatprep.subr.bf16.mxu0 %v10388_v40  ;;  %v7212_v3 = vld [vmem:[%s11373_s10 + $0x128] sm:$0xff] }
 0x14e   : > { %9549 = vmatprep.mubr.bf16.mxu1 %v5784_v9  ;;  %9574 = vmatpush3.bf16.msra.mxu1 %v10387_v8  ;;  %v2244_v8 = vsel %vm1114_vm1, %v2241_v11, %v2243_v13  ;;  %v5801_v9 = vrot.slane %v11441_v24, 1  ;;  %v2248_v14 = vsel %vm1114_vm1, %v2245_v0, %v2247_v15  ;;  %v7213_v24 = vld [vmem:[%s11373_s10 + $0x130] sm:$0xff]  ;;  %v7224_v11 = vld [vmem:[%s11373_s10 + $0x188] sm:$0xff]  ;;  %v10441_v13 = vld [vmem:[%s12196_s2 + $0x1f8] sm:$0xff]  }
 0x14f   : > { %9575 = vmatprep.subr.bf16.mxu1 %v10389_v31  ;;  %3792 = vperm.xlu0 %10192, %v3674_v48   ;;  %v7218_v48 = vld [vmem:[%s11373_s10 + $0x158] sm:$0xff]  ;;  %v10427_v15 = vld [vmem:[#allocation2 + $0x60] sm:$0xff]  }
 0x150   : > { %9180 = vmatpush3.bf16.msra.mxu0 %v10388_v40  ;;  %3797 = vperm.xlu1 %10193, %v3675_v25   ;;  %v5798_v40 = vsel %vm1114_vm1, %v5795_v33, %v5797_v39  ;;  %v5802_v36 = vsel %vm1114_vm1, %v5799_v44, %v5801_v9  ;;  %v7216_v25 = vld [vmem:[%s11373_s10 + $0x148] sm:$0xff]  ;;  %v10420_v33 = vld [vmem:[%s10656_s12 + $0x50] sm:$0xff]   ;;  %v2834_v0 = vld [vmem:[%s10656_s12 + $0x18] sm:$0xf] }
 0x151   : > { %9181 = vmatprep.subr.bf16.mxu0 %v10390_v32  ;;  %v11672_v39 = vld [vmem:[%s12196_s2 + $0x200] sm:$0xff]   ;;  %v10431_v9 = vld [vmem:[#allocation2 + $0x68] sm:$0xff]  }
 0x152   : > { %9154 = vmatmul.mubr.bf16.gmra.mrb[8].mxu0 %v2232_v49  ;;  %9576 = vmatpush3.bf16.msra.mxu1 %v10389_v31  ;;  %v10398_v31 = vld [vmem:[%s10656_s12 + $0x18] sm:$0xff]   ;;  %v10404_v49 = vld [vmem:[%s10656_s12 + $0x28] sm:$0xff]   ;;  %v10426_v44 = vld [vmem:[%s10656_s12 + $0x60] sm:$0xff]  }
 0x153   : > { %9157 = vmatprep.mubr.bf16.mxu0 %v2234_v20  ;;  %9577 = vmatprep.subr.bf16.mxu1 %v10391_v18  ;;  %v7215_v20 = vld [vmem:[%s11373_s10 + $0x140] sm:$0xff] }
 0x154   : > { %9182 = vmatpush3.bf16.msra.mxu0 %v10390_v32  ;;  %3807 = vperm.xlu1 %10193, %v3677_v55   ;;  %v10399_v32 = vld [vmem:[#allocation2 + $0x18] sm:$0xff]   ;;  %v10411_v55 = vld [vmem:[%s12196_s2 + $0x1d0] sm:$0xff]  }
 0x155   : > { %9550 = vmatmul.mubr.bf16.gmra.mrb[8].mxu1 %v5786_v27  ;;  %9183 = vmatprep.subr.bf16.mxu0 %v10392_v4  ;;  %v10407_v27 = vld [vmem:[%s12196_s2 + $0x1c8] sm:$0xff]  }
 0x156   : > { %9553 = vmatprep.mubr.bf16.mxu1 %v5788_v41  ;;  %9578 = vmatpush3.bf16.msra.mxu1 %v10391_v18  ;;  %v10402_v18 = vld [vmem:[#allocation2 + $0x20] sm:$0xff]   ;;  %v10410_v41 = vld [vmem:[%s12196_s2 + $0x1d0] sm:$0xff]  }
 0x157   : > { %9579 = vmatprep.subr.bf16.mxu1 %v10393_v46  ;;  %3802 = vperm.xlu0 %10192, %v3676_v47   ;;  %v10409_v47 = vld [vmem:[#allocation2 + $0x30] sm:$0xff]  }
 0x158   : > { %9184 = vmatpush3.bf16.msra.mxu0 %v10392_v4  ;;  %3817 = vperm.xlu1 %10193, %v3679_v60   ;;  %v10406_v4 = vld [vmem:[#allocation2 + $0x28] sm:$0xff]   ;;  %v10414_v60 = vld [vmem:[%s10656_s12 + $0x40] sm:$0xff]  }
 0x159   : > { %9185 = vmatprep.subr.bf16.mxu0 %v10394_v10 }
 0x15a   : > { %9158 = vmatmul.mubr.bf16.gmra.mrb[12].mxu0 %v2236_v56  ;;  %9580 = vmatpush3.bf16.msra.mxu1 %v10393_v46  ;;  %v10408_v46 = vld [vmem:[%s10656_s12 + $0x30] sm:$0xff]   ;;  %v7219_v56 = vld [vmem:[%s11373_s10 + $0x160] sm:$0xff] }
 0x15b   : > { %9161 = vmatprep.mubr.bf16.mxu0 %v2238_v7  ;;  %9581 = vmatprep.subr.bf16.mxu1 %v10395_v26  ;;  %v10422_v7 = vld [vmem:[%s12196_s2 + $0x1e0] sm:$0xff]  }
 0x15c   : > { %9186 = vmatpush3.bf16.msra.mxu0 %v10394_v10  ;;  %3812 = vperm.xlu0 %10192, %v3678_v6   ;;  %v10412_v10 = vld [vmem:[%s10656_s12 + $0x38] sm:$0xff]   ;;  %v10419_v6 = vld [vmem:[#allocation2 + $0x48] sm:$0xff]  }
 0x15d   : > { %9554 = vmatmul.mubr.bf16.gmra.mrb[12].mxu1 %v5790_v37  ;;  %9187 = vmatprep.subr.bf16.mxu0 %v10396_v28  ;;  %v10418_v37 = vld [vmem:[%s10656_s12 + $0x48] sm:$0xff]  }
 0x15e   : > { %9557 = vmatprep.mubr.bf16.mxu1 %v5792_v61  ;;  %9582 = vmatpush3.bf16.msra.mxu1 %v10395_v26  ;;  %v10417_v26 = vld [vmem:[%s12196_s2 + $0x1d8] sm:$0xff]   ;;  %v10423_v61 = vld [vmem:[%s12196_s2 + $0x1e0] sm:$0xff]  }
 0x15f   : > { %9583 = vmatprep.subr.bf16.mxu1 %v10397_v5  ;;  %7238 = vperm.xlu1 %10193, %v7204_v42   ;;  %v7223_v42 = vld [vmem:[%s11373_s10 + $0x180] sm:$0xff] }
 0x160   : > { %9188 = vmatpush3.bf16.msra.mxu0 %v10396_v28  ;;  %7233 = vperm.xlu0 %10192, %v7203_v12   ;;  %v7221_v28 = vld [vmem:[%s11373_s10 + $0x170] sm:$0xff] }
 0x161   : > { %9217 = vmatprep.subr.bf16.mxu0 %v11560_v38  ;;  %v10421_v12 = vld [vmem:[#allocation2 + $0x50] sm:$0xff]  }
 0x162   : > { %9162 = vmatmul.mubr.bf16.gmra.mrb[16].mxu0 %v2240_v29  ;;  %9584 = vmatpush3.bf16.msra.mxu1 %v10397_v5  ;;  %v10428_v5 = vld [vmem:[%s12196_s2 + $0x1e8] sm:$0xff]   ;;  %v7226_v29 = vld [vmem:[%s11373_s10 + $0x198] sm:$0xff] }
 0x163   : > { %9165 = vmatprep.mubr.bf16.mxu0 %v2242_v2  ;;  %9613 = vmatprep.subr.bf16.mxu1 %v11569_v17  ;;  %v10435_v2 = vld [vmem:[%s12196_s2 + $0x1f0] sm:$0xff]  }
 0x164   : > { %7248 = vperm.xlu1 %10193, %v7206_v22   ;;  %7243 = vperm.xlu0 %10192, %v7205_v19   ;;  %v10440_v22 = vld [vmem:[%s12196_s2 + $0x1f8] sm:$0xff]   ;;  %v7228_v19 = vld [vmem:[%s11373_s10 + $0x1a8] sm:$0xff] }
 0x165   : > { %9558 = vmatmul.mubr.bf16.gmra.mrb[16].mxu1 %v5794_v45  ;;  %v7225_v45 = vld [vmem:[%s11373_s10 + $0x190] sm:$0xff] }
 0x166   : > { %9561 = vmatprep.mubr.bf16.mxu1 %v5796_v63  ;;  %v10425_v63 = vld [vmem:[#allocation2 + $0x58] sm:$0xff]  }
 0x168   : > { %7258 = vperm.xlu1 %10193, %v7208_v58   ;;  %7253 = vperm.xlu0 %10192, %v7207_v57   ;;  %v11667_v58 = vld [vmem:[%s10656_s12 + $0x1c] sm:$0xf]  ;;  %v11680_v57 = vld [vmem:[%s12196_s2 + $0x200] sm:$0xff]  }
 0x16a   : > { %9166 = vmatmul.mubr.bf16.gmra.mrb[20].mxu0 %v2244_v8  ;;  %v7227_v8 = vld [vmem:[%s11373_s10 + $0x1a0] sm:$0xff] }
 0x16b   : > { %9169 = vmatprep.mubr.bf16.mxu0 %v2246_v52  ;;  %v10430_v52 = vld [vmem:[%s10656_s12 + $0x68] sm:$0xff]  }
 0x16c   : > { %7268 = vperm.xlu1 %10193, %v7210_v35   ;;  %7263 = vperm.xlu0 %10192, %v7209_v30   ;;  %v7900_v35 = vcombine.low %v2834_v0, %v11667_v58  ;;  %v7230_v30 = vld [vmem:[%s11373_s10 + $0x1b8] sm:$0xff]  ;;  %v11731_v0 = vld [vmem:[#allocation2 + $0x40] sm:$0xff]  }
 0x16d   : > { %9562 = vmatmul.mubr.bf16.gmra.mrb[20].mxu1 %v5798_v40  ;;  %v6387_v40 = vld [vmem:[#allocation2 + $0x18] sm:$0xf] }
 0x16e   : > { %9565 = vmatprep.mubr.bf16.mxu1 %v5800_v54  ;;  %v11683_v54 = vld [vmem:[#allocation2 + $0x1c] sm:$0xf] }
 0x170   : > { %7278 = vperm.xlu1 %10193, %v7212_v3   ;;  %7273 = vperm.xlu0 %10192, %v7211_v21   ;;  %v7229_v3 = vld [vmem:[%s11373_s10 + $0x1b0] sm:$0xff]  ;;  %v2956_v21 = vshll.u32 %v7900_v35, 16 }
 0x172   : > { %9170 = vmatmul.mubr.bf16.gmra.mrb[24].mxu0 %v2248_v14  ;;  %v8205_v14 = vcombine.low %v6387_v40, %v11683_v54 }
 0x173   : > { %9189 = vmatprep.mubr.bf16.mxu0 %v10398_v31  ;;  %v11691_v31 = vld [vmem:[%s10656_s12 + $0x20] sm:$0xff]  }
 0x174   : > { %7288 = vperm.xlu1 %10193, %v7214_v23   ;;  %7283 = vperm.xlu0 %10192, %v7213_v24   ;;  %v10432_v23 = vld [vmem:[%s10656_s12 + $0x70] sm:$0xff]   ;;  %v6508_v24 = vshll.u32 %v8205_v14, 16 }
 0x175   : > { %9566 = vmatmul.mubr.bf16.gmra.mrb[24].mxu1 %v5802_v36  ;;  %v10436_v36 = vld [vmem:[%s10656_s12 + $0x78] sm:$0xff]  }
 0x176   : > { %9585 = vmatprep.mubr.bf16.mxu1 %v10399_v32  ;;  %v11695_v32 = vld [vmem:[#allocation2 + $0x20] sm:$0xff]  }
 0x178   : > { %7298 = vperm.xlu1 %10193, %v7216_v25   ;;  %7293 = vperm.xlu0 %10192, %v7215_v20   ;;  %v2954_v25 = vshrl.u32 %v7900_v35, 16  ;;  %v11699_v20 = vld [vmem:[%s10656_s12 + $0x28] sm:$0xff]  }
 0x17a   : > { %9190 = vmatmul.mubr.bf16.vlgmr.msra.gmra.mrb[0].mxu0 %v10400_v50  ;;  %v2958_v50 = vrot.slane %v2956_v21, 1 }
 0x17b   : > { %9218 = vmatpush3.bf16.msra.mxu0 %v11560_v38  ;;  %9193 = vmatprep.mubr.bf16.mxu0 %v10404_v49  ;;  %v10429_v38 = vld [vmem:[%s12196_s2 + $0x1e8] sm:$0xff]   ;;  %v2961_v49 = vshll.u32 %v11691_v31, 16 }
 0x17c   : > { %9219 = vmatprep.subr.bf16.mxu0 %v10405_v1  ;;  %7308 = vperm.xlu1 %10193, %v7218_v48   ;;  %v6510_v48 = vrot.slane %v6508_v24, 1  ;;  %v10456_v24 = vld [vmem:[%s12196_s2 + $0x210] sm:$0xff]  }
 0x17d   : > { %9586 = vmatmul.mubr.bf16.vlgmr.msra.gmra.mrb[0].mxu1 %v10402_v18  ;;  %7303 = vperm.xlu0 %10192, %v7217_v43   ;;  %v10437_v18 = vld [vmem:[#allocation2 + $0x78] sm:$0xff]   ;;  %v2963_v43 = vrot.slane %v2961_v49, 1 }
 0x17e   : > { %9614 = vmatpush3.bf16.msra.mxu1 %v11569_v17  ;;  %9589 = vmatprep.mubr.bf16.mxu1 %v10406_v4  ;;  %v10424_v17 = vld [vmem:[%s10656_s12 + $0x58] sm:$0xff]   ;;  %v6506_v4 = vshrl.u32 %v8205_v14, 16  ;;  %v10453_v14 = vld [vmem:[%s12196_s2 + $0x208] sm:$0xff]  }
 0x17f   : > { %9615 = vmatprep.subr.bf16.mxu1 %v10407_v27  ;;  %9220 = vmatpush3.bf16.msra.mxu0 %v10405_v1  ;;  %v10433_v1 = vld [vmem:[#allocation2 + $0x70] sm:$0xff]  }
 0x180   : > { %9221 = vmatprep.subr.bf16.mxu0 %v10410_v41  ;;  %7318 = vperm.xlu1 %10193, %v7220_v51   ;;  %v11705_v51 = vld [vmem:[#allocation2 + $0x28] sm:$0xff]  }
 0x181   : > { %7313 = vperm.xlu0 %10192, %v7219_v56  }
 0x182   : > { %9194 = vmatmul.mubr.bf16.gmra.mrb[4].mxu0 %v10408_v46  ;;  %9616 = vmatpush3.bf16.msra.mxu1 %v10407_v27  ;;  %v6513_v27 = vshll.u32 %v11695_v32, 16  ;;  %v11703_v46 = vld [vmem:[%s10656_s12 + $0x30] sm:$0xff]  }
 0x183   : > { %9617 = vmatprep.subr.bf16.mxu1 %v10411_v55  ;;  %9197 = vmatprep.mubr.bf16.mxu0 %v10412_v10  ;;  %v2969_v10 = vshll.u32 %v11699_v20, 16 }
 0x184   : > { %9222 = vmatpush3.bf16.msra.mxu0 %v10410_v41  ;;  %7328 = vperm.xlu1 %10193, %v7222_v59   ;;  %v2959_v41 = vor.u32 %v2958_v50, %v2954_v25  ;;  %v6515_v56 = vrot.slane %v6513_v27, 1  ;;  %v2973_v59 = vshrl.u32 %v11699_v20, 16  ;;  %v10457_v27 = vld [vmem:[%s12196_s2 + $0x210] sm:$0xff]  }
 0x185   : > { %9590 = vmatmul.mubr.bf16.gmra.mrb[4].mxu1 %v10409_v47  ;;  %9223 = vmatprep.subr.bf16.mxu0 %v10416_v34  ;;  %v2965_v47 = vshrl.u32 %v11691_v31, 16 }
 0x186   : > { %9593 = vmatprep.mubr.bf16.mxu1 %v10413_v16  ;;  %9618 = vmatpush3.bf16.msra.mxu1 %v10411_v55  ;;  %v10438_v55 = vld [vmem:[%s10656_s12 + $0x80] sm:$0xff]   ;;  %v11710_v16 = vld [vmem:[#allocation2 + $0x30] sm:$0xff]  }
 0x187   : > { %9619 = vmatprep.subr.bf16.mxu1 %v10417_v26  ;;  %7323 = vperm.xlu0 %10192, %v7221_v28   ;;  %v10439_v28 = vld [vmem:[#allocation2 + $0x80] sm:$0xff]  }
 0x188   : > { %9224 = vmatpush3.bf16.msra.mxu0 %v10416_v34  ;;  %7338 = vperm.xlu1 %10193, %v7224_v11   ;;  %v6511_v34 = vor.u32 %v6510_v48, %v6506_v4 }
 0x189   : > { %9225 = vmatprep.subr.bf16.mxu0 %v10422_v7 }
 0x18a   : > { %9198 = vmatmul.mubr.bf16.gmra.mrb[8].mxu0 %v10414_v60  ;;  %9620 = vmatpush3.bf16.msra.mxu1 %v10417_v26  ;;  %v2964_v26 = vsel %vm562_vm0, %v2959_v41, %v2963_v43  ;;  %v6521_v60 = vshll.u32 %v11705_v51, 16  ;;  %v6516_v11 = vsel %vm562_vm0, %v6511_v34, %v6515_v56 }
 0x18b   : > { %9201 = vmatprep.mubr.bf16.mxu0 %v10418_v37  ;;  %9621 = vmatprep.subr.bf16.mxu1 %v10423_v61  ;;  %v6517_v37 = vshrl.u32 %v11695_v32, 16 }
 0x18c   : > { %9226 = vmatpush3.bf16.msra.mxu0 %v10422_v7  ;;  %7333 = vperm.xlu0 %10192, %v7223_v42   ;;  %v2977_v7 = vshll.u32 %v11703_v46, 16 }
 0x18d   : > { %9594 = vmatmul.mubr.bf16.gmra.mrb[8].mxu1 %v10415_v53  ;;  %9227 = vmatprep.subr.bf16.mxu0 %v10428_v5  ;;  %v11718_v53 = vld [vmem:[%s10656_s12 + $0x38] sm:$0xff]  }
 0x18e   : > { %9597 = vmatprep.mubr.bf16.mxu1 %v10419_v6  ;;  %9622 = vmatpush3.bf16.msra.mxu1 %v10423_v61  ;;  %v2971_v61 = vrot.slane %v2969_v10, 1  ;;  %v6525_v6 = vshrl.u32 %v11705_v51, 16  ;;  %v11767_v10 = vld [vmem:[#allocation2 + $0x50] sm:$0xff]  }
 0x18f   : > { %9623 = vmatprep.subr.bf16.mxu1 %v10429_v38  ;;  %7348 = vperm.xlu1 %10193, %v7226_v29   ;;  %v11724_v29 = vld [vmem:[%s10656_s12 + $0x40] sm:$0xff]  }
 0x190   : > { %9228 = vmatpush3.bf16.msra.mxu0 %v10428_v5  ;;  %7343 = vperm.xlu0 %10192, %v7225_v45   ;;  %v2967_v5 = vor.u32 %v2965_v47, %v2963_v43  ;;  %v2975_v42 = vor.u32 %v2973_v59, %v2971_v61 }
 0x191   : > { %9229 = vmatprep.subr.bf16.mxu0 %v10434_v62 }
 0x192   : > { %9202 = vmatmul.mubr.bf16.gmra.mrb[12].mxu0 %v10420_v33  ;;  %9624 = vmatpush3.bf16.msra.mxu1 %v10429_v38  ;;  %v6529_v38 = vshll.u32 %v11710_v16, 16  ;;  %v6523_v33 = vrot.slane %v6521_v60, 1  ;;  %v11779_v60 = vld [vmem:[%s10656_s12 + $0x58] sm:$0xff]  }
 0x193   : > { %9205 = vmatprep.mubr.bf16.mxu0 %v10424_v17  ;;  %9625 = vmatprep.subr.bf16.mxu1 %v10435_v2  ;;  %v11726_v17 = vld [vmem:[#allocation2 + $0x38] sm:$0xff]  }
 0x194   : > { %9230 = vmatpush3.bf16.msra.mxu0 %v10434_v62  ;;  %7358 = vperm.xlu1 %10193, %v7228_v19   ;;  %v2979_v62 = vrot.slane %v2977_v7, 1  ;;  %v6527_v45 = vor.u32 %v6525_v6, %v6523_v33  ;;  %v6537_v35 = vshll.u32 %v11726_v17, 16  ;;  %v6561_v6 = vshll.u32 %v11767_v10, 16 }
 0x195   : > { %9598 = vmatmul.mubr.bf16.gmra.mrb[12].mxu1 %v10421_v12  ;;  %9231 = vmatprep.subr.bf16.mxu0 %v10440_v22  ;;  %v2985_v12 = vshll.u32 %v11718_v53, 16 }
 0x196   : > { %9601 = vmatprep.mubr.bf16.mxu1 %v10425_v63  ;;  %9626 = vmatpush3.bf16.msra.mxu1 %v10435_v2  ;;  %v6519_v2 = vor.u32 %v6517_v37, %v6515_v56  ;;  %v6531_v63 = vrot.slane %v6529_v38, 1  ;;  %v2980_v19 = vsel %vm562_vm0, %v2975_v42, %v2979_v62  ;;  %v6539_v49 = vrot.slane %v6537_v35, 1 }
 0x197   : > { %9627 = vmatprep.subr.bf16.mxu1 %v10441_v13  ;;  %7353 = vperm.xlu0 %10192, %v7227_v8   ;;  %v10451_v8 = vld [vmem:[%s12196_s2 + $0x208] sm:$0xff]  }
 0x198   : > { %9232 = vmatpush3.bf16.msra.mxu0 %v10440_v22  ;;  %7368 = vperm.xlu1 %10193, %v7230_v30   ;;  %v2972_v22 = vsel %vm562_vm0, %v2967_v5, %v2971_v61  ;;  %v6524_v40 = vsel %vm562_vm0, %v6519_v2, %v6523_v33  ;;  %v6533_v30 = vshrl.u32 %v11710_v16, 16  ;;  %v10463_v5 = vld [vmem:[%s12196_s2 + $0x218] sm:$0xff]  }
 0x199   : > { %9261 = vmatprep.subr.bf16.mxu0 %v11672_v39  ;;  %v11790_v2 = vld [vmem:[#allocation2 + $0x58] sm:$0xff]  }
 0x19a   : > { %9206 = vmatmul.mubr.bf16.gmra.mrb[16].mxu0 %v10426_v44  ;;  %9628 = vmatpush3.bf16.msra.mxu1 %v10441_v13  ;;  %v2981_v13 = vshrl.u32 %v11703_v46, 16  ;;  %v2989_v44 = vshrl.u32 %v11718_v53, 16 }
 0x19b   : > { %9209 = vmatprep.mubr.bf16.mxu0 %v10430_v52  ;;  %9657 = vmatprep.subr.bf16.mxu1 %v11680_v57  ;;  %v2993_v52 = vshll.u32 %v11724_v29, 16 }
 0x19c   : > { %7363 = vperm.xlu0 %10192, %v7229_v3   ;;  %v11743_v3 = vld [vmem:[%s10656_s12 + $0x48] sm:$0xff]   ;;  %v2983_v21 = vor.u32 %v2981_v13, %v2979_v62  ;;  %v11788_v62 = vld [vmem:[%s10656_s12 + $0x60] sm:$0xff]  }
 0x19d   : > { %9602 = vmatmul.mubr.bf16.gmra.mrb[16].mxu1 %v10427_v15  ;;  %v2987_v15 = vrot.slane %v2985_v12, 1  ;;  %v2995_v50 = vrot.slane %v2993_v52, 1  ;;  %v3001_v4 = vshll.u32 %v11743_v3, 16  ;;  %v3005_v47 = vshrl.u32 %v11743_v3, 16  ;;  %v10468_v12 = vld [vmem:[%s12196_s2 + $0x220] sm:$0xff]  }
 0x19e   : > { %9605 = vmatprep.mubr.bf16.mxu1 %v10431_v9  ;;  %v6532_v9 = vsel %vm562_vm0, %v6527_v45, %v6531_v63  ;;  %v3017_v45 = vshll.u32 %v11779_v60, 16  ;;  %v11801_v52 = vld [vmem:[#allocation2 + $0x60] sm:$0xff]  }
 0x19f   : > { %v2991_v25 = vor.u32 %v2989_v44, %v2987_v15  ;;  %v2988_v48 = vsel %vm562_vm0, %v2983_v21, %v2987_v15  ;;  %v3003_v7 = vrot.slane %v3001_v4, 1  ;;  %v10469_v44 = vld [vmem:[%s12196_s2 + $0x220] sm:$0xff]   ;;  %v3025_v15 = vshll.u32 %v11788_v62, 16 }
 0x1a0   : > { %v3019_v21 = vrot.slane %v3017_v45, 1 }
 0x1a1   : > { %v3007_v38 = vor.u32 %v3005_v47, %v3003_v7 }
 0x1a2   : > { %9210 = vmatmul.mubr.bf16.gmra.mrb[20].mxu0 %v10432_v23  ;;  %v6541_v23 = vshrl.u32 %v11726_v17, 16 }
 0x1a3   : > { %9213 = vmatprep.mubr.bf16.mxu0 %v10436_v36  ;;  %v6545_v36 = vshll.u32 %v11731_v0, 16 }
 0x1a4   : > { %v6543_v41 = vor.u32 %v6541_v23, %v6539_v49  ;;  %v6565_v23 = vshrl.u32 %v11767_v10, 16 }
 0x1a5   : > { %9606 = vmatmul.mubr.bf16.gmra.mrb[20].mxu1 %v10433_v1  ;;  %v11758_v1 = vld [vmem:[#allocation2 + $0x48] sm:$0xff]   ;;  %v6547_v43 = vrot.slane %v6545_v36, 1 }
 0x1a6   : > { %9609 = vmatprep.mubr.bf16.mxu1 %v10437_v18  ;;  %v6535_v18 = vor.u32 %v6533_v30, %v6531_v63  ;;  %v6553_v56 = vshll.u32 %v11758_v1, 16  ;;  %v6569_v30 = vshll.u32 %v11790_v2, 16  ;;  %v11813_v36 = vld [vmem:[%s10656_s12 + $0x68] sm:$0xff]  }
 0x1a7   : > { %v6548_v37 = vsel %vm562_vm0, %v6543_v41, %v6547_v43  ;;  %v3033_v47 = vshll.u32 %v11813_v36, 16 }
 0x1a8   : > { %v6540_v59 = vsel %vm562_vm0, %v6535_v18, %v6539_v49  ;;  %v6555_v33 = vrot.slane %v6553_v56, 1  ;;  %v6577_v49 = vshll.u32 %v11801_v52, 16  ;;  %v10475_v18 = vld [vmem:[%s12196_s2 + $0x228] sm:$0xff]   ;;  %v6571_v41 = vrot.slane %v6569_v30, 1 }
 0x1aa   : > { %9214 = vmatmul.mubr.bf16.gmra.mrb[24].mxu0 %v10438_v55  ;;  %v2997_v55 = vshrl.u32 %v11724_v29, 16 }
 0x1ab   : > { %9233 = vmatprep.mubr.bf16.mxu0 %v2964_v26  ;;  %v10462_v26 = vld [vmem:[%s12196_s2 + $0x218] sm:$0xff]  }
 0x1ac   : > { %v2999_v61 = vor.u32 %v2997_v55, %v2995_v50  ;;  %v10480_v55 = vld [vmem:[%s12196_s2 + $0x230] sm:$0xff]  }
 0x1ad   : > { %9610 = vmatmul.mubr.bf16.gmra.mrb[24].mxu1 %v10439_v28  ;;  %v6549_v28 = vshrl.u32 %v11731_v0, 16 }
 0x1ae   : > { %9629 = vmatprep.mubr.bf16.mxu1 %v6516_v11  ;;  %v6557_v11 = vshrl.u32 %v11758_v1, 16  ;;  %v3004_v63 = vsel %vm562_vm0, %v2999_v61, %v3003_v7  ;;  %v11832_v7 = vld [vmem:[#allocation2 + $0x70] sm:$0xff]   ;;  %v3037_v61 = vshrl.u32 %v11813_v36, 16 }
 0x1b0   : > { %v6559_v13 = vor.u32 %v6557_v11, %v6555_v33 }
 0x1b2   : > { %9234 = vmatmul.mubr.bf16.vlgmr.msra.gmra.mrb[0].mxu0 %v2972_v22  ;;  %v6551_v22 = vor.u32 %v6549_v28, %v6547_v43  ;;  %v11824_v43 = vld [vmem:[#allocation2 + $0x68] sm:$0xff]   ;;  %v10481_v28 = vld [vmem:[%s12196_s2 + $0x230] sm:$0xff]  }
 0x1b3   : > { %9262 = vmatpush3.bf16.msra.mxu0 %v11672_v39  ;;  %9237 = vmatprep.mubr.bf16.mxu0 %v2980_v19  ;;  %v11756_v39 = vld [vmem:[%s10656_s12 + $0x50] sm:$0xff]   ;;  %v6563_v19 = vrot.slane %v6561_v6, 1  ;;  %v6585_v11 = vshll.u32 %v11824_v43, 16  ;;  %v10486_v6 = vld [vmem:[%s12196_s2 + $0x238] sm:$0xff]  }
 0x1b4   : > { %9263 = vmatprep.subr.bf16.mxu0 %v10451_v8  ;;  %v3009_v34 = vshll.u32 %v11756_v39, 16 }
 0x1b5   : > { %9630 = vmatmul.mubr.bf16.vlgmr.msra.gmra.mrb[0].mxu1 %v6524_v40  ;;  %v3021_v40 = vshrl.u32 %v11779_v60, 16 }
 0x1b6   : > { %9658 = vmatpush3.bf16.msra.mxu1 %v11680_v57  ;;  %9633 = vmatprep.mubr.bf16.mxu1 %v6532_v9  ;;  %v2996_v57 = vsel %vm562_vm0, %v2991_v25, %v2995_v50  ;;  %v3011_v42 = vrot.slane %v3009_v34, 1  ;;  %v10474_v9 = vld [vmem:[%s12196_s2 + $0x228] sm:$0xff]   ;;  %v6573_v50 = vshrl.u32 %v11790_v2, 16 }
 0x1b7   : > { %9659 = vmatprep.subr.bf16.mxu1 %v10453_v14  ;;  %9264 = vmatpush3.bf16.msra.mxu0 %v10451_v8  ;;  %v3013_v8 = vshrl.u32 %v11756_v39, 16  ;;  %v3023_v4 = vor.u32 %v3021_v40, %v3019_v21  ;;  %v6587_v40 = vrot.slane %v6585_v11, 1 }
 0x1b8   : > { %9265 = vmatprep.subr.bf16.mxu0 %v10456_v24  ;;  %v3012_v35 = vsel %vm562_vm0, %v3007_v38, %v3011_v42  ;;  %v6575_v56 = vor.u32 %v6573_v50, %v6571_v41 }
 0x1b9   : > { %v3015_v25 = vor.u32 %v3013_v8, %v3011_v42  ;;  %v3035_v42 = vrot.slane %v3033_v47, 1 }
 0x1ba   : > { %9238 = vmatmul.mubr.bf16.gmra.mrb[4].mxu0 %v2988_v48  ;;  %9660 = vmatpush3.bf16.msra.mxu1 %v10453_v14  ;;  %v6556_v14 = vsel %vm562_vm0, %v6551_v22, %v6555_v33  ;;  %v3027_v48 = vrot.slane %v3025_v15, 1  ;;  %v6581_v33 = vshrl.u32 %v11801_v52, 16  ;;  %v11858_v15 = vld [vmem:[#allocation2 + $0x78] sm:$0xff]  }
 0x1bb   : > { %9661 = vmatprep.subr.bf16.mxu1 %v10457_v27  ;;  %9241 = vmatprep.mubr.bf16.mxu0 %v2996_v57  ;;  %v6567_v57 = vor.u32 %v6565_v23, %v6563_v19  ;;  %v3020_v34 = vsel %vm562_vm0, %v3015_v25, %v3019_v21  ;;  %v3039_v8 = vor.u32 %v3037_v61, %v3035_v42  ;;  %v11863_v25 = vld [vmem:[#allocation2 + $0x80] sm:$0xff]   ;;  %v3304_v61 = vld [vmem:[%s10656_s12 + $0x18] sm:$0xe] }
 0x1bc   : > { %9266 = vmatpush3.bf16.msra.mxu0 %v10456_v24  ;;  %v6564_v24 = vsel %vm562_vm0, %v6559_v13, %v6563_v19  ;;  %v6593_v13 = vshll.u32 %v11832_v7, 16  ;;  %v10487_v19 = vld [vmem:[%s12196_s2 + $0x238] sm:$0xff]  }
 0x1bd   : > { %9634 = vmatmul.mubr.bf16.gmra.mrb[4].mxu1 %v6540_v59  ;;  %9267 = vmatprep.subr.bf16.mxu0 %v10462_v26  ;;  %v3029_v59 = vshrl.u32 %v11788_v62, 16  ;;  %v6572_v38 = vsel %vm562_vm0, %v6567_v57, %v6571_v41  ;;  %v6597_v57 = vshrl.u32 %v11832_v7, 16 }
 0x1be   : > { %9637 = vmatprep.mubr.bf16.mxu1 %v6548_v37  ;;  %9662 = vmatpush3.bf16.msra.mxu1 %v10457_v27  ;;  %v11822_v27 = vld [vmem:[%s10656_s12 + $0x70] sm:$0xff]   ;;  %v3028_v37 = vsel %vm562_vm0, %v3023_v4, %v3027_v48  ;;  %v6601_v4 = vshll.u32 %v11858_v15, 16 }
 0x1bf   : > { %9663 = vmatprep.subr.bf16.mxu1 %v10463_v5  ;;  %v3031_v45 = vor.u32 %v3029_v59, %v3027_v48 }
 0x1c0   : > { %9268 = vmatpush3.bf16.msra.mxu0 %v10462_v26  ;;  %v6579_v26 = vrot.slane %v6577_v49, 1 }
 0x1c1   : > { %9269 = vmatprep.subr.bf16.mxu0 %v10468_v12  ;;  %v3036_v21 = vsel %vm562_vm0, %v3031_v45, %v3035_v42 }
 0x1c2   : > { %9242 = vmatmul.mubr.bf16.gmra.mrb[8].mxu0 %v3004_v63  ;;  %9664 = vmatpush3.bf16.msra.mxu1 %v10463_v5  ;;  %v3041_v5 = vshll.u32 %v11822_v27, 16  ;;  %v6580_v22 = vsel %vm562_vm0, %v6575_v56, %v6579_v26  ;;  %v6589_v63 = vshrl.u32 %v11824_v43, 16  ;;  %v6583_v30 = vor.u32 %v6581_v33, %v6579_v26  ;;  %v11875_v26 = vld [vmem:[%s10656_s12 + $0x88] ss:$0 sps:$4 sm:$0x11]  }
 0x1c3   : > { %9245 = vmatprep.mubr.bf16.mxu0 %v3012_v35  ;;  %9665 = vmatprep.subr.bf16.mxu1 %v10469_v44  ;;  %v11856_v35 = vld [vmem:[%s10656_s12 + $0x80] sm:$0xff]   ;;  %v6609_v56 = vshll.u32 %v11863_v25, 16 }
 0x1c4   : > { %9270 = vmatpush3.bf16.msra.mxu0 %v10468_v12  ;;  %v11847_v12 = vld [vmem:[%s10656_s12 + $0x78] sm:$0xff]   ;;  %v6591_v23 = vor.u32 %v6589_v63, %v6587_v40  ;;  %v6588_v48 = vsel %vm562_vm0, %v6583_v30, %v6587_v40  ;;  %v3061_v33 = vshrl.u32 %v11856_v35, 16  ;;  %v7939_v63 = vcombine.low %v3304_v61, %v11667_v58 }
 0x1c5   : > { %9638 = vmatmul.mubr.bf16.gmra.mrb[8].mxu1 %v6556_v14  ;;  %9271 = vmatprep.subr.bf16.mxu0 %v10474_v9  ;;  %v3049_v14 = vshll.u32 %v11847_v12, 16  ;;  %v3053_v49 = vshrl.u32 %v11847_v12, 16  ;;  %v6611_v42 = vrot.slane %v6609_v56, 1 }
 0x1c6   : > { %9641 = vmatprep.mubr.bf16.mxu1 %v6564_v24  ;;  %9666 = vmatpush3.bf16.msra.mxu1 %v10469_v44  ;;  %v3043_v44 = vrot.slane %v3041_v5, 1  ;;  %v6595_v24 = vrot.slane %v6593_v13, 1  ;;  %v6856_v13 = vld [vmem:[#allocation2 + $0x18] sm:$0xe] }
 0x1c7   : > { %9667 = vmatprep.subr.bf16.mxu1 %v10475_v18 }
 0x1c8   : > { %9272 = vmatpush3.bf16.msra.mxu0 %v10474_v9  ;;  %v3045_v9 = vshrl.u32 %v11822_v27, 16  ;;  %v3044_v50 = vsel %vm562_vm0, %v3039_v8, %v3043_v44  ;;  %v6596_v47 = vsel %vm562_vm0, %v6591_v23, %v6595_v24  ;;  %v6599_v11 = vor.u32 %v6597_v57, %v6595_v24 }
 0x1c9   : > { %9273 = vmatprep.subr.bf16.mxu0 %v10480_v55  ;;  %v6613_v8 = vshrl.u32 %v11863_v25, 16  ;;  %v3326_v23 = vrot.slane %v11691_v31, 1  ;;  %v3330_v31 = vrot.slane %v11703_v46, 1  ;;  %v3334_v46 = vrot.slane %v11724_v29, 1 }
 0x1ca   : > { %9246 = vmatmul.mubr.bf16.gmra.mrb[12].mxu0 %v3020_v34  ;;  %9668 = vmatpush3.bf16.msra.mxu1 %v10475_v18  ;;  %v3057_v18 = vshll.u32 %v11856_v35, 16  ;;  %v3047_v41 = vor.u32 %v3045_v9, %v3043_v44  ;;  %v6605_v34 = vshrl.u32 %v11858_v15, 16  ;;  %v3338_v29 = vrot.slane %v11756_v39, 1 }
 0x1cb   : > { %9249 = vmatprep.mubr.bf16.mxu0 %v3028_v37  ;;  %9669 = vmatprep.subr.bf16.mxu1 %v10481_v28  ;;  %v6603_v37 = vrot.slane %v6601_v4, 1  ;;  %v6615_v58 = vor.u32 %v6613_v8, %v6611_v42  ;;  %v3342_v39 = vrot.slane %v11788_v62, 1  ;;  %v3346_v62 = vrot.slane %v11822_v27, 1 }
 0x1cc   : > { %9274 = vmatpush3.bf16.msra.mxu0 %v10480_v55  ;;  %v3051_v55 = vrot.slane %v3049_v14, 1  ;;  %v8244_v14 = vcombine.low %v6856_v13, %v11683_v54  ;;  %v3350_v27 = vrot.slane %v11856_v35, 1 }
 0x1cd   : > { %9642 = vmatmul.mubr.bf16.gmra.mrb[12].mxu1 %v6572_v38  ;;  %9275 = vmatprep.subr.bf16.mxu0 %v10486_v6  ;;  %v6607_v38 = vor.u32 %v6605_v34, %v6603_v37 }
 0x1ce   : > { %9645 = vmatprep.mubr.bf16.mxu1 %v6580_v22  ;;  %9670 = vmatpush3.bf16.msra.mxu1 %v10481_v28  ;;  %v3055_v59 = vor.u32 %v3053_v49, %v3051_v55  ;;  %v3059_v28 = vrot.slane %v3057_v18, 1  ;;  %v3052_v5 = vsel %vm562_vm0, %v3047_v41, %v3051_v55  ;;  %v3065_v22 = vshll.u32 %v11875_v26, 16 }
 0x1cf   : > { %9671 = vmatprep.subr.bf16.mxu1 %v10487_v19  ;;  %v6612_v40 = vsel %vm562_vm0, %v6607_v38, %v6611_v42  ;;  %v6876_v49 = vrot.slane %v8244_v14, 1  ;;  %v6877_v18 = vrot.slane %v11695_v32, 1  ;;  %v3328_v41 = vrot.slane %v11699_v20, 1 }
 0x1d0   : > { %9276 = vmatpush3.bf16.msra.mxu0 %v10486_v6  ;;  %v11879_v6 = vld [vmem:[#allocation2 + $0x88] ss:$0 sps:$4 sm:$0x11]   ;;  %v3060_v45 = vsel %vm562_vm0, %v3055_v59, %v3059_v28  ;;  %v3063_v30 = vor.u32 %v3061_v33, %v3059_v28  ;;  %v3067_v9 = vrot.slane %v3065_v22, 1  ;;  %v6879_v55 = vrot.slane %v11705_v51, 1 }
 0x1d1   : > { %v6617_v44 = vshll.u32 %v11879_v6, 16  ;;  %v6878_v54 = vsel %vm1114_vm1, %v6876_v49, %v6877_v18  ;;  %v3329_v57 = vsel %vm1114_vm1, %v3326_v23, %v3328_v41  ;;  %v6881_v32 = vrot.slane %v11710_v16, 1 }
 0x1d2   : > { %9250 = vmatmul.mubr.bf16.gmra.mrb[16].mxu0 %v3036_v21  ;;  %9672 = vmatpush3.bf16.msra.mxu1 %v10487_v19  ;;  %v6604_v19 = vsel %vm562_vm0, %v6599_v11, %v6603_v37  ;;  %v3325_v21 = vrot.slane %v7939_v63, 1  ;;  %v6880_v34 = vsel %vm1114_vm1, %v6877_v18, %v6879_v55  ;;  %v3332_v20 = vrot.slane %v11718_v53, 1 }
 0x1d3   : > { %9253 = vmatprep.mubr.bf16.mxu0 %v3044_v50  ;;  %v6619_v24 = vrot.slane %v6617_v44, 1  ;;  %v3068_v50 = vsel %vm562_vm0, %v3063_v30, %v3067_v9  ;;  %v6882_v56 = vsel %vm1114_vm1, %v6879_v55, %v6881_v32  ;;  %v6883_v51 = vrot.slane %v11726_v17, 1 }
 0x1d4   : > { %v3327_v4 = vsel %vm1114_vm1, %v3325_v21, %v3326_v23  ;;  %v3333_v59 = vsel %vm1114_vm1, %v3330_v31, %v3332_v20  ;;  %v6885_v16 = vrot.slane %v11731_v0, 1  ;;  %v3335_v28 = vsel %vm1114_vm1, %v3332_v20, %v3334_v46  ;;  %v11950_v23 = vpop.permute.xlu0 %3682 }
 0x1d5   : > { %9646 = vmatmul.mubr.bf16.gmra.mrb[16].mxu1 %v6588_v48  ;;  %v6620_v48 = vsel %vm562_vm0, %v6615_v58, %v6619_v24  ;;  %v6884_v37 = vsel %vm1114_vm1, %v6881_v32, %v6883_v51  ;;  %v3336_v53 = vrot.slane %v11743_v3, 1  ;;  %v6887_v17 = vrot.slane %v11758_v1, 1 }
 0x1d6   : > { %9649 = vmatprep.mubr.bf16.mxu1 %v6596_v47  ;;  %v3331_v47 = vsel %vm1114_vm1, %v3328_v41, %v3330_v31  ;;  %v6886_v61 = vsel %vm1114_vm1, %v6883_v51, %v6885_v16  ;;  %v6889_v0 = vrot.slane %v11767_v10, 1  ;;  %v3340_v3 = vrot.slane %v11779_v60, 1 }
 0x1d7   : > { %v3339_v11 = vsel %vm1114_vm1, %v3336_v53, %v3338_v29  ;;  %v6888_v38 = vsel %vm1114_vm1, %v6885_v16, %v6887_v17  ;;  %v6891_v1 = vrot.slane %v11790_v2, 1  ;;  %v6893_v10 = vrot.slane %v11801_v52, 1 }
 0x1d8   : > { %v6890_v42 = vsel %vm1114_vm1, %v6887_v17, %v6889_v0  ;;  %v3341_v33 = vsel %vm1114_vm1, %v3338_v29, %v3340_v3  ;;  %v3343_v22 = vsel %vm1114_vm1, %v3340_v3, %v3342_v39  ;;  %v3344_v60 = vrot.slane %v11813_v36, 1  ;;  %v11954_v24 = vpop.permute.xlu0 %3687  ;;  %v12015_v3 = vld [vmem:[%s12197_s3] ss:$0 sm:$0xff] }
 0x1d9   : > { %v6894_v63 = vsel %vm1114_vm1, %v6891_v1, %v6893_v10  ;;  %v6895_v2 = vrot.slane %v11824_v43, 1  ;;  %v6897_v52 = vrot.slane %v11832_v7, 1  ;;  %v3348_v36 = vrot.slane %v11847_v12, 1 }
 0x1da   : > { %9254 = vmatmul.mubr.bf16.gmra.mrb[20].mxu0 %v3052_v5  ;;  %v3337_v5 = vsel %vm1114_vm1, %v3334_v46, %v3336_v53  ;;  %v3345_v13 = vsel %vm1114_vm1, %v3342_v39, %v3344_v60  ;;  %v6899_v43 = vrot.slane %v11858_v15, 1  ;;  %v6901_v7 = vrot.slane %v11863_v25, 1  ;;  %v11948_v25 = vpop.permute.xlu1 %3692 }
 0x1db   : > { %9257 = vmatprep.mubr.bf16.mxu0 %v3060_v45  ;;  %v6892_v45 = vsel %vm1114_vm1, %v6889_v0, %v6891_v1  ;;  %v6896_v8 = vsel %vm1114_vm1, %v6893_v10, %v6895_v2  ;;  %v6898_v44 = vsel %vm1114_vm1, %v6895_v2, %v6897_v52  ;;  %v3351_v30 = vsel %vm1114_vm1, %v3348_v36, %v3350_v27 }
 0x1dc   : > { %v6900_v9 = vsel %vm1114_vm1, %v6897_v52, %v6899_v43  ;;  %v6902_v14 = vsel %vm1114_vm1, %v6899_v43, %v6901_v7  ;;  %v3352_v12 = vrot.slane %v11875_v26, 1  ;;  %v6903_v35 = vrot.slane %v11879_v6, 1  ;;  %v11958_v26 = vpop.permute.xlu0 %3702 }
 0x1dd   : > { %9650 = vmatmul.mubr.bf16.gmra.mrb[20].mxu1 %v6604_v19  ;;  %v3347_v19 = vsel %vm1114_vm1, %v3344_v60, %v3346_v62 }
 0x1de   : > { %9653 = vmatprep.mubr.bf16.mxu1 %v6612_v40  ;;  %v3349_v40 = vsel %vm1114_vm1, %v3346_v62, %v3348_v36  ;;  %v3353_v15 = vsel %vm1114_vm1, %v3350_v27, %v3352_v12  ;;  %v6904_v21 = vsel %vm1114_vm1, %v6901_v7, %v6903_v35  ;;  %v11952_v58 = vpop.permute.xlu1 %3697 }
 0x1e0   : > { %v11962_v6 = vpop.permute.xlu0 %3712 }
 0x1e2   : > { %9258 = vmatmul.mubr.bf16.gmra.mrb[24].mxu0 %v3068_v50  ;;  %v11956_v50 = vpop.permute.xlu1 %3707 }
 0x1e3   : > { %9277 = vmatprep.mubr.bf16.mxu0 %v3327_v4 }
 0x1e4   : > { %v11966_v4 = vpop.permute.xlu0 %3722 }
 0x1e5   : > { %9654 = vmatmul.mubr.bf16.gmra.mrb[24].mxu1 %v6620_v48 }
 0x1e6   : > { %9673 = vmatprep.mubr.bf16.mxu1 %v6878_v54  ;;  %v11960_v49 = vpop.permute.xlu1 %3717 }
 0x1e8   : > { %v11970_v54 = vpop.permute.xlu0 %3732 }
 0x1ea   : > { %9278 = vmatmul.mubr.bf16.vlgmr.msra.gmra.mrb[0].mxu0 %v3329_v57  ;;  %v11964_v18 = vpop.permute.xlu1 %3727 }
 0x1eb   : > { %9281 = vmatprep.mubr.bf16.mxu0 %v3331_v47 }
 0x1ec   : > { %v11974_v31 = vpop.permute.xlu0 %3742 }
 0x1ed   : > { %9674 = vmatmul.mubr.bf16.vlgmr.msra.gmra.mrb[0].mxu1 %v6880_v34 }
 0x1ee   : > { %9677 = vmatprep.mubr.bf16.mxu1 %v6882_v56  ;;  %v11968_v48 = vpop.permute.xlu1 %3737 }
 0x1f0   : > { %v11978_v57 = vpop.permute.xlu0 %3752 }
 0x1f2   : > { %9282 = vmatmul.mubr.bf16.gmra.mrb[4].mxu0 %v3333_v59  ;;  %v11972_v41 = vpop.permute.xlu1 %3747 }
 0x1f3   : > { %9285 = vmatprep.mubr.bf16.mxu0 %v3335_v28 }
 0x1f4   : > { %v11982_v47 = vpop.permute.xlu0 %3762 }
 0x1f5   : > { %9678 = vmatmul.mubr.bf16.gmra.mrb[4].mxu1 %v6884_v37 }
 0x1f6   : > { %9681 = vmatprep.mubr.bf16.mxu1 %v6886_v61  ;;  %v11976_v55 = vpop.permute.xlu1 %3757 }
 0x1f8   : > { %v11986_v56 = vpop.permute.xlu0 %3772 }
 0x1fa   : > { %9286 = vmatmul.mubr.bf16.gmra.mrb[8].mxu0 %v3337_v5  ;;  %v11980_v32 = vpop.permute.xlu1 %3767 }
 0x1fb   : > { %9289 = vmatprep.mubr.bf16.mxu0 %v3339_v11 }
 0x1fc   : > { %v11990_v46 = vpop.permute.xlu0 %3782 }
 0x1fd   : > { %9682 = vmatmul.mubr.bf16.gmra.mrb[8].mxu1 %v6888_v38 }
 0x1fe   : > { %9685 = vmatprep.mubr.bf16.mxu1 %v6890_v42  ;;  %v11984_v34 = vpop.permute.xlu1 %3777 }
 0x200   : > { %v11994_v59 = vpop.permute.xlu0 %3792 }
 0x202   : > { %9290 = vmatmul.mubr.bf16.gmra.mrb[12].mxu0 %v3341_v33  ;;  %v11988_v20 = vpop.permute.xlu1 %3787 }
 0x203   : > { %9293 = vmatprep.mubr.bf16.mxu0 %v3343_v22 }
 0x204   : > { %v11998_v28 = vpop.permute.xlu0 %3802 }
 0x205   : > { %9686 = vmatmul.mubr.bf16.gmra.mrb[12].mxu1 %v6892_v45 }
 0x206   : > { %9689 = vmatprep.mubr.bf16.mxu1 %v6894_v63  ;;  %v11992_v51 = vpop.permute.xlu1 %3797 }
 0x208   : > { %v12002_v61 = vpop.permute.xlu0 %3812 }
 0x20a   : > { %9294 = vmatmul.mubr.bf16.gmra.mrb[16].mxu0 %v3345_v13  ;;  %v11996_v16 = vpop.permute.xlu1 %3807 }
 0x20b   : > { %9297 = vmatprep.mubr.bf16.mxu0 %v3347_v19 }
 0x20c   : > { %v7234_v29 = vpop.permute.xlu0 %7233 }
 0x20d   : > { %9690 = vmatmul.mubr.bf16.gmra.mrb[16].mxu1 %v6896_v8 }
 0x20e   : > { %9693 = vmatprep.mubr.bf16.mxu1 %v6898_v44  ;;  %v12000_v37 = vpop.permute.xlu1 %3817 }
 0x210   : > { %v7244_v5 = vpop.permute.xlu0 %7243 }
 0x212   : > { %9298 = vmatmul.mubr.bf16.gmra.mrb[20].mxu0 %v3349_v40  ;;  %v7239_v53 = vpop.permute.xlu1 %7238 }
 0x213   : > { %9301 = vmatprep.mubr.bf16.mxu0 %v3351_v30 }
 0x214   : > { %v12006_v11 = vpop.permute.xlu0 %7253 }
 0x215   : > { %9694 = vmatmul.mubr.bf16.gmra.mrb[20].mxu1 %v6900_v9 }
 0x216   : > { %9697 = vmatprep.mubr.bf16.mxu1 %v6902_v14  ;;  %v7249_v17 = vpop.permute.xlu1 %7248 }
 0x218   : > { %v12010_v42 = vpop.permute.xlu0 %7263 }
 0x21a   : > { %9302 = vmatmul.mubr.bf16.gmra.mrb[24].mxu0 %v3353_v15  ;;  %v12004_v0 = vpop.permute.xlu1 %7258 }
 0x21c   : > { %v12021_v22 = vpop.permute.xlu0 %7273 }
 0x21d   : > { %9698 = vmatmul.mubr.bf16.gmra.mrb[24].mxu1 %v6904_v21 }
 0x21e   : > { %v12008_v38 = vpop.permute.xlu1 %7268 }
 0x222   : > { %v12018_v39 = vpop.permute.xlu1 %7278 }
 0x226   : > { %v12029_v40 = vpop.permute.xlu1 %7288 }
 0x2bd   : > { %v9279_v1 = vpop.f32.mrb[0].mxu0 }
 0x2be   : > { %v3598_v33 = vadd.f32 %v9279_v1, %v12015_v3  ;;  %v3450_v10 = vpop.f32.mrb[1].mxu0  ;;  %v12035_v1 = vpop.permute.xlu0 %7283 }
 0x2bf   : > { %v3596_v45 = vadd.f32 %v12015_v3, %v3450_v10  ;;  %v9280_v63 = vpop.f32.mrb[2].mxu0 }
 0x2c0   : > { %v3626_v60 = vmax.f32 %v3598_v33, 0.0  ;;  %v9675_v62 = vpop.f32.mrb[0].mxu1  ;;  %v3599_v2 = vadd.f32 %v9280_v63, %v12015_v3  ;;  %v3453_v13 = vpop.f32.mrb[3].mxu0 }
 0x2c1   : > { %v7149_v52 = vadd.f32 %v9675_v62, %v12015_v3  ;;  %v3624_v19 = vmax.f32 %v3596_v45, 0.0  ;;  %v7001_v8 = vpop.f32.mrb[1].mxu1  ;;  %v3597_v44 = vadd.f32 %v12015_v3, %v3453_v13 }
 0x2c2   : > { %v7147_v36 = vadd.f32 %v12015_v3, %v7001_v8  ;;  %v3627_v27 = vmax.f32 %v3599_v2, 0.0  ;;  %v9676_v43 = vpop.f32.mrb[2].mxu1  ;;  %v3822_v12 = vmul.f32 %v11948_v25, %v3626_v60 }
 0x2c3   : > { %v7177_v7 = vmax.f32 %v7149_v52, 0.0  ;;  %v7150_v30 = vadd.f32 %v9676_v43, %v12015_v3  ;;  %v3625_v9 = vmax.f32 %v3597_v44, 0.0  ;;  %v7004_v14 = vpop.f32.mrb[3].mxu1  ;;  %v3820_v33 = vmul.f32 %v11950_v23, %v3624_v19 }
 0x2c4   : > { %v7175_v35 = vmax.f32 %v7147_v36, 0.0  ;;  %v3823_v15 = vmul.f32 %v11952_v58, %v3627_v27  ;;  %v7148_v21 = vadd.f32 %v12015_v3, %v7004_v14 }
 0x2c5   : > { %v7178_v10 = vmax.f32 %v7150_v30, 0.0  ;;  %v3821_v45 = vmul.f32 %v11954_v24, %v3625_v9  ;;  %v9283_v63 = vpop.f32.mrb[4].mxu0  ;;  %v7373_v2 = vmul.f32 %v7244_v5, %v7177_v7  ;;  %v12048_v30 = vpop.permute.xlu1 %7298 }
 0x2c6   : > { %v8354_v25 = vpack.c.bf16 %v3823_v15, %v3822_v12  ;;  %v7176_v60 = vmax.f32 %v7148_v21, 0.0  ;;  %v3602_v58 = vadd.f32 %v9283_v63, %v12015_v3  ;;  %v3466_v62 = vpop.f32.mrb[5].mxu0  ;;  %v7371_v8 = vmul.f32 %v7234_v29, %v7175_v35  ;;  %v12054_v15 = vpop.permute.xlu0 %7293 }
 0x2c7   : > { %v7374_v13 = vmul.f32 %v7249_v17, %v7178_v10  ;;  %v8349_v52 = vpack.c.bf16 %v3821_v45, %v3820_v33  ;;  %v3600_v23 = vadd.f32 %v12015_v3, %v3466_v62  ;;  %v9284_v19 = vpop.f32.mrb[6].mxu0 }
 0x2c8   : > { %8486 = vst [vmem:[%s12041_s28 + $0x8] sm:$0xff] %v8354_v25   ;;  %v7372_v44 = vmul.f32 %v7239_v53, %v7176_v60  ;;  %v3630_v36 = vmax.f32 %v3602_v58, 0.0  ;;  %v9679_v27 = vpop.f32.mrb[4].mxu1  ;;  %v3603_v24 = vadd.f32 %v9284_v19, %v12015_v3  ;;  %v3469_v43 = vpop.f32.mrb[7].mxu0 }
 0x2c9   : > { %v8424_v9 = vpack.c.bf16 %v7374_v13, %v7373_v2  ;;  %8350 = vst [vmem:[%s12041_s28] sm:$0xff] %v8349_v52   ;;  %v7153_v17 = vadd.f32 %v9679_v27, %v12015_v3  ;;  %v3628_v5 = vmax.f32 %v3600_v23, 0.0  ;;  %v7017_v7 = vpop.f32.mrb[5].mxu1  ;;  %v3601_v14 = vadd.f32 %v12015_v3, %v3469_v43  ;;  %v12065_v27 = vpop.permute.xlu1 %7308 }
 0x2ca   : > { %v8419_v29 = vpack.c.bf16 %v7372_v44, %v7371_v8  ;;  %v7151_v53 = vadd.f32 %v12015_v3, %v7017_v7  ;;  %v3631_v12 = vmax.f32 %v3603_v24, 0.0  ;;  %v9680_v35 = vpop.f32.mrb[6].mxu1  ;;  %v3826_v63 = vmul.f32 %v11962_v6, %v3630_v36 }
 0x2cb   : > { %8500 = vst [vmem:[%s12041_s28 + $0x78] sm:$0xff] %v8424_v9   ;;  %v7181_v21 = vmax.f32 %v7153_v17, 0.0  ;;  %v7154_v33 = vadd.f32 %v9680_v35, %v12015_v3  ;;  %v3629_v10 = vmax.f32 %v3601_v14, 0.0  ;;  %v7020_v45 = vpop.f32.mrb[7].mxu1  ;;  %v3824_v62 = vmul.f32 %v11958_v26, %v3628_v5  ;;  %v12074_v14 = vpop.permute.xlu0 %7303 }
 0x2cc   : > { %8499 = vst [vmem:[%s12041_s28 + $0x70] sm:$0xff] %v8419_v29   ;;  %v7179_v25 = vmax.f32 %v7151_v53, 0.0  ;;  %v3827_v60 = vmul.f32 %v11960_v49, %v3631_v12  ;;  %v7152_v58 = vadd.f32 %v12015_v3, %v7020_v45 }
 0x2cd   : > { %v7182_v2 = vmax.f32 %v7154_v33, 0.0  ;;  %v3825_v13 = vmul.f32 %v11956_v50, %v3629_v10  ;;  %v9287_v52 = vpop.f32.mrb[8].mxu0  ;;  %v7377_v6 = vmul.f32 %v12010_v42, %v7181_v21 }
 0x2ce   : > { %v8364_v23 = vpack.c.bf16 %v3827_v60, %v3826_v63  ;;  %v7180_v19 = vmax.f32 %v7152_v58, 0.0  ;;  %v3606_v8 = vadd.f32 %v9287_v52, %v12015_v3  ;;  %v3482_v44 = vpop.f32.mrb[9].mxu0  ;;  %v7375_v43 = vmul.f32 %v12006_v11, %v7179_v25 }
 0x2cf   : > { %v7378_v49 = vmul.f32 %v12008_v38, %v7182_v2  ;;  %v8359_v36 = vpack.c.bf16 %v3825_v13, %v3824_v62  ;;  %v3604_v24 = vadd.f32 %v12015_v3, %v3482_v44  ;;  %v9288_v26 = vpop.f32.mrb[10].mxu0  ;;  %v12086_v2 = vpop.permute.xlu1 %7318 }
 0x2d0   : > { %8488 = vst [vmem:[%s12041_s28 + $0x18] sm:$0xff] %v8364_v23   ;;  %v7376_v50 = vmul.f32 %v12004_v0, %v7180_v19  ;;  %v3634_v9 = vmax.f32 %v3606_v8, 0.0  ;;  %v9683_v17 = vpop.f32.mrb[8].mxu1  ;;  %v3607_v5 = vadd.f32 %v9288_v26, %v12015_v3  ;;  %v3485_v7 = vpop.f32.mrb[11].mxu0 }
 0x2d1   : > { %v8434_v42 = vpack.c.bf16 %v7378_v49, %v7377_v6  ;;  %8487 = vst [vmem:[%s12041_s28 + $0x10] sm:$0xff] %v8359_v36   ;;  %v7157_v38 = vadd.f32 %v9683_v17, %v12015_v3  ;;  %v3632_v29 = vmax.f32 %v3604_v24, 0.0  ;;  %v7033_v53 = vpop.f32.mrb[9].mxu1  ;;  %v3605_v11 = vadd.f32 %v12015_v3, %v3485_v7  ;;  %v12091_v49 = vpop.permute.xlu0 %7313 }
 0x2d2   : > { %v8429_v12 = vpack.c.bf16 %v7376_v50, %v7375_v43  ;;  %v7155_v0 = vadd.f32 %v12015_v3, %v7033_v53  ;;  %v3635_v35 = vmax.f32 %v3607_v5, 0.0  ;;  %v9684_v21 = vpop.f32.mrb[10].mxu1  ;;  %v3830_v25 = vmul.f32 %v11970_v54, %v3634_v9 }
 0x2d3   : > { %8502 = vst [vmem:[%s12041_s28 + $0x88] sm:$0xff] %v8434_v42   ;;  %v7185_v33 = vmax.f32 %v7157_v38, 0.0  ;;  %v7158_v10 = vadd.f32 %v9684_v21, %v12015_v3  ;;  %v3633_v45 = vmax.f32 %v3605_v11, 0.0  ;;  %v7036_v63 = vpop.f32.mrb[11].mxu1  ;;  %v3828_v13 = vmul.f32 %v11966_v4, %v3632_v29  ;;  %v12104_v11 = vpop.permute.xlu1 %7328 }
 0x2d4   : > { %8501 = vst [vmem:[%s12041_s28 + $0x80] sm:$0xff] %v8429_v12   ;;  %v7183_v60 = vmax.f32 %v7155_v0, 0.0  ;;  %v3831_v58 = vmul.f32 %v11968_v48, %v3635_v35  ;;  %v7156_v62 = vadd.f32 %v12015_v3, %v7036_v63 }
 0x2d5   : > { %v7186_v52 = vmax.f32 %v7158_v10, 0.0  ;;  %v3829_v23 = vmul.f32 %v11964_v18, %v3633_v45  ;;  %v9291_v19 = vpop.f32.mrb[12].mxu0  ;;  %v7381_v48 = vmul.f32 %v12035_v1, %v7185_v33 }
 0x2d6   : > { %v8374_v8 = vpack.c.bf16 %v3831_v58, %v3830_v25  ;;  %v7184_v44 = vmax.f32 %v7156_v62, 0.0  ;;  %v3610_v6 = vadd.f32 %v9291_v19, %v12015_v3  ;;  %v3498_v54 = vpop.f32.mrb[13].mxu0  ;;  %v7379_v43 = vmul.f32 %v12021_v22, %v7183_v60  ;;  %v7324_v25 = vpop.permute.xlu0 %7323 }
 0x2d7   : > { %v7382_v36 = vmul.f32 %v12029_v40, %v7186_v52  ;;  %v8369_v24 = vpack.c.bf16 %v3829_v23, %v3828_v13  ;;  %v3608_v26 = vadd.f32 %v12015_v3, %v3498_v54  ;;  %v9292_v4 = vpop.f32.mrb[14].mxu0 }
 0x2d8   : > { %8490 = vst [vmem:[%s12041_s28 + $0x28] sm:$0xff] %v8374_v8   ;;  %v7380_v18 = vmul.f32 %v12018_v39, %v7184_v44  ;;  %v3638_v50 = vmax.f32 %v3610_v6, 0.0  ;;  %v9687_v9 = vpop.f32.mrb[12].mxu1  ;;  %v3611_v17 = vadd.f32 %v9292_v4, %v12015_v3  ;;  %v3501_v5 = vpop.f32.mrb[15].mxu0 }
 0x2d9   : > { %v8444_v7 = vpack.c.bf16 %v7382_v36, %v7381_v48  ;;  %8489 = vst [vmem:[%s12041_s28 + $0x20] sm:$0xff] %v8369_v24   ;;  %v7161_v40 = vadd.f32 %v9687_v9, %v12015_v3  ;;  %v3636_v1 = vmax.f32 %v3608_v26, 0.0  ;;  %v7049_v42 = vpop.f32.mrb[13].mxu1  ;;  %v3609_v38 = vadd.f32 %v12015_v3, %v3501_v5  ;;  %v12122_v4 = vpop.permute.xlu1 %7338 }
 0x2da   : > { %v8439_v29 = vpack.c.bf16 %v7380_v18, %v7379_v43  ;;  %v7159_v22 = vadd.f32 %v12015_v3, %v7049_v42  ;;  %v3639_v53 = vmax.f32 %v3611_v17, 0.0  ;;  %v9688_v39 = vpop.f32.mrb[14].mxu1  ;;  %v3834_v33 = vmul.f32 %v11978_v57, %v3638_v50  ;;  %v12128_v5 = vpop.permute.xlu0 %7333 }
 0x2db   : > { %8504 = vst [vmem:[%s12041_s28 + $0x98] sm:$0xff] %v8444_v7   ;;  %v7189_v12 = vmax.f32 %v7161_v40, 0.0  ;;  %v7162_v0 = vadd.f32 %v9688_v39, %v12015_v3  ;;  %v3637_v35 = vmax.f32 %v3609_v38, 0.0  ;;  %v7052_v21 = vpop.f32.mrb[15].mxu1  ;;  %v3832_v60 = vmul.f32 %v11974_v31, %v3636_v1 }
 0x2dc   : > { %8503 = vst [vmem:[%s12041_s28 + $0x90] sm:$0xff] %v8439_v29   ;;  %v7187_v10 = vmax.f32 %v7159_v22, 0.0  ;;  %v3835_v45 = vmul.f32 %v11976_v55, %v3639_v53  ;;  %v7160_v63 = vadd.f32 %v12015_v3, %v7052_v21 }
 0x2dd   : > { %v7190_v58 = vmax.f32 %v7162_v0, 0.0  ;;  %v3833_v62 = vmul.f32 %v11972_v41, %v3637_v35  ;;  %v9295_v13 = vpop.f32.mrb[16].mxu0  ;;  %v7385_v57 = vmul.f32 %v12074_v14, %v7189_v12 }
 0x2de   : > { %v8384_v52 = vpack.c.bf16 %v3835_v45, %v3834_v33  ;;  %v7188_v23 = vmax.f32 %v7160_v63, 0.0  ;;  %v3614_v19 = vadd.f32 %v9295_v13, %v12015_v3  ;;  %v3514_v8 = vpop.f32.mrb[17].mxu0  ;;  %v7383_v31 = vmul.f32 %v12054_v15, %v7187_v10  ;;  %v7349_v63 = vpop.permute.xlu1 %7348 }
 0x2df   : > { %v7386_v55 = vmul.f32 %v12065_v27, %v7190_v58  ;;  %v8379_v44 = vpack.c.bf16 %v3833_v62, %v3832_v60  ;;  %v3612_v6 = vadd.f32 %v12015_v3, %v3514_v8  ;;  %v9296_v54 = vpop.f32.mrb[18].mxu0  ;;  %v7344_v8 = vpop.permute.xlu0 %7343 }
 0x2e0   : > { %8492 = vst [vmem:[%s12041_s28 + $0x38] sm:$0xff] %v8384_v52   ;;  %v7384_v41 = vmul.f32 %v12048_v30, %v7188_v23  ;;  %v3642_v48 = vmax.f32 %v3614_v19, 0.0  ;;  %v9691_v36 = vpop.f32.mrb[16].mxu1  ;;  %v3615_v24 = vadd.f32 %v9296_v54, %v12015_v3  ;;  %v3517_v26 = vpop.f32.mrb[19].mxu0 }
 0x2e1   : > { %v8454_v14 = vpack.c.bf16 %v7386_v55, %v7385_v57  ;;  %8491 = vst [vmem:[%s12041_s28 + $0x30] sm:$0xff] %v8379_v44   ;;  %v7165_v27 = vadd.f32 %v9691_v36, %v12015_v3  ;;  %v3640_v43 = vmax.f32 %v3612_v6, 0.0  ;;  %v7065_v18 = vpop.f32.mrb[17].mxu1  ;;  %v3613_v15 = vadd.f32 %v12015_v3, %v3517_v26 }
 0x2e2   : > { %v8449_v50 = vpack.c.bf16 %v7384_v41, %v7383_v31  ;;  %v7163_v30 = vadd.f32 %v12015_v3, %v7065_v18  ;;  %v3643_v9 = vmax.f32 %v3615_v24, 0.0  ;;  %v9692_v17 = vpop.f32.mrb[18].mxu1  ;;  %v3838_v38 = vmul.f32 %v11986_v56, %v3642_v48 }
 0x2e3   : > { %8506 = vst [vmem:[%s12041_s28 + $0xa8] sm:$0xff] %v8454_v14   ;;  %v7193_v7 = vmax.f32 %v7165_v27, 0.0  ;;  %v7166_v40 = vadd.f32 %v9692_v17, %v12015_v3  ;;  %v3641_v1 = vmax.f32 %v3613_v15, 0.0  ;;  %v7068_v42 = vpop.f32.mrb[19].mxu1  ;;  %v3836_v39 = vmul.f32 %v11982_v47, %v3640_v43 }
 0x2e4   : > { %8505 = vst [vmem:[%s12041_s28 + $0xa0] sm:$0xff] %v8449_v50   ;;  %v7191_v29 = vmax.f32 %v7163_v30, 0.0  ;;  %v3839_v22 = vmul.f32 %v11984_v34, %v3643_v9  ;;  %v7164_v53 = vadd.f32 %v12015_v3, %v7068_v42  ;;  %v7359_v30 = vpop.permute.xlu1 %7358 }
 0x2e5   : > { %v7194_v12 = vmax.f32 %v7166_v40, 0.0  ;;  %v3837_v0 = vmul.f32 %v11980_v32, %v3641_v1  ;;  %v9299_v35 = vpop.f32.mrb[20].mxu0  ;;  %v7389_v56 = vmul.f32 %v7324_v25, %v7193_v7 }
 0x2e6   : > { %v8394_v21 = vpack.c.bf16 %v3839_v22, %v3838_v38  ;;  %v7192_v33 = vmax.f32 %v7164_v53, 0.0  ;;  %v3618_v10 = vadd.f32 %v9299_v35, %v12015_v3  ;;  %v3530_v45 = vpop.f32.mrb[21].mxu0  ;;  %v7387_v47 = vmul.f32 %v12091_v49, %v7191_v29 }
 0x2e7   : > { %v7390_v60 = vmul.f32 %v12104_v11, %v7194_v12  ;;  %v8389_v34 = vpack.c.bf16 %v3837_v0, %v3836_v39  ;;  %v3616_v58 = vadd.f32 %v12015_v3, %v3530_v45  ;;  %v9300_v62 = vpop.f32.mrb[22].mxu0 }
 0x2e8   : > { %8494 = vst [vmem:[%s12041_s28 + $0x48] sm:$0xff] %v8394_v21   ;;  %v7388_v32 = vmul.f32 %v12086_v2, %v7192_v33  ;;  %v3646_v13 = vmax.f32 %v3618_v10, 0.0  ;;  %v9695_v52 = vpop.f32.mrb[20].mxu1  ;;  %v3619_v23 = vadd.f32 %v9300_v62, %v12015_v3  ;;  %v3533_v19 = vpop.f32.mrb[23].mxu0 }
 0x2e9   : > { %v8464_v25 = vpack.c.bf16 %v7390_v60, %v7389_v56  ;;  %8493 = vst [vmem:[%s12041_s28 + $0x40] sm:$0xff] %v8389_v34   ;;  %v7169_v11 = vadd.f32 %v9695_v52, %v12015_v3  ;;  %v3644_v57 = vmax.f32 %v3616_v58, 0.0  ;;  %v7081_v55 = vpop.f32.mrb[21].mxu1  ;;  %v3617_v44 = vadd.f32 %v12015_v3, %v3533_v19 }
 0x2ea   : > { %v8459_v49 = vpack.c.bf16 %v7388_v32, %v7387_v47  ;;  %v7167_v6 = vadd.f32 %v12015_v3, %v7081_v55  ;;  %v3647_v2 = vmax.f32 %v3619_v23, 0.0  ;;  %v9696_v54 = vpop.f32.mrb[22].mxu1  ;;  %v3842_v24 = vmul.f32 %v11994_v59, %v3646_v13  ;;  %v7354_v59 = vpop.permute.xlu0 %7353 }
 0x2eb   : > { %8508 = vst [vmem:[%s12041_s28 + $0xb8] sm:$0xff] %v8464_v25   ;;  %v7197_v31 = vmax.f32 %v7169_v11, 0.0  ;;  %v7170_v41 = vadd.f32 %v9696_v54, %v12015_v3  ;;  %v3645_v48 = vmax.f32 %v3617_v44, 0.0  ;;  %v7084_v36 = vpop.f32.mrb[23].mxu1  ;;  %v3840_v43 = vmul.f32 %v11990_v46, %v3644_v57 }
 0x2ec   : > { %8507 = vst [vmem:[%s12041_s28 + $0xb0] sm:$0xff] %v8459_v49   ;;  %v7195_v26 = vmax.f32 %v7167_v6, 0.0  ;;  %v3843_v14 = vmul.f32 %v11992_v51, %v3647_v2  ;;  %v7168_v27 = vadd.f32 %v12015_v3, %v7084_v36 }
 0x2ed   : > { %v7198_v18 = vmax.f32 %v7170_v41, 0.0  ;;  %v3841_v15 = vmul.f32 %v11988_v20, %v3645_v48  ;;  %v9303_v50 = vpop.f32.mrb[24].mxu0  ;;  %v7393_v1 = vmul.f32 %v7344_v8, %v7197_v31  ;;  %v7369_v8 = vpop.permute.xlu1 %7368 }
 0x2ee   : > { %v8404_v9 = vpack.c.bf16 %v3843_v14, %v3842_v24  ;;  %v7196_v17 = vmax.f32 %v7168_v27, 0.0  ;;  %v3622_v7 = vadd.f32 %v9303_v50, %v12015_v3  ;;  %v3546_v40 = vpop.f32.mrb[25].mxu0  ;;  %v7391_v46 = vmul.f32 %v12128_v5, %v7195_v26  ;;  %v7364_v25 = vpop.permute.xlu0 %7363 }
 0x2ef   : > { %v7394_v42 = vmul.f32 %v7349_v63, %v7198_v18  ;;  %v8399_v51 = vpack.c.bf16 %v3841_v15, %v3840_v43  ;;  %v3620_v38 = vadd.f32 %v12015_v3, %v3546_v40  ;;  %v9304_v29 = vpop.f32.mrb[26].mxu0 }
 0x2f0   : > { %8496 = vst [vmem:[%s12041_s28 + $0x58] sm:$0xff] %v8404_v9   ;;  %v7392_v20 = vmul.f32 %v12122_v4, %v7196_v17  ;;  %v3650_v22 = vmax.f32 %v3622_v7, 0.0  ;;  %v9699_v53 = vpop.f32.mrb[24].mxu1  ;;  %v3623_v39 = vadd.f32 %v9304_v29, %v12015_v3  ;;  %v3549_v12 = vpop.f32.mrb[27].mxu0 }
 0x2f1   : > { %v8474_v0 = vpack.c.bf16 %v7394_v42, %v7393_v1  ;;  %8495 = vst [vmem:[%s12041_s28 + $0x50] sm:$0xff] %v8399_v51   ;;  %v7173_v35 = vadd.f32 %v9699_v53, %v12015_v3  ;;  %v3648_v21 = vmax.f32 %v3620_v38, 0.0  ;;  %v7097_v33 = vpop.f32.mrb[25].mxu1  ;;  %v3621_v10 = vadd.f32 %v12015_v3, %v3549_v12 }
 0x2f2   : > { %v8469_v45 = vpack.c.bf16 %v7392_v20, %v7391_v46  ;;  %v7171_v5 = vadd.f32 %v12015_v3, %v7097_v33  ;;  %v3651_v63 = vmax.f32 %v3623_v39, 0.0  ;;  %v9700_v56 = vpop.f32.mrb[26].mxu1  ;;  %v3846_v62 = vmul.f32 %v12002_v61, %v3650_v22 }
 0x2f3   : > { %8510 = vst [vmem:[%s12041_s28 + $0xc8] sm:$0xff] %v8474_v0   ;;  %v7201_v4 = vmax.f32 %v7173_v35, 0.0  ;;  %v7174_v60 = vadd.f32 %v9700_v56, %v12015_v3  ;;  %v3649_v34 = vmax.f32 %v3621_v10, 0.0  ;;  %v7100_v58 = vpop.f32.mrb[27].mxu1  ;;  %v3844_v52 = vmul.f32 %v11998_v28, %v3648_v21 }
 0x2f4   : > { %8509 = vst [vmem:[%s12041_s28 + $0xc0] sm:$0xff] %v8469_v45   ;;  %v7199_v47 = vmax.f32 %v7171_v5, 0.0  ;;  %v3847_v32 = vmul.f32 %v12000_v37, %v3651_v63  ;;  %v7172_v13 = vadd.f32 %v12015_v3, %v7100_v58 }
 0x2f5   : > { %v7202_v23 = vmax.f32 %v7174_v60, 0.0  ;;  %v3845_v19 = vmul.f32 %v11996_v16, %v3649_v34  ;;  %v7397_v55 = vmul.f32 %v7364_v25, %v7201_v4 }
 0x2f6   : > { %v8414_v11 = vpack.c.bf16 %v3847_v32, %v3846_v62  ;;  %v7200_v57 = vmax.f32 %v7172_v13, 0.0  ;;  %v7395_v49 = vmul.f32 %v7354_v59, %v7199_v47 }
 0x2f7   : > { %v7398_v44 = vmul.f32 %v7369_v8, %v7202_v23  ;;  %v8409_v61 = vpack.c.bf16 %v3845_v19, %v3844_v52 }
 0x2f8   : > { %8498 = vst [vmem:[%s12041_s28 + $0x68] sm:$0xff] %v8414_v11   ;;  %v7396_v37 = vmul.f32 %v7359_v30, %v7200_v57 }
 0x2f9   : > { %v8484_v6 = vpack.c.bf16 %v7398_v44, %v7397_v55  ;;  %8497 = vst [vmem:[%s12041_s28 + $0x60] sm:$0xff] %v8409_v61  }
 0x2fa   : > { %v8479_v3 = vpack.c.bf16 %v7396_v37, %v7395_v49 }
 0x2fb   : > { %8512 = vst [vmem:[%s12041_s28 + $0xd8] sm:$0xff] %v8484_v6  }
 0x2fc   : > { %8511 = vst [vmem:[%s12041_s28 + $0xd0] sm:$0xff] %v8479_v3  }
 0x2fd PF: > { %s15_s22 = sadd.s32 1, %s10545_s22   ;;  %s12200_s18 = smov %s10537_s20 }
 0x2fe   : > { %p12_p9 = scmp.ge.s32.totalorder %s15_s22, 6   ;;  %s12201_s19 = smov %s10541_s21 }
 0x2ff   : > { %s12202_s20 = smov %s12205_s23  ;;  %s12203_s21 = smov %s12209_s24 }
 0x300   :  { %14 = sbr.rel (!%p12_p9) target bundleno = 3 (0x3), region = 84 }

// kernel: residual_block.3
= control target key start
LH: loop header
LB: loop body
LE: loop exit
PB: predicated region body
PF: predicated region fallthrough
CT: control target
= control target key end

     0   :  { %s10700_s21 = smov 0   ;;  %s10702_s22 = smov 0   ;;  %s12193_s0 = inlined_call_operand.vmem [shape: bf16[2,896,128], index: 0, kind: input, shape index: {}, may-alias: {0,1}]   ;;  %s12194_s1 = inlined_call_operand.vmem [shape: bf16[2,896,128], index: 1, kind: input, shape index: {}, may-alias: {0,1}]   ;;  %s12195_s2 = inlined_call_operand.vmem [shape: bf16[9,128,128], index: 2, kind: input, shape index: {}]   ;;  %s12196_s3 = inlined_call_operand.vmem [shape: f32[1,128], index: 3, kind: input, shape index: {}]   ;;  %s12197_s4 = inlined_call_operand.vmem [shape: bf16[2,448,128], index: 4, kind: input, shape index: {}]   ;;  %s12198_s5 = inlined_call_operand.vmem [shape: bf16[128,128], index: 5, kind: input, shape index: {}]   ;;  %s12199_s6 = inlined_call_operand.vmem [shape: f32[2,448,128], index: 6, kind: output, shape index: {}]  }
   0x1   :  { %s10704_s23 = smov 0  }
   0x2 LB: > { %s28_s24 = sadd.s32 1, %s10659_s22  ;;  %p7769_p0 = scmp.ge.s32.totalorder %s10663_s23, 1  ;;  %s10663_s23 = sphi %s10704_s23, %s16_s23   ;;  %s10659_s22 = sphi %s10702_s22, %s12201_s22   ;;  %s10655_s21 = sphi %s10700_s21, %s12200_s21  }
   0x3   : > { %p30_p1 = scmp.ge.s32.totalorder %s28_s24, 2  ;;  %p275_p2 = scmp.lt.s32.totalorder %s10663_s23, 3 }
   0x5   : > { %s12203_s24 = smov (%p30_p1, %s28_s24), 0  ;;  %p276_p3 = pnand %p7769_p0, %p275_p2 }
   0x6   : > { %v10284_v0 = vld [vmem:[%s12195_s2 + $0x40] sm:$0xff] (!%p276_p3)   ;;  %p334_p4 = scmp.lt.s32.totalorder (!%p276_p3), %s10655_s21, 1  ;;  %v10286_v2 = vld [vmem:[%s12195_s2 + $0x48] sm:$0xff] (!%p276_p3)   ;;  %v10288_v4 = vld [vmem:[%s12195_s2 + $0x50] sm:$0xff] (!%p276_p3)   ;;  %vm583_vm0 = vsmask.f32 (!%p276_p3), 7424 }
   0x7   : > { %279 = sbr.rel (%p276_p3) target bundleno = 813 (0x32d), region = 44  ;;  %v10285_v1 = vld [vmem:[%s12195_s2 + $0x40] sm:$0xff] (!%p276_p3)   ;;  %8816 = vmatprep.subr.bf16.mxu0 (!%p276_p3), %v10284_v0  ;;  %v10287_v3 = vld [vmem:[%s12195_s2 + $0x48] sm:$0xff] (!%p276_p3)   ;;  %v10289_v5 = vld [vmem:[%s12195_s2 + $0x50] sm:$0xff] (!%p276_p3)   ;;  %vm1135_vm1 = vcmask (!%p276_p3), 1046528  }
   0x8   : > { %9256 = vmatprep.subr.bf16.mxu1 (!%p276_p3), %v10285_v1  ;;  %8817 = vmatpush3.bf16.msra.mxu0 (!%p276_p3), %v10284_v0  ;;  %v10290_v6 = vld [vmem:[%s12195_s2 + $0x58] sm:$0xff] (!%p276_p3)   ;;  %v10292_v8 = vld [vmem:[%s12195_s2 + $0x60] sm:$0xff] (!%p276_p3)   ;;  %v10294_v10 = vld [vmem:[%s12195_s2 + $0x68] sm:$0xff] (!%p276_p3)  }
   0x9   : > { %9257 = vmatpush3.bf16.msra.mxu1 (!%p276_p3), %v10285_v1  ;;  %8818 = vmatprep.subr.bf16.mxu0 (!%p276_p3), %v10286_v2  ;;  %v10291_v7 = vld [vmem:[%s12195_s2 + $0x58] sm:$0xff] (!%p276_p3)   ;;  %v10293_v9 = vld [vmem:[%s12195_s2 + $0x60] sm:$0xff] (!%p276_p3)   ;;  %v10295_v11 = vld [vmem:[%s12195_s2 + $0x68] sm:$0xff] (!%p276_p3)  }
   0xa   : > { %9258 = vmatprep.subr.bf16.mxu1 (!%p276_p3), %v10287_v3  ;;  %v10296_v18 = vld [vmem:[%s12195_s2 + $0x70] sm:$0xff] (!%p276_p3)   ;;  %v10298_v27 = vld [vmem:[%s12195_s2 + $0x78] sm:$0xff] (!%p276_p3)   ;;  %v10305_v41 = vld [vmem:[%s12195_s2] sm:$0xff] (!%p276_p3)  }
   0xb   : > { %v10297_v19 = vld [vmem:[%s12195_s2 + $0x70] sm:$0xff] (!%p276_p3)   ;;  %v10299_v28 = vld [vmem:[%s12195_s2 + $0x78] sm:$0xff] (!%p276_p3)   ;;  %v10307_v44 = vld [vmem:[%s12195_s2] sm:$0xff] (!%p276_p3)  }
   0xc   : > { %8819 = vmatpush3.bf16.msra.mxu0 (!%p276_p3), %v10286_v2  ;;  %v10309_v59 = vld [vmem:[%s12195_s2 + $0x8] sm:$0xff] (!%p276_p3)  }
   0xd   : > { %9259 = vmatpush3.bf16.msra.mxu1 (!%p276_p3), %v10287_v3  ;;  %8820 = vmatprep.subr.bf16.mxu0 (!%p276_p3), %v10288_v4  ;;  %v10311_v2 = vld [vmem:[%s12195_s2 + $0x8] sm:$0xff] (!%p276_p3)  }
   0xe   : > { %s12205_s21 = smov (!%p334_p4, %s10655_s21), 1  ;;  %9260 = vmatprep.subr.bf16.mxu1 %v10289_v5 }
   0xf   : > { %s10745_s17 = smul.u32 448, %s12205_s21 }
  0x10   : > { %8821 = vmatpush3.bf16.msra.mxu0 %v10288_v4 }
  0x11   : > { %9261 = vmatpush3.bf16.msra.mxu1 %v10289_v5  ;;  %8822 = vmatprep.subr.bf16.mxu0 %v10290_v6  ;;  %s10760_s30 = scalar_lea.vmem %s12193_s0, %s10745_s17  ;;  %s8375_s28 = sadd.s32 224, %s10745_s17 }
  0x12   : > { %9262 = vmatprep.subr.bf16.mxu1 %v10291_v7  ;;  %v448_v12 = vld [vmem:[%s10760_s30] sm:$0xf]  ;;  %v449_v13 = vld [vmem:[%s10760_s30 + $0x4] sm:$0xf]  ;;  %v10770_v15 = vld [vmem:[%s10760_s30 + $0x8] sm:$0xff]   ;;  %s10975_s12 = scalar_lea.vmem %s12194_s1, %s8375_s28  ;;  %s10258_s28 = smul.u32 224, %s12205_s21 }
  0x13   : > { %v10767_v14 = vcombine.low %v448_v12, %v449_v13  ;;  %v378_v16 = vld [vmem:[%s10760_s30 + $0x70] sm:$0xff]   ;;  %v380_v17 = vld [vmem:[%s10760_s30 + $0x78] sm:$0xff]   ;;  %v592_v22 = vshll.u32 %v10770_v15, 16  ;;  %v382_v24 = vld [vmem:[%s10760_s30 + $0x80] sm:$0xff]   ;;  %v596_v30 = vshrl.u32 %v10770_v15, 16  ;;  %s12071_s18 = scalar_lea.vmem %s12199_s6, %s10745_s17 }
  0x14   : > { %8823 = vmatpush3.bf16.msra.mxu0 %v10290_v6  ;;  %406 = vst [vmem:[#allocation2] sm:$0xff] %v378_v16   ;;  %408 = vst [vmem:[#allocation2 + $0x8] sm:$0xff] %v380_v17   ;;  %v10784_v23 = vld [vmem:[%s10760_s30 + $0x10] sm:$0xff]   ;;  %v10796_v32 = vld [vmem:[%s10760_s30 + $0x18] sm:$0xff]   ;;  %s11740_s7 = scalar_lea.vmem %s12197_s4, %s10258_s28 }
  0x15   : > { %9263 = vmatpush3.bf16.msra.mxu1 %v10291_v7  ;;  %8824 = vmatprep.subr.bf16.mxu0 %v10292_v8  ;;  %v585_v20 = vshrl.u32 %v10767_v14, 16  ;;  %v587_v21 = vshll.u32 %v10767_v14, 16  ;;  %v594_v26 = vrot.slane %v592_v22, 1  ;;  %410 = vst [vmem:[#allocation2 + $0x10] sm:$0xff] %v382_v24   ;;  %v600_v31 = vshll.u32 %v10784_v23, 16  ;;  %v384_v33 = vld [vmem:[%s10760_s30 + $0x88] sm:$0xff]  }
  0x16   : > { %9264 = vmatprep.subr.bf16.mxu1 %v10293_v9  ;;  %v604_v37 = vshrl.u32 %v10784_v23, 16  ;;  %v608_v38 = vshll.u32 %v10796_v32, 16  ;;  %412 = vst [vmem:[#allocation2 + $0x18] sm:$0xff] %v384_v33   ;;  %v10813_v45 = vld [vmem:[%s10760_s30 + $0x20] sm:$0xff]   ;;  %v386_v57 = vld [vmem:[%s10760_s30 + $0x90] sm:$0xff]   ;;  %v612_v60 = vshrl.u32 %v10796_v32, 16 }
  0x17   : > { %v589_v25 = vrot.slane %v587_v21, 1  ;;  %v598_v42 = vor.u32 %v596_v30, %v594_v26  ;;  %v602_v43 = vrot.slane %v600_v31, 1  ;;  %v616_v61 = vshll.u32 %v10813_v45, 16  ;;  %414 = vst [vmem:[#allocation2 + $0x20] sm:$0xff] %v386_v57   ;;  %v390_v22 = vld [vmem:[%s10760_s30 + $0xa0] sm:$0xff]   ;;  %v10320_v30 = vld [vmem:[%s12195_s2 + $0x18] sm:$0xff]  }
  0x18   : > { %8825 = vmatpush3.bf16.msra.mxu0 %v10292_v8  ;;  %v610_v52 = vrot.slane %v608_v38, 1  ;;  %v10314_v8 = vld [vmem:[%s12195_s2 + $0x10] sm:$0xff]   ;;  %v620_v13 = vshrl.u32 %v10813_v45, 16  ;;  %418 = vst [vmem:[#allocation2 + $0x30] sm:$0xff] %v390_v22  }
  0x19   : > { %9265 = vmatpush3.bf16.msra.mxu1 %v10293_v9  ;;  %8826 = vmatprep.subr.bf16.mxu0 %v10294_v10  ;;  %v590_v29 = vor.u32 %v589_v25, %v585_v20  ;;  %v606_v51 = vor.u32 %v604_v37, %v602_v43  ;;  %v603_v58 = vsel %vm583_vm0, %v598_v42, %v602_v43  ;;  %v10843_v9 = vld [vmem:[%s10760_s30 + $0x28] sm:$0xff]   ;;  %v618_v12 = vrot.slane %v616_v61, 1  ;;  %v10853_v20 = vld [vmem:[%s10760_s30 + $0x30] sm:$0xff]  }
  0x1a   : > { %9266 = vmatprep.subr.bf16.mxu1 %v10295_v11  ;;  %v628_v21 = vshrl.u32 %v10843_v9, 16  ;;  %v392_v37 = vld [vmem:[%s10760_s30 + $0xa8] sm:$0xff]   ;;  %v636_v42 = vshrl.u32 %v10853_v20, 16 }
  0x1b   : > { %v595_v34 = vsel %vm583_vm0, %v590_v29, %v594_v26  ;;  %v4050_v35 = vld [vmem:[#allocation2] sm:$0xf]  ;;  %v4051_v36 = vld [vmem:[#allocation2 + $0x4] sm:$0xf]  ;;  %v10804_v40 = vld [vmem:[#allocation2 + $0x8] sm:$0xff]   ;;  %v611_v3 = vsel %vm583_vm0, %v606_v51, %v610_v52  ;;  %v622_v24 = vor.u32 %v620_v13, %v618_v12  ;;  %v632_v29 = vshll.u32 %v10853_v20, 16 }
  0x1c   : > { %8827 = vmatpush3.bf16.msra.mxu0 %v10294_v10  ;;  %8832 = vmatprep.mubr.bf16.mxu0 %v595_v34  ;;  %v10802_v39 = vcombine.low %v4050_v35, %v4051_v36  ;;  %v4192_v48 = vshll.u32 %v10804_v40, 16  ;;  %v10818_v49 = vld [vmem:[#allocation2 + $0x10] sm:$0xff]   ;;  %v4196_v50 = vshrl.u32 %v10804_v40, 16  ;;  %v388_v10 = vld [vmem:[%s10760_s30 + $0x98] sm:$0xff]   ;;  %420 = vst [vmem:[#allocation2 + $0x38] sm:$0xff] %v392_v37  }
  0x1d   : > { %9267 = vmatpush3.bf16.msra.mxu1 %v10295_v11  ;;  %8828 = vmatprep.subr.bf16.mxu0 %v10296_v18  ;;  %v4200_v55 = vshll.u32 %v10818_v49, 16  ;;  %v4204_v56 = vshrl.u32 %v10818_v49, 16  ;;  %v10830_v1 = vld [vmem:[#allocation2 + $0x18] sm:$0xff]   ;;  %v614_v11 = vor.u32 %v612_v60, %v610_v52  ;;  %416 = vst [vmem:[#allocation2 + $0x28] sm:$0xff] %v388_v10   ;;  %v634_v38 = vrot.slane %v632_v29, 1  ;;  %v394_v51 = vld [vmem:[%s10760_s30 + $0xb0] sm:$0xff]  }
  0x1e   : > { %9268 = vmatprep.subr.bf16.mxu1 %v10297_v19  ;;  %v4185_v46 = vshrl.u32 %v10802_v39, 16  ;;  %v4187_v47 = vshll.u32 %v10802_v39, 16  ;;  %v4194_v54 = vrot.slane %v4192_v48, 1  ;;  %v4208_v7 = vshll.u32 %v10830_v1, 16  ;;  %v10858_v26 = vld [vmem:[#allocation2 + $0x20] sm:$0xff]   ;;  %v10869_v36 = vld [vmem:[%s10760_s30 + $0x38] sm:$0xff]  }
  0x1f   : > { %v4202_v0 = vrot.slane %v4200_v55, 1  ;;  %v4212_v17 = vshrl.u32 %v10830_v1, 16  ;;  %v4216_v33 = vshll.u32 %v10858_v26, 16  ;;  %v4220_v35 = vshrl.u32 %v10858_v26, 16  ;;  %v10880_v48 = vld [vmem:[%s10760_s30 + $0x40] sm:$0xff]   ;;  %v10886_v55 = vld [vmem:[#allocation2 + $0x30] sm:$0xff]  }
  0x20   : > { %8829 = vmatpush3.bf16.msra.mxu0 %v10296_v18  ;;  %v4189_v53 = vrot.slane %v4187_v47, 1  ;;  %v4198_v63 = vor.u32 %v4196_v50, %v4194_v54  ;;  %v4210_v16 = vrot.slane %v4208_v7, 1  ;;  %v10315_v18 = vld [vmem:[%s12195_s2 + $0x10] sm:$0xff]   ;;  %v640_v47 = vshll.u32 %v10869_v36, 16  ;;  %422 = vst [vmem:[#allocation2 + $0x40] sm:$0xff] %v394_v51   ;;  %v10326_v60 = vld [vmem:[%s12195_s2 + $0x20] sm:$0xff]  }
  0x21   : > { %9269 = vmatpush3.bf16.msra.mxu1 %v10297_v19  ;;  %8830 = vmatprep.subr.bf16.mxu0 %v10298_v27  ;;  %v4206_v6 = vor.u32 %v4204_v56, %v4202_v0  ;;  %v624_v19 = vshll.u32 %v10843_v9, 16  ;;  %v4218_v43 = vrot.slane %v4216_v33, 1  ;;  %v644_v50 = vshrl.u32 %v10869_v36, 16  ;;  %v396_v13 = vld [vmem:[%s10760_s30 + $0xb8] sm:$0xff]  }
  0x22   : > { %9270 = vmatprep.subr.bf16.mxu1 %v10299_v28  ;;  %v4190_v62 = vor.u32 %v4189_v53, %v4185_v46  ;;  %v4203_v5 = vsel %vm583_vm0, %v4198_v63, %v4202_v0  ;;  %v4214_v31 = vor.u32 %v4212_v17, %v4210_v16  ;;  %v638_v56 = vor.u32 %v636_v42, %v634_v38  ;;  %v10327_v0 = vld [vmem:[%s12195_s2 + $0x20] sm:$0xff]   ;;  %v10930_v42 = vld [vmem:[%s10760_s30 + $0x58] sm:$0xff]  }
  0x23   : > { %v4211_v25 = vsel %vm583_vm0, %v4206_v6, %v4210_v16  ;;  %v4222_v53 = vor.u32 %v4220_v35, %v4218_v43  ;;  %v4236_v63 = vshrl.u32 %v10886_v55, 16  ;;  %v10904_v10 = vld [vmem:[#allocation2 + $0x38] sm:$0xff]   ;;  %v10910_v16 = vld [vmem:[%s10760_s30 + $0x50] sm:$0xff]   ;;  %424 = vst [vmem:[#allocation2 + $0x48] sm:$0xff] %v396_v13   ;;  %v10333_v35 = vld [vmem:[%s12195_s2 + $0x28] sm:$0xff]   ;;  %v672_v51 = vshll.u32 %v10930_v42, 16 }
  0x24   : > { %8831 = vmatpush3.bf16.msra.mxu0 %v10298_v27  ;;  %v4195_v4 = vsel %vm583_vm0, %v4190_v62, %v4194_v54  ;;  %v626_v27 = vrot.slane %v624_v19, 1  ;;  %v4219_v52 = vsel %vm583_vm0, %v4214_v31, %v4218_v43  ;;  %v4232_v62 = vshll.u32 %v10886_v55, 16 }
  0x25   : > { %9271 = vmatpush3.bf16.msra.mxu1 %v10299_v28  ;;  %8860 = vmatprep.subr.bf16.mxu0 %v10305_v41  ;;  %v619_v28 = vsel %vm583_vm0, %v614_v11, %v618_v12  ;;  %v652_v11 = vshrl.u32 %v10880_v48, 16  ;;  %v4240_v19 = vshll.u32 %v10904_v10, 16  ;;  %v664_v33 = vshll.u32 %v10910_v16, 16 }
  0x26   : > { %9300 = vmatprep.subr.bf16.mxu1 %v10307_v44  ;;  %9272 = vmatprep.mubr.bf16.mxu1 %v4195_v4  ;;  %v627_v34 = vsel %vm583_vm0, %v622_v24, %v626_v27  ;;  %v630_v46 = vor.u32 %v628_v21, %v626_v27  ;;  %v10900_v4 = vld [vmem:[%s10760_s30 + $0x48] sm:$0xff]   ;;  %v4234_v7 = vrot.slane %v4232_v62, 1  ;;  %v4244_v21 = vshrl.u32 %v10904_v10, 16 }
  0x27   : > { %8833 = vmatmul.mubr.bf16.vlgmr.msra.gmra.mrb[0].mxu0 %v603_v58  ;;  %v642_v58 = vrot.slane %v640_v47, 1  ;;  %v656_v12 = vshll.u32 %v10900_v4, 16  ;;  %v10915_v24 = vld [vmem:[#allocation2 + $0x40] sm:$0xff]   ;;  %v660_v29 = vshrl.u32 %v10900_v4, 16  ;;  %v668_v47 = vshrl.u32 %v10910_v16, 16 }
  0x28   : > { %8861 = vmatpush3.bf16.msra.mxu0 %v10305_v41  ;;  %9273 = vmatmul.mubr.bf16.vlgmr.msra.gmra.mrb[0].mxu1 %v4203_v5  ;;  %v10321_v41 = vld [vmem:[%s12195_s2 + $0x18] sm:$0xff]   ;;  %v4248_v31 = vshll.u32 %v10915_v24, 16  ;;  %v676_v13 = vshrl.u32 %v10930_v42, 16 }
  0x29   : > { %8836 = vmatprep.mubr.bf16.mxu0 %v611_v3  ;;  %9301 = vmatpush3.bf16.msra.mxu1 %v10307_v44  ;;  %v10876_v44 = vld [vmem:[#allocation2 + $0x28] sm:$0xff]   ;;  %v646_v22 = vor.u32 %v644_v50, %v642_v58 }
  0x2a   : > { %8862 = vmatprep.subr.bf16.mxu0 %v10309_v59  ;;  %9302 = vmatprep.subr.bf16.mxu1 %v10311_v2  ;;  %v4224_v54 = vshll.u32 %v10876_v44, 16  ;;  %v4228_v57 = vshrl.u32 %v10876_v44, 16 }
  0x2b   : > { %9276 = vmatprep.mubr.bf16.mxu1 %v4211_v25  ;;  %v4242_v25 = vrot.slane %v4240_v19, 1 }
  0x2c   : > { %8863 = vmatpush3.bf16.msra.mxu0 %v10309_v59  ;;  %v648_v59 = vshll.u32 %v10880_v48, 16  ;;  %v4226_v61 = vrot.slane %v4224_v54, 1 }
  0x2d   : > { %8864 = vmatprep.subr.bf16.mxu0 %v10314_v8  ;;  %9303 = vmatpush3.bf16.msra.mxu1 %v10311_v2  ;;  %v635_v2 = vsel %vm583_vm0, %v630_v46, %v634_v38  ;;  %v4246_v38 = vor.u32 %v4244_v21, %v4242_v25  ;;  %v4250_v46 = vrot.slane %v4248_v31, 1  ;;  %v10978_v31 = vld [vmem:[%s10760_s30 + $0x70] ss:$0 sps:$4 sm:$0x11]  }
  0x2e   : > { %9304 = vmatprep.subr.bf16.mxu1 %v10315_v18  ;;  %v650_v3 = vrot.slane %v648_v59, 1  ;;  %v4227_v5 = vsel %vm583_vm0, %v4222_v53, %v4226_v61  ;;  %v4230_v6 = vor.u32 %v4228_v57, %v4226_v61  ;;  %v10937_v53 = vld [vmem:[#allocation2 + $0x48] sm:$0xff]   ;;  %v674_v57 = vrot.slane %v672_v51, 1  ;;  %v402_v59 = vld [vmem:[%s10760_s30 + $0xd0] sm:$0xff]  }
  0x2f   : > { %8837 = vmatmul.mubr.bf16.gmra.mrb[4].mxu0 %v619_v28  ;;  %v658_v28 = vrot.slane %v656_v12, 1  ;;  %v4251_v54 = vsel %vm583_vm0, %v4246_v38, %v4250_v46  ;;  %v4256_v61 = vshll.u32 %v10937_v53, 16  ;;  %430 = vst [vmem:[#allocation2 + $0x60] sm:$0xff] %v402_v59   ;;  %v10346_v59 = vld [vmem:[%s12195_s2 + $0x80] sm:$0xff]  }
  0x30   : > { %8840 = vmatprep.mubr.bf16.mxu0 %v627_v34  ;;  %8865 = vmatpush3.bf16.msra.mxu0 %v10314_v8  ;;  %v643_v8 = vsel %vm583_vm0, %v638_v56, %v642_v58  ;;  %v4235_v17 = vsel %vm583_vm0, %v4230_v6, %v4234_v7  ;;  %v654_v27 = vor.u32 %v652_v11, %v650_v3  ;;  %v10332_v34 = vld [vmem:[%s12195_s2 + $0x28] sm:$0xff]   ;;  %v666_v56 = vrot.slane %v664_v33, 1  ;;  %v10942_v58 = vld [vmem:[%s10760_s30 + $0x60] sm:$0xff]   ;;  %v10344_v33 = vld [vmem:[%s12195_s2 + $0x38] sm:$0xff]  }
  0x31   : > { %8866 = vmatprep.subr.bf16.mxu0 %v10320_v30  ;;  %9277 = vmatmul.mubr.bf16.gmra.mrb[4].mxu1 %v4219_v52  ;;  %v651_v43 = vsel %vm583_vm0, %v646_v22, %v650_v3  ;;  %v400_v52 = vld [vmem:[%s10760_s30 + $0xc8] sm:$0xff]   ;;  %v662_v62 = vor.u32 %v660_v29, %v658_v28  ;;  %v680_v6 = vshll.u32 %v10942_v58, 16 }
  0x32   : > { %9305 = vmatpush3.bf16.msra.mxu1 %v10315_v18  ;;  %9280 = vmatprep.mubr.bf16.mxu1 %v4227_v5  ;;  %v4238_v18 = vor.u32 %v4236_v63, %v4234_v7  ;;  %v659_v50 = vsel %vm583_vm0, %v654_v27, %v658_v28  ;;  %428 = vst [vmem:[#allocation2 + $0x58] sm:$0xff] %v400_v52   ;;  %v4260_v63 = vshrl.u32 %v10937_v53, 16  ;;  %v4258_v7 = vrot.slane %v4256_v61, 1 }
  0x33   : > { %9306 = vmatprep.subr.bf16.mxu1 %v10321_v41  ;;  %v670_v5 = vor.u32 %v668_v47, %v666_v56  ;;  %v667_v19 = vsel %vm583_vm0, %v662_v62, %v666_v56  ;;  %v434_v47 = vld [vmem:[%s10975_s12] sm:$0xf]  ;;  %v10345_v56 = vld [vmem:[%s12195_s2 + $0x38] sm:$0xff]  }
  0x34   : > { %8867 = vmatpush3.bf16.msra.mxu0 %v10320_v30  ;;  %v398_v30 = vld [vmem:[%s10760_s30 + $0xc0] sm:$0xff]   ;;  %v4243_v37 = vsel %vm583_vm0, %v4238_v18, %v4242_v25  ;;  %v4262_v21 = vor.u32 %v4260_v63, %v4258_v7  ;;  %v404_v25 = vld [vmem:[%s10760_s30 + $0xd8] sm:$0xff]   ;;  %441 = vst [vmem:[#allocation2 + $0x70] sm:$0xf] %v434_v47 }
  0x35   : > { %8868 = vmatprep.subr.bf16.mxu0 %v10326_v60  ;;  %426 = vst [vmem:[#allocation2 + $0x50] sm:$0xff] %v398_v30   ;;  %v675_v28 = vsel %vm583_vm0, %v670_v5, %v674_v57  ;;  %432 = vst [vmem:[#allocation2 + $0x68] sm:$0xff] %v404_v25   ;;  %v682_v30 = vrot.slane %v680_v6, 1  ;;  %v10347_v63 = vld [vmem:[%s12195_s2 + $0x80] sm:$0xff]  }
  0x36   : > { %9307 = vmatpush3.bf16.msra.mxu1 %v10321_v41  ;;  %v4252_v41 = vshrl.u32 %v10915_v24, 16  ;;  %v10985_v38 = vld [vmem:[#allocation2 + $0x60] sm:$0xff]  }
  0x37   : > { %8841 = vmatmul.mubr.bf16.gmra.mrb[8].mxu0 %v635_v2  ;;  %9308 = vmatprep.subr.bf16.mxu1 %v10327_v0  ;;  %v10339_v2 = vld [vmem:[%s12195_s2 + $0x30] sm:$0xff]   ;;  %v4280_v51 = vshll.u32 %v10985_v38, 16  ;;  %v10625_v47 = vld [vmem:[#allocation2 + $0x4] sm:$0xf] }
  0x38   : > { %8844 = vmatprep.mubr.bf16.mxu0 %v643_v8  ;;  %8869 = vmatpush3.bf16.msra.mxu0 %v10326_v60  ;;  %v4254_v60 = vor.u32 %v4252_v41, %v4250_v46  ;;  %v10957_v8 = vld [vmem:[%s10760_s30 + $0x68] sm:$0xff]   ;;  %v678_v41 = vor.u32 %v676_v13, %v674_v57  ;;  %v4284_v57 = vshrl.u32 %v10985_v38, 16 }
  0x39   : > { %9281 = vmatmul.mubr.bf16.gmra.mrb[8].mxu1 %v4235_v17  ;;  %8870 = vmatprep.subr.bf16.mxu0 %v10332_v34  ;;  %v684_v17 = vshrl.u32 %v10942_v58, 16  ;;  %v688_v22 = vshll.u32 %v10957_v8, 16  ;;  %v10968_v29 = vld [vmem:[#allocation2 + $0x58] sm:$0xff]   ;;  %v4282_v62 = vrot.slane %v4280_v51, 1  ;;  %v692_v5 = vshrl.u32 %v10957_v8, 16  ;;  %v10626_v51 = vld [vmem:[%s10760_s30 + $0x8] sm:$0xff]  }
  0x3a   : > { %9309 = vmatpush3.bf16.msra.mxu1 %v10327_v0  ;;  %9284 = vmatprep.mubr.bf16.mxu1 %v4243_v37  ;;  %v10338_v0 = vld [vmem:[%s12195_s2 + $0x30] sm:$0xff]   ;;  %v4259_v18 = vsel %vm583_vm0, %v4254_v60, %v4258_v7  ;;  %v4272_v37 = vshll.u32 %v10968_v29, 16 }
  0x3b   : > { %9310 = vmatprep.subr.bf16.mxu1 %v10333_v35  ;;  %v690_v46 = vrot.slane %v688_v22, 1  ;;  %v686_v52 = vor.u32 %v684_v17, %v682_v30  ;;  %v4286_v7 = vor.u32 %v4284_v57, %v4282_v62 }
  0x3c   : > { %8871 = vmatpush3.bf16.msra.mxu0 %v10332_v34  ;;  %v10953_v3 = vld [vmem:[#allocation2 + $0x50] sm:$0xff]  }
  0x3d   : > { %8872 = vmatprep.subr.bf16.mxu0 %v10338_v0  ;;  %v4264_v11 = vshll.u32 %v10953_v3, 16  ;;  %v4268_v12 = vshrl.u32 %v10953_v3, 16  ;;  %v691_v6 = vsel %vm583_vm0, %v686_v52, %v690_v46 }
  0x3e   : > { %9311 = vmatpush3.bf16.msra.mxu1 %v10333_v35 }
  0x3f   : > { %8845 = vmatmul.mubr.bf16.gmra.mrb[12].mxu0 %v651_v43  ;;  %9312 = vmatprep.subr.bf16.mxu1 %v10339_v2  ;;  %v4266_v27 = vrot.slane %v4264_v11, 1  ;;  %v4276_v43 = vshrl.u32 %v10968_v29, 16 }
  0x40   : > { %8848 = vmatprep.mubr.bf16.mxu0 %v659_v50  ;;  %8873 = vmatpush3.bf16.msra.mxu0 %v10338_v0  ;;  %v4274_v50 = vrot.slane %v4272_v37, 1  ;;  %v683_v0 = vsel %vm583_vm0, %v678_v41, %v682_v30  ;;  %v10364_v37 = vld [vmem:[%s12195_s2 + $0xc0] sm:$0xff]  }
  0x41   : > { %9285 = vmatmul.mubr.bf16.gmra.mrb[12].mxu1 %v4251_v54  ;;  %v4267_v34 = vsel %vm583_vm0, %v4262_v21, %v4266_v27  ;;  %v4270_v35 = vor.u32 %v4268_v12, %v4266_v27  ;;  %8874 = vmatprep.subr.bf16.mxu0 %v10344_v33  ;;  %v696_v54 = vshll.u32 %v10978_v31, 16  ;;  %v11010_v21 = vld [vmem:[#allocation2 + $0x70] ss:$0 sps:$4 sm:$0x11]   ;;  %v10624_v41 = vld [vmem:[%s10760_s30 + $0x4] sm:$0xf] }
  0x42   : > { %9313 = vmatpush3.bf16.msra.mxu1 %v10339_v2  ;;  %9288 = vmatprep.mubr.bf16.mxu1 %v4259_v18  ;;  %v4278_v61 = vor.u32 %v4276_v43, %v4274_v50  ;;  %v11003_v2 = vld [vmem:[#allocation2 + $0x68] sm:$0xff]   ;;  %v4296_v25 = vshll.u32 %v11010_v21, 16 }
  0x43   : > { %v4275_v60 = vsel %vm583_vm0, %v4270_v35, %v4274_v50  ;;  %9314 = vmatprep.subr.bf16.mxu1 %v10345_v56  ;;  %v4288_v11 = vshll.u32 %v11003_v2, 16  ;;  %v698_v12 = vrot.slane %v696_v54, 1  ;;  %v4292_v13 = vshrl.u32 %v11003_v2, 16  ;;  %v10349_v35 = vld [vmem:[%s12195_s2 + $0x88] sm:$0xff]  }
  0x44   : > { %8875 = vmatpush3.bf16.msra.mxu0 %v10344_v33  ;;  %v4283_v17 = vsel %vm583_vm0, %v4278_v61, %v4282_v62  ;;  %v4298_v30 = vrot.slane %v4296_v25, 1  ;;  %v10627_v54 = vld [vmem:[#allocation2 + $0x8] sm:$0xff]   ;;  %v10629_v62 = vld [vmem:[%s10760_s30 + $0x18] sm:$0xff]   ;;  %v10632_v25 = vld [vmem:[%s10760_s30 + $0x20] sm:$0xff]  }
  0x45   : > { %8904 = vmatprep.subr.bf16.mxu0 %v10346_v59  ;;  %v4290_v18 = vrot.slane %v4288_v11, 1 }
  0x46   : > { %9315 = vmatpush3.bf16.msra.mxu1 %v10345_v56  ;;  %v4735_v56 = vrot.slane %v10627_v54, 1  ;;  %v4749_v54 = vrot.slane %v10915_v24, 1 }
  0x47   : > { %8849 = vmatmul.mubr.bf16.gmra.mrb[16].mxu0 %v667_v19  ;;  %9344 = vmatprep.subr.bf16.mxu1 %v10347_v63  ;;  %v694_v19 = vor.u32 %v692_v5, %v690_v46  ;;  %v4291_v22 = vsel %vm583_vm0, %v4286_v7, %v4290_v18  ;;  %v4294_v27 = vor.u32 %v4292_v13, %v4290_v18  ;;  %v4714_v46 = vld [vmem:[#allocation2] sm:$0xe]  ;;  %v10631_v7 = vld [vmem:[#allocation2 + $0x18] sm:$0xff]   ;;  %v10366_v13 = vld [vmem:[%s12195_s2 + $0xc8] sm:$0xff]  }
  0x48   : > { %8852 = vmatprep.mubr.bf16.mxu0 %v675_v28  ;;  %v8136_v50 = vcombine.low %v4714_v46, %v10625_v47  ;;  %v4739_v11 = vrot.slane %v10631_v7, 1  ;;  %v10374_v46 = vld [vmem:[%s12195_s2 + $0xe8] sm:$0xff]   ;;  %v10637_v47 = vld [vmem:[%s10760_s30 + $0x40] sm:$0xff]   ;;  %v4753_v7 = vrot.slane %v10953_v3, 1 }
  0x49   : > { %9289 = vmatmul.mubr.bf16.gmra.mrb[16].mxu1 %v4267_v34  ;;  %v699_v28 = vsel %vm583_vm0, %v694_v19, %v698_v12  ;;  %v4299_v33 = vsel %vm583_vm0, %v4294_v27, %v4298_v30  ;;  %v10348_v34 = vld [vmem:[%s12195_s2 + $0x88] sm:$0xff]   ;;  %v1143_v27 = vrot.slane %v10632_v25, 1  ;;  %v4759_v25 = vrot.slane %v11003_v2, 1 }
  0x4a   : > { %9292 = vmatprep.mubr.bf16.mxu1 %v4275_v60  ;;  %v4734_v52 = vrot.slane %v8136_v50, 1  ;;  %v10628_v60 = vld [vmem:[%s10760_s30 + $0x10] sm:$0xff]   ;;  %v10633_v30 = vld [vmem:[%s10760_s30 + $0x28] sm:$0xff]   ;;  %v1151_v50 = vrot.slane %v10637_v47, 1  ;;  %v10405_v47 = vld [vmem:[%s12195_s2 + $0x120] sm:$0xff]  }
  0x4b   : > { %v1139_v61 = vrot.slane %v10628_v60, 1 }
  0x4f   : > { %8853 = vmatmul.mubr.bf16.gmra.mrb[20].mxu0 %v683_v0  ;;  %v10630_v0 = vld [vmem:[#allocation2 + $0x10] sm:$0xff]  }
  0x50   : > { %8856 = vmatprep.mubr.bf16.mxu0 %v691_v6  ;;  %v4737_v5 = vrot.slane %v10630_v0, 1  ;;  %v10379_v0 = vld [vmem:[%s12195_s2 + $0xf8] sm:$0xff]  }
  0x51   : > { %9293 = vmatmul.mubr.bf16.gmra.mrb[20].mxu1 %v4283_v17  ;;  %v435_v17 = vld [vmem:[%s10975_s12 + $0x4] sm:$0xff]  }
  0x52   : > { %9296 = vmatprep.mubr.bf16.mxu1 %v4291_v22  ;;  %v4738_v18 = vsel %vm1135_vm1, %v4735_v56, %v4737_v5  ;;  %442 = vst [vmem:[#allocation2 + $0x74] sm:$0xff] %v435_v17   ;;  %v4740_v19 = vsel %vm1135_vm1, %v4737_v5, %v4739_v11  ;;  %v10367_v22 = vld [vmem:[%s12195_s2 + $0xc8] sm:$0xff]   ;;  %v1157_v5 = vrot.slane %v10930_v42, 1 }
  0x57   : > { %8857 = vmatmul.mubr.bf16.gmra.mrb[24].mxu0 %v699_v28  ;;  %v10368_v28 = vld [vmem:[%s12195_s2 + $0xd0] sm:$0xff]  }
  0x58   : > { %8876 = vmatprep.mubr.bf16.mxu0 %v10767_v14  ;;  %v10350_v14 = vld [vmem:[%s12195_s2 + $0x90] sm:$0xff]  }
  0x59   : > { %9297 = vmatmul.mubr.bf16.gmra.mrb[24].mxu1 %v4299_v33  ;;  %v1145_v33 = vrot.slane %v10633_v30, 1 }
  0x5a   : > { %9316 = vmatprep.mubr.bf16.mxu1 %v10802_v39  ;;  %v10353_v39 = vld [vmem:[%s12195_s2 + $0x98] sm:$0xff]  }
  0x5f   : > { %8877 = vmatmul.mubr.bf16.vlgmr.msra.gmra.mrb[0].mxu0 %v10770_v15  ;;  %v10351_v15 = vld [vmem:[%s12195_s2 + $0x90] sm:$0xff]  }
  0x60   : > { %8905 = vmatpush3.bf16.msra.mxu0 %v10346_v59  ;;  %8880 = vmatprep.mubr.bf16.mxu0 %v10784_v23  ;;  %v10352_v23 = vld [vmem:[%s12195_s2 + $0x98] sm:$0xff]   ;;  %v4736_v59 = vsel %vm1135_vm1, %v4734_v52, %v4735_v56  ;;  %v10376_v52 = vld [vmem:[%s12195_s2 + $0xf0] sm:$0xff]  }
  0x61   : > { %8906 = vmatprep.subr.bf16.mxu0 %v10348_v34  ;;  %9317 = vmatmul.mubr.bf16.vlgmr.msra.gmra.mrb[0].mxu1 %v10804_v40  ;;  %v10354_v40 = vld [vmem:[%s12195_s2 + $0xa0] sm:$0xff]  }
  0x62   : > { %9345 = vmatpush3.bf16.msra.mxu1 %v10347_v63  ;;  %9320 = vmatprep.mubr.bf16.mxu1 %v10818_v49  ;;  %v10357_v49 = vld [vmem:[%s12195_s2 + $0xa8] sm:$0xff]   ;;  %v1141_v63 = vrot.slane %v10629_v62, 1  ;;  %v10639_v62 = vld [vmem:[%s10760_s30 + $0x50] sm:$0xff]  }
  0x63   : > { %9346 = vmatprep.subr.bf16.mxu1 %v10349_v35 }
  0x64   : > { %8907 = vmatpush3.bf16.msra.mxu0 %v10348_v34  ;;  %v1142_v12 = vsel %vm1135_vm1, %v1139_v61, %v1141_v63  ;;  %v10634_v34 = vld [vmem:[#allocation2 + $0x20] sm:$0xff]  }
  0x65   : > { %8908 = vmatprep.subr.bf16.mxu0 %v10350_v14 }
  0x66   : > { %9347 = vmatpush3.bf16.msra.mxu1 %v10349_v35  ;;  %v4741_v35 = vrot.slane %v10634_v34, 1  ;;  %v10381_v34 = vld [vmem:[#allocation2 + $0xc] sm:$0xff]  }
  0x67   : > { %8881 = vmatmul.mubr.bf16.gmra.mrb[4].mxu0 %v10796_v32  ;;  %9348 = vmatprep.subr.bf16.mxu1 %v10351_v15  ;;  %v10355_v32 = vld [vmem:[%s12195_s2 + $0xa0] sm:$0xff]  }
  0x68   : > { %8884 = vmatprep.mubr.bf16.mxu0 %v10813_v45  ;;  %8909 = vmatpush3.bf16.msra.mxu0 %v10350_v14  ;;  %v10356_v45 = vld [vmem:[%s12195_s2 + $0xa8] sm:$0xff]   ;;  %v1144_v14 = vsel %vm1135_vm1, %v1141_v63, %v1143_v27  ;;  %v1155_v63 = vrot.slane %v10639_v62, 1 }
  0x69   : > { %9321 = vmatmul.mubr.bf16.gmra.mrb[4].mxu1 %v10830_v1  ;;  %8910 = vmatprep.subr.bf16.mxu0 %v10352_v23  ;;  %v10358_v1 = vld [vmem:[%s12195_s2 + $0xb0] sm:$0xff]  }
  0x6a   : > { %9324 = vmatprep.mubr.bf16.mxu1 %v10858_v26  ;;  %9349 = vmatpush3.bf16.msra.mxu1 %v10351_v15  ;;  %v10361_v26 = vld [vmem:[%s12195_s2 + $0xb8] sm:$0xff]   ;;  %v10369_v15 = vld [vmem:[%s12195_s2 + $0xd0] sm:$0xff]  }
  0x6b   : > { %9350 = vmatprep.subr.bf16.mxu1 %v10353_v39  ;;  %v10406_v62 = vld [vmem:[%s10760_s30 + $0x4c] sm:$0xff]  }
  0x6c   : > { %8911 = vmatpush3.bf16.msra.mxu0 %v10352_v23  ;;  %v4743_v23 = vrot.slane %v10876_v44, 1 }
  0x6d   : > { %8912 = vmatprep.subr.bf16.mxu0 %v10354_v40 }
  0x6e   : > { %9351 = vmatpush3.bf16.msra.mxu1 %v10353_v39  ;;  %v1146_v39 = vsel %vm1135_vm1, %v1143_v27, %v1145_v33 }
  0x6f   : > { %8885 = vmatmul.mubr.bf16.gmra.mrb[8].mxu0 %v10843_v9  ;;  %9352 = vmatprep.subr.bf16.mxu1 %v10355_v32  ;;  %v10359_v9 = vld [vmem:[%s12195_s2 + $0xb0] sm:$0xff]  }
  0x70   : > { %8888 = vmatprep.mubr.bf16.mxu0 %v10853_v20  ;;  %8913 = vmatpush3.bf16.msra.mxu0 %v10354_v40  ;;  %v10360_v20 = vld [vmem:[%s12195_s2 + $0xb8] sm:$0xff]  }
  0x71   : > { %9325 = vmatmul.mubr.bf16.gmra.mrb[8].mxu1 %v10876_v44  ;;  %8914 = vmatprep.subr.bf16.mxu0 %v10356_v45  ;;  %v10370_v40 = vld [vmem:[%s12195_s2 + $0xd8] sm:$0xff]  }
  0x72   : > { %9328 = vmatprep.mubr.bf16.mxu1 %v10886_v55  ;;  %9353 = vmatpush3.bf16.msra.mxu1 %v10355_v32  ;;  %v4742_v32 = vsel %vm1135_vm1, %v4739_v11, %v4741_v35  ;;  %v10371_v44 = vld [vmem:[%s12195_s2 + $0xd8] sm:$0xff]  }
  0x73   : > { %9354 = vmatprep.subr.bf16.mxu1 %v10357_v49 }
  0x74   : > { %8915 = vmatpush3.bf16.msra.mxu0 %v10356_v45  ;;  %v4744_v45 = vsel %vm1135_vm1, %v4741_v35, %v4743_v23  ;;  %v10382_v35 = vld [vmem:[%s10760_s30 + $0x14] sm:$0xff]  }
  0x75   : > { %8916 = vmatprep.subr.bf16.mxu0 %v10358_v1 }
  0x76   : > { %9355 = vmatpush3.bf16.msra.mxu1 %v10357_v49  ;;  %v10635_v49 = vld [vmem:[%s10760_s30 + $0x30] sm:$0xff]  }
  0x77   : > { %8889 = vmatmul.mubr.bf16.gmra.mrb[12].mxu0 %v10869_v36  ;;  %9356 = vmatprep.subr.bf16.mxu1 %v10359_v9  ;;  %v10365_v36 = vld [vmem:[%s12195_s2 + $0xc0] sm:$0xff]  }
  0x78   : > { %8892 = vmatprep.mubr.bf16.mxu0 %v10880_v48  ;;  %8917 = vmatpush3.bf16.msra.mxu0 %v10358_v1  ;;  %v1114_v48 = vld [vmem:[%s10760_s30] sm:$0xe]  ;;  %v1147_v1 = vrot.slane %v10635_v49, 1  ;;  %v10394_v49 = vld [vmem:[%s10760_s30 + $0x2c] sm:$0xff]  }
  0x79   : > { %9329 = vmatmul.mubr.bf16.gmra.mrb[12].mxu1 %v10904_v10  ;;  %8918 = vmatprep.subr.bf16.mxu0 %v10360_v20  ;;  %v7837_v43 = vcombine.low %v1114_v48, %v10624_v41  ;;  %v4747_v48 = vrot.slane %v10904_v10, 1  ;;  %v10373_v41 = vld [vmem:[%s12195_s2 + $0xe0] sm:$0xff]  }
  0x7a   : > { %9332 = vmatprep.mubr.bf16.mxu1 %v10915_v24  ;;  %9357 = vmatpush3.bf16.msra.mxu1 %v10359_v9  ;;  %v10636_v9 = vld [vmem:[%s10760_s30 + $0x38] sm:$0xff]  }
  0x7b   : > { %9358 = vmatprep.subr.bf16.mxu1 %v10361_v26  ;;  %v4750_v24 = vsel %vm1135_vm1, %v4747_v48, %v4749_v54 }
  0x7c   : > { %8919 = vmatpush3.bf16.msra.mxu0 %v10360_v20  ;;  %v1149_v20 = vrot.slane %v10636_v9, 1  ;;  %v10391_v9 = vld [vmem:[#allocation2 + $0x24] sm:$0xff]  }
  0x7d   : > { %8948 = vmatprep.subr.bf16.mxu0 %v10364_v37 }
  0x7e   : > { %9359 = vmatpush3.bf16.msra.mxu1 %v10361_v26  ;;  %v10372_v26 = vld [vmem:[%s12195_s2 + $0xe0] sm:$0xff]   ;;  %v1152_v56 = vsel %vm1135_vm1, %v1149_v20, %v1151_v50 }
  0x7f   : > { %8893 = vmatmul.mubr.bf16.gmra.mrb[16].mxu0 %v10900_v4  ;;  %9388 = vmatprep.subr.bf16.mxu1 %v10365_v36  ;;  %v1136_v4 = vrot.slane %v7837_v43, 1  ;;  %v1150_v43 = vsel %vm1135_vm1, %v1147_v1, %v1149_v20  ;;  %v10395_v20 = vld [vmem:[#allocation2 + $0x2c] sm:$0xff]  }
  0x80   : > { %8896 = vmatprep.mubr.bf16.mxu0 %v10910_v16  ;;  %v1137_v16 = vrot.slane %v10626_v51, 1  ;;  %v10638_v51 = vld [vmem:[%s10760_s30 + $0x48] sm:$0xff]  }
  0x81   : > { %9333 = vmatmul.mubr.bf16.gmra.mrb[16].mxu1 %v10937_v53 }
  0x82   : > { %9336 = vmatprep.mubr.bf16.mxu1 %v10953_v3  ;;  %v1138_v57 = vsel %vm1135_vm1, %v1136_v4, %v1137_v16  ;;  %v1140_v6 = vsel %vm1135_vm1, %v1137_v16, %v1139_v61  ;;  %v10375_v4 = vld [vmem:[%s12195_s2 + $0xe8] sm:$0xff]   ;;  %v1153_v16 = vrot.slane %v10638_v51, 1  ;;  %v10378_v61 = vld [vmem:[%s12195_s2 + $0xf8] sm:$0xff]  }
  0x84   : > { %v1154_v60 = vsel %vm1135_vm1, %v1151_v50, %v1153_v16  ;;  %v1156_v11 = vsel %vm1135_vm1, %v1153_v16, %v1155_v63  ;;  %v10397_v16 = vld [vmem:[#allocation2 + $0x34] sm:$0xff]  }
  0x87   : > { %8897 = vmatmul.mubr.bf16.gmra.mrb[20].mxu0 %v10930_v42  ;;  %v10385_v42 = vld [vmem:[%s12195_s2 + $0x100] sm:$0xff]  }
  0x88   : > { %8900 = vmatprep.mubr.bf16.mxu0 %v10942_v58 }
  0x89   : > { %9337 = vmatmul.mubr.bf16.gmra.mrb[20].mxu1 %v10968_v29 }
  0x8a   : > { %9340 = vmatprep.mubr.bf16.mxu1 %v10985_v38 }
  0x8f   : > { %8901 = vmatmul.mubr.bf16.gmra.mrb[24].mxu0 %v10957_v8 }
  0x90   : > { %8920 = vmatprep.mubr.bf16.mxu0 %v1138_v57  ;;  %v4751_v57 = vrot.slane %v10937_v53, 1 }
  0x91   : > { %9341 = vmatmul.mubr.bf16.gmra.mrb[24].mxu1 %v11003_v2  ;;  %v10380_v2 = vld [vmem:[%s10760_s30 + $0xc] sm:$0xff]  }
  0x92   : > { %9360 = vmatprep.mubr.bf16.mxu1 %v4736_v59  ;;  %v10377_v59 = vld [vmem:[%s12195_s2 + $0xf0] sm:$0xff]   ;;  %v4752_v53 = vsel %vm1135_vm1, %v4749_v54, %v4751_v57  ;;  %v4754_v17 = vsel %vm1135_vm1, %v4751_v57, %v4753_v7  ;;  %v10401_v54 = vld [vmem:[#allocation2 + $0x3c] sm:$0xff]  }
  0x97   : > { %8921 = vmatmul.mubr.bf16.vlgmr.msra.gmra.mrb[0].mxu0 %v1140_v6  ;;  %v10383_v6 = vld [vmem:[%s12195_s2 + $0x100] sm:$0xff]  }
  0x98   : > { %8949 = vmatpush3.bf16.msra.mxu0 %v10364_v37  ;;  %8924 = vmatprep.mubr.bf16.mxu0 %v1142_v12  ;;  %v4745_v37 = vrot.slane %v10886_v55, 1  ;;  %v4755_v12 = vrot.slane %v10968_v29, 1  ;;  %v1161_v29 = vrot.slane %v10957_v8, 1  ;;  %v1163_v8 = vrot.slane %v10978_v31, 1  ;;  %v10387_v31 = vld [vmem:[%s12195_s2 + $0x108] sm:$0xff]  }
  0x99   : > { %8950 = vmatprep.subr.bf16.mxu0 %v10366_v13  ;;  %9361 = vmatmul.mubr.bf16.vlgmr.msra.gmra.mrb[0].mxu1 %v4738_v18  ;;  %v1159_v18 = vrot.slane %v10942_v58, 1 }
  0x9a   : > { %9389 = vmatpush3.bf16.msra.mxu1 %v10365_v36  ;;  %9364 = vmatprep.mubr.bf16.mxu1 %v4740_v19  ;;  %v1148_v36 = vsel %vm1135_vm1, %v1145_v33, %v1147_v1  ;;  %v4746_v55 = vsel %vm1135_vm1, %v4743_v23, %v4745_v37  ;;  %v4748_v10 = vsel %vm1135_vm1, %v4745_v37, %v4747_v48  ;;  %v4757_v19 = vrot.slane %v10985_v38, 1  ;;  %v10388_v23 = vld [vmem:[#allocation2 + $0x1c] sm:$0xff]   ;;  %v1750_v1 = vld [vmem:[%s10760_s30 + $0xc] sm:$0xf]  ;;  %v11227_v48 = vld [vmem:[%s10760_s30 + $0x14] sm:$0xff]  }
  0x9b   : > { %9390 = vmatprep.subr.bf16.mxu1 %v10367_v22  ;;  %v4756_v3 = vsel %vm1135_vm1, %v4753_v7, %v4755_v12  ;;  %v1162_v27 = vsel %vm1135_vm1, %v1159_v18, %v1161_v29  ;;  %v4761_v38 = vrot.slane %v11010_v21, 1  ;;  %v1164_v30 = vsel %vm1135_vm1, %v1161_v29, %v1163_v8  ;;  %v10384_v21 = vld [vmem:[#allocation2 + $0x14] sm:$0xff]   ;;  %v11280_v29 = vld [vmem:[#allocation2 + $0x1c] sm:$0xff]  }
  0x9c   : > { %8951 = vmatpush3.bf16.msra.mxu0 %v10366_v13  ;;  %v1158_v13 = vsel %vm1135_vm1, %v1155_v63, %v1157_v5  ;;  %v4760_v58 = vsel %vm1135_vm1, %v4757_v19, %v4759_v25  ;;  %v10399_v37 = vld [vmem:[%s12195_s2 + $0x118] sm:$0xff]   ;;  %v1877_v51 = vshll.u32 %v11227_v48, 16  ;;  %v10417_v63 = vld [vmem:[%s12195_s2 + $0x130] sm:$0xff]   ;;  %v5481_v8 = vshll.u32 %v11280_v29, 16 }
  0x9d   : > { %8952 = vmatprep.subr.bf16.mxu0 %v10368_v28  ;;  %v4762_v33 = vsel %vm1135_vm1, %v4759_v25, %v4761_v38  ;;  %v11298_v38 = vld [vmem:[%s10760_s30 + $0x24] sm:$0xff]  }
  0x9e   : > { %9391 = vmatpush3.bf16.msra.mxu1 %v10367_v22  ;;  %v1160_v22 = vsel %vm1135_vm1, %v1157_v5, %v1159_v18  ;;  %v11267_v5 = vrot.slane %v1877_v51, 1 }
  0x9f   : > { %8925 = vmatmul.mubr.bf16.gmra.mrb[4].mxu0 %v1144_v14  ;;  %9392 = vmatprep.subr.bf16.mxu1 %v10369_v15  ;;  %v437_v14 = vld [vmem:[%s10975_s12 + $0xc] sm:$0xf] }
  0xa0   : > { %8928 = vmatprep.mubr.bf16.mxu0 %v1146_v39  ;;  %8953 = vmatpush3.bf16.msra.mxu0 %v10368_v28  ;;  %v4758_v28 = vsel %vm1135_vm1, %v4755_v12, %v4757_v19  ;;  %444 = vst [vmem:[#allocation2 + $0x7c] sm:$0xf] %v437_v14  ;;  %v10389_v39 = vld [vmem:[%s12195_s2 + $0x108] sm:$0xff]   ;;  %v10408_v19 = vld [vmem:[%s10760_s30 + $0x54] sm:$0xff]  }
  0xa1   : > { %9365 = vmatmul.mubr.bf16.gmra.mrb[4].mxu1 %v4742_v32  ;;  %8954 = vmatprep.subr.bf16.mxu0 %v10370_v40  ;;  %v10392_v32 = vld [vmem:[%s12195_s2 + $0x110] sm:$0xff]  }
  0xa2   : > { %9368 = vmatprep.mubr.bf16.mxu1 %v4744_v45  ;;  %9393 = vmatpush3.bf16.msra.mxu1 %v10369_v15  ;;  %v10386_v15 = vld [vmem:[%s10760_s30 + $0x1c] sm:$0xff]   ;;  %v10393_v45 = vld [vmem:[%s12195_s2 + $0x110] sm:$0xff]  }
  0xa3   : > { %9394 = vmatprep.subr.bf16.mxu1 %v10371_v44  ;;  %v10418_v14 = vld [vmem:[%s10760_s30 + $0x6c] sm:$0xff]  }
  0xa4   : > { %8955 = vmatpush3.bf16.msra.mxu0 %v10370_v40  ;;  %v10390_v40 = vld [vmem:[%s10760_s30 + $0x24] sm:$0xff]  }
  0xa5   : > { %8956 = vmatprep.subr.bf16.mxu0 %v10372_v26 }
  0xa6   : > { %9395 = vmatpush3.bf16.msra.mxu1 %v10371_v44  ;;  %v11215_v44 = vld [vmem:[%s10760_s30 + $0x10] sm:$0xf] }
  0xa7   : > { %8929 = vmatmul.mubr.bf16.gmra.mrb[8].mxu0 %v1148_v36  ;;  %9396 = vmatprep.subr.bf16.mxu1 %v10373_v41  ;;  %v11224_v36 = vcombine.low %v1750_v1, %v11215_v44  ;;  %v10419_v1 = vld [vmem:[#allocation2 + $0x6c] sm:$0xff]  }
  0xa8   : > { %8932 = vmatprep.mubr.bf16.mxu0 %v1150_v43  ;;  %8957 = vmatpush3.bf16.msra.mxu0 %v10372_v26  ;;  %v10398_v26 = vld [vmem:[%s12195_s2 + $0x118] sm:$0xff]  }
  0xa9   : > { %9369 = vmatmul.mubr.bf16.gmra.mrb[8].mxu1 %v4746_v55  ;;  %8958 = vmatprep.subr.bf16.mxu0 %v10374_v46  ;;  %v10396_v43 = vld [vmem:[%s10760_s30 + $0x34] sm:$0xff]   ;;  %v10400_v55 = vld [vmem:[%s10760_s30 + $0x3c] sm:$0xff]   ;;  %v1870_v50 = vshrl.u32 %v11224_v36, 16 }
  0xaa   : > { %9372 = vmatprep.mubr.bf16.mxu1 %v4748_v10  ;;  %9397 = vmatpush3.bf16.msra.mxu1 %v10373_v41  ;;  %v10404_v41 = vld [vmem:[%s12195_s2 + $0x120] sm:$0xff]   ;;  %v11234_v10 = vld [vmem:[#allocation2 + $0x10] sm:$0xf] }
  0xab   : > { %9398 = vmatprep.subr.bf16.mxu1 %v10375_v4 }
  0xac   : > { %8959 = vmatpush3.bf16.msra.mxu0 %v10374_v46  ;;  %v5347_v46 = vld [vmem:[#allocation2 + $0xc] sm:$0xf] }
  0xad   : > { %8960 = vmatprep.subr.bf16.mxu0 %v10376_v52  ;;  %v11249_v57 = vcombine.low %v5347_v46, %v11234_v10 }
  0xae   : > { %9399 = vmatpush3.bf16.msra.mxu1 %v10375_v4  ;;  %v1872_v4 = vshll.u32 %v11224_v36, 16  ;;  %v11338_v36 = vld [vmem:[#allocation2 + $0x3c] sm:$0xff]  }
  0xaf   : > { %8933 = vmatmul.mubr.bf16.gmra.mrb[12].mxu0 %v1152_v56  ;;  %9400 = vmatprep.subr.bf16.mxu1 %v10377_v59  ;;  %v10411_v56 = vld [vmem:[%s12195_s2 + $0x128] sm:$0xff]   ;;  %v5468_v7 = vshll.u32 %v11249_v57, 16 }
  0xb0   : > { %8936 = vmatprep.mubr.bf16.mxu0 %v1154_v60  ;;  %8961 = vmatpush3.bf16.msra.mxu0 %v10376_v52  ;;  %v10410_v52 = vld [vmem:[%s12195_s2 + $0x128] sm:$0xff]   ;;  %v11252_v60 = vld [vmem:[#allocation2 + $0x14] sm:$0xff]  }
  0xb1   : > { %9373 = vmatmul.mubr.bf16.gmra.mrb[12].mxu1 %v4750_v24  ;;  %8962 = vmatprep.subr.bf16.mxu0 %v10378_v61  ;;  %v10402_v24 = vld [vmem:[%s10760_s30 + $0x44] sm:$0xff]   ;;  %v5477_v12 = vshrl.u32 %v11252_v60, 16  ;;  %v5470_v25 = vrot.slane %v5468_v7, 1 }
  0xb2   : > { %9376 = vmatprep.mubr.bf16.mxu1 %v4752_v53  ;;  %9401 = vmatpush3.bf16.msra.mxu1 %v10377_v59  ;;  %v1881_v59 = vshrl.u32 %v11227_v48, 16  ;;  %v11259_v53 = vld [vmem:[%s10760_s30 + $0x1c] sm:$0xff]   ;;  %v10433_v48 = vld [vmem:[%s12195_s2 + $0x148] sm:$0xff]  }
  0xb3   : > { %9402 = vmatprep.subr.bf16.mxu1 %v10379_v0  ;;  %v1885_v18 = vshll.u32 %v11259_v53, 16 }
  0xb4   : > { %8963 = vmatpush3.bf16.msra.mxu0 %v10378_v61  ;;  %v10416_v61 = vld [vmem:[%s12195_s2 + $0x130] sm:$0xff]  }
  0xb5   : > { %8992 = vmatprep.subr.bf16.mxu0 %v10383_v6 }
  0xb6   : > { %9403 = vmatpush3.bf16.msra.mxu1 %v10379_v0  ;;  %v11265_v0 = vrot.slane %v1872_v4, 1  ;;  %v10420_v4 = vld [vmem:[%s10760_s30 + $0x74] sm:$0xff]  }
  0xb7   : > { %8937 = vmatmul.mubr.bf16.gmra.mrb[16].mxu0 %v1156_v11  ;;  %9432 = vmatprep.subr.bf16.mxu1 %v10385_v42  ;;  %v5473_v11 = vshll.u32 %v11252_v60, 16 }
  0xb8   : > { %8940 = vmatprep.mubr.bf16.mxu0 %v1158_v13  ;;  %v10422_v13 = vld [vmem:[%s12195_s2 + $0x138] sm:$0xff]  }
  0xb9   : > { %9377 = vmatmul.mubr.bf16.gmra.mrb[16].mxu1 %v4754_v17  ;;  %v10407_v17 = vld [vmem:[#allocation2 + $0x4c] sm:$0xff]  }
  0xba   : > { %9380 = vmatprep.mubr.bf16.mxu1 %v4756_v3  ;;  %v10423_v3 = vld [vmem:[%s12195_s2 + $0x138] sm:$0xff]  }
  0xbf   : > { %8941 = vmatmul.mubr.bf16.gmra.mrb[20].mxu0 %v1160_v22  ;;  %v10412_v22 = vld [vmem:[%s10760_s30 + $0x5c] sm:$0xff]  }
  0xc0   : > { %8944 = vmatprep.mubr.bf16.mxu0 %v1162_v27  ;;  %v11284_v27 = vrot.slane %v5473_v11, 1 }
  0xc1   : > { %9381 = vmatmul.mubr.bf16.gmra.mrb[20].mxu1 %v4758_v28  ;;  %v11289_v28 = vld [vmem:[%s12195_s2 + $0x140] sm:$0xff]  }
  0xc2   : > { %9384 = vmatprep.mubr.bf16.mxu1 %v4760_v58  ;;  %v11294_v58 = vld [vmem:[%s12195_s2 + $0x140] sm:$0xff]  }
  0xc7   : > { %8945 = vmatmul.mubr.bf16.gmra.mrb[24].mxu0 %v1164_v30  ;;  %v10409_v30 = vld [vmem:[#allocation2 + $0x54] sm:$0xff]  }
  0xc8   : > { %8964 = vmatprep.mubr.bf16.mxu0 %v10380_v2  ;;  %v10413_v2 = vld [vmem:[#allocation2 + $0x5c] sm:$0xff]  }
  0xc9   : > { %9385 = vmatmul.mubr.bf16.gmra.mrb[24].mxu1 %v4762_v33  ;;  %v1893_v33 = vshll.u32 %v11298_v38, 16 }
  0xca   : > { %9404 = vmatprep.mubr.bf16.mxu1 %v10381_v34  ;;  %v11302_v34 = vld [vmem:[#allocation2 + $0x24] sm:$0xff]  }
  0xcf   : > { %8965 = vmatmul.mubr.bf16.vlgmr.msra.gmra.mrb[0].mxu0 %v10382_v35  ;;  %v10414_v35 = vld [vmem:[%s10760_s30 + $0x64] sm:$0xff]  }
  0xd0   : > { %8993 = vmatpush3.bf16.msra.mxu0 %v10383_v6  ;;  %8968 = vmatprep.mubr.bf16.mxu0 %v10386_v15  ;;  %v5466_v6 = vshrl.u32 %v11249_v57, 16  ;;  %v1887_v15 = vrot.slane %v1885_v18, 1  ;;  %v5479_v18 = vor.u32 %v5477_v12, %v11284_v27  ;;  %v11374_v12 = vld [vmem:[%s10760_s30 + $0x4c] sm:$0xff]  }
  0xd1   : > { %8994 = vmatprep.subr.bf16.mxu0 %v10387_v31  ;;  %9405 = vmatmul.mubr.bf16.vlgmr.msra.gmra.mrb[0].mxu1 %v10384_v21  ;;  %v1889_v21 = vshrl.u32 %v11259_v53, 16 }
  0xd2   : > { %9433 = vmatpush3.bf16.msra.mxu1 %v10385_v42  ;;  %9408 = vmatprep.mubr.bf16.mxu1 %v10388_v23  ;;  %v10403_v42 = vld [vmem:[#allocation2 + $0x44] sm:$0xff]   ;;  %v5485_v23 = vshrl.u32 %v11280_v29, 16  ;;  %v5471_v46 = vor.u32 %v5470_v25, %v5466_v6  ;;  %v1883_v6 = vor.u32 %v1881_v59, %v11267_v5 }
  0xd3   : > { %9434 = vmatprep.subr.bf16.mxu1 %v10389_v39  ;;  %v1891_v11 = vor.u32 %v1889_v21, %v1887_v15 }
  0xd4   : > { %8995 = vmatpush3.bf16.msra.mxu0 %v10387_v31  ;;  %v5483_v31 = vrot.slane %v5481_v8, 1  ;;  %v5476_v7 = vsel %vm583_vm0, %v5471_v46, %v11284_v27  ;;  %v1888_v25 = vsel %vm583_vm0, %v1883_v6, %v1887_v15  ;;  %v10435_v27 = vld [vmem:[%s12195_s2 + $0x148] sm:$0xff]  }
  0xd5   : > { %8996 = vmatprep.subr.bf16.mxu0 %v10392_v32 }
  0xd6   : > { %9435 = vmatpush3.bf16.msra.mxu1 %v10389_v39  ;;  %v11309_v39 = vrot.slane %v1893_v33, 1  ;;  %v5487_v8 = vor.u32 %v5485_v23, %v5483_v31  ;;  %v10438_v33 = vld [vmem:[%s12195_s2 + $0x150] sm:$0xff]  }
  0xd7   : > { %8969 = vmatmul.mubr.bf16.gmra.mrb[4].mxu0 %v10390_v40  ;;  %9436 = vmatprep.subr.bf16.mxu1 %v10393_v45  ;;  %v5489_v40 = vshll.u32 %v11302_v34, 16 }
  0xd8   : > { %8972 = vmatprep.mubr.bf16.mxu0 %v10394_v49  ;;  %8997 = vmatpush3.bf16.msra.mxu0 %v10392_v32  ;;  %v11313_v32 = vld [vmem:[%s10760_s30 + $0x2c] sm:$0xff]   ;;  %v10415_v49 = vld [vmem:[#allocation2 + $0x64] sm:$0xff]  }
  0xd9   : > { %9409 = vmatmul.mubr.bf16.gmra.mrb[4].mxu1 %v10391_v9  ;;  %8998 = vmatprep.subr.bf16.mxu0 %v10398_v26  ;;  %v11318_v9 = vld [vmem:[%s10760_s30 + $0x34] sm:$0xff]  }
  0xda   : > { %9412 = vmatprep.mubr.bf16.mxu1 %v10395_v20  ;;  %9437 = vmatpush3.bf16.msra.mxu1 %v10393_v45  ;;  %v11315_v45 = vld [vmem:[#allocation2 + $0x2c] sm:$0xff]   ;;  %v1901_v20 = vshll.u32 %v11313_v32, 16 }
  0xdb   : > { %9438 = vmatprep.subr.bf16.mxu1 %v10399_v37  ;;  %v5501_v57 = vshrl.u32 %v11315_v45, 16 }
  0xdc   : > { %8999 = vmatpush3.bf16.msra.mxu0 %v10398_v26  ;;  %v5497_v26 = vshll.u32 %v11315_v45, 16  ;;  %v1903_v51 = vrot.slane %v1901_v20, 1 }
  0xdd   : > { %9000 = vmatprep.subr.bf16.mxu0 %v10404_v41 }
  0xde   : > { %9439 = vmatpush3.bf16.msra.mxu1 %v10399_v37  ;;  %v11322_v37 = vld [vmem:[#allocation2 + $0x34] sm:$0xff]  }
  0xdf   : > { %8973 = vmatmul.mubr.bf16.gmra.mrb[8].mxu0 %v10396_v43  ;;  %9440 = vmatprep.subr.bf16.mxu1 %v10405_v47  ;;  %v1875_v43 = vor.u32 %v11265_v0, %v1870_v50  ;;  %v10421_v50 = vld [vmem:[#allocation2 + $0x74] sm:$0xff]   ;;  %v11348_v0 = vld [vmem:[%s10760_s30 + $0x44] sm:$0xff]  }
  0xe0   : > { %8976 = vmatprep.mubr.bf16.mxu0 %v10400_v55  ;;  %9001 = vmatpush3.bf16.msra.mxu0 %v10404_v41  ;;  %v11325_v41 = vld [vmem:[%s10760_s30 + $0x3c] sm:$0xff]   ;;  %v5491_v55 = vrot.slane %v5489_v40, 1 }
  0xe1   : > { %9413 = vmatmul.mubr.bf16.gmra.mrb[8].mxu1 %v10397_v16  ;;  %9002 = vmatprep.subr.bf16.mxu0 %v10410_v52  ;;  %v5493_v16 = vshrl.u32 %v11302_v34, 16 }
  0xe2   : > { %9416 = vmatprep.mubr.bf16.mxu1 %v10401_v54  ;;  %9441 = vmatpush3.bf16.msra.mxu1 %v10405_v47  ;;  %v1897_v47 = vshrl.u32 %v11298_v38, 16  ;;  %v1905_v54 = vshrl.u32 %v11313_v32, 16  ;;  %v5492_v15 = vsel %vm583_vm0, %v5487_v8, %v5491_v55 }
  0xe3   : > { %9442 = vmatprep.subr.bf16.mxu1 %v10411_v56  ;;  %v5495_v23 = vor.u32 %v5493_v16, %v5491_v55  ;;  %v11407_v16 = vld [vmem:[%s10760_s30 + $0x54] sm:$0xff]  }
  0xe4   : > { %9003 = vmatpush3.bf16.msra.mxu0 %v10410_v52  ;;  %v11335_v52 = vrot.slane %v5497_v26, 1  ;;  %v1899_v21 = vor.u32 %v1897_v47, %v11309_v39  ;;  %v1907_v40 = vor.u32 %v1905_v54, %v1903_v51  ;;  %v11410_v54 = vld [vmem:[#allocation2 + $0x54] sm:$0xff]  }
  0xe5   : > { %9004 = vmatprep.subr.bf16.mxu0 %v10416_v61 }
  0xe6   : > { %9443 = vmatpush3.bf16.msra.mxu1 %v10411_v56  ;;  %v1909_v56 = vshll.u32 %v11318_v9, 16  ;;  %v1904_v55 = vsel %vm583_vm0, %v1899_v21, %v1903_v51  ;;  %v5503_v47 = vor.u32 %v5501_v57, %v11335_v52  ;;  %v10445_v51 = vld [vmem:[%s12195_s2 + $0x158] sm:$0xff]  }
  0xe7   : > { %8977 = vmatmul.mubr.bf16.gmra.mrb[12].mxu0 %v10402_v24  ;;  %9444 = vmatprep.subr.bf16.mxu1 %v10417_v63  ;;  %v1917_v24 = vshll.u32 %v11325_v41, 16 }
  0xe8   : > { %8980 = vmatprep.mubr.bf16.mxu0 %v10406_v62  ;;  %9005 = vmatpush3.bf16.msra.mxu0 %v10416_v61  ;;  %v5505_v61 = vshll.u32 %v11322_v37, 16  ;;  %v1880_v62 = vsel %vm583_vm0, %v1875_v43, %v11267_v5  ;;  %v1933_v43 = vshll.u32 %v11374_v12, 16 }
  0xe9   : > { %9417 = vmatmul.mubr.bf16.gmra.mrb[12].mxu1 %v10403_v42  ;;  %9006 = vmatprep.subr.bf16.mxu0 %v10422_v13  ;;  %v1911_v42 = vrot.slane %v1909_v56, 1  ;;  %v11363_v59 = vrot.slane %v1917_v24, 1  ;;  %v5500_v56 = vsel %vm583_vm0, %v5495_v23, %v11335_v52  ;;  %v10450_v52 = vld [vmem:[%s12195_s2 + $0x160] sm:$0xff]  }
  0xea   : > { %9420 = vmatprep.mubr.bf16.mxu1 %v10407_v17  ;;  %9445 = vmatpush3.bf16.msra.mxu1 %v10417_v63  ;;  %v5513_v63 = vshll.u32 %v11338_v36, 16  ;;  %v1913_v17 = vshrl.u32 %v11318_v9, 16  ;;  %v1935_v57 = vrot.slane %v1933_v43, 1 }
  0xeb   : > { %9446 = vmatprep.subr.bf16.mxu1 %v10423_v3 }
  0xec   : > { %9007 = vmatpush3.bf16.msra.mxu0 %v10422_v13  ;;  %v5507_v13 = vrot.slane %v5505_v61, 1  ;;  %v11365_v5 = vrot.slane %v5513_v63, 1  ;;  %v11420_v61 = vld [vmem:[#allocation2 + $0x5c] sm:$0xff]  }
  0xed   : > { %9036 = vmatprep.subr.bf16.mxu0 %v11289_v28 }
  0xee   : > { %9447 = vmatpush3.bf16.msra.mxu1 %v10423_v3  ;;  %v5509_v3 = vshrl.u32 %v11322_v37, 16  ;;  %v5508_v24 = vsel %vm583_vm0, %v5503_v47, %v5507_v13  ;;  %v10463_v47 = vld [vmem:[%s12195_s2 + $0x170] sm:$0xff]  }
  0xef   : > { %8981 = vmatmul.mubr.bf16.gmra.mrb[16].mxu0 %v10408_v19  ;;  %9476 = vmatprep.subr.bf16.mxu1 %v11294_v58  ;;  %v1925_v19 = vshll.u32 %v11348_v0, 16 }
  0xf0   : > { %8984 = vmatprep.mubr.bf16.mxu0 %v10412_v22  ;;  %v11368_v22 = vld [vmem:[#allocation2 + $0x44] sm:$0xff]   ;;  %v5511_v63 = vor.u32 %v5509_v3, %v5507_v13  ;;  %v1945_v3 = vshrl.u32 %v11407_v16, 16 }
  0xf1   : > { %9421 = vmatmul.mubr.bf16.gmra.mrb[16].mxu1 %v10409_v30  ;;  %v1896_v30 = vsel %vm583_vm0, %v1891_v11, %v11309_v39  ;;  %v5525_v20 = vshrl.u32 %v11368_v22, 16  ;;  %v1927_v39 = vrot.slane %v1925_v19, 1  ;;  %v10451_v11 = vld [vmem:[%s12195_s2 + $0x160] sm:$0xff]   ;;  %v5545_v19 = vshll.u32 %v11420_v61, 16 }
  0xf2   : > { %9424 = vmatprep.mubr.bf16.mxu1 %v10413_v2  ;;  %v5484_v2 = vsel %vm583_vm0, %v5479_v18, %v5483_v31  ;;  %v10439_v31 = vld [vmem:[%s12195_s2 + $0x150] sm:$0xff]   ;;  %v1937_v18 = vshrl.u32 %v11374_v12, 16 }
  0xf3   : > { %v5547_v43 = vrot.slane %v5545_v19, 1  ;;  %v11495_v19 = vld [vmem:[%s12195_s2 + $0x180] sm:$0xff]  }
  0xf7   : > { %8985 = vmatmul.mubr.bf16.gmra.mrb[20].mxu0 %v10414_v35  ;;  %v5521_v35 = vshll.u32 %v11368_v22, 16 }
  0xf8   : > { %8988 = vmatprep.mubr.bf16.mxu0 %v10418_v14  ;;  %v11384_v14 = vld [vmem:[#allocation2 + $0x4c] sm:$0xff]  }
  0xf9   : > { %9425 = vmatmul.mubr.bf16.gmra.mrb[20].mxu1 %v10415_v49  ;;  %v1921_v49 = vshrl.u32 %v11325_v41, 16  ;;  %v11397_v26 = vrot.slane %v5521_v35, 1  ;;  %v5529_v46 = vshll.u32 %v11384_v14, 16  ;;  %v5533_v13 = vshrl.u32 %v11384_v14, 16 }
  0xfa   : > { %9428 = vmatprep.mubr.bf16.mxu1 %v10419_v1  ;;  %v5517_v1 = vshrl.u32 %v11338_v36, 16 }
  0xfb   : > { %v1923_v6 = vor.u32 %v1921_v49, %v11363_v59 }
  0xfc   : > { %v5519_v8 = vor.u32 %v5517_v1, %v11365_v5  ;;  %v5541_v1 = vshrl.u32 %v11410_v54, 16 }
  0xfe   : > { %v5524_v21 = vsel %vm583_vm0, %v5519_v8, %v11397_v26 }
  0xff   : > { %8989 = vmatmul.mubr.bf16.gmra.mrb[24].mxu0 %v10420_v4  ;;  %v10444_v4 = vld [vmem:[%s12195_s2 + $0x158] sm:$0xff]  }
 0x100   : > { %9008 = vmatprep.mubr.bf16.mxu0 %v1880_v62  ;;  %v1915_v62 = vor.u32 %v1913_v17, %v1911_v42  ;;  %v5537_v17 = vshll.u32 %v11410_v54, 16 }
 0x101   : > { %9429 = vmatmul.mubr.bf16.gmra.mrb[24].mxu1 %v10421_v50  ;;  %v11413_v50 = vld [vmem:[%s10760_s30 + $0x5c] sm:$0xff]  }
 0x102   : > { %9448 = vmatprep.mubr.bf16.mxu1 %v5476_v7  ;;  %v5531_v7 = vrot.slane %v5529_v46, 1 }
 0x107   : > { %9009 = vmatmul.mubr.bf16.vlgmr.msra.gmra.mrb[0].mxu0 %v1888_v25  ;;  %v1920_v25 = vsel %vm583_vm0, %v1915_v62, %v11363_v59  ;;  %v5516_v59 = vsel %vm583_vm0, %v5511_v63, %v11365_v5  ;;  %v10462_v5 = vld [vmem:[%s12195_s2 + $0x170] sm:$0xff]   ;;  %v5549_v62 = vshrl.u32 %v11420_v61, 16  ;;  %v10469_v63 = vld [vmem:[%s12195_s2 + $0x178] sm:$0xff]  }
 0x108   : > { %9037 = vmatpush3.bf16.msra.mxu0 %v11289_v28  ;;  %9012 = vmatprep.mubr.bf16.mxu0 %v1896_v30  ;;  %v1929_v28 = vshrl.u32 %v11348_v0, 16  ;;  %v10456_v30 = vld [vmem:[%s12195_s2 + $0x168] sm:$0xff]  }
 0x109   : > { %9038 = vmatprep.subr.bf16.mxu0 %v10433_v48  ;;  %9449 = vmatmul.mubr.bf16.vlgmr.msra.gmra.mrb[0].mxu1 %v5484_v2  ;;  %v11445_v2 = vld [vmem:[%s10760_s30 + $0x64] sm:$0xff]  }
 0x10a   : > { %9477 = vmatpush3.bf16.msra.mxu1 %v11294_v58  ;;  %9452 = vmatprep.mubr.bf16.mxu1 %v5492_v15  ;;  %v1912_v58 = vsel %vm583_vm0, %v1907_v40, %v1911_v42  ;;  %v1941_v42 = vshll.u32 %v11407_v16, 16  ;;  %v11452_v15 = vld [vmem:[#allocation2 + $0x64] sm:$0xff]   ;;  %v1931_v23 = vor.u32 %v1929_v28, %v1927_v39  ;;  %v1939_v40 = vor.u32 %v1937_v18, %v1935_v57  ;;  %v438_v18 = vld [vmem:[%s10975_s12 + $0x10] sm:$0xff]  }
 0x10b   : > { %9478 = vmatprep.subr.bf16.mxu1 %v10435_v27  ;;  %v5527_v28 = vor.u32 %v5525_v20, %v11397_v26  ;;  %v1957_v46 = vshll.u32 %v11445_v2, 16  ;;  %v10468_v20 = vld [vmem:[%s12195_s2 + $0x178] sm:$0xff]   ;;  %445 = vst [vmem:[#allocation2 + $0x80] sm:$0xff] %v438_v18  }
 0x10c   : > { %9039 = vmatpush3.bf16.msra.mxu0 %v10433_v48  ;;  %v1949_v48 = vshll.u32 %v11413_v50, 16  ;;  %v1943_v35 = vrot.slane %v1941_v42, 1 }
 0x10d   : > { %9040 = vmatprep.subr.bf16.mxu0 %v10438_v33 }
 0x10e   : > { %9479 = vmatpush3.bf16.msra.mxu1 %v10435_v27  ;;  %v1928_v27 = vsel %vm583_vm0, %v1923_v6, %v1927_v39  ;;  %v1951_v49 = vrot.slane %v1949_v48, 1  ;;  %v1953_v39 = vshrl.u32 %v11413_v50, 16  ;;  %v1944_v26 = vsel %vm583_vm0, %v1939_v40, %v1943_v35 }
 0x10f   : > { %9013 = vmatmul.mubr.bf16.gmra.mrb[4].mxu0 %v1904_v55  ;;  %9480 = vmatprep.subr.bf16.mxu1 %v10439_v31  ;;  %v5553_v55 = vshll.u32 %v11452_v15, 16  ;;  %v5557_v40 = vshrl.u32 %v11452_v15, 16 }
 0x110   : > { %9016 = vmatprep.mubr.bf16.mxu0 %v1912_v58  ;;  %9041 = vmatpush3.bf16.msra.mxu0 %v10438_v33  ;;  %v10457_v33 = vld [vmem:[%s12195_s2 + $0x168] sm:$0xff]   ;;  %v5535_v58 = vor.u32 %v5533_v13, %v5531_v7  ;;  %v1955_v42 = vor.u32 %v1953_v39, %v1951_v49 }
 0x111   : > { %9453 = vmatmul.mubr.bf16.gmra.mrb[4].mxu1 %v5500_v56  ;;  %9042 = vmatprep.subr.bf16.mxu0 %v10444_v4  ;;  %v11473_v56 = vld [vmem:[#allocation2 + $0x6c] sm:$0xff]   ;;  %v5555_v13 = vrot.slane %v5553_v55, 1 }
 0x112   : > { %9456 = vmatprep.mubr.bf16.mxu1 %v5508_v24  ;;  %9481 = vmatpush3.bf16.msra.mxu1 %v10439_v31  ;;  %v5539_v31 = vrot.slane %v5537_v17, 1  ;;  %v11480_v24 = vld [vmem:[%s10760_s30 + $0x74] sm:$0xff]   ;;  %v5561_v48 = vshll.u32 %v11473_v56, 16  ;;  %v2220_v55 = vld [vmem:[%s10760_s30 + $0xc] sm:$0xe] }
 0x113   : > { %9482 = vmatprep.subr.bf16.mxu1 %v10445_v51  ;;  %v1973_v8 = vshll.u32 %v11480_v24, 16 }
 0x114   : > { %9043 = vmatpush3.bf16.msra.mxu0 %v10444_v4  ;;  %v1936_v4 = vsel %vm583_vm0, %v1931_v23, %v1935_v57  ;;  %v5532_v57 = vsel %vm583_vm0, %v5527_v28, %v5531_v7  ;;  %v5540_v6 = vsel %vm583_vm0, %v5535_v58, %v5539_v31  ;;  %v1961_v7 = vshrl.u32 %v11445_v2, 16  ;;  %v11520_v58 = vld [vmem:[#allocation2 + $0x7c] ss:$0 sps:$4 sm:$0x11]  }
 0x115   : > { %9044 = vmatprep.subr.bf16.mxu0 %v10450_v52 }
 0x116   : > { %9483 = vmatpush3.bf16.msra.mxu1 %v10445_v51  ;;  %v11471_v51 = vld [vmem:[%s10760_s30 + $0x6c] sm:$0xff]  }
 0x117   : > { %9017 = vmatmul.mubr.bf16.gmra.mrb[8].mxu0 %v1920_v25  ;;  %9484 = vmatprep.subr.bf16.mxu1 %v10451_v11  ;;  %v1965_v17 = vshll.u32 %v11471_v51, 16  ;;  %v1969_v25 = vshrl.u32 %v11471_v51, 16 }
 0x118   : > { %9020 = vmatprep.mubr.bf16.mxu0 %v1928_v27  ;;  %9045 = vmatpush3.bf16.msra.mxu0 %v10450_v52  ;;  %v1947_v52 = vor.u32 %v1945_v3, %v1943_v35  ;;  %v5543_v3 = vor.u32 %v5541_v1, %v5539_v31  ;;  %v11504_v27 = vld [vmem:[%s12195_s2 + $0x180] sm:$0xff]   ;;  %v11512_v31 = vld [vmem:[%s10760_s30 + $0x7c] ss:$0 sps:$4 sm:$0x11]  }
 0x119   : > { %9457 = vmatmul.mubr.bf16.gmra.mrb[8].mxu1 %v5516_v59  ;;  %9046 = vmatprep.subr.bf16.mxu0 %v10456_v30  ;;  %v5551_v59 = vor.u32 %v5549_v62, %v5547_v43  ;;  %v1967_v23 = vrot.slane %v1965_v17, 1  ;;  %v1977_v62 = vshrl.u32 %v11480_v24, 16 }
 0x11a   : > { %9460 = vmatprep.mubr.bf16.mxu1 %v5524_v21  ;;  %9485 = vmatpush3.bf16.msra.mxu1 %v10451_v11  ;;  %v1959_v11 = vrot.slane %v1957_v46, 1  ;;  %v5548_v21 = vsel %vm583_vm0, %v5543_v3, %v5547_v43  ;;  %v1975_v46 = vrot.slane %v1973_v8, 1  ;;  %v5563_v43 = vrot.slane %v5561_v48, 1 }
 0x11b   : > { %9486 = vmatprep.subr.bf16.mxu1 %v10457_v33  ;;  %v1971_v39 = vor.u32 %v1969_v25, %v1967_v23  ;;  %v10640_v25 = vld [vmem:[%s10760_s30 + $0x14] sm:$0xff]  }
 0x11c   : > { %9047 = vmatpush3.bf16.msra.mxu0 %v10456_v30  ;;  %v11499_v30 = vld [vmem:[#allocation2 + $0x74] sm:$0xff]   ;;  %v1960_v35 = vsel %vm583_vm0, %v1955_v42, %v1959_v11  ;;  %v1963_v1 = vor.u32 %v1961_v7, %v1959_v11  ;;  %v1979_v17 = vor.u32 %v1977_v62, %v1975_v46  ;;  %v2242_v8 = vrot.slane %v10640_v25, 1  ;;  %v10480_v62 = vld [vmem:[%s12195_s2 + $0x1a0] sm:$0xff]  }
 0x11d   : > { %9048 = vmatprep.subr.bf16.mxu0 %v10462_v5  ;;  %v5569_v28 = vshll.u32 %v11499_v30, 16  ;;  %v5573_v42 = vshrl.u32 %v11499_v30, 16 }
 0x11e   : > { %9487 = vmatpush3.bf16.msra.mxu1 %v10457_v33  ;;  %v1952_v33 = vsel %vm583_vm0, %v1947_v52, %v1951_v49  ;;  %v5556_v49 = vsel %vm583_vm0, %v5551_v59, %v5555_v13  ;;  %v5816_v52 = vld [vmem:[#allocation2 + $0xc] sm:$0xe] }
 0x11f   : > { %9021 = vmatmul.mubr.bf16.gmra.mrb[12].mxu0 %v1936_v4  ;;  %9488 = vmatprep.subr.bf16.mxu1 %v10463_v47  ;;  %v1981_v4 = vshll.u32 %v11512_v31, 16  ;;  %v8238_v48 = vcombine.low %v5816_v52, %v11234_v10  ;;  %v10481_v52 = vld [vmem:[%s12195_s2 + $0x1a0] sm:$0xff]  }
 0x120   : > { %9024 = vmatprep.mubr.bf16.mxu0 %v1944_v26  ;;  %9049 = vmatpush3.bf16.msra.mxu0 %v10462_v5  ;;  %v5565_v5 = vshrl.u32 %v11473_v56, 16 }
 0x121   : > { %9461 = vmatmul.mubr.bf16.gmra.mrb[12].mxu1 %v5532_v57  ;;  %9050 = vmatprep.subr.bf16.mxu0 %v10468_v20  ;;  %v5571_v57 = vrot.slane %v5569_v28, 1  ;;  %v1983_v18 = vrot.slane %v1981_v4, 1  ;;  %v5841_v28 = vrot.slane %v11302_v34, 1  ;;  %v10476_v34 = vld [vmem:[%s12195_s2 + $0x190] sm:$0xff]   ;;  %v5845_v4 = vrot.slane %v11322_v37, 1 }
 0x122   : > { %9464 = vmatprep.mubr.bf16.mxu1 %v5540_v6  ;;  %9489 = vmatpush3.bf16.msra.mxu1 %v10463_v47  ;;  %v5559_v47 = vor.u32 %v5557_v40, %v5555_v13  ;;  %v5567_v26 = vor.u32 %v5565_v5, %v5563_v43  ;;  %v7939_v6 = vcombine.low %v2220_v55, %v11215_v44  ;;  %v5577_v13 = vshll.u32 %v11520_v58, 16 }
 0x123   : > { %9490 = vmatprep.subr.bf16.mxu1 %v10469_v63  ;;  %v5575_v44 = vor.u32 %v5573_v42, %v5571_v57  ;;  %v1984_v59 = vsel %vm583_vm0, %v1979_v17, %v1983_v18  ;;  %v5839_v5 = vrot.slane %v11280_v29, 1  ;;  %v10475_v29 = vld [vmem:[%s12195_s2 + $0x188] sm:$0xff]   ;;  %v2250_v55 = vrot.slane %v11318_v9, 1  ;;  %v10478_v9 = vld [vmem:[%s12195_s2 + $0x198] sm:$0xff]  }
 0x124   : > { %9051 = vmatpush3.bf16.msra.mxu0 %v10468_v20  ;;  %v1968_v20 = vsel %vm583_vm0, %v1963_v1, %v1967_v23  ;;  %v5564_v11 = vsel %vm583_vm0, %v5559_v47, %v5563_v43  ;;  %v5572_v7 = vsel %vm583_vm0, %v5567_v26, %v5571_v57  ;;  %v2241_v3 = vrot.slane %v7939_v6, 1  ;;  %v10477_v47 = vld [vmem:[%s12195_s2 + $0x190] sm:$0xff]   ;;  %v10479_v26 = vld [vmem:[%s12195_s2 + $0x198] sm:$0xff]   ;;  %v10483_v42 = vld [vmem:[%s12195_s2 + $0x1a8] sm:$0xff]  }
 0x125   : > { %9080 = vmatprep.subr.bf16.mxu0 %v11495_v19  ;;  %v2246_v1 = vrot.slane %v11298_v38, 1  ;;  %v2248_v38 = vrot.slane %v11313_v32, 1  ;;  %v2252_v37 = vrot.slane %v11325_v41, 1  ;;  %v2254_v57 = vrot.slane %v11348_v0, 1 }
 0x126   : > { %9491 = vmatpush3.bf16.msra.mxu1 %v10469_v63  ;;  %v1976_v63 = vsel %vm583_vm0, %v1971_v39, %v1975_v46  ;;  %v2243_v23 = vsel %vm1135_vm1, %v2241_v3, %v2242_v8  ;;  %v10474_v46 = vld [vmem:[%s12195_s2 + $0x188] sm:$0xff]   ;;  %v5849_v41 = vrot.slane %v11368_v22, 1  ;;  %v2256_v22 = vrot.slane %v11374_v12, 1  ;;  %v10485_v3 = vld [vmem:[%s12195_s2 + $0x1b0] sm:$0xff]  }
 0x127   : > { %9025 = vmatmul.mubr.bf16.gmra.mrb[16].mxu0 %v1952_v33  ;;  %9520 = vmatprep.subr.bf16.mxu1 %v11504_v27  ;;  %v5579_v33 = vrot.slane %v5577_v13, 1  ;;  %v2249_v32 = vsel %vm1135_vm1, %v2246_v1, %v2248_v38  ;;  %v2253_v6 = vsel %vm1135_vm1, %v2250_v55, %v2252_v37  ;;  %v2255_v0 = vsel %vm1135_vm1, %v2252_v37, %v2254_v57  ;;  %v10512_v37 = vld [vmem:[%s12195_s2 + $0x1e0] sm:$0xff]  }
 0x128   : > { %9028 = vmatprep.mubr.bf16.mxu0 %v1960_v35  ;;  %v5836_v35 = vrot.slane %v8238_v48, 1  ;;  %v2258_v13 = vrot.slane %v11407_v16, 1  ;;  %v5851_v17 = vrot.slane %v11384_v14, 1  ;;  %v2257_v12 = vsel %vm1135_vm1, %v2254_v57, %v2256_v22  ;;  %v440_v16 = vld [vmem:[%s10975_s12 + $0x18] sm:$0xf]  ;;  %v10508_v57 = vld [vmem:[%s10760_s30 + $0x48] sm:$0xff]  }
 0x129   : > { %9465 = vmatmul.mubr.bf16.gmra.mrb[16].mxu1 %v5548_v21  ;;  %v5837_v21 = vrot.slane %v11252_v60, 1  ;;  %v5580_v40 = vsel %vm583_vm0, %v5575_v44, %v5579_v33  ;;  %v5853_v48 = vrot.slane %v11410_v54, 1  ;;  %447 = vst [vmem:[#allocation2 + $0x88] sm:$0xf] %v440_v16  ;;  %v10486_v14 = vld [vmem:[%s12195_s2 + $0x1b8] sm:$0xff]   ;;  %v2260_v44 = vrot.slane %v11413_v50, 1 }
 0x12a   : > { %9468 = vmatprep.mubr.bf16.mxu1 %v5556_v49  ;;  %v2244_v49 = vrot.slane %v11259_v53, 1  ;;  %v5842_v53 = vsel %vm1135_vm1, %v5839_v5, %v5841_v28  ;;  %v2259_v25 = vsel %vm1135_vm1, %v2256_v22, %v2258_v13  ;;  %v10487_v33 = vld [vmem:[%s12195_s2 + $0x1b8] sm:$0xff]   ;;  %v10511_v22 = vld [vmem:[#allocation2 + $0x50] sm:$0xff]  }
 0x12b   : > { %v5838_v10 = vsel %vm1135_vm1, %v5836_v35, %v5837_v21  ;;  %v5840_v43 = vsel %vm1135_vm1, %v5837_v21, %v5839_v5  ;;  %v5854_v54 = vsel %vm1135_vm1, %v5851_v17, %v5853_v48  ;;  %v10491_v35 = vld [vmem:[%s12195_s2 + $0x1c0] sm:$0xff]   ;;  %v5855_v21 = vrot.slane %v11420_v61, 1  ;;  %v6449_v16 = vld [vmem:[#allocation2 + $0x18] sm:$0xf] }
 0x12c   : > { %v2245_v60 = vsel %vm1135_vm1, %v2242_v8, %v2244_v49  ;;  %v2247_v39 = vsel %vm1135_vm1, %v2244_v49, %v2246_v1  ;;  %v5852_v8 = vsel %vm1135_vm1, %v5849_v41, %v5851_v17  ;;  %v2261_v50 = vsel %vm1135_vm1, %v2258_v13, %v2260_v44  ;;  %v10515_v13 = vld [vmem:[#allocation2 + $0x58] sm:$0xff]  }
 0x12d   : > { %v2264_v49 = vrot.slane %v11471_v51, 1  ;;  %v5859_v1 = vrot.slane %v11473_v56, 1  ;;  %v5863_v56 = vrot.slane %v11520_v58, 1  ;;  %v10496_v58 = vld [vmem:[#allocation2 + $0x28] sm:$0xff]   ;;  %v2855_v17 = vld [vmem:[%s10760_s30 + $0x18] sm:$0xf] }
 0x12f   : > { %9029 = vmatmul.mubr.bf16.gmra.mrb[20].mxu0 %v1968_v20  ;;  %v2251_v20 = vsel %vm1135_vm1, %v2248_v38, %v2250_v55  ;;  %v10494_v38 = vld [vmem:[%s10760_s30 + $0x28] sm:$0xff]  }
 0x130   : > { %9032 = vmatprep.mubr.bf16.mxu0 %v1976_v63  ;;  %v5847_v63 = vrot.slane %v11338_v36, 1  ;;  %v10497_v55 = vld [vmem:[%s12195_s2 + $0x1c8] sm:$0xff]  }
 0x131   : > { %9469 = vmatmul.mubr.bf16.gmra.mrb[20].mxu1 %v5564_v11  ;;  %v10482_v11 = vld [vmem:[%s12195_s2 + $0x1a8] sm:$0xff]  }
 0x132   : > { %9472 = vmatprep.mubr.bf16.mxu1 %v5572_v7  ;;  %v5848_v36 = vsel %vm1135_vm1, %v5845_v4, %v5847_v63  ;;  %v5850_v18 = vsel %vm1135_vm1, %v5847_v63, %v5849_v41  ;;  %v10484_v7 = vld [vmem:[%s12195_s2 + $0x1b0] sm:$0xff]   ;;  %v10505_v63 = vld [vmem:[#allocation2 + $0x40] sm:$0xff]   ;;  %v10509_v41 = vld [vmem:[#allocation2 + $0x48] sm:$0xff]  }
 0x137   : > { %9033 = vmatmul.mubr.bf16.gmra.mrb[24].mxu0 %v1984_v59  ;;  %v2262_v59 = vrot.slane %v11445_v2, 1  ;;  %v10493_v2 = vld [vmem:[%s12195_s2 + $0x1c0] sm:$0xff]  }
 0x138   : > { %9052 = vmatprep.mubr.bf16.mxu0 %v2243_v23  ;;  %v5857_v23 = vrot.slane %v11452_v15, 1  ;;  %v2266_v15 = vrot.slane %v11480_v24, 1  ;;  %v2268_v24 = vrot.slane %v11512_v31, 1  ;;  %v10495_v31 = vld [vmem:[%s12195_s2 + $0x1c8] sm:$0xff]  }
 0x139   : > { %9473 = vmatmul.mubr.bf16.gmra.mrb[24].mxu1 %v5580_v40  ;;  %v2263_v40 = vsel %vm1135_vm1, %v2260_v44, %v2262_v59  ;;  %v2265_v5 = vsel %vm1135_vm1, %v2262_v59, %v2264_v49  ;;  %v11711_v44 = vld [vmem:[%s10760_s30 + $0x20] sm:$0xff]  }
 0x13a   : > { %9492 = vmatprep.mubr.bf16.mxu1 %v5838_v10  ;;  %v5856_v10 = vsel %vm1135_vm1, %v5853_v48, %v5855_v21  ;;  %v5858_v61 = vsel %vm1135_vm1, %v5855_v21, %v5857_v23  ;;  %v11698_v48 = vld [vmem:[%s12195_s2 + $0x200] sm:$0xff]   ;;  %v10521_v21 = vld [vmem:[#allocation2 + $0x68] sm:$0xff]  }
 0x13b   : > { %v10517_v59 = vld [vmem:[#allocation2 + $0x60] sm:$0xff]  }
 0x13f   : > { %9053 = vmatmul.mubr.bf16.vlgmr.msra.gmra.mrb[0].mxu0 %v2245_v60  ;;  %v2267_v60 = vsel %vm1135_vm1, %v2264_v49, %v2266_v15  ;;  %v11726_v49 = vld [vmem:[%s10760_s30 + $0x30] sm:$0xff]  }
 0x140   : > { %9081 = vmatpush3.bf16.msra.mxu0 %v11495_v19  ;;  %9056 = vmatprep.mubr.bf16.mxu0 %v2247_v39  ;;  %v5843_v19 = vrot.slane %v11315_v45, 1  ;;  %v5860_v39 = vsel %vm1135_vm1, %v5857_v23, %v5859_v1  ;;  %v11718_v23 = vld [vmem:[%s10760_s30 + $0x28] sm:$0xff]  }
 0x141   : > { %9082 = vmatprep.subr.bf16.mxu0 %v10474_v46  ;;  %9493 = vmatmul.mubr.bf16.vlgmr.msra.gmra.mrb[0].mxu1 %v5840_v43  ;;  %v10488_v43 = vld [vmem:[%s10760_s30 + $0x18] sm:$0xff]  }
 0x142   : > { %9521 = vmatpush3.bf16.msra.mxu1 %v11504_v27  ;;  %9496 = vmatprep.mubr.bf16.mxu1 %v5842_v53  ;;  %v5844_v45 = vsel %vm1135_vm1, %v5841_v28, %v5843_v19  ;;  %v5846_v27 = vsel %vm1135_vm1, %v5843_v19, %v5845_v4  ;;  %v5861_v28 = vrot.slane %v11499_v30, 1  ;;  %v10489_v53 = vld [vmem:[#allocation2 + $0x18] sm:$0xff]   ;;  %v10500_v19 = vld [vmem:[%s12195_s2 + $0x1d0] sm:$0xff]  }
 0x143   : > { %9522 = vmatprep.subr.bf16.mxu1 %v10475_v29  ;;  %v10501_v4 = vld [vmem:[%s12195_s2 + $0x1d0] sm:$0xff]  }
 0x144   : > { %9083 = vmatpush3.bf16.msra.mxu0 %v10474_v46  ;;  %v5862_v51 = vsel %vm1135_vm1, %v5859_v1, %v5861_v28  ;;  %v2269_v46 = vsel %vm1135_vm1, %v2266_v15, %v2268_v24  ;;  %v5864_v30 = vsel %vm1135_vm1, %v5861_v28, %v5863_v56  ;;  %v10522_v15 = vld [vmem:[%s10760_s30 + $0x70] sm:$0xff]  }
 0x145   : > { %9084 = vmatprep.subr.bf16.mxu0 %v10476_v34 }
 0x146   : > { %9523 = vmatpush3.bf16.msra.mxu1 %v10475_v29  ;;  %v10490_v29 = vld [vmem:[%s10760_s30 + $0x20] sm:$0xff]  }
 0x147   : > { %9057 = vmatmul.mubr.bf16.gmra.mrb[4].mxu0 %v2249_v32  ;;  %9524 = vmatprep.subr.bf16.mxu1 %v10477_v47  ;;  %v10502_v32 = vld [vmem:[%s10760_s30 + $0x38] sm:$0xff]  }
 0x148   : > { %9060 = vmatprep.mubr.bf16.mxu0 %v2251_v20  ;;  %9085 = vmatpush3.bf16.msra.mxu0 %v10476_v34  ;;  %v10492_v34 = vld [vmem:[#allocation2 + $0x20] sm:$0xff]   ;;  %v10499_v20 = vld [vmem:[#allocation2 + $0x30] sm:$0xff]  }
 0x149   : > { %9497 = vmatmul.mubr.bf16.gmra.mrb[4].mxu1 %v5844_v45  ;;  %9086 = vmatprep.subr.bf16.mxu0 %v10478_v9  ;;  %v10503_v45 = vld [vmem:[#allocation2 + $0x38] sm:$0xff]  }
 0x14a   : > { %9500 = vmatprep.mubr.bf16.mxu1 %v5846_v27  ;;  %9525 = vmatpush3.bf16.msra.mxu1 %v10477_v47  ;;  %v10498_v47 = vld [vmem:[%s10760_s30 + $0x30] sm:$0xff]   ;;  %v10507_v27 = vld [vmem:[%s12195_s2 + $0x1d8] sm:$0xff]  }
 0x14b   : > { %9526 = vmatprep.subr.bf16.mxu1 %v10479_v26 }
 0x14c   : > { %9087 = vmatpush3.bf16.msra.mxu0 %v10478_v9  ;;  %v10506_v9 = vld [vmem:[%s12195_s2 + $0x1d8] sm:$0xff]  }
 0x14d   : > { %9088 = vmatprep.subr.bf16.mxu0 %v10480_v62 }
 0x14e   : > { %9527 = vmatpush3.bf16.msra.mxu1 %v10479_v26  ;;  %v10504_v26 = vld [vmem:[%s10760_s30 + $0x40] sm:$0xff]  }
 0x14f   : > { %9061 = vmatmul.mubr.bf16.gmra.mrb[8].mxu0 %v2253_v6  ;;  %9528 = vmatprep.subr.bf16.mxu1 %v10481_v52  ;;  %v10518_v6 = vld [vmem:[%s12195_s2 + $0x1e8] sm:$0xff]  }
 0x150   : > { %9064 = vmatprep.mubr.bf16.mxu0 %v2255_v0  ;;  %9089 = vmatpush3.bf16.msra.mxu0 %v10480_v62  ;;  %v10513_v62 = vld [vmem:[%s12195_s2 + $0x1e0] sm:$0xff]   ;;  %v10524_v0 = vld [vmem:[%s12195_s2 + $0x1f0] sm:$0xff]  }
 0x151   : > { %9501 = vmatmul.mubr.bf16.gmra.mrb[8].mxu1 %v5848_v36  ;;  %9090 = vmatprep.subr.bf16.mxu0 %v10482_v11  ;;  %v10514_v36 = vld [vmem:[%s10760_s30 + $0x58] sm:$0xff]  }
 0x152   : > { %9504 = vmatprep.mubr.bf16.mxu1 %v5850_v18  ;;  %9529 = vmatpush3.bf16.msra.mxu1 %v10481_v52  ;;  %v10519_v52 = vld [vmem:[%s12195_s2 + $0x1e8] sm:$0xff]   ;;  %v10525_v18 = vld [vmem:[%s12195_s2 + $0x1f0] sm:$0xff]  }
 0x153   : > { %9530 = vmatprep.subr.bf16.mxu1 %v10483_v42 }
 0x154   : > { %9091 = vmatpush3.bf16.msra.mxu0 %v10482_v11  ;;  %v10510_v11 = vld [vmem:[%s10760_s30 + $0x50] sm:$0xff]  }
 0x155   : > { %9092 = vmatprep.subr.bf16.mxu0 %v10484_v7 }
 0x156   : > { %9531 = vmatpush3.bf16.msra.mxu1 %v10483_v42  ;;  %v10530_v42 = vld [vmem:[%s12195_s2 + $0x1f8] sm:$0xff]  }
 0x157   : > { %9065 = vmatmul.mubr.bf16.gmra.mrb[12].mxu0 %v2257_v12  ;;  %9532 = vmatprep.subr.bf16.mxu1 %v10485_v3  ;;  %v11693_v12 = vld [vmem:[%s10760_s30 + $0x1c] sm:$0xf] }
 0x158   : > { %9068 = vmatprep.mubr.bf16.mxu0 %v2259_v25  ;;  %9093 = vmatpush3.bf16.msra.mxu0 %v10484_v7  ;;  %v10531_v7 = vld [vmem:[%s12195_s2 + $0x1f8] sm:$0xff]  }
 0x159   : > { %9505 = vmatmul.mubr.bf16.gmra.mrb[12].mxu1 %v5852_v8  ;;  %9094 = vmatprep.subr.bf16.mxu0 %v10486_v14  ;;  %v11701_v25 = vld [vmem:[#allocation2 + $0x1c] sm:$0xf]  ;;  %v8002_v8 = vcombine.low %v2855_v17, %v11693_v12  ;;  %v10541_v17 = vld [vmem:[%s12195_s2 + $0x208] sm:$0xff]  }
 0x15a   : > { %9508 = vmatprep.mubr.bf16.mxu1 %v5854_v54  ;;  %9533 = vmatpush3.bf16.msra.mxu1 %v10485_v3  ;;  %v10516_v3 = vld [vmem:[%s10760_s30 + $0x60] sm:$0xff]  }
 0x15b   : > { %9534 = vmatprep.subr.bf16.mxu1 %v10487_v33  ;;  %v11708_v54 = vld [vmem:[%s12195_s2 + $0x200] sm:$0xff]   ;;  %v2975_v1 = vshrl.u32 %v8002_v8, 16 }
 0x15c   : > { %9095 = vmatpush3.bf16.msra.mxu0 %v10486_v14  ;;  %v10520_v14 = vld [vmem:[%s10760_s30 + $0x68] sm:$0xff]  }
 0x15d   : > { %9124 = vmatprep.subr.bf16.mxu0 %v10491_v35 }
 0x15e   : > { %9535 = vmatpush3.bf16.msra.mxu1 %v10487_v33  ;;  %v11713_v33 = vld [vmem:[#allocation2 + $0x20] sm:$0xff]  }
 0x15f   : > { %9069 = vmatmul.mubr.bf16.gmra.mrb[16].mxu0 %v2261_v50  ;;  %9564 = vmatprep.subr.bf16.mxu1 %v10493_v2  ;;  %v2977_v50 = vshll.u32 %v8002_v8, 16  ;;  %v6579_v28 = vshrl.u32 %v11713_v33, 16 }
 0x160   : > { %9072 = vmatprep.mubr.bf16.mxu0 %v2263_v40  ;;  %v2982_v40 = vshll.u32 %v11711_v44, 16 }
 0x161   : > { %9509 = vmatmul.mubr.bf16.gmra.mrb[16].mxu1 %v5856_v10  ;;  %v6575_v10 = vshll.u32 %v11713_v33, 16  ;;  %v2979_v24 = vrot.slane %v2977_v50, 1 }
 0x162   : > { %9512 = vmatprep.mubr.bf16.mxu1 %v5858_v61 }
 0x167   : > { %9073 = vmatmul.mubr.bf16.gmra.mrb[20].mxu0 %v2265_v5  ;;  %v2986_v5 = vshrl.u32 %v11711_v44, 16 }
 0x168   : > { %9076 = vmatprep.mubr.bf16.mxu0 %v2267_v60  ;;  %v11732_v60 = vld [vmem:[#allocation2 + $0x30] sm:$0xff]  }
 0x169   : > { %9513 = vmatmul.mubr.bf16.gmra.mrb[20].mxu1 %v5860_v39  ;;  %v10523_v39 = vld [vmem:[#allocation2 + $0x70] sm:$0xff]  }
 0x16a   : > { %9516 = vmatprep.mubr.bf16.mxu1 %v5862_v51  ;;  %v10526_v51 = vld [vmem:[%s10760_s30 + $0x78] sm:$0xff]  }
 0x16f   : > { %9077 = vmatmul.mubr.bf16.gmra.mrb[24].mxu0 %v2269_v46  ;;  %v2990_v46 = vshll.u32 %v11718_v23, 16 }
 0x170   : > { %9096 = vmatprep.mubr.bf16.mxu0 %v10488_v43 }
 0x171   : > { %9517 = vmatmul.mubr.bf16.gmra.mrb[24].mxu1 %v5864_v30  ;;  %v10527_v30 = vld [vmem:[#allocation2 + $0x78] sm:$0xff]  }
 0x172   : > { %9536 = vmatprep.mubr.bf16.mxu1 %v10489_v53  ;;  %v2984_v53 = vrot.slane %v2982_v40, 1  ;;  %v10546_v40 = vld [vmem:[%s12195_s2 + $0x210] sm:$0xff]  }
 0x177   : > { %9097 = vmatmul.mubr.bf16.vlgmr.msra.gmra.mrb[0].mxu0 %v10490_v29  ;;  %v6577_v29 = vrot.slane %v6575_v10, 1 }
 0x178   : > { %9125 = vmatpush3.bf16.msra.mxu0 %v10491_v35  ;;  %9100 = vmatprep.mubr.bf16.mxu0 %v10494_v38  ;;  %v8301_v35 = vcombine.low %v6449_v16, %v11701_v25 }
 0x179   : > { %9126 = vmatprep.subr.bf16.mxu0 %v10495_v31  ;;  %9537 = vmatmul.mubr.bf16.vlgmr.msra.gmra.mrb[0].mxu1 %v10492_v34  ;;  %v6591_v34 = vshll.u32 %v11732_v60, 16 }
 0x17a   : > { %9565 = vmatpush3.bf16.msra.mxu1 %v10493_v2  ;;  %9540 = vmatprep.mubr.bf16.mxu1 %v10496_v58  ;;  %v11720_v2 = vld [vmem:[#allocation2 + $0x28] sm:$0xff]   ;;  %v6570_v61 = vshll.u32 %v8301_v35, 16  ;;  %v6568_v56 = vshrl.u32 %v8301_v35, 16  ;;  %v11745_v58 = vld [vmem:[%s10760_s30 + $0x38] sm:$0xff]  }
 0x17b   : > { %9566 = vmatprep.subr.bf16.mxu1 %v10497_v55  ;;  %v6583_v43 = vshll.u32 %v11720_v2, 16  ;;  %v11773_v35 = vld [vmem:[%s10760_s30 + $0x48] sm:$0xff]  }
 0x17c   : > { %9127 = vmatpush3.bf16.msra.mxu0 %v10495_v31  ;;  %v6572_v38 = vrot.slane %v6570_v61, 1  ;;  %v2998_v31 = vshll.u32 %v11726_v49, 16  ;;  %v11783_v61 = vld [vmem:[%s10760_s30 + $0x50] sm:$0xff]  }
 0x17d   : > { %9128 = vmatprep.subr.bf16.mxu0 %v10500_v19 }
 0x17e   : > { %9567 = vmatpush3.bf16.msra.mxu1 %v10497_v55  ;;  %v2992_v55 = vrot.slane %v2990_v46, 1 }
 0x17f   : > { %9101 = vmatmul.mubr.bf16.gmra.mrb[4].mxu0 %v10498_v47  ;;  %9568 = vmatprep.subr.bf16.mxu1 %v10501_v4  ;;  %v10528_v47 = vld [vmem:[%s10760_s30 + $0x80] sm:$0xff]  }
 0x180   : > { %9104 = vmatprep.mubr.bf16.mxu0 %v10502_v32  ;;  %9129 = vmatpush3.bf16.msra.mxu0 %v10500_v19  ;;  %v6585_v19 = vrot.slane %v6583_v43, 1  ;;  %v2994_v32 = vshrl.u32 %v11718_v23, 16 }
 0x181   : > { %9541 = vmatmul.mubr.bf16.gmra.mrb[4].mxu1 %v10499_v20  ;;  %9130 = vmatprep.subr.bf16.mxu0 %v10506_v9  ;;  %v3000_v20 = vrot.slane %v2998_v31, 1 }
 0x182   : > { %9544 = vmatprep.mubr.bf16.mxu1 %v10503_v45  ;;  %9569 = vmatpush3.bf16.msra.mxu1 %v10501_v4  ;;  %v2980_v4 = vor.u32 %v2979_v24, %v2975_v1  ;;  %v3002_v45 = vshrl.u32 %v11726_v49, 16 }
 0x183   : > { %9570 = vmatprep.subr.bf16.mxu1 %v10507_v27 }
 0x184   : > { %9131 = vmatpush3.bf16.msra.mxu0 %v10506_v9  ;;  %v6587_v9 = vshrl.u32 %v11720_v2, 16  ;;  %v3004_v1 = vor.u32 %v3002_v45, %v3000_v20 }
 0x185   : > { %9132 = vmatprep.subr.bf16.mxu0 %v10512_v37 }
 0x186   : > { %9571 = vmatpush3.bf16.msra.mxu1 %v10507_v27  ;;  %v6593_v27 = vrot.slane %v6591_v34, 1  ;;  %v6589_v8 = vor.u32 %v6587_v9, %v6585_v19  ;;  %v10552_v34 = vld [vmem:[%s12195_s2 + $0x218] sm:$0xff]  }
 0x187   : > { %9105 = vmatmul.mubr.bf16.gmra.mrb[8].mxu0 %v10504_v26  ;;  %9572 = vmatprep.subr.bf16.mxu1 %v10513_v62  ;;  %v10529_v26 = vld [vmem:[#allocation2 + $0x80] sm:$0xff]   ;;  %v10553_v9 = vld [vmem:[%s12195_s2 + $0x218] sm:$0xff]  }
 0x188   : > { %9108 = vmatprep.mubr.bf16.mxu0 %v10508_v57  ;;  %9133 = vmatpush3.bf16.msra.mxu0 %v10512_v37  ;;  %v3006_v37 = vshll.u32 %v11745_v58, 16  ;;  %v6573_v57 = vor.u32 %v6572_v38, %v6568_v56  ;;  %v3022_v56 = vshll.u32 %v11773_v35, 16  ;;  %v3030_v38 = vshll.u32 %v11783_v61, 16 }
 0x189   : > { %9545 = vmatmul.mubr.bf16.gmra.mrb[8].mxu1 %v10505_v63  ;;  %9134 = vmatprep.subr.bf16.mxu0 %v10518_v6  ;;  %v2985_v63 = vsel %vm583_vm0, %v2980_v4, %v2984_v53  ;;  %v11808_v4 = vld [vmem:[%s10760_s30 + $0x58] sm:$0xff]  }
 0x18a   : > { %9548 = vmatprep.mubr.bf16.mxu1 %v10509_v41  ;;  %9573 = vmatpush3.bf16.msra.mxu1 %v10513_v62  ;;  %v11752_v62 = vld [vmem:[#allocation2 + $0x38] sm:$0xff]   ;;  %v6595_v41 = vshrl.u32 %v11732_v60, 16 }
 0x18b   : > { %9574 = vmatprep.subr.bf16.mxu1 %v10519_v52 }
 0x18c   : > { %9135 = vmatpush3.bf16.msra.mxu0 %v10518_v6  ;;  %v11756_v6 = vld [vmem:[%s10760_s30 + $0x40] sm:$0xff]   ;;  %v6597_v24 = vor.u32 %v6595_v41, %v6593_v27  ;;  %v11819_v41 = vld [vmem:[#allocation2 + $0x58] sm:$0xff]  }
 0x18d   : > { %9136 = vmatprep.subr.bf16.mxu0 %v10524_v0 }
 0x18e   : > { %9575 = vmatpush3.bf16.msra.mxu1 %v10519_v52  ;;  %v11759_v52 = vld [vmem:[#allocation2 + $0x40] sm:$0xff]  }
 0x18f   : > { %9109 = vmatmul.mubr.bf16.gmra.mrb[12].mxu0 %v10510_v11  ;;  %9576 = vmatprep.subr.bf16.mxu1 %v10525_v18  ;;  %v6578_v11 = vsel %vm583_vm0, %v6573_v57, %v6577_v29  ;;  %v6607_v16 = vshll.u32 %v11759_v52, 16  ;;  %v11817_v57 = vld [vmem:[%s10760_s30 + $0x60] sm:$0xff]  }
 0x190   : > { %9112 = vmatprep.mubr.bf16.mxu0 %v10514_v36  ;;  %9137 = vmatpush3.bf16.msra.mxu0 %v10524_v0  ;;  %v2988_v0 = vor.u32 %v2986_v5, %v2984_v53  ;;  %v2996_v36 = vor.u32 %v2994_v32, %v2992_v55  ;;  %v11796_v53 = vld [vmem:[#allocation2 + $0x50] sm:$0xff]  }
 0x191   : > { %9549 = vmatmul.mubr.bf16.gmra.mrb[12].mxu1 %v10511_v22  ;;  %9138 = vmatprep.subr.bf16.mxu0 %v10530_v42  ;;  %v6599_v22 = vshll.u32 %v11752_v62, 16 }
 0x192   : > { %9552 = vmatprep.mubr.bf16.mxu1 %v10515_v13  ;;  %9577 = vmatpush3.bf16.msra.mxu1 %v10525_v18  ;;  %v3008_v18 = vrot.slane %v3006_v37, 1  ;;  %v6603_v13 = vshrl.u32 %v11752_v62, 16 }
 0x193   : > { %9578 = vmatprep.subr.bf16.mxu1 %v10531_v7 }
 0x194   : > { %9139 = vmatpush3.bf16.msra.mxu0 %v10530_v42  ;;  %v3010_v42 = vshrl.u32 %v11745_v58, 16  ;;  %v3009_v46 = vsel %vm583_vm0, %v3004_v1, %v3008_v18 }
 0x195   : > { %9168 = vmatprep.subr.bf16.mxu0 %v11698_v48 }
 0x196   : > { %9579 = vmatpush3.bf16.msra.mxu1 %v10531_v7  ;;  %v6581_v7 = vor.u32 %v6579_v28, %v6577_v29  ;;  %v3012_v5 = vor.u32 %v3010_v42, %v3008_v18  ;;  %v6601_v28 = vrot.slane %v6599_v22, 1 }
 0x197   : > { %9113 = vmatmul.mubr.bf16.gmra.mrb[16].mxu0 %v10516_v3  ;;  %9608 = vmatprep.subr.bf16.mxu1 %v11708_v54  ;;  %v3014_v3 = vshll.u32 %v11756_v6, 16 }
 0x198   : > { %9116 = vmatprep.mubr.bf16.mxu0 %v10520_v14  ;;  %v2993_v14 = vsel %vm583_vm0, %v2988_v0, %v2992_v55  ;;  %v6586_v50 = vsel %vm583_vm0, %v6581_v7, %v6585_v19  ;;  %v6605_v43 = vor.u32 %v6603_v13, %v6601_v28  ;;  %v6602_v55 = vsel %vm583_vm0, %v6597_v24, %v6601_v28  ;;  %v10558_v0 = vld [vmem:[%s12195_s2 + $0x220] sm:$0xff]  }
 0x199   : > { %9553 = vmatmul.mubr.bf16.gmra.mrb[16].mxu1 %v10517_v59  ;;  %v3001_v59 = vsel %vm583_vm0, %v2996_v36, %v3000_v20  ;;  %v3016_v10 = vrot.slane %v3014_v3, 1  ;;  %v3024_v19 = vrot.slane %v3022_v56, 1  ;;  %v3038_v36 = vshll.u32 %v11808_v4, 16  ;;  %v10559_v7 = vld [vmem:[%s12195_s2 + $0x220] sm:$0xff]   ;;  %v11851_v56 = vld [vmem:[%s10760_s30 + $0x70] sm:$0xff]  }
 0x19a   : > { %9556 = vmatprep.mubr.bf16.mxu1 %v10521_v21  ;;  %v10543_v21 = vld [vmem:[%s12195_s2 + $0x208] sm:$0xff]   ;;  %v3034_v13 = vshrl.u32 %v11783_v61, 16 }
 0x19b   : > { %v3017_v29 = vsel %vm583_vm0, %v3012_v5, %v3016_v10  ;;  %v6635_v5 = vshrl.u32 %v11819_v41, 16 }
 0x19f   : > { %9117 = vmatmul.mubr.bf16.gmra.mrb[20].mxu0 %v10522_v15  ;;  %v6594_v15 = vsel %vm583_vm0, %v6589_v8, %v6593_v27  ;;  %v6623_v27 = vshll.u32 %v11796_v53, 16  ;;  %v6631_v8 = vshll.u32 %v11819_v41, 16 }
 0x1a0   : > { %9120 = vmatprep.mubr.bf16.mxu0 %v10526_v51  ;;  %v11790_v51 = vld [vmem:[#allocation2 + $0x48] sm:$0xff]  }
 0x1a1   : > { %9557 = vmatmul.mubr.bf16.gmra.mrb[20].mxu1 %v10523_v39  ;;  %v10547_v39 = vld [vmem:[%s12195_s2 + $0x210] sm:$0xff]   ;;  %v6615_v31 = vshll.u32 %v11790_v51, 16  ;;  %v6619_v45 = vshrl.u32 %v11790_v51, 16  ;;  %v6625_v42 = vrot.slane %v6623_v27, 1  ;;  %v10576_v27 = vld [vmem:[%s12195_s2 + $0x238] sm:$0xff]  }
 0x1a2   : > { %9560 = vmatprep.mubr.bf16.mxu1 %v10527_v30  ;;  %v6609_v30 = vrot.slane %v6607_v16, 1  ;;  %v3042_v16 = vshrl.u32 %v11808_v4, 16 }
 0x1a4   : > { %v6610_v32 = vsel %vm583_vm0, %v6605_v43, %v6609_v30  ;;  %v11853_v43 = vld [vmem:[#allocation2 + $0x68] sm:$0xff]  }
 0x1a7   : > { %9121 = vmatmul.mubr.bf16.gmra.mrb[24].mxu0 %v10528_v47  ;;  %v6611_v47 = vshrl.u32 %v11759_v52, 16 }
 0x1a8   : > { %9140 = vmatprep.mubr.bf16.mxu0 %v2985_v63  ;;  %v6617_v63 = vrot.slane %v6615_v31, 1 }
 0x1a9   : > { %9561 = vmatmul.mubr.bf16.gmra.mrb[24].mxu1 %v10529_v26  ;;  %v3032_v26 = vrot.slane %v3030_v38, 1 }
 0x1aa   : > { %9580 = vmatprep.mubr.bf16.mxu1 %v6578_v11  ;;  %v6613_v11 = vor.u32 %v6611_v47, %v6609_v30  ;;  %v6621_v22 = vor.u32 %v6619_v45, %v6617_v63  ;;  %v10570_v30 = vld [vmem:[%s12195_s2 + $0x230] sm:$0xff]   ;;  %v6647_v45 = vshll.u32 %v11853_v43, 16 }
 0x1ab   : > { %v3036_v1 = vor.u32 %v3034_v13, %v3032_v26  ;;  %v10571_v47 = vld [vmem:[%s12195_s2 + $0x230] sm:$0xff]  }
 0x1af   : > { %9141 = vmatmul.mubr.bf16.vlgmr.msra.gmra.mrb[0].mxu0 %v2993_v14  ;;  %v3046_v14 = vshll.u32 %v11817_v57, 16 }
 0x1b0   : > { %9169 = vmatpush3.bf16.msra.mxu0 %v11698_v48  ;;  %9144 = vmatprep.mubr.bf16.mxu0 %v3001_v59  ;;  %v3018_v48 = vshrl.u32 %v11756_v6, 16  ;;  %v10564_v59 = vld [vmem:[%s12195_s2 + $0x228] sm:$0xff]  }
 0x1b1   : > { %9170 = vmatprep.subr.bf16.mxu0 %v10541_v17  ;;  %9581 = vmatmul.mubr.bf16.vlgmr.msra.gmra.mrb[0].mxu1 %v6586_v50  ;;  %v3040_v50 = vrot.slane %v3038_v36, 1 }
 0x1b2   : > { %9609 = vmatpush3.bf16.msra.mxu1 %v11708_v54  ;;  %9584 = vmatprep.mubr.bf16.mxu1 %v6594_v15  ;;  %v3026_v54 = vshrl.u32 %v11773_v35, 16  ;;  %v3020_v20 = vor.u32 %v3018_v48, %v3016_v10  ;;  %v11842_v10 = vld [vmem:[%s10760_s30 + $0x68] sm:$0xff]   ;;  %v6626_v15 = vsel %vm583_vm0, %v6621_v22, %v6625_v42  ;;  %v3048_v48 = vrot.slane %v3046_v14, 1  ;;  %v11887_v14 = vld [vmem:[#allocation2 + $0x78] sm:$0xff]  }
 0x1b3   : > { %9610 = vmatprep.subr.bf16.mxu1 %v10543_v21  ;;  %v3044_v24 = vor.u32 %v3042_v16, %v3040_v50  ;;  %v3041_v38 = vsel %vm583_vm0, %v3036_v1, %v3040_v50  ;;  %v6649_v16 = vrot.slane %v6647_v45, 1  ;;  %v3325_v45 = vld [vmem:[%s10760_s30 + $0x18] sm:$0xe] }
 0x1b4   : > { %9171 = vmatpush3.bf16.msra.mxu0 %v10541_v17  ;;  %v3028_v37 = vor.u32 %v3026_v54, %v3024_v19  ;;  %v3025_v18 = vsel %vm583_vm0, %v3020_v20, %v3024_v19  ;;  %v11830_v17 = vld [vmem:[#allocation2 + $0x60] sm:$0xff]   ;;  %v3054_v54 = vshll.u32 %v11842_v10, 16  ;;  %v11861_v19 = vld [vmem:[#allocation2 + $0x70] sm:$0xff]   ;;  %v3058_v20 = vshrl.u32 %v11842_v10, 16 }
 0x1b5   : > { %9172 = vmatprep.subr.bf16.mxu0 %v10546_v40  ;;  %v6639_v28 = vshll.u32 %v11830_v17, 16  ;;  %v6655_v22 = vshll.u32 %v11861_v19, 16 }
 0x1b6   : > { %9611 = vmatpush3.bf16.msra.mxu1 %v10543_v21  ;;  %v3033_v3 = vsel %vm583_vm0, %v3028_v37, %v3032_v26  ;;  %v6618_v21 = vsel %vm583_vm0, %v6613_v11, %v6617_v63  ;;  %v3056_v26 = vrot.slane %v3054_v54, 1  ;;  %v6643_v63 = vshrl.u32 %v11830_v17, 16 }
 0x1b7   : > { %9145 = vmatmul.mubr.bf16.gmra.mrb[4].mxu0 %v3009_v46  ;;  %9612 = vmatprep.subr.bf16.mxu1 %v10547_v39  ;;  %v6633_v46 = vrot.slane %v6631_v8, 1  ;;  %v11892_v8 = vld [vmem:[%s12198_s5] sm:$0xff]   ;;  %v6657_v1 = vrot.slane %v6655_v22, 1 }
 0x1b8   : > { %9148 = vmatprep.mubr.bf16.mxu0 %v3017_v29  ;;  %9173 = vmatpush3.bf16.msra.mxu0 %v10546_v40  ;;  %v6627_v40 = vshrl.u32 %v11796_v53, 16  ;;  %v3060_v13 = vor.u32 %v3058_v20, %v3056_v26 }
 0x1b9   : > { %9585 = vmatmul.mubr.bf16.gmra.mrb[4].mxu1 %v6602_v55  ;;  %9174 = vmatprep.subr.bf16.mxu0 %v10552_v34  ;;  %v6637_v31 = vor.u32 %v6635_v5, %v6633_v46  ;;  %v3050_v55 = vshrl.u32 %v11817_v57, 16  ;;  %v11897_v5 = vld [vmem:[#allocation2 + $0x80] sm:$0xff]  }
 0x1ba   : > { %9588 = vmatprep.mubr.bf16.mxu1 %v6610_v32  ;;  %9613 = vmatpush3.bf16.msra.mxu1 %v10547_v39  ;;  %v10565_v39 = vld [vmem:[%s12195_s2 + $0x228] sm:$0xff]   ;;  %v6629_v29 = vor.u32 %v6627_v40, %v6625_v42  ;;  %v3049_v32 = vsel %vm583_vm0, %v3044_v24, %v3048_v48  ;;  %v10577_v42 = vld [vmem:[%s12195_s2 + $0x238] sm:$0xff]  }
 0x1bb   : > { %9614 = vmatprep.subr.bf16.mxu1 %v10553_v9  ;;  %v3052_v36 = vor.u32 %v3050_v55, %v3048_v48  ;;  %v6671_v55 = vshll.u32 %v11897_v5, 16 }
 0x1bc   : > { %9175 = vmatpush3.bf16.msra.mxu0 %v10552_v34  ;;  %v6641_v34 = vrot.slane %v6639_v28, 1  ;;  %v6634_v37 = vsel %vm583_vm0, %v6629_v29, %v6633_v46  ;;  %v11902_v28 = vld [vmem:[%s12198_s5] sm:$0xff]   ;;  %v6663_v46 = vshll.u32 %v11887_v14, 16 }
 0x1bd   : > { %9176 = vmatprep.subr.bf16.mxu0 %v10558_v0  ;;  %v3057_v40 = vsel %vm583_vm0, %v3052_v36, %v3056_v26  ;;  %v11920_v26 = vld [vmem:[#allocation2 + $0x88] ss:$0 sps:$4 sm:$0x11]  }
 0x1be   : > { %9615 = vmatpush3.bf16.msra.mxu1 %v10553_v9  ;;  %v3062_v9 = vshll.u32 %v11851_v56, 16  ;;  %v6642_v11 = vsel %vm583_vm0, %v6637_v31, %v6641_v34 }
 0x1bf   : > { %9149 = vmatmul.mubr.bf16.gmra.mrb[8].mxu0 %v3025_v18  ;;  %9616 = vmatprep.subr.bf16.mxu1 %v10559_v7  ;;  %v6651_v18 = vshrl.u32 %v11853_v43, 16 }
 0x1c0   : > { %9152 = vmatprep.mubr.bf16.mxu0 %v3033_v3  ;;  %9177 = vmatpush3.bf16.msra.mxu0 %v10558_v0  ;;  %v11876_v0 = vld [vmem:[%s10760_s30 + $0x78] sm:$0xff]   ;;  %v11885_v3 = vld [vmem:[%s10760_s30 + $0x80] sm:$0xff]  }
 0x1c1   : > { %9589 = vmatmul.mubr.bf16.gmra.mrb[8].mxu1 %v6618_v21  ;;  %9178 = vmatprep.subr.bf16.mxu0 %v10564_v59  ;;  %v3066_v21 = vshrl.u32 %v11851_v56, 16  ;;  %v3070_v50 = vshll.u32 %v11876_v0, 16  ;;  %v3074_v24 = vshrl.u32 %v11876_v0, 16  ;;  %v3078_v48 = vshll.u32 %v11885_v3, 16 }
 0x1c2   : > { %9592 = vmatprep.mubr.bf16.mxu1 %v6626_v15  ;;  %9617 = vmatpush3.bf16.msra.mxu1 %v10559_v7  ;;  %v3064_v7 = vrot.slane %v3062_v9, 1  ;;  %v6653_v15 = vor.u32 %v6651_v18, %v6649_v16  ;;  %v6665_v9 = vrot.slane %v6663_v46, 1  ;;  %v3082_v36 = vshrl.u32 %v11885_v3, 16 }
 0x1c3   : > { %9618 = vmatprep.subr.bf16.mxu1 %v10565_v39  ;;  %v3072_v54 = vrot.slane %v3070_v50, 1  ;;  %v3080_v20 = vrot.slane %v3078_v48, 1 }
 0x1c4   : > { %9179 = vmatpush3.bf16.msra.mxu0 %v10564_v59  ;;  %v6645_v59 = vor.u32 %v6643_v63, %v6641_v34  ;;  %v3068_v29 = vor.u32 %v3066_v21, %v3064_v7  ;;  %v6658_v31 = vsel %vm583_vm0, %v6653_v15, %v6657_v1  ;;  %v6667_v34 = vshrl.u32 %v11887_v14, 16 }
 0x1c5   : > { %9180 = vmatprep.subr.bf16.mxu0 %v10570_v30  ;;  %v3084_v50 = vor.u32 %v3082_v36, %v3080_v20  ;;  %v10588_v36 = vld [vmem:[%s12198_s5 + $0x20] sm:$0xff]  }
 0x1c6   : > { %9619 = vmatpush3.bf16.msra.mxu1 %v10565_v39  ;;  %v3065_v39 = vsel %vm583_vm0, %v3060_v13, %v3064_v7  ;;  %v6669_v63 = vor.u32 %v6667_v34, %v6665_v9  ;;  %v6918_v13 = vld [vmem:[#allocation2 + $0x18] sm:$0xe] }
 0x1c7   : > { %9153 = vmatmul.mubr.bf16.gmra.mrb[12].mxu0 %v3041_v38  ;;  %9620 = vmatprep.subr.bf16.mxu1 %v10571_v47  ;;  %v6659_v38 = vshrl.u32 %v11861_v19, 16  ;;  %v8340_v15 = vcombine.low %v6918_v13, %v11701_v25  ;;  %v10590_v13 = vld [vmem:[%s12198_s5 + $0x28] sm:$0xff]  }
 0x1c8   : > { %9156 = vmatprep.mubr.bf16.mxu0 %v3049_v32  ;;  %9181 = vmatpush3.bf16.msra.mxu0 %v10570_v30  ;;  %v6650_v30 = vsel %vm583_vm0, %v6645_v59, %v6649_v16  ;;  %v3076_v32 = vor.u32 %v3074_v24, %v3072_v54  ;;  %v6675_v16 = vshrl.u32 %v11897_v5, 16  ;;  %v6679_v59 = vshll.u32 %v11920_v26, 16 }
 0x1c9   : > { %9593 = vmatmul.mubr.bf16.gmra.mrb[12].mxu1 %v6634_v37  ;;  %9182 = vmatprep.subr.bf16.mxu0 %v10576_v27  ;;  %v6661_v37 = vor.u32 %v6659_v38, %v6657_v1  ;;  %v6938_v46 = vrot.slane %v8340_v15, 1  ;;  %v3349_v38 = vrot.slane %v11718_v23, 1  ;;  %v10593_v15 = vld [vmem:[%s12198_s5 + $0x30] sm:$0xff]  }
 0x1ca   : > { %9596 = vmatprep.mubr.bf16.mxu1 %v6642_v11  ;;  %9621 = vmatpush3.bf16.msra.mxu1 %v10571_v47  ;;  %v11915_v47 = vld [vmem:[%s10760_s30 + $0x88] ss:$0 sps:$4 sm:$0x11]   ;;  %v6673_v11 = vrot.slane %v6671_v55, 1  ;;  %v3081_v22 = vsel %vm583_vm0, %v3076_v32, %v3080_v20  ;;  %v6681_v24 = vrot.slane %v6679_v59, 1  ;;  %v3363_v59 = vrot.slane %v11817_v57, 1 }
 0x1cb   : > { %9622 = vmatprep.subr.bf16.mxu1 %v10577_v42  ;;  %v3086_v18 = vshll.u32 %v11915_v47, 16  ;;  %v6666_v7 = vsel %vm583_vm0, %v6661_v37, %v6665_v9  ;;  %v10582_v32 = vld [vmem:[%s12198_s5 + $0x8] sm:$0xff]   ;;  %v3355_v9 = vrot.slane %v11756_v6, 1  ;;  %v10586_v6 = vld [vmem:[%s12198_s5 + $0x18] sm:$0xff]  }
 0x1cc   : > { %9183 = vmatpush3.bf16.msra.mxu0 %v10576_v27  ;;  %v3073_v27 = vsel %vm583_vm0, %v3068_v29, %v3072_v54  ;;  %v6674_v21 = vsel %vm583_vm0, %v6669_v63, %v6673_v11  ;;  %v3357_v63 = vrot.slane %v11773_v35, 1  ;;  %v6951_v35 = vrot.slane %v11796_v53, 1 }
 0x1cd   : > { %9212 = vmatprep.subr.bf16.mxu0 %v11892_v8  ;;  %v3361_v53 = vrot.slane %v11808_v4, 1 }
 0x1ce   : > { %9623 = vmatpush3.bf16.msra.mxu1 %v10577_v42  ;;  %v8041_v42 = vcombine.low %v3325_v45, %v11693_v12  ;;  %v6677_v12 = vor.u32 %v6675_v16, %v6673_v11  ;;  %v3359_v11 = vrot.slane %v11783_v61, 1  ;;  %v10591_v16 = vld [vmem:[%s12198_s5 + $0x28] sm:$0xff]  }
 0x1cf   : > { %9157 = vmatmul.mubr.bf16.gmra.mrb[16].mxu0 %v3057_v40  ;;  %9652 = vmatprep.subr.bf16.mxu1 %v11902_v28  ;;  %v3088_v40 = vrot.slane %v3086_v18, 1  ;;  %v6949_v18 = vrot.slane %v11790_v51, 1  ;;  %v3364_v57 = vsel %vm1135_vm1, %v3361_v53, %v3363_v59 }
 0x1d0   : > { %9160 = vmatprep.mubr.bf16.mxu0 %v3065_v39  ;;  %v3346_v1 = vrot.slane %v8041_v42, 1  ;;  %v3347_v39 = vrot.slane %v11711_v44, 1  ;;  %v6682_v54 = vsel %vm583_vm0, %v6677_v12, %v6681_v24  ;;  %v3351_v44 = vrot.slane %v11726_v49, 1  ;;  %v10589_v42 = vld [vmem:[%s12198_s5 + $0x20] sm:$0xff]   ;;  %v10595_v12 = vld [vmem:[%s12198_s5 + $0x38] sm:$0xff]  }
 0x1d1   : > { %9597 = vmatmul.mubr.bf16.gmra.mrb[16].mxu1 %v6650_v30  ;;  %v3089_v48 = vsel %vm583_vm0, %v3084_v50, %v3088_v40  ;;  %v6939_v30 = vrot.slane %v11713_v33, 1  ;;  %v6943_v33 = vrot.slane %v11732_v60, 1  ;;  %v3353_v49 = vrot.slane %v11745_v58, 1  ;;  %v10584_v60 = vld [vmem:[%s12198_s5 + $0x10] sm:$0xff]  }
 0x1d2   : > { %9600 = vmatprep.mubr.bf16.mxu1 %v6658_v31  ;;  %v3348_v29 = vsel %vm1135_vm1, %v3346_v1, %v3347_v39  ;;  %v6941_v31 = vrot.slane %v11720_v2, 1  ;;  %v3350_v34 = vsel %vm1135_vm1, %v3347_v39, %v3349_v38  ;;  %v3352_v55 = vsel %vm1135_vm1, %v3349_v38, %v3351_v44  ;;  %v10583_v2 = vld [vmem:[%s12198_s5 + $0x8] sm:$0xff]   ;;  %v10585_v58 = vld [vmem:[%s12198_s5 + $0x10] sm:$0xff]   ;;  %v10594_v1 = vld [vmem:[%s12198_s5 + $0x38] sm:$0xff]  }
 0x1d3   : > { %v6940_v25 = vsel %vm1135_vm1, %v6938_v46, %v6939_v30  ;;  %v3354_v45 = vsel %vm1135_vm1, %v3351_v44, %v3353_v49  ;;  %v3356_v37 = vsel %vm1135_vm1, %v3353_v49, %v3355_v9  ;;  %v3360_v61 = vsel %vm1135_vm1, %v3357_v63, %v3359_v11  ;;  %v10603_v49 = vld [vmem:[%s11740_s7 + $0x88] sm:$0xff]  }
 0x1d4   : > { %v6942_v20 = vsel %vm1135_vm1, %v6939_v30, %v6941_v31  ;;  %v6944_v23 = vsel %vm1135_vm1, %v6941_v31, %v6943_v33  ;;  %v6953_v50 = vrot.slane %v11819_v41, 1  ;;  %v3362_v4 = vsel %vm1135_vm1, %v3359_v11, %v3361_v53  ;;  %v10617_v11 = vld [vmem:[%s11740_s7 + $0xc0] sm:$0xff]  }
 0x1d5   : > { %v6955_v40 = vrot.slane %v11830_v17, 1  ;;  %v3365_v39 = vrot.slane %v11842_v10, 1  ;;  %v3367_v24 = vrot.slane %v11851_v56, 1  ;;  %v6959_v30 = vrot.slane %v11861_v19, 1 }
 0x1d6   : > { %v6954_v41 = vsel %vm1135_vm1, %v6951_v35, %v6953_v50  ;;  %v6961_v19 = vrot.slane %v11887_v14, 1  ;;  %v6963_v38 = vrot.slane %v11897_v5, 1  ;;  %v6965_v14 = vrot.slane %v11920_v26, 1  ;;  %v10601_v26 = vld [vmem:[%s11740_s7 + $0x80] sm:$0xff]  }
 0x1d7   : > { %9161 = vmatmul.mubr.bf16.gmra.mrb[20].mxu0 %v3073_v27  ;;  %v6947_v27 = vrot.slane %v11759_v52, 1  ;;  %v10587_v52 = vld [vmem:[%s12198_s5 + $0x18] sm:$0xff]   ;;  %v6956_v17 = vsel %vm1135_vm1, %v6953_v50, %v6955_v40  ;;  %v3366_v46 = vsel %vm1135_vm1, %v3363_v59, %v3365_v39  ;;  %v3368_v10 = vsel %vm1135_vm1, %v3365_v39, %v3367_v24 }
 0x1d8   : > { %9164 = vmatprep.mubr.bf16.mxu0 %v3081_v22  ;;  %v3358_v22 = vsel %vm1135_vm1, %v3355_v9, %v3357_v63  ;;  %v6962_v31 = vsel %vm1135_vm1, %v6959_v30, %v6961_v19  ;;  %v10606_v9 = vld [vmem:[%s11740_s7 + $0x28] sm:$0xff]   ;;  %v10616_v63 = vld [vmem:[%s11740_s7 + $0x50] sm:$0xff]  }
 0x1d9   : > { %9601 = vmatmul.mubr.bf16.gmra.mrb[20].mxu1 %v6666_v7  ;;  %v6950_v51 = vsel %vm1135_vm1, %v6947_v27, %v6949_v18  ;;  %v6952_v7 = vsel %vm1135_vm1, %v6949_v18, %v6951_v35  ;;  %v10620_v18 = vld [vmem:[%s11740_s7 + $0x60] sm:$0xff]   ;;  %v10621_v35 = vld [vmem:[%s11740_s7 + $0xd0] sm:$0xff]  }
 0x1da   : > { %9604 = vmatprep.mubr.bf16.mxu1 %v6674_v21  ;;  %v10592_v21 = vld [vmem:[%s12198_s5 + $0x30] sm:$0xff]  }
 0x1df   : > { %9165 = vmatmul.mubr.bf16.gmra.mrb[24].mxu0 %v3089_v48  ;;  %v6957_v48 = vrot.slane %v11853_v43, 1  ;;  %v3371_v43 = vrot.slane %v11885_v3, 1  ;;  %v3373_v3 = vrot.slane %v11915_v47, 1  ;;  %v10598_v47 = vld [vmem:[%s11740_s7 + $0x8] sm:$0xff]  }
 0x1e0   : > { %9184 = vmatprep.mubr.bf16.mxu0 %v3348_v29 }
 0x1e1   : > { %9605 = vmatmul.mubr.bf16.gmra.mrb[24].mxu1 %v6682_v54  ;;  %v6958_v29 = vsel %vm1135_vm1, %v6955_v40, %v6957_v48  ;;  %v6960_v56 = vsel %vm1135_vm1, %v6957_v48, %v6959_v30  ;;  %v3369_v54 = vrot.slane %v11876_v0, 1  ;;  %v6964_v0 = vsel %vm1135_vm1, %v6961_v19, %v6963_v38 }
 0x1e2   : > { %9624 = vmatprep.mubr.bf16.mxu1 %v6940_v25  ;;  %v3374_v5 = vsel %vm1135_vm1, %v3371_v43, %v3373_v3 }
 0x1e3   : > { %v3370_v25 = vsel %vm1135_vm1, %v3367_v24, %v3369_v54  ;;  %v3372_v44 = vsel %vm1135_vm1, %v3369_v54, %v3371_v43 }
 0x1e7   : > { %9185 = vmatmul.mubr.bf16.vlgmr.msra.gmra.mrb[0].mxu0 %v3350_v34  ;;  %v10596_v34 = vld [vmem:[%s11740_s7] sm:$0xff]  }
 0x1e8   : > { %9213 = vmatpush3.bf16.msra.mxu0 %v11892_v8  ;;  %9188 = vmatprep.mubr.bf16.mxu0 %v3352_v55  ;;  %v6945_v8 = vrot.slane %v11752_v62, 1  ;;  %v10597_v55 = vld [vmem:[%s11740_s7 + $0x70] sm:$0xff]  }
 0x1e9   : > { %9214 = vmatprep.subr.bf16.mxu0 %v10582_v32  ;;  %9625 = vmatmul.mubr.bf16.vlgmr.msra.gmra.mrb[0].mxu1 %v6942_v20  ;;  %v10599_v20 = vld [vmem:[%s11740_s7 + $0x78] sm:$0xff]  }
 0x1ea   : > { %9653 = vmatpush3.bf16.msra.mxu1 %v11902_v28  ;;  %9628 = vmatprep.mubr.bf16.mxu1 %v6944_v23  ;;  %v6946_v62 = vsel %vm1135_vm1, %v6943_v33, %v6945_v8  ;;  %v6948_v28 = vsel %vm1135_vm1, %v6945_v8, %v6947_v27  ;;  %v6966_v33 = vsel %vm1135_vm1, %v6963_v38, %v6965_v14  ;;  %v10602_v23 = vld [vmem:[%s11740_s7 + $0x18] sm:$0xff]   ;;  %v10608_v8 = vld [vmem:[%s11740_s7 + $0x30] sm:$0xff]  }
 0x1eb   : > { %9654 = vmatprep.subr.bf16.mxu1 %v10583_v2  ;;  %v10610_v27 = vld [vmem:[%s11740_s7 + $0x38] sm:$0xff]  }
 0x1ec   : > { %9215 = vmatpush3.bf16.msra.mxu0 %v10582_v32  ;;  %v10600_v32 = vld [vmem:[%s11740_s7 + $0x10] sm:$0xff]  }
 0x1ed   : > { %9216 = vmatprep.subr.bf16.mxu0 %v10584_v60 }
 0x1ee   : > { %9655 = vmatpush3.bf16.msra.mxu1 %v10583_v2  ;;  %v10604_v2 = vld [vmem:[%s11740_s7 + $0x20] sm:$0xff]  }
 0x1ef   : > { %9189 = vmatmul.mubr.bf16.gmra.mrb[4].mxu0 %v3354_v45  ;;  %9656 = vmatprep.subr.bf16.mxu1 %v10585_v58  ;;  %v10607_v45 = vld [vmem:[%s11740_s7 + $0x98] sm:$0xff]  }
 0x1f0   : > { %9192 = vmatprep.mubr.bf16.mxu0 %v3356_v37  ;;  %9217 = vmatpush3.bf16.msra.mxu0 %v10584_v60  ;;  %v10605_v60 = vld [vmem:[%s11740_s7 + $0x90] sm:$0xff]   ;;  %v10612_v37 = vld [vmem:[%s11740_s7 + $0x40] sm:$0xff]  }
 0x1f1   : > { %9629 = vmatmul.mubr.bf16.gmra.mrb[4].mxu1 %v6946_v62  ;;  %9218 = vmatprep.subr.bf16.mxu0 %v10586_v6  ;;  %v10613_v62 = vld [vmem:[%s11740_s7 + $0xb0] sm:$0xff]  }
 0x1f2   : > { %9632 = vmatprep.mubr.bf16.mxu1 %v6948_v28  ;;  %9657 = vmatpush3.bf16.msra.mxu1 %v10585_v58  ;;  %v10609_v58 = vld [vmem:[%s11740_s7 + $0xa0] sm:$0xff]   ;;  %v10614_v28 = vld [vmem:[%s11740_s7 + $0x48] sm:$0xff]  }
 0x1f3   : > { %9658 = vmatprep.subr.bf16.mxu1 %v10587_v52 }
 0x1f4   : > { %9219 = vmatpush3.bf16.msra.mxu0 %v10586_v6  ;;  %v10611_v6 = vld [vmem:[%s11740_s7 + $0xa8] sm:$0xff]  }
 0x1f5   : > { %9220 = vmatprep.subr.bf16.mxu0 %v10588_v36 }
 0x1f6   : > { %9659 = vmatpush3.bf16.msra.mxu1 %v10587_v52  ;;  %v10615_v52 = vld [vmem:[%s11740_s7 + $0xb8] sm:$0xff]  }
 0x1f7   : > { %9193 = vmatmul.mubr.bf16.gmra.mrb[8].mxu0 %v3358_v22  ;;  %9660 = vmatprep.subr.bf16.mxu1 %v10589_v42  ;;  %v10619_v22 = vld [vmem:[%s11740_s7 + $0xc8] sm:$0xff]  }
 0x1f8   : > { %9196 = vmatprep.mubr.bf16.mxu0 %v3360_v61  ;;  %9221 = vmatpush3.bf16.msra.mxu0 %v10588_v36  ;;  %v10618_v36 = vld [vmem:[%s11740_s7 + $0x58] sm:$0xff]  }
 0x1f9   : > { %9633 = vmatmul.mubr.bf16.gmra.mrb[8].mxu1 %v6950_v51  ;;  %9222 = vmatprep.subr.bf16.mxu0 %v10590_v13  ;;  %v10623_v61 = vld [vmem:[%s11740_s7 + $0xd8] sm:$0xff]  }
 0x1fa   : > { %9636 = vmatprep.mubr.bf16.mxu1 %v6952_v7  ;;  %9661 = vmatpush3.bf16.msra.mxu1 %v10589_v42  ;;  %v10622_v42 = vld [vmem:[%s11740_s7 + $0x68] sm:$0xff]  }
 0x1fb   : > { %9662 = vmatprep.subr.bf16.mxu1 %v10591_v16 }
 0x1fc   : > { %9223 = vmatpush3.bf16.msra.mxu0 %v10590_v13  ;;  %v12064_v13 = vld [vmem:[%s12196_s3] ss:$0 sm:$0xff] }
 0x1fd   : > { %9224 = vmatprep.subr.bf16.mxu0 %v10592_v21 }
 0x1fe   : > { %9663 = vmatpush3.bf16.msra.mxu1 %v10591_v16 }
 0x1ff   : > { %9197 = vmatmul.mubr.bf16.gmra.mrb[12].mxu0 %v3362_v4  ;;  %9664 = vmatprep.subr.bf16.mxu1 %v10593_v15 }
 0x200   : > { %9200 = vmatprep.mubr.bf16.mxu0 %v3364_v57  ;;  %9225 = vmatpush3.bf16.msra.mxu0 %v10592_v21 }
 0x201   : > { %9637 = vmatmul.mubr.bf16.gmra.mrb[12].mxu1 %v6954_v41  ;;  %9226 = vmatprep.subr.bf16.mxu0 %v10594_v1 }
 0x202   : > { %9640 = vmatprep.mubr.bf16.mxu1 %v6956_v17  ;;  %9665 = vmatpush3.bf16.msra.mxu1 %v10593_v15 }
 0x203   : > { %9666 = vmatprep.subr.bf16.mxu1 %v10595_v12 }
 0x204   : > { %9227 = vmatpush3.bf16.msra.mxu0 %v10594_v1 }
 0x206   : > { %9667 = vmatpush3.bf16.msra.mxu1 %v10595_v12 }
 0x207   : > { %9201 = vmatmul.mubr.bf16.gmra.mrb[16].mxu0 %v3366_v46 }
 0x208   : > { %9204 = vmatprep.mubr.bf16.mxu0 %v3368_v10 }
 0x209   : > { %9641 = vmatmul.mubr.bf16.gmra.mrb[16].mxu1 %v6958_v29 }
 0x20a   : > { %9644 = vmatprep.mubr.bf16.mxu1 %v6960_v56 }
 0x20f   : > { %9205 = vmatmul.mubr.bf16.gmra.mrb[20].mxu0 %v3370_v25 }
 0x210   : > { %9208 = vmatprep.mubr.bf16.mxu0 %v3372_v44 }
 0x211   : > { %9645 = vmatmul.mubr.bf16.gmra.mrb[20].mxu1 %v6962_v31 }
 0x212   : > { %9648 = vmatprep.mubr.bf16.mxu1 %v6964_v0 }
 0x217   : > { %9209 = vmatmul.mubr.bf16.gmra.mrb[24].mxu0 %v3374_v5 }
 0x218   : > { %9228 = vmatprep.mubr.bf16.mxu0 %v10596_v34 }
 0x219   : > { %9649 = vmatmul.mubr.bf16.gmra.mrb[24].mxu1 %v6966_v33 }
 0x21a   : > { %9668 = vmatprep.mubr.bf16.mxu1 %v10597_v55 }
 0x21f   : > { %9229 = vmatmul.mubr.bf16.vlgmr.msra.gmra.mrb[0].mxu0 %v10598_v47 }
 0x220   : > { %9232 = vmatprep.mubr.bf16.mxu0 %v10600_v32 }
 0x221   : > { %9669 = vmatmul.mubr.bf16.vlgmr.msra.gmra.mrb[0].mxu1 %v10599_v20 }
 0x222   : > { %9672 = vmatprep.mubr.bf16.mxu1 %v10601_v26 }
 0x227   : > { %9233 = vmatmul.mubr.bf16.gmra.mrb[4].mxu0 %v10602_v23 }
 0x228   : > { %9236 = vmatprep.mubr.bf16.mxu0 %v10604_v2 }
 0x229   : > { %9673 = vmatmul.mubr.bf16.gmra.mrb[4].mxu1 %v10603_v49 }
 0x22a   : > { %9676 = vmatprep.mubr.bf16.mxu1 %v10605_v60 }
 0x22f   : > { %9237 = vmatmul.mubr.bf16.gmra.mrb[8].mxu0 %v10606_v9 }
 0x230   : > { %9240 = vmatprep.mubr.bf16.mxu0 %v10608_v8 }
 0x231   : > { %9677 = vmatmul.mubr.bf16.gmra.mrb[8].mxu1 %v10607_v45 }
 0x232   : > { %9680 = vmatprep.mubr.bf16.mxu1 %v10609_v58 }
 0x237   : > { %9241 = vmatmul.mubr.bf16.gmra.mrb[12].mxu0 %v10610_v27 }
 0x238   : > { %9244 = vmatprep.mubr.bf16.mxu0 %v10612_v37 }
 0x239   : > { %9681 = vmatmul.mubr.bf16.gmra.mrb[12].mxu1 %v10611_v6 }
 0x23a   : > { %9684 = vmatprep.mubr.bf16.mxu1 %v10613_v62 }
 0x23f   : > { %9245 = vmatmul.mubr.bf16.gmra.mrb[16].mxu0 %v10614_v28 }
 0x240   : > { %9248 = vmatprep.mubr.bf16.mxu0 %v10616_v63 }
 0x241   : > { %9685 = vmatmul.mubr.bf16.gmra.mrb[16].mxu1 %v10615_v52 }
 0x242   : > { %9688 = vmatprep.mubr.bf16.mxu1 %v10617_v11 }
 0x247   : > { %9249 = vmatmul.mubr.bf16.gmra.mrb[20].mxu0 %v10618_v36 }
 0x248   : > { %9252 = vmatprep.mubr.bf16.mxu0 %v10620_v18 }
 0x249   : > { %9689 = vmatmul.mubr.bf16.gmra.mrb[20].mxu1 %v10619_v22 }
 0x24a   : > { %9692 = vmatprep.mubr.bf16.mxu1 %v10621_v35 }
 0x24f   : > { %9253 = vmatmul.mubr.bf16.gmra.mrb[24].mxu0 %v10622_v42 }
 0x251   : > { %9693 = vmatmul.mubr.bf16.gmra.mrb[24].mxu1 %v10623_v61 }
 0x2f2   : > { %v9230_v51 = vpop.f32.mrb[0].mxu0 }
 0x2f3   : > { %v9696_v7 = vadd.f32 %v9230_v51, %v12064_v13  ;;  %v3855_v53 = vpop.f32.mrb[1].mxu0 }
 0x2f4   : > { %v9697_v16 = vadd.f32 %v12064_v13, %v3855_v53  ;;  %v9231_v59 = vpop.f32.mrb[2].mxu0  ;;  %v9670_v50 = vpop.f32.mrb[0].mxu1 }
 0x2f5   : > { %v3996_v21 = vmax.f32 %v9696_v7, 0.0  ;;  %v9698_v4 = vadd.f32 %v9231_v59, %v12064_v13  ;;  %v3858_v40 = vpop.f32.mrb[3].mxu0  ;;  %v9724_v15 = vadd.f32 %v9670_v50, %v12064_v13  ;;  %v7447_v1 = vpop.f32.mrb[1].mxu1 }
 0x2f6   : > { %v3994_v57 = vmax.f32 %v9697_v16, 0.0  ;;  %v9699_v41 = vadd.f32 %v12064_v13, %v3858_v40  ;;  %v9725_v17 = vadd.f32 %v12064_v13, %v7447_v1  ;;  %v9671_v12 = vpop.f32.mrb[2].mxu1 }
 0x2f7   : > { %4024 = vst [vmem:[%s12071_s18 + $0x10] sm:$0xff] %v3996_v21  ;;  %v3997_v39 = vmax.f32 %v9698_v4, 0.0  ;;  %v7588_v24 = vmax.f32 %v9724_v15, 0.0  ;;  %v9726_v48 = vadd.f32 %v9671_v12, %v12064_v13  ;;  %v7450_v30 = vpop.f32.mrb[3].mxu1 }
 0x2f8   : > { %4022 = vst [vmem:[%s12071_s18] sm:$0xff] %v3994_v57  ;;  %v3995_v46 = vmax.f32 %v9699_v41, 0.0  ;;  %v7586_v10 = vmax.f32 %v9725_v17, 0.0  ;;  %v9727_v29 = vadd.f32 %v12064_v13, %v7450_v30 }
 0x2f9   : > { %4025 = vst [vmem:[%s12071_s18 + $0x18] sm:$0xff] %v3997_v39  ;;  %7616 = vst [vmem:[%s12071_s18 + $0xf0] sm:$0xff] %v7588_v24  ;;  %v7589_v56 = vmax.f32 %v9726_v48, 0.0 }
 0x2fa   : > { %4023 = vst [vmem:[%s12071_s18 + $0x8] sm:$0xff] %v3995_v46  ;;  %v9234_v54 = vpop.f32.mrb[4].mxu0  ;;  %7614 = vst [vmem:[%s12071_s18 + $0xe0] sm:$0xff] %v7586_v10  ;;  %v7587_v43 = vmax.f32 %v9727_v29, 0.0 }
 0x2fb   : > { %v9700_v19 = vadd.f32 %v9234_v54, %v12064_v13  ;;  %v3871_v25 = vpop.f32.mrb[5].mxu0  ;;  %7617 = vst [vmem:[%s12071_s18 + $0xf8] sm:$0xff] %v7589_v56 }
 0x2fc   : > { %v9701_v38 = vadd.f32 %v12064_v13, %v3871_v25  ;;  %v9235_v44 = vpop.f32.mrb[6].mxu0  ;;  %7615 = vst [vmem:[%s12071_s18 + $0xe8] sm:$0xff] %v7587_v43  ;;  %v9674_v0 = vpop.f32.mrb[4].mxu1 }
 0x2fd   : > { %v4000_v31 = vmax.f32 %v9700_v19, 0.0  ;;  %v9702_v3 = vadd.f32 %v9235_v44, %v12064_v13  ;;  %v3874_v14 = vpop.f32.mrb[7].mxu0  ;;  %v9728_v5 = vadd.f32 %v9674_v0, %v12064_v13  ;;  %v7463_v33 = vpop.f32.mrb[5].mxu1 }
 0x2fe   : > { %v3998_v34 = vmax.f32 %v9701_v38, 0.0  ;;  %v9703_v55 = vadd.f32 %v12064_v13, %v3874_v14  ;;  %v9729_v47 = vadd.f32 %v12064_v13, %v7463_v33  ;;  %v9675_v20 = vpop.f32.mrb[6].mxu1 }
 0x2ff   : > { %4028 = vst [vmem:[%s12071_s18 + $0x30] sm:$0xff] %v4000_v31  ;;  %v4001_v32 = vmax.f32 %v9702_v3, 0.0  ;;  %v7592_v26 = vmax.f32 %v9728_v5, 0.0  ;;  %v9730_v23 = vadd.f32 %v9675_v20, %v12064_v13  ;;  %v7466_v49 = vpop.f32.mrb[7].mxu1 }
 0x300   : > { %4026 = vst [vmem:[%s12071_s18 + $0x20] sm:$0xff] %v3998_v34  ;;  %v3999_v2 = vmax.f32 %v9703_v55, 0.0  ;;  %v7590_v60 = vmax.f32 %v9729_v47, 0.0  ;;  %v9731_v9 = vadd.f32 %v12064_v13, %v7466_v49 }
 0x301   : > { %4029 = vst [vmem:[%s12071_s18 + $0x38] sm:$0xff] %v4001_v32  ;;  %7620 = vst [vmem:[%s12071_s18 + $0x110] sm:$0xff] %v7592_v26  ;;  %v7593_v8 = vmax.f32 %v9730_v23, 0.0 }
 0x302   : > { %4027 = vst [vmem:[%s12071_s18 + $0x28] sm:$0xff] %v3999_v2  ;;  %v9238_v45 = vpop.f32.mrb[8].mxu0  ;;  %7618 = vst [vmem:[%s12071_s18 + $0x100] sm:$0xff] %v7590_v60  ;;  %v7591_v58 = vmax.f32 %v9731_v9, 0.0 }
 0x303   : > { %v9704_v27 = vadd.f32 %v9238_v45, %v12064_v13  ;;  %v3887_v37 = vpop.f32.mrb[9].mxu0  ;;  %7621 = vst [vmem:[%s12071_s18 + $0x118] sm:$0xff] %v7593_v8 }
 0x304   : > { %v9705_v6 = vadd.f32 %v12064_v13, %v3887_v37  ;;  %v9239_v62 = vpop.f32.mrb[10].mxu0  ;;  %7619 = vst [vmem:[%s12071_s18 + $0x108] sm:$0xff] %v7591_v58  ;;  %v9678_v63 = vpop.f32.mrb[8].mxu1 }
 0x305   : > { %v4004_v28 = vmax.f32 %v9704_v27, 0.0  ;;  %v9706_v52 = vadd.f32 %v9239_v62, %v12064_v13  ;;  %v3890_v11 = vpop.f32.mrb[11].mxu0  ;;  %v9732_v36 = vadd.f32 %v9678_v63, %v12064_v13  ;;  %v7479_v22 = vpop.f32.mrb[9].mxu1 }
 0x306   : > { %v4002_v18 = vmax.f32 %v9705_v6, 0.0  ;;  %v9707_v35 = vadd.f32 %v12064_v13, %v3890_v11  ;;  %v9733_v42 = vadd.f32 %v12064_v13, %v7479_v22  ;;  %v9679_v51 = vpop.f32.mrb[10].mxu1 }
 0x307   : > { %4032 = vst [vmem:[%s12071_s18 + $0x50] sm:$0xff] %v4004_v28  ;;  %v4005_v61 = vmax.f32 %v9706_v52, 0.0  ;;  %v7596_v7 = vmax.f32 %v9732_v36, 0.0  ;;  %v9734_v53 = vadd.f32 %v9679_v51, %v12064_v13  ;;  %v7482_v59 = vpop.f32.mrb[11].mxu1 }
 0x308   : > { %4030 = vst [vmem:[%s12071_s18 + $0x40] sm:$0xff] %v4002_v18  ;;  %v4003_v16 = vmax.f32 %v9707_v35, 0.0  ;;  %v7594_v21 = vmax.f32 %v9733_v42, 0.0  ;;  %v9735_v50 = vadd.f32 %v12064_v13, %v7482_v59 }
 0x309   : > { %4033 = vst [vmem:[%s12071_s18 + $0x58] sm:$0xff] %v4005_v61  ;;  %7624 = vst [vmem:[%s12071_s18 + $0x130] sm:$0xff] %v7596_v7  ;;  %v7597_v4 = vmax.f32 %v9734_v53, 0.0 }
 0x30a   : > { %4031 = vst [vmem:[%s12071_s18 + $0x48] sm:$0xff] %v4003_v16  ;;  %v9242_v40 = vpop.f32.mrb[12].mxu0  ;;  %7622 = vst [vmem:[%s12071_s18 + $0x120] sm:$0xff] %v7594_v21  ;;  %v7595_v15 = vmax.f32 %v9735_v50, 0.0 }
 0x30b   : > { %v9708_v57 = vadd.f32 %v9242_v40, %v12064_v13  ;;  %v3903_v1 = vpop.f32.mrb[13].mxu0  ;;  %7625 = vst [vmem:[%s12071_s18 + $0x138] sm:$0xff] %v7597_v4 }
 0x30c   : > { %v9709_v41 = vadd.f32 %v12064_v13, %v3903_v1  ;;  %v9243_v17 = vpop.f32.mrb[14].mxu0  ;;  %7623 = vst [vmem:[%s12071_s18 + $0x128] sm:$0xff] %v7595_v15  ;;  %v9682_v12 = vpop.f32.mrb[12].mxu1 }
 0x30d   : > { %v4008_v39 = vmax.f32 %v9708_v57, 0.0  ;;  %v9710_v24 = vadd.f32 %v9243_v17, %v12064_v13  ;;  %v3906_v48 = vpop.f32.mrb[15].mxu0  ;;  %v9736_v46 = vadd.f32 %v9682_v12, %v12064_v13  ;;  %v7495_v10 = vpop.f32.mrb[13].mxu1 }
 0x30e   : > { %v4006_v30 = vmax.f32 %v9709_v41, 0.0  ;;  %v9711_v29 = vadd.f32 %v12064_v13, %v3906_v48  ;;  %v9737_v56 = vadd.f32 %v12064_v13, %v7495_v10  ;;  %v9683_v43 = vpop.f32.mrb[14].mxu1 }
 0x30f   : > { %4036 = vst [vmem:[%s12071_s18 + $0x70] sm:$0xff] %v4008_v39  ;;  %v4009_v54 = vmax.f32 %v9710_v24, 0.0  ;;  %v7600_v19 = vmax.f32 %v9736_v46, 0.0  ;;  %v9738_v25 = vadd.f32 %v9683_v43, %v12064_v13  ;;  %v7498_v44 = vpop.f32.mrb[15].mxu1 }
 0x310   : > { %4034 = vst [vmem:[%s12071_s18 + $0x60] sm:$0xff] %v4006_v30  ;;  %v4007_v38 = vmax.f32 %v9711_v29, 0.0  ;;  %v7598_v31 = vmax.f32 %v9737_v56, 0.0  ;;  %v9739_v0 = vadd.f32 %v12064_v13, %v7498_v44 }
 0x311   : > { %4037 = vst [vmem:[%s12071_s18 + $0x78] sm:$0xff] %v4009_v54  ;;  %7628 = vst [vmem:[%s12071_s18 + $0x150] sm:$0xff] %v7600_v19  ;;  %v7601_v3 = vmax.f32 %v9738_v25, 0.0 }
 0x312   : > { %4035 = vst [vmem:[%s12071_s18 + $0x68] sm:$0xff] %v4007_v38  ;;  %v9246_v14 = vpop.f32.mrb[16].mxu0  ;;  %7626 = vst [vmem:[%s12071_s18 + $0x140] sm:$0xff] %v7598_v31  ;;  %v7599_v5 = vmax.f32 %v9739_v0, 0.0 }
 0x313   : > { %v9712_v34 = vadd.f32 %v9246_v14, %v12064_v13  ;;  %v3919_v33 = vpop.f32.mrb[17].mxu0  ;;  %7629 = vst [vmem:[%s12071_s18 + $0x158] sm:$0xff] %v7601_v3 }
 0x314   : > { %v9713_v55 = vadd.f32 %v12064_v13, %v3919_v33  ;;  %v9247_v47 = vpop.f32.mrb[18].mxu0  ;;  %7627 = vst [vmem:[%s12071_s18 + $0x148] sm:$0xff] %v7599_v5  ;;  %v9686_v20 = vpop.f32.mrb[16].mxu1 }
 0x315   : > { %v4012_v32 = vmax.f32 %v9712_v34, 0.0  ;;  %v9714_v26 = vadd.f32 %v9247_v47, %v12064_v13  ;;  %v3922_v23 = vpop.f32.mrb[19].mxu0  ;;  %v9740_v2 = vadd.f32 %v9686_v20, %v12064_v13  ;;  %v7511_v60 = vpop.f32.mrb[17].mxu1 }
 0x316   : > { %v4010_v49 = vmax.f32 %v9713_v55, 0.0  ;;  %v9715_v9 = vadd.f32 %v12064_v13, %v3922_v23  ;;  %v9741_v8 = vadd.f32 %v12064_v13, %v7511_v60  ;;  %v9687_v58 = vpop.f32.mrb[18].mxu1 }
 0x317   : > { %4040 = vst [vmem:[%s12071_s18 + $0x90] sm:$0xff] %v4012_v32  ;;  %v4013_v45 = vmax.f32 %v9714_v26, 0.0  ;;  %v7604_v27 = vmax.f32 %v9740_v2, 0.0  ;;  %v9742_v37 = vadd.f32 %v9687_v58, %v12064_v13  ;;  %v7514_v62 = vpop.f32.mrb[19].mxu1 }
 0x318   : > { %4038 = vst [vmem:[%s12071_s18 + $0x80] sm:$0xff] %v4010_v49  ;;  %v4011_v6 = vmax.f32 %v9715_v9, 0.0  ;;  %v7602_v28 = vmax.f32 %v9741_v8, 0.0  ;;  %v9743_v63 = vadd.f32 %v12064_v13, %v7514_v62 }
 0x319   : > { %4041 = vst [vmem:[%s12071_s18 + $0x98] sm:$0xff] %v4013_v45  ;;  %7632 = vst [vmem:[%s12071_s18 + $0x170] sm:$0xff] %v7604_v27  ;;  %v7605_v52 = vmax.f32 %v9742_v37, 0.0 }
 0x31a   : > { %4039 = vst [vmem:[%s12071_s18 + $0x88] sm:$0xff] %v4011_v6  ;;  %v9250_v11 = vpop.f32.mrb[20].mxu0  ;;  %7630 = vst [vmem:[%s12071_s18 + $0x160] sm:$0xff] %v7602_v28  ;;  %v7603_v36 = vmax.f32 %v9743_v63, 0.0 }
 0x31b   : > { %v9716_v18 = vadd.f32 %v9250_v11, %v12064_v13  ;;  %v3935_v22 = vpop.f32.mrb[21].mxu0  ;;  %7633 = vst [vmem:[%s12071_s18 + $0x178] sm:$0xff] %v7605_v52 }
 0x31c   : > { %v9717_v35 = vadd.f32 %v12064_v13, %v3935_v22  ;;  %v9251_v42 = vpop.f32.mrb[22].mxu0  ;;  %7631 = vst [vmem:[%s12071_s18 + $0x168] sm:$0xff] %v7603_v36  ;;  %v9690_v51 = vpop.f32.mrb[20].mxu1 }
 0x31d   : > { %v4016_v61 = vmax.f32 %v9716_v18, 0.0  ;;  %v9718_v7 = vadd.f32 %v9251_v42, %v12064_v13  ;;  %v3938_v53 = vpop.f32.mrb[23].mxu0  ;;  %v9744_v16 = vadd.f32 %v9690_v51, %v12064_v13  ;;  %v7527_v21 = vpop.f32.mrb[21].mxu1 }
 0x31e   : > { %v4014_v59 = vmax.f32 %v9717_v35, 0.0  ;;  %v9719_v50 = vadd.f32 %v12064_v13, %v3938_v53  ;;  %v9745_v4 = vadd.f32 %v12064_v13, %v7527_v21  ;;  %v9691_v15 = vpop.f32.mrb[22].mxu1 }
 0x31f   : > { %4044 = vst [vmem:[%s12071_s18 + $0xb0] sm:$0xff] %v4016_v61  ;;  %v4017_v40 = vmax.f32 %v9718_v7, 0.0  ;;  %v7608_v57 = vmax.f32 %v9744_v16, 0.0  ;;  %v9746_v1 = vadd.f32 %v9691_v15, %v12064_v13  ;;  %v7530_v17 = vpop.f32.mrb[23].mxu1 }
 0x320   : > { %4042 = vst [vmem:[%s12071_s18 + $0xa0] sm:$0xff] %v4014_v59  ;;  %v4015_v41 = vmax.f32 %v9719_v50, 0.0  ;;  %v7606_v39 = vmax.f32 %v9745_v4, 0.0  ;;  %v9747_v12 = vadd.f32 %v12064_v13, %v7530_v17 }
 0x321   : > { %4045 = vst [vmem:[%s12071_s18 + $0xb8] sm:$0xff] %v4017_v40  ;;  %7636 = vst [vmem:[%s12071_s18 + $0x190] sm:$0xff] %v7608_v57  ;;  %v7609_v24 = vmax.f32 %v9746_v1, 0.0 }
 0x322   : > { %4043 = vst [vmem:[%s12071_s18 + $0xa8] sm:$0xff] %v4015_v41  ;;  %v9254_v48 = vpop.f32.mrb[24].mxu0  ;;  %7634 = vst [vmem:[%s12071_s18 + $0x180] sm:$0xff] %v7606_v39  ;;  %v7607_v46 = vmax.f32 %v9747_v12, 0.0 }
 0x323   : > { %v9720_v30 = vadd.f32 %v9254_v48, %v12064_v13  ;;  %v3951_v10 = vpop.f32.mrb[25].mxu0  ;;  %7637 = vst [vmem:[%s12071_s18 + $0x198] sm:$0xff] %v7609_v24 }
 0x324   : > { %v9721_v29 = vadd.f32 %v12064_v13, %v3951_v10  ;;  %v9255_v56 = vpop.f32.mrb[26].mxu0  ;;  %7635 = vst [vmem:[%s12071_s18 + $0x188] sm:$0xff] %v7607_v46  ;;  %v9694_v43 = vpop.f32.mrb[24].mxu1 }
 0x325   : > { %v4020_v54 = vmax.f32 %v9720_v30, 0.0  ;;  %v9722_v19 = vadd.f32 %v9255_v56, %v12064_v13  ;;  %v3954_v25 = vpop.f32.mrb[27].mxu0  ;;  %v9748_v38 = vadd.f32 %v9694_v43, %v12064_v13  ;;  %v7543_v31 = vpop.f32.mrb[25].mxu1 }
 0x326   : > { %v4018_v44 = vmax.f32 %v9721_v29, 0.0  ;;  %v9723_v0 = vadd.f32 %v12064_v13, %v3954_v25  ;;  %v9749_v3 = vadd.f32 %v12064_v13, %v7543_v31  ;;  %v9695_v5 = vpop.f32.mrb[26].mxu1 }
 0x327   : > { %4048 = vst [vmem:[%s12071_s18 + $0xd0] sm:$0xff] %v4020_v54  ;;  %v4021_v14 = vmax.f32 %v9722_v19, 0.0  ;;  %v7612_v34 = vmax.f32 %v9748_v38, 0.0  ;;  %v9750_v33 = vadd.f32 %v9695_v5, %v12064_v13  ;;  %v7546_v47 = vpop.f32.mrb[27].mxu1 }
 0x328   : > { %4046 = vst [vmem:[%s12071_s18 + $0xc0] sm:$0xff] %v4018_v44  ;;  %v4019_v55 = vmax.f32 %v9723_v0, 0.0  ;;  %v7610_v32 = vmax.f32 %v9749_v3, 0.0  ;;  %v9751_v20 = vadd.f32 %v12064_v13, %v7546_v47 }
 0x329   : > { %4049 = vst [vmem:[%s12071_s18 + $0xd8] sm:$0xff] %v4021_v14  ;;  %7640 = vst [vmem:[%s12071_s18 + $0x1b0] sm:$0xff] %v7612_v34  ;;  %v7613_v26 = vmax.f32 %v9750_v33, 0.0 }
 0x32a   : > { %4047 = vst [vmem:[%s12071_s18 + $0xc8] sm:$0xff] %v4019_v55  ;;  %7638 = vst [vmem:[%s12071_s18 + $0x1a0] sm:$0xff] %v7610_v32  ;;  %v7611_v23 = vmax.f32 %v9751_v20, 0.0 }
 0x32b   : > { %7641 = vst [vmem:[%s12071_s18 + $0x1b8] sm:$0xff] %v7613_v26 }
 0x32c   : > { %7639 = vst [vmem:[%s12071_s18 + $0x1a8] sm:$0xff] %v7611_v23 }
 0x32d PF: > { %s16_s23 = sadd.s32 1, %s10663_s23   ;;  %s12200_s21 = smov %s10659_s22 }
 0x32e   : > { %p13_p5 = scmp.ge.s32.totalorder %s16_s23, 4   ;;  %s12201_s22 = smov %s12203_s24 }
 0x330   :  { %15 = sbr.rel (!%p13_p5) target bundleno = 2 (0x2), region = 88 }

</bundles_post_ra>
